<compile_context>
chip_gen: v7x
topology: tpu7x:2x2x1
jax: 0.10.0
libtpu: 0.0.40
codegen_flags: <defaults>
</compile_context>

<pallas_src>
import jax
import jax.numpy as jnp
from jax.experimental import pallas as pl
from jax.experimental.pallas import tpu as pltpu

# ---- SiT hyperparameters (from Net8.__init__) --------------------------------
NUM_CLASSES = 3
SIGNAL_LEN = 180
PATCH_LEN = 6
DIM = 30
DEPTH = 4
HEADS = 2
MLP_DIM = 256
CHANNELS = 2
DIM_HEAD = 64
INNER = HEADS * DIM_HEAD               # 128
NUM_PATCHES = SIGNAL_LEN // PATCH_LEN  # 30
PATCH_DIM = CHANNELS * PATCH_LEN       # 12
SEQ = NUM_PATCHES + 1                  # 31 (cls token prepended)
SEQ_PAD = 32                           # padded to a multiple of 8 sublanes
OUT_PAD = 128                          # lane-dense logits block (sliced to 3 outside)
LN_EPS = 1e-5
SCALE = DIM_HEAD ** -0.5
NEG_INF = -1e30                        # additive mask for the padded key column
MAX_B_TILE = 16                        # 16 * 32 = 512 MXU rows per grid step


def _layernorm(x, g, b):
    mu = jnp.mean(x, axis=-1, keepdims=True)
    var = jnp.mean(jnp.square(x - mu), axis=-1, keepdims=True)
    return (x - mu) * jax.lax.rsqrt(var + LN_EPS) * g + b


# ---- single fused kernel: patch-embed -> DEPTH encoder layers -> head ---------
def _net8_fused_kernel(patches_ref, patch_w_ref, patch_b_ref, cls_ref, pos_ref,
                       ln1g_ref, ln1b_ref, wqkv_ref, wo_ref, bo_ref,
                       ln2g_ref, ln2b_ref, w1_ref, b1_ref, w2_ref, b2_ref,
                       headg_ref, headb_ref, headw_ref, headbias_ref,
                       o_ref):
    bt = patches_ref.shape[0]

    # --- patch embedding (row 0 = cls slot, row SEQ_PAD-1 = dummy; both zero-padded)
    pf = patches_ref[...].astype(jnp.bfloat16).reshape(bt * SEQ_PAD, PATCH_DIM)
    tok = jnp.dot(pf, patch_w_ref[...],
                  preferred_element_type=jnp.float32) + patch_b_ref[...]
    tok = tok.reshape(bt, SEQ_PAD, DIM)

    row = jax.lax.broadcasted_iota(jnp.int32, (bt, SEQ_PAD, DIM), 1)
    cls_bc = jnp.broadcast_to(cls_ref[...], (bt, SEQ_PAD, DIM))
    x = jnp.where(row == 0, cls_bc, tok) + pos_ref[...]          # (bt, SEQ_PAD, DIM) f32

    # padded key column (index >= SEQ) must never receive attention weight
    kidx = jax.lax.broadcasted_iota(jnp.int32, (1, 1, SEQ_PAD), 2)
    kmask = kidx >= SEQ                                          # (1, 1, SEQ_PAD)

    # --- DEPTH pre-norm encoder layers (statically unrolled) ---
    for l in range(DEPTH):
        # x = x + Attention(LayerNorm(x))
        xn = _layernorm(x, ln1g_ref[l], ln1b_ref[l])
        qkv = jnp.dot(xn.reshape(bt * SEQ_PAD, DIM).astype(jnp.bfloat16),
                      wqkv_ref[l], preferred_element_type=jnp.float32)
        qkv = qkv.reshape(bt, SEQ_PAD, 3 * INNER)
        # TODO(synk): if bundle dump shows vreg spills, stage qkv in a VMEM scratch
        # and slice per head from the ref instead of keeping the value live.
        wo_l = wo_ref[l]                                         # (INNER, DIM) bf16
        proj = None
        for h in range(HEADS):                                   # static unroll (HEADS=2)
            lo = h * DIM_HEAD
            qh = qkv[:, :, lo:lo + DIM_HEAD].astype(jnp.bfloat16)
            kh = qkv[:, :, INNER + lo:INNER + lo + DIM_HEAD].astype(jnp.bfloat16)
            vh = qkv[:, :, 2 * INNER + lo:2 * INNER + lo + DIM_HEAD].astype(jnp.bfloat16)
            dots = jnp.einsum('bqd,bkd->bqk', qh, kh,
                              preferred_element_type=jnp.float32) * SCALE
            dots = jnp.where(kmask, NEG_INF, dots)               # mask padded key col
            dots = dots - jnp.max(dots, axis=-1, keepdims=True)
            p = jnp.exp(dots)
            p = p * pl.reciprocal(jnp.sum(p, axis=-1, keepdims=True),
                                  approx=True)                   # softmax (EUP recip)
            ho = jnp.einsum('bqk,bkd->bqd', p.astype(jnp.bfloat16), vh,
                            preferred_element_type=jnp.float32)  # (bt, SEQ_PAD, Dh)
            # fold per-head output through its W_o block; no head concat needed
            contrib = jnp.dot(
                ho.reshape(bt * SEQ_PAD, DIM_HEAD).astype(jnp.bfloat16),
                wo_l[lo:lo + DIM_HEAD, :],
                preferred_element_type=jnp.float32)
            proj = contrib if proj is None else proj + contrib
        x = x + (proj + bo_ref[l]).reshape(bt, SEQ_PAD, DIM)

        # x = x + MLP(LayerNorm(x))
        xn2 = _layernorm(x, ln2g_ref[l], ln2b_ref[l])
        h1 = jnp.dot(xn2.reshape(bt * SEQ_PAD, DIM).astype(jnp.bfloat16),
                     w1_ref[l], preferred_element_type=jnp.float32) + b1_ref[l]
        h1 = jax.nn.gelu(h1, approximate=True)   # tanh GELU (EUP); deviation from exact erf
        h2 = jnp.dot(h1.astype(jnp.bfloat16), w2_ref[l],
                     preferred_element_type=jnp.float32) + b2_ref[l]
        x = x + h2.reshape(bt, SEQ_PAD, DIM)

    # --- 'cls' pooling + LayerNorm + classifier head (lane-padded to 128 cols) ---
    cls_out = x[:, 0, :]                                         # (bt, DIM)
    xn = _layernorm(cls_out, headg_ref[...], headb_ref[...])
    o_ref[...] = jnp.dot(xn.astype(jnp.bfloat16), headw_ref[...],
                         preferred_element_type=jnp.float32) + headbias_ref[...]


_PARAM_ORDER = ("patch_w", "patch_b", "cls_tok", "pos_emb",
                "ln1_g", "ln1_b", "wqkv", "wo", "bo",
                "ln2_g", "ln2_b", "w1", "b1", "w2", "b2",
                "head_g", "head_beta", "head_w", "head_b")

# matmul (MXU) operands go to bf16; LN scales / biases stay f32
_BF16_WEIGHTS = frozenset({"patch_w", "wqkv", "wo", "w1", "w2", "head_w"})


def _const_spec(a):
    nd = a.ndim
    return pl.BlockSpec(a.shape, lambda i, _nd=nd: (0,) * _nd)


@jax.jit
def net8_forward(params, x):
    B = x.shape[0]
    # 'b c (n p) -> b n (p c)' rearrange, then pad:
    #   +1 leading zero row (cls slot, overwritten in-kernel)
    #   +1 trailing zero row (dummy token so SEQ_PAD = 32 = multiple of 8 sublanes)
    patches = x.reshape(B, CHANNELS, NUM_PATCHES, PATCH_LEN)
    patches = patches.transpose(0, 2, 3, 1).reshape(B, NUM_PATCHES, PATCH_DIM)
    patches = jnp.pad(patches,
                      ((0, 0), (1, SEQ_PAD - 1 - NUM_PATCHES), (0, 0)))

    bt = min(B, MAX_B_TILE)
    b_pad = pl.cdiv(B, bt) * bt
    if b_pad != B:
        patches = jnp.pad(patches, ((0, b_pad - B), (0, 0), (0, 0)))

    # parameter preprocessing (cheap, fused by XLA): seq-pad pos emb, lane-pad head,
    # bf16-cast MXU weight matrices.
    w = dict(params)
    w["pos_emb"] = jnp.pad(params["pos_emb"], ((0, 0), (0, SEQ_PAD - SEQ), (0, 0)))
    w["head_w"] = jnp.pad(params["head_w"], ((0, 0), (0, OUT_PAD - NUM_CLASSES)))
    w["head_b"] = jnp.pad(params["head_b"], ((0, 0), (0, OUT_PAD - NUM_CLASSES)))
    weights = [w[k].astype(jnp.bfloat16) if k in _BF16_WEIGHTS else w[k]
               for k in _PARAM_ORDER]

    out = pl.pallas_call(
        _net8_fused_kernel,
        out_shape=jax.ShapeDtypeStruct((b_pad, OUT_PAD), jnp.float32),
        grid=(b_pad // bt,),
        in_specs=[pl.BlockSpec((bt, SEQ_PAD, PATCH_DIM), lambda i: (i, 0, 0))]
                 + [_const_spec(a) for a in weights],
        out_specs=pl.BlockSpec((bt, OUT_PAD), lambda i: (i, 0)),
        compiler_params=pltpu.CompilerParams(
            dimension_semantics=("parallel",)),   # megacore sharding on v7x, pipelining elsewhere
    )(patches, *weights)
    return out[:B, :NUM_CLASSES]


# ---- deterministic parameter init (synthetic; shapes match SiT) ---------------
def init_params(key):
    ks = iter(jax.random.split(key, 32))

    def nrm(shape, scale=0.02):
        return scale * jax.random.normal(next(ks), shape, jnp.float32)

    return {
        "patch_w": nrm((PATCH_DIM, DIM)),
        "patch_b": jnp.zeros((1, DIM), jnp.float32),
        "cls_tok": nrm((1, 1, DIM)),
        "pos_emb": nrm((1, SEQ, DIM)),
        # per-layer weights stacked on a leading DEPTH axis (VMEM-resident)
        "ln1_g": jnp.ones((DEPTH, 1, DIM), jnp.float32),
        "ln1_b": jnp.zeros((DEPTH, 1, DIM), jnp.float32),
        "wqkv": nrm((DEPTH, DIM, 3 * INNER)),      # to_qkv has no bias in SiT
        "wo": nrm((DEPTH, INNER, DIM)),
        "bo": jnp.zeros((DEPTH, 1, DIM), jnp.float32),
        "ln2_g": jnp.ones((DEPTH, 1, DIM), jnp.float32),
        "ln2_b": jnp.zeros((DEPTH, 1, DIM), jnp.float32),
        "w1": nrm((DEPTH, DIM, MLP_DIM)),
        "b1": jnp.zeros((DEPTH, 1, MLP_DIM), jnp.float32),
        "w2": nrm((DEPTH, MLP_DIM, DIM)),
        "b2": jnp.zeros((DEPTH, 1, DIM), jnp.float32),
        "head_g": jnp.ones((1, DIM), jnp.float32),
        "head_beta": jnp.zeros((1, DIM), jnp.float32),
        "head_w": nrm((DIM, NUM_CLASSES)),
        "head_b": jnp.zeros((1, NUM_CLASSES), jnp.float32),
    }


if __name__ == "__main__":
    key = jax.random.PRNGKey(0)
    pkey, xkey = jax.random.split(key)
    params = init_params(pkey)
    x = jax.random.normal(xkey, (2, CHANNELS, SIGNAL_LEN), jnp.float32)  # (B, 2, 180)
    out = net8_forward(params, x)
    out = jax.block_until_ready(out)
    assert out.shape == (2, NUM_CLASSES) and out.dtype == jnp.float32
    assert bool(jnp.all(jnp.isfinite(out)))
    print("KERNEL_OK")
</pallas_src>

<mosaic_0001>
module attributes {stable_mosaic.version = 11 : i64} {
  func.func @_net8_fused_kernel(%arg0: i32, %arg1: memref<2x32x12xf32, #tpu.memory_space<vmem>>, %arg2: memref<12x30xbf16, #tpu.memory_space<vmem>>, %arg3: memref<1x30xf32, #tpu.memory_space<vmem>>, %arg4: memref<1x1x30xf32, #tpu.memory_space<vmem>>, %arg5: memref<1x32x30xf32, #tpu.memory_space<vmem>>, %arg6: memref<4x1x30xf32, #tpu.memory_space<vmem>>, %arg7: memref<4x1x30xf32, #tpu.memory_space<vmem>>, %arg8: memref<4x30x384xbf16, #tpu.memory_space<vmem>>, %arg9: memref<4x128x30xbf16, #tpu.memory_space<vmem>>, %arg10: memref<4x1x30xf32, #tpu.memory_space<vmem>>, %arg11: memref<4x1x30xf32, #tpu.memory_space<vmem>>, %arg12: memref<4x1x30xf32, #tpu.memory_space<vmem>>, %arg13: memref<4x30x256xbf16, #tpu.memory_space<vmem>>, %arg14: memref<4x1x256xf32, #tpu.memory_space<vmem>>, %arg15: memref<4x256x30xbf16, #tpu.memory_space<vmem>>, %arg16: memref<4x1x30xf32, #tpu.memory_space<vmem>>, %arg17: memref<1x30xf32, #tpu.memory_space<vmem>>, %arg18: memref<1x30xf32, #tpu.memory_space<vmem>>, %arg19: memref<30x128xbf16, #tpu.memory_space<vmem>>, %arg20: memref<1x128xf32, #tpu.memory_space<vmem>>, %arg21: memref<2x128xf32, #tpu.memory_space<vmem>>) attributes {dimension_semantics = [#tpu.dimension_semantics<parallel>], iteration_bounds = array<i64: 1>, scalar_prefetch = 0 : i64, scratch_operands = 0 : i64, tpu.core_type = #tpu.core_type<tc>, window_params = [{transform_indices = @transform_0, window_bounds = array<i64: 2, 32, 12>}, {pipeline_mode = #tpu.pipeline_mode<synchronous>, transform_indices = @transform_1, window_bounds = array<i64: 12, 30>}, {pipeline_mode = #tpu.pipeline_mode<synchronous>, transform_indices = @transform_2, window_bounds = array<i64: 1, 30>}, {pipeline_mode = #tpu.pipeline_mode<synchronous>, transform_indices = @transform_3, window_bounds = array<i64: 1, 1, 30>}, {pipeline_mode = #tpu.pipeline_mode<synchronous>, transform_indices = @transform_4, window_bounds = array<i64: 1, 32, 30>}, {pipeline_mode = #tpu.pipeline_mode<synchronous>, transform_indices = @transform_5, window_bounds = array<i64: 4, 1, 30>}, {pipeline_mode = #tpu.pipeline_mode<synchronous>, transform_indices = @transform_6, window_bounds = array<i64: 4, 1, 30>}, {pipeline_mode = #tpu.pipeline_mode<synchronous>, transform_indices = @transform_7, window_bounds = array<i64: 4, 30, 384>}, {pipeline_mode = #tpu.pipeline_mode<synchronous>, transform_indices = @transform_8, window_bounds = array<i64: 4, 128, 30>}, {pipeline_mode = #tpu.pipeline_mode<synchronous>, transform_indices = @transform_9, window_bounds = array<i64: 4, 1, 30>}, {pipeline_mode = #tpu.pipeline_mode<synchronous>, transform_indices = @transform_10, window_bounds = array<i64: 4, 1, 30>}, {pipeline_mode = #tpu.pipeline_mode<synchronous>, transform_indices = @transform_11, window_bounds = array<i64: 4, 1, 30>}, {pipeline_mode = #tpu.pipeline_mode<synchronous>, transform_indices = @transform_12, window_bounds = array<i64: 4, 30, 256>}, {pipeline_mode = #tpu.pipeline_mode<synchronous>, transform_indices = @transform_13, window_bounds = array<i64: 4, 1, 256>}, {pipeline_mode = #tpu.pipeline_mode<synchronous>, transform_indices = @transform_14, window_bounds = array<i64: 4, 256, 30>}, {pipeline_mode = #tpu.pipeline_mode<synchronous>, transform_indices = @transform_15, window_bounds = array<i64: 4, 1, 30>}, {pipeline_mode = #tpu.pipeline_mode<synchronous>, transform_indices = @transform_16, window_bounds = array<i64: 1, 30>}, {pipeline_mode = #tpu.pipeline_mode<synchronous>, transform_indices = @transform_17, window_bounds = array<i64: 1, 30>}, {pipeline_mode = #tpu.pipeline_mode<synchronous>, transform_indices = @transform_18, window_bounds = array<i64: 30, 128>}, {pipeline_mode = #tpu.pipeline_mode<synchronous>, transform_indices = @transform_19, window_bounds = array<i64: 1, 128>}, {transform_indices = @transform_20, window_bounds = array<i64: 2, 128>}]} {
    %c0 = arith.constant 0 : index
    %c0_0 = arith.constant 0 : index
    %c0_1 = arith.constant 0 : index
    %0 = vector.load %arg1[%c0, %c0_0, %c0_1] : memref<2x32x12xf32, #tpu.memory_space<vmem>>, vector<2x32x12xf32>
    %1 = arith.truncf %0 : vector<2x32x12xf32> to vector<2x32x12xbf16>
    %2 = vector.shape_cast %1 : vector<2x32x12xbf16> to vector<64x12xbf16>
    %c0_2 = arith.constant 0 : index
    %c0_3 = arith.constant 0 : index
    %3 = vector.load %arg2[%c0_2, %c0_3] : memref<12x30xbf16, #tpu.memory_space<vmem>>, vector<12x30xbf16>
    %cst = arith.constant dense<0.000000e+00> : vector<64x30xf32>
    %4 = tpu.matmul %2, %3, %cst {dimension_numbers = #tpu.dot_dimension_numbers<[1], [0], [0], [1], [0, 0, 1, 1], [], []>} : vector<64x12xbf16>, vector<12x30xbf16>, vector<64x30xf32> -> vector<64x30xf32>
    %c0_4 = arith.constant 0 : index
    %c0_5 = arith.constant 0 : index
    %5 = vector.load %arg3[%c0_4, %c0_5] : memref<1x30xf32, #tpu.memory_space<vmem>>, vector<1x30xf32>
    %6 = vector.broadcast %5 : vector<1x30xf32> to vector<64x30xf32>
    %7 = arith.addf %4, %6 : vector<64x30xf32>
    %8 = vector.shape_cast %7 : vector<64x30xf32> to vector<2x32x30xf32>
    %9 = tpu.iota {dimensions = array<i32: 1>} : vector<2x32x30xi32>
    %c0_6 = arith.constant 0 : index
    %c0_7 = arith.constant 0 : index
    %c0_8 = arith.constant 0 : index
    %10 = vector.load %arg4[%c0_6, %c0_7, %c0_8] : memref<1x1x30xf32, #tpu.memory_space<vmem>>, vector<1x1x30xf32>
    %11 = vector.shape_cast %10 : vector<1x1x30xf32> to vector<1x1x30xf32>
    %12 = vector.broadcast %11 : vector<1x1x30xf32> to vector<2x32x30xf32>
    %c0_i32 = arith.constant 0 : i32
    %13 = vector.broadcast %c0_i32 : i32 to vector<2x32x30xi32>
    %14 = arith.cmpi eq, %9, %13 : vector<2x32x30xi32>
    %15 = arith.select %14, %12, %8 : vector<2x32x30xi1>, vector<2x32x30xf32>
    %c0_9 = arith.constant 0 : index
    %c0_10 = arith.constant 0 : index
    %c0_11 = arith.constant 0 : index
    %16 = vector.load %arg5[%c0_9, %c0_10, %c0_11] : memref<1x32x30xf32, #tpu.memory_space<vmem>>, vector<1x32x30xf32>
    %17 = vector.broadcast %16 : vector<1x32x30xf32> to vector<2x32x30xf32>
    %18 = arith.addf %15, %17 : vector<2x32x30xf32>
    %19 = tpu.iota {dimensions = array<i32: 2>} : vector<1x1x32xi32>
    %c31_i32 = arith.constant 31 : i32
    %20 = vector.broadcast %c31_i32 : i32 to vector<1x1x32xi32>
    %21 = arith.cmpi sge, %19, %20 : vector<1x1x32xi32>
    %c0_12 = arith.constant 0 : index
    %c0_13 = arith.constant 0 : index
    %c0_14 = arith.constant 0 : index
    %22 = vector.load %arg6[%c0_12, %c0_13, %c0_14] : memref<4x1x30xf32, #tpu.memory_space<vmem>>, vector<1x1x30xf32>
    %23 = vector.shape_cast %22 : vector<1x1x30xf32> to vector<1x30xf32>
    %c0_15 = arith.constant 0 : index
    %c0_16 = arith.constant 0 : index
    %c0_17 = arith.constant 0 : index
    %24 = vector.load %arg7[%c0_15, %c0_16, %c0_17] : memref<4x1x30xf32, #tpu.memory_space<vmem>>, vector<1x1x30xf32>
    %25 = vector.shape_cast %24 : vector<1x1x30xf32> to vector<1x30xf32>
    %cst_18 = arith.constant dense<0.000000e+00> : vector<2x32xf32>
    %26 = vector.multi_reduction <add>, %18, %cst_18 [2] : vector<2x32x30xf32> to vector<2x32xf32>
    %27 = vector.shape_cast %26 : vector<2x32xf32> to vector<2x32x1xf32>
    %cst_19 = arith.constant 3.000000e+01 : f32
    %28 = vector.broadcast %cst_19 : f32 to vector<2x32x1xf32>
    %29 = arith.divf %27, %28 : vector<2x32x1xf32>
    %30 = vector.broadcast %29 : vector<2x32x1xf32> to vector<2x32x30xf32>
    %31 = arith.subf %18, %30 : vector<2x32x30xf32>
    %32 = arith.mulf %31, %31 : vector<2x32x30xf32>
    %cst_20 = arith.constant dense<0.000000e+00> : vector<2x32xf32>
    %33 = vector.multi_reduction <add>, %32, %cst_20 [2] : vector<2x32x30xf32> to vector<2x32xf32>
    %34 = vector.shape_cast %33 : vector<2x32xf32> to vector<2x32x1xf32>
    %cst_21 = arith.constant 3.000000e+01 : f32
    %35 = vector.broadcast %cst_21 : f32 to vector<2x32x1xf32>
    %36 = arith.divf %34, %35 : vector<2x32x1xf32>
    %37 = vector.broadcast %29 : vector<2x32x1xf32> to vector<2x32x30xf32>
    %38 = arith.subf %18, %37 : vector<2x32x30xf32>
    %cst_22 = arith.constant 9.99999974E-6 : f32
    %39 = vector.broadcast %cst_22 : f32 to vector<2x32x1xf32>
    %40 = arith.addf %36, %39 : vector<2x32x1xf32>
    %41 = math.rsqrt %40 : vector<2x32x1xf32>
    %42 = vector.broadcast %41 : vector<2x32x1xf32> to vector<2x32x30xf32>
    %43 = arith.mulf %38, %42 : vector<2x32x30xf32>
    %44 = vector.shape_cast %23 : vector<1x30xf32> to vector<1x1x30xf32>
    %45 = vector.broadcast %44 : vector<1x1x30xf32> to vector<2x32x30xf32>
    %46 = arith.mulf %43, %45 : vector<2x32x30xf32>
    %47 = vector.shape_cast %25 : vector<1x30xf32> to vector<1x1x30xf32>
    %48 = vector.broadcast %47 : vector<1x1x30xf32> to vector<2x32x30xf32>
    %49 = arith.addf %46, %48 : vector<2x32x30xf32>
    %50 = vector.shape_cast %49 : vector<2x32x30xf32> to vector<64x30xf32>
    %51 = arith.truncf %50 : vector<64x30xf32> to vector<64x30xbf16>
    %c0_23 = arith.constant 0 : index
    %c0_24 = arith.constant 0 : index
    %c0_25 = arith.constant 0 : index
    %52 = vector.load %arg8[%c0_23, %c0_24, %c0_25] : memref<4x30x384xbf16, #tpu.memory_space<vmem>>, vector<1x30x384xbf16>
    %53 = vector.shape_cast %52 : vector<1x30x384xbf16> to vector<30x384xbf16>
    %cst_26 = arith.constant dense<0.000000e+00> : vector<64x384xf32>
    %54 = tpu.matmul %51, %53, %cst_26 {dimension_numbers = #tpu.dot_dimension_numbers<[1], [0], [0], [1], [0, 0, 1, 1], [], []>} : vector<64x30xbf16>, vector<30x384xbf16>, vector<64x384xf32> -> vector<64x384xf32>
    %55 = vector.shape_cast %54 : vector<64x384xf32> to vector<2x32x384xf32>
    %c0_27 = arith.constant 0 : index
    %c0_28 = arith.constant 0 : index
    %c0_29 = arith.constant 0 : index
    %56 = vector.load %arg9[%c0_27, %c0_28, %c0_29] : memref<4x128x30xbf16, #tpu.memory_space<vmem>>, vector<1x128x30xbf16>
    %57 = vector.shape_cast %56 : vector<1x128x30xbf16> to vector<128x30xbf16>
    %58 = vector.extract_strided_slice %55 {offsets = [0, 0, 0], sizes = [2, 32, 64], strides = [1, 1, 1]} : vector<2x32x384xf32> to vector<2x32x64xf32>
    %59 = arith.truncf %58 : vector<2x32x64xf32> to vector<2x32x64xbf16>
    %60 = vector.extract_strided_slice %55 {offsets = [0, 0, 128], sizes = [2, 32, 64], strides = [1, 1, 1]} : vector<2x32x384xf32> to vector<2x32x64xf32>
    %61 = arith.truncf %60 : vector<2x32x64xf32> to vector<2x32x64xbf16>
    %62 = vector.extract_strided_slice %55 {offsets = [0, 0, 256], sizes = [2, 32, 64], strides = [1, 1, 1]} : vector<2x32x384xf32> to vector<2x32x64xf32>
    %63 = arith.truncf %62 : vector<2x32x64xf32> to vector<2x32x64xbf16>
    "tpu.trace_start"() <{level = 10 : i32, message = "bqd,bkd->bqk"}> : () -> ()
    %cst_30 = arith.constant dense<0.000000e+00> : vector<2x32x32xf32>
    %64 = tpu.matmul %59, %61, %cst_30 {dimension_numbers = #tpu.dot_dimension_numbers<[2], [2], [1], [1], [0, 0, 0, 1, 1, 1], [0], [0]>} : vector<2x32x64xbf16>, vector<2x32x64xbf16>, vector<2x32x32xf32> -> vector<2x32x32xf32>
    "tpu.trace_stop"() : () -> ()
    %cst_31 = arith.constant 1.250000e-01 : f32
    %65 = vector.broadcast %cst_31 : f32 to vector<2x32x32xf32>
    %66 = arith.mulf %64, %65 : vector<2x32x32xf32>
    %cst_32 = arith.constant -1.000000e+30 : f32
    %67 = vector.shape_cast %21 : vector<1x1x32xi1> to vector<1x1x32xi1>
    %68 = vector.broadcast %67 : vector<1x1x32xi1> to vector<2x32x32xi1>
    %69 = vector.broadcast %cst_32 : f32 to vector<2x32x32xf32>
    %70 = arith.select %68, %69, %66 : vector<2x32x32xi1>, vector<2x32x32xf32>
    %cst_33 = arith.constant dense<0xFF800000> : vector<2x32xf32>
    %71 = vector.multi_reduction <maximumf>, %70, %cst_33 [2] : vector<2x32x32xf32> to vector<2x32xf32>
    %72 = vector.shape_cast %71 : vector<2x32xf32> to vector<2x32x1xf32>
    %73 = vector.broadcast %72 : vector<2x32x1xf32> to vector<2x32x32xf32>
    %74 = arith.subf %70, %73 : vector<2x32x32xf32>
    %75 = math.exp %74 : vector<2x32x32xf32>
    %cst_34 = arith.constant dense<0.000000e+00> : vector<2x32xf32>
    %76 = vector.multi_reduction <add>, %75, %cst_34 [2] : vector<2x32x32xf32> to vector<2x32xf32>
    %77 = vector.shape_cast %76 : vector<2x32xf32> to vector<2x32x1xf32>
    %78 = tpu.reciprocal %77 {approx = true} : vector<2x32x1xf32> -> vector<2x32x1xf32>
    %79 = vector.broadcast %78 : vector<2x32x1xf32> to vector<2x32x32xf32>
    %80 = arith.mulf %75, %79 : vector<2x32x32xf32>
    %81 = arith.truncf %80 : vector<2x32x32xf32> to vector<2x32x32xbf16>
    "tpu.trace_start"() <{level = 10 : i32, message = "bqk,bkd->bqd"}> : () -> ()
    %cst_35 = arith.constant dense<0.000000e+00> : vector<2x32x64xf32>
    %82 = tpu.matmul %81, %63, %cst_35 {dimension_numbers = #tpu.dot_dimension_numbers<[2], [1], [1], [2], [0, 0, 0, 1, 1, 2], [0], [0]>} : vector<2x32x32xbf16>, vector<2x32x64xbf16>, vector<2x32x64xf32> -> vector<2x32x64xf32>
    "tpu.trace_stop"() : () -> ()
    %83 = vector.shape_cast %82 : vector<2x32x64xf32> to vector<64x64xf32>
    %84 = arith.truncf %83 : vector<64x64xf32> to vector<64x64xbf16>
    %85 = vector.extract_strided_slice %57 {offsets = [0, 0], sizes = [64, 30], strides = [1, 1]} : vector<128x30xbf16> to vector<64x30xbf16>
    %cst_36 = arith.constant dense<0.000000e+00> : vector<64x30xf32>
    %86 = tpu.matmul %84, %85, %cst_36 {dimension_numbers = #tpu.dot_dimension_numbers<[1], [0], [0], [1], [0, 0, 1, 1], [], []>} : vector<64x64xbf16>, vector<64x30xbf16>, vector<64x30xf32> -> vector<64x30xf32>
    %87 = vector.extract_strided_slice %55 {offsets = [0, 0, 64], sizes = [2, 32, 64], strides = [1, 1, 1]} : vector<2x32x384xf32> to vector<2x32x64xf32>
    %88 = arith.truncf %87 : vector<2x32x64xf32> to vector<2x32x64xbf16>
    %89 = vector.extract_strided_slice %55 {offsets = [0, 0, 192], sizes = [2, 32, 64], strides = [1, 1, 1]} : vector<2x32x384xf32> to vector<2x32x64xf32>
    %90 = arith.truncf %89 : vector<2x32x64xf32> to vector<2x32x64xbf16>
    %91 = vector.extract_strided_slice %55 {offsets = [0, 0, 320], sizes = [2, 32, 64], strides = [1, 1, 1]} : vector<2x32x384xf32> to vector<2x32x64xf32>
    %92 = arith.truncf %91 : vector<2x32x64xf32> to vector<2x32x64xbf16>
    "tpu.trace_start"() <{level = 10 : i32, message = "bqd,bkd->bqk"}> : () -> ()
    %cst_37 = arith.constant dense<0.000000e+00> : vector<2x32x32xf32>
    %93 = tpu.matmul %88, %90, %cst_37 {dimension_numbers = #tpu.dot_dimension_numbers<[2], [2], [1], [1], [0, 0, 0, 1, 1, 1], [0], [0]>} : vector<2x32x64xbf16>, vector<2x32x64xbf16>, vector<2x32x32xf32> -> vector<2x32x32xf32>
    "tpu.trace_stop"() : () -> ()
    %cst_38 = arith.constant 1.250000e-01 : f32
    %94 = vector.broadcast %cst_38 : f32 to vector<2x32x32xf32>
    %95 = arith.mulf %93, %94 : vector<2x32x32xf32>
    %cst_39 = arith.constant -1.000000e+30 : f32
    %96 = vector.shape_cast %21 : vector<1x1x32xi1> to vector<1x1x32xi1>
    %97 = vector.broadcast %96 : vector<1x1x32xi1> to vector<2x32x32xi1>
    %98 = vector.broadcast %cst_39 : f32 to vector<2x32x32xf32>
    %99 = arith.select %97, %98, %95 : vector<2x32x32xi1>, vector<2x32x32xf32>
    %cst_40 = arith.constant dense<0xFF800000> : vector<2x32xf32>
    %100 = vector.multi_reduction <maximumf>, %99, %cst_40 [2] : vector<2x32x32xf32> to vector<2x32xf32>
    %101 = vector.shape_cast %100 : vector<2x32xf32> to vector<2x32x1xf32>
    %102 = vector.broadcast %101 : vector<2x32x1xf32> to vector<2x32x32xf32>
    %103 = arith.subf %99, %102 : vector<2x32x32xf32>
    %104 = math.exp %103 : vector<2x32x32xf32>
    %cst_41 = arith.constant dense<0.000000e+00> : vector<2x32xf32>
    %105 = vector.multi_reduction <add>, %104, %cst_41 [2] : vector<2x32x32xf32> to vector<2x32xf32>
    %106 = vector.shape_cast %105 : vector<2x32xf32> to vector<2x32x1xf32>
    %107 = tpu.reciprocal %106 {approx = true} : vector<2x32x1xf32> -> vector<2x32x1xf32>
    %108 = vector.broadcast %107 : vector<2x32x1xf32> to vector<2x32x32xf32>
    %109 = arith.mulf %104, %108 : vector<2x32x32xf32>
    %110 = arith.truncf %109 : vector<2x32x32xf32> to vector<2x32x32xbf16>
    "tpu.trace_start"() <{level = 10 : i32, message = "bqk,bkd->bqd"}> : () -> ()
    %cst_42 = arith.constant dense<0.000000e+00> : vector<2x32x64xf32>
    %111 = tpu.matmul %110, %92, %cst_42 {dimension_numbers = #tpu.dot_dimension_numbers<[2], [1], [1], [2], [0, 0, 0, 1, 1, 2], [0], [0]>} : vector<2x32x32xbf16>, vector<2x32x64xbf16>, vector<2x32x64xf32> -> vector<2x32x64xf32>
    "tpu.trace_stop"() : () -> ()
    %112 = vector.shape_cast %111 : vector<2x32x64xf32> to vector<64x64xf32>
    %113 = arith.truncf %112 : vector<64x64xf32> to vector<64x64xbf16>
    %114 = vector.extract_strided_slice %57 {offsets = [64, 0], sizes = [64, 30], strides = [1, 1]} : vector<128x30xbf16> to vector<64x30xbf16>
    %cst_43 = arith.constant dense<0.000000e+00> : vector<64x30xf32>
    %115 = tpu.matmul %113, %114, %cst_43 {dimension_numbers = #tpu.dot_dimension_numbers<[1], [0], [0], [1], [0, 0, 1, 1], [], []>} : vector<64x64xbf16>, vector<64x30xbf16>, vector<64x30xf32> -> vector<64x30xf32>
    %116 = arith.addf %86, %115 : vector<64x30xf32>
    %c0_44 = arith.constant 0 : index
    %c0_45 = arith.constant 0 : index
    %c0_46 = arith.constant 0 : index
    %117 = vector.load %arg10[%c0_44, %c0_45, %c0_46] : memref<4x1x30xf32, #tpu.memory_space<vmem>>, vector<1x1x30xf32>
    %118 = vector.shape_cast %117 : vector<1x1x30xf32> to vector<1x30xf32>
    %119 = vector.broadcast %118 : vector<1x30xf32> to vector<64x30xf32>
    %120 = arith.addf %116, %119 : vector<64x30xf32>
    %121 = vector.shape_cast %120 : vector<64x30xf32> to vector<2x32x30xf32>
    %122 = arith.addf %18, %121 : vector<2x32x30xf32>
    %c0_47 = arith.constant 0 : index
    %c0_48 = arith.constant 0 : index
    %c0_49 = arith.constant 0 : index
    %123 = vector.load %arg11[%c0_47, %c0_48, %c0_49] : memref<4x1x30xf32, #tpu.memory_space<vmem>>, vector<1x1x30xf32>
    %124 = vector.shape_cast %123 : vector<1x1x30xf32> to vector<1x30xf32>
    %c0_50 = arith.constant 0 : index
    %c0_51 = arith.constant 0 : index
    %c0_52 = arith.constant 0 : index
    %125 = vector.load %arg12[%c0_50, %c0_51, %c0_52] : memref<4x1x30xf32, #tpu.memory_space<vmem>>, vector<1x1x30xf32>
    %126 = vector.shape_cast %125 : vector<1x1x30xf32> to vector<1x30xf32>
    %cst_53 = arith.constant dense<0.000000e+00> : vector<2x32xf32>
    %127 = vector.multi_reduction <add>, %122, %cst_53 [2] : vector<2x32x30xf32> to vector<2x32xf32>
    %128 = vector.shape_cast %127 : vector<2x32xf32> to vector<2x32x1xf32>
    %cst_54 = arith.constant 3.000000e+01 : f32
    %129 = vector.broadcast %cst_54 : f32 to vector<2x32x1xf32>
    %130 = arith.divf %128, %129 : vector<2x32x1xf32>
    %131 = vector.broadcast %130 : vector<2x32x1xf32> to vector<2x32x30xf32>
    %132 = arith.subf %122, %131 : vector<2x32x30xf32>
    %133 = arith.mulf %132, %132 : vector<2x32x30xf32>
    %cst_55 = arith.constant dense<0.000000e+00> : vector<2x32xf32>
    %134 = vector.multi_reduction <add>, %133, %cst_55 [2] : vector<2x32x30xf32> to vector<2x32xf32>
    %135 = vector.shape_cast %134 : vector<2x32xf32> to vector<2x32x1xf32>
    %cst_56 = arith.constant 3.000000e+01 : f32
    %136 = vector.broadcast %cst_56 : f32 to vector<2x32x1xf32>
    %137 = arith.divf %135, %136 : vector<2x32x1xf32>
    %138 = vector.broadcast %130 : vector<2x32x1xf32> to vector<2x32x30xf32>
    %139 = arith.subf %122, %138 : vector<2x32x30xf32>
    %cst_57 = arith.constant 9.99999974E-6 : f32
    %140 = vector.broadcast %cst_57 : f32 to vector<2x32x1xf32>
    %141 = arith.addf %137, %140 : vector<2x32x1xf32>
    %142 = math.rsqrt %141 : vector<2x32x1xf32>
    %143 = vector.broadcast %142 : vector<2x32x1xf32> to vector<2x32x30xf32>
    %144 = arith.mulf %139, %143 : vector<2x32x30xf32>
    %145 = vector.shape_cast %124 : vector<1x30xf32> to vector<1x1x30xf32>
    %146 = vector.broadcast %145 : vector<1x1x30xf32> to vector<2x32x30xf32>
    %147 = arith.mulf %144, %146 : vector<2x32x30xf32>
    %148 = vector.shape_cast %126 : vector<1x30xf32> to vector<1x1x30xf32>
    %149 = vector.broadcast %148 : vector<1x1x30xf32> to vector<2x32x30xf32>
    %150 = arith.addf %147, %149 : vector<2x32x30xf32>
    %151 = vector.shape_cast %150 : vector<2x32x30xf32> to vector<64x30xf32>
    %152 = arith.truncf %151 : vector<64x30xf32> to vector<64x30xbf16>
    %c0_58 = arith.constant 0 : index
    %c0_59 = arith.constant 0 : index
    %c0_60 = arith.constant 0 : index
    %153 = vector.load %arg13[%c0_58, %c0_59, %c0_60] : memref<4x30x256xbf16, #tpu.memory_space<vmem>>, vector<1x30x256xbf16>
    %154 = vector.shape_cast %153 : vector<1x30x256xbf16> to vector<30x256xbf16>
    %cst_61 = arith.constant dense<0.000000e+00> : vector<64x256xf32>
    %155 = tpu.matmul %152, %154, %cst_61 {dimension_numbers = #tpu.dot_dimension_numbers<[1], [0], [0], [1], [0, 0, 1, 1], [], []>} : vector<64x30xbf16>, vector<30x256xbf16>, vector<64x256xf32> -> vector<64x256xf32>
    %c0_62 = arith.constant 0 : index
    %c0_63 = arith.constant 0 : index
    %c0_64 = arith.constant 0 : index
    %156 = vector.load %arg14[%c0_62, %c0_63, %c0_64] : memref<4x1x256xf32, #tpu.memory_space<vmem>>, vector<1x1x256xf32>
    %157 = vector.shape_cast %156 : vector<1x1x256xf32> to vector<1x256xf32>
    %158 = vector.broadcast %157 : vector<1x256xf32> to vector<64x256xf32>
    %159 = arith.addf %155, %158 : vector<64x256xf32>
    %160 = arith.mulf %159, %159 : vector<64x256xf32>
    %161 = arith.mulf %159, %160 : vector<64x256xf32>
    %cst_65 = arith.constant 4.471500e-02 : f32
    %162 = vector.broadcast %cst_65 : f32 to vector<64x256xf32>
    %163 = arith.mulf %162, %161 : vector<64x256xf32>
    %164 = arith.addf %159, %163 : vector<64x256xf32>
    %cst_66 = arith.constant 0.797884583 : f32
    %165 = vector.broadcast %cst_66 : f32 to vector<64x256xf32>
    %166 = arith.mulf %165, %164 : vector<64x256xf32>
    %167 = math.tanh %166 : vector<64x256xf32>
    %cst_67 = arith.constant 1.000000e+00 : f32
    %168 = vector.broadcast %cst_67 : f32 to vector<64x256xf32>
    %169 = arith.addf %168, %167 : vector<64x256xf32>
    %cst_68 = arith.constant 5.000000e-01 : f32
    %170 = vector.broadcast %cst_68 : f32 to vector<64x256xf32>
    %171 = arith.mulf %170, %169 : vector<64x256xf32>
    %172 = arith.mulf %159, %171 : vector<64x256xf32>
    %173 = arith.truncf %172 : vector<64x256xf32> to vector<64x256xbf16>
    %c0_69 = arith.constant 0 : index
    %c0_70 = arith.constant 0 : index
    %c0_71 = arith.constant 0 : index
    %174 = vector.load %arg15[%c0_69, %c0_70, %c0_71] : memref<4x256x30xbf16, #tpu.memory_space<vmem>>, vector<1x256x30xbf16>
    %175 = vector.shape_cast %174 : vector<1x256x30xbf16> to vector<256x30xbf16>
    %cst_72 = arith.constant dense<0.000000e+00> : vector<64x30xf32>
    %176 = tpu.matmul %173, %175, %cst_72 {dimension_numbers = #tpu.dot_dimension_numbers<[1], [0], [0], [1], [0, 0, 1, 1], [], []>} : vector<64x256xbf16>, vector<256x30xbf16>, vector<64x30xf32> -> vector<64x30xf32>
    %c0_73 = arith.constant 0 : index
    %c0_74 = arith.constant 0 : index
    %c0_75 = arith.constant 0 : index
    %177 = vector.load %arg16[%c0_73, %c0_74, %c0_75] : memref<4x1x30xf32, #tpu.memory_space<vmem>>, vector<1x1x30xf32>
    %178 = vector.shape_cast %177 : vector<1x1x30xf32> to vector<1x30xf32>
    %179 = vector.broadcast %178 : vector<1x30xf32> to vector<64x30xf32>
    %180 = arith.addf %176, %179 : vector<64x30xf32>
    %181 = vector.shape_cast %180 : vector<64x30xf32> to vector<2x32x30xf32>
    %182 = arith.addf %122, %181 : vector<2x32x30xf32>
    %c1 = arith.constant 1 : index
    %c0_76 = arith.constant 0 : index
    %c0_77 = arith.constant 0 : index
    %183 = vector.load %arg6[%c1, %c0_76, %c0_77] : memref<4x1x30xf32, #tpu.memory_space<vmem>>, vector<1x1x30xf32>
    %184 = vector.shape_cast %183 : vector<1x1x30xf32> to vector<1x30xf32>
    %c1_78 = arith.constant 1 : index
    %c0_79 = arith.constant 0 : index
    %c0_80 = arith.constant 0 : index
    %185 = vector.load %arg7[%c1_78, %c0_79, %c0_80] : memref<4x1x30xf32, #tpu.memory_space<vmem>>, vector<1x1x30xf32>
    %186 = vector.shape_cast %185 : vector<1x1x30xf32> to vector<1x30xf32>
    %cst_81 = arith.constant dense<0.000000e+00> : vector<2x32xf32>
    %187 = vector.multi_reduction <add>, %182, %cst_81 [2] : vector<2x32x30xf32> to vector<2x32xf32>
    %188 = vector.shape_cast %187 : vector<2x32xf32> to vector<2x32x1xf32>
    %cst_82 = arith.constant 3.000000e+01 : f32
    %189 = vector.broadcast %cst_82 : f32 to vector<2x32x1xf32>
    %190 = arith.divf %188, %189 : vector<2x32x1xf32>
    %191 = vector.broadcast %190 : vector<2x32x1xf32> to vector<2x32x30xf32>
    %192 = arith.subf %182, %191 : vector<2x32x30xf32>
    %193 = arith.mulf %192, %192 : vector<2x32x30xf32>
    %cst_83 = arith.constant dense<0.000000e+00> : vector<2x32xf32>
    %194 = vector.multi_reduction <add>, %193, %cst_83 [2] : vector<2x32x30xf32> to vector<2x32xf32>
    %195 = vector.shape_cast %194 : vector<2x32xf32> to vector<2x32x1xf32>
    %cst_84 = arith.constant 3.000000e+01 : f32
    %196 = vector.broadcast %cst_84 : f32 to vector<2x32x1xf32>
    %197 = arith.divf %195, %196 : vector<2x32x1xf32>
    %198 = vector.broadcast %190 : vector<2x32x1xf32> to vector<2x32x30xf32>
    %199 = arith.subf %182, %198 : vector<2x32x30xf32>
    %cst_85 = arith.constant 9.99999974E-6 : f32
    %200 = vector.broadcast %cst_85 : f32 to vector<2x32x1xf32>
    %201 = arith.addf %197, %200 : vector<2x32x1xf32>
    %202 = math.rsqrt %201 : vector<2x32x1xf32>
    %203 = vector.broadcast %202 : vector<2x32x1xf32> to vector<2x32x30xf32>
    %204 = arith.mulf %199, %203 : vector<2x32x30xf32>
    %205 = vector.shape_cast %184 : vector<1x30xf32> to vector<1x1x30xf32>
    %206 = vector.broadcast %205 : vector<1x1x30xf32> to vector<2x32x30xf32>
    %207 = arith.mulf %204, %206 : vector<2x32x30xf32>
    %208 = vector.shape_cast %186 : vector<1x30xf32> to vector<1x1x30xf32>
    %209 = vector.broadcast %208 : vector<1x1x30xf32> to vector<2x32x30xf32>
    %210 = arith.addf %207, %209 : vector<2x32x30xf32>
    %211 = vector.shape_cast %210 : vector<2x32x30xf32> to vector<64x30xf32>
    %212 = arith.truncf %211 : vector<64x30xf32> to vector<64x30xbf16>
    %c1_86 = arith.constant 1 : index
    %c0_87 = arith.constant 0 : index
    %c0_88 = arith.constant 0 : index
    %213 = vector.load %arg8[%c1_86, %c0_87, %c0_88] : memref<4x30x384xbf16, #tpu.memory_space<vmem>>, vector<1x30x384xbf16>
    %214 = vector.shape_cast %213 : vector<1x30x384xbf16> to vector<30x384xbf16>
    %cst_89 = arith.constant dense<0.000000e+00> : vector<64x384xf32>
    %215 = tpu.matmul %212, %214, %cst_89 {dimension_numbers = #tpu.dot_dimension_numbers<[1], [0], [0], [1], [0, 0, 1, 1], [], []>} : vector<64x30xbf16>, vector<30x384xbf16>, vector<64x384xf32> -> vector<64x384xf32>
    %216 = vector.shape_cast %215 : vector<64x384xf32> to vector<2x32x384xf32>
    %c1_90 = arith.constant 1 : index
    %c0_91 = arith.constant 0 : index
    %c0_92 = arith.constant 0 : index
    %217 = vector.load %arg9[%c1_90, %c0_91, %c0_92] : memref<4x128x30xbf16, #tpu.memory_space<vmem>>, vector<1x128x30xbf16>
    %218 = vector.shape_cast %217 : vector<1x128x30xbf16> to vector<128x30xbf16>
    %219 = vector.extract_strided_slice %216 {offsets = [0, 0, 0], sizes = [2, 32, 64], strides = [1, 1, 1]} : vector<2x32x384xf32> to vector<2x32x64xf32>
    %220 = arith.truncf %219 : vector<2x32x64xf32> to vector<2x32x64xbf16>
    %221 = vector.extract_strided_slice %216 {offsets = [0, 0, 128], sizes = [2, 32, 64], strides = [1, 1, 1]} : vector<2x32x384xf32> to vector<2x32x64xf32>
    %222 = arith.truncf %221 : vector<2x32x64xf32> to vector<2x32x64xbf16>
    %223 = vector.extract_strided_slice %216 {offsets = [0, 0, 256], sizes = [2, 32, 64], strides = [1, 1, 1]} : vector<2x32x384xf32> to vector<2x32x64xf32>
    %224 = arith.truncf %223 : vector<2x32x64xf32> to vector<2x32x64xbf16>
    "tpu.trace_start"() <{level = 10 : i32, message = "bqd,bkd->bqk"}> : () -> ()
    %cst_93 = arith.constant dense<0.000000e+00> : vector<2x32x32xf32>
    %225 = tpu.matmul %220, %222, %cst_93 {dimension_numbers = #tpu.dot_dimension_numbers<[2], [2], [1], [1], [0, 0, 0, 1, 1, 1], [0], [0]>} : vector<2x32x64xbf16>, vector<2x32x64xbf16>, vector<2x32x32xf32> -> vector<2x32x32xf32>
    "tpu.trace_stop"() : () -> ()
    %cst_94 = arith.constant 1.250000e-01 : f32
    %226 = vector.broadcast %cst_94 : f32 to vector<2x32x32xf32>
    %227 = arith.mulf %225, %226 : vector<2x32x32xf32>
    %cst_95 = arith.constant -1.000000e+30 : f32
    %228 = vector.shape_cast %21 : vector<1x1x32xi1> to vector<1x1x32xi1>
    %229 = vector.broadcast %228 : vector<1x1x32xi1> to vector<2x32x32xi1>
    %230 = vector.broadcast %cst_95 : f32 to vector<2x32x32xf32>
    %231 = arith.select %229, %230, %227 : vector<2x32x32xi1>, vector<2x32x32xf32>
    %cst_96 = arith.constant dense<0xFF800000> : vector<2x32xf32>
    %232 = vector.multi_reduction <maximumf>, %231, %cst_96 [2] : vector<2x32x32xf32> to vector<2x32xf32>
    %233 = vector.shape_cast %232 : vector<2x32xf32> to vector<2x32x1xf32>
    %234 = vector.broadcast %233 : vector<2x32x1xf32> to vector<2x32x32xf32>
    %235 = arith.subf %231, %234 : vector<2x32x32xf32>
    %236 = math.exp %235 : vector<2x32x32xf32>
    %cst_97 = arith.constant dense<0.000000e+00> : vector<2x32xf32>
    %237 = vector.multi_reduction <add>, %236, %cst_97 [2] : vector<2x32x32xf32> to vector<2x32xf32>
    %238 = vector.shape_cast %237 : vector<2x32xf32> to vector<2x32x1xf32>
    %239 = tpu.reciprocal %238 {approx = true} : vector<2x32x1xf32> -> vector<2x32x1xf32>
    %240 = vector.broadcast %239 : vector<2x32x1xf32> to vector<2x32x32xf32>
    %241 = arith.mulf %236, %240 : vector<2x32x32xf32>
    %242 = arith.truncf %241 : vector<2x32x32xf32> to vector<2x32x32xbf16>
    "tpu.trace_start"() <{level = 10 : i32, message = "bqk,bkd->bqd"}> : () -> ()
    %cst_98 = arith.constant dense<0.000000e+00> : vector<2x32x64xf32>
    %243 = tpu.matmul %242, %224, %cst_98 {dimension_numbers = #tpu.dot_dimension_numbers<[2], [1], [1], [2], [0, 0, 0, 1, 1, 2], [0], [0]>} : vector<2x32x32xbf16>, vector<2x32x64xbf16>, vector<2x32x64xf32> -> vector<2x32x64xf32>
    "tpu.trace_stop"() : () -> ()
    %244 = vector.shape_cast %243 : vector<2x32x64xf32> to vector<64x64xf32>
    %245 = arith.truncf %244 : vector<64x64xf32> to vector<64x64xbf16>
    %246 = vector.extract_strided_slice %218 {offsets = [0, 0], sizes = [64, 30], strides = [1, 1]} : vector<128x30xbf16> to vector<64x30xbf16>
    %cst_99 = arith.constant dense<0.000000e+00> : vector<64x30xf32>
    %247 = tpu.matmul %245, %246, %cst_99 {dimension_numbers = #tpu.dot_dimension_numbers<[1], [0], [0], [1], [0, 0, 1, 1], [], []>} : vector<64x64xbf16>, vector<64x30xbf16>, vector<64x30xf32> -> vector<64x30xf32>
    %248 = vector.extract_strided_slice %216 {offsets = [0, 0, 64], sizes = [2, 32, 64], strides = [1, 1, 1]} : vector<2x32x384xf32> to vector<2x32x64xf32>
    %249 = arith.truncf %248 : vector<2x32x64xf32> to vector<2x32x64xbf16>
    %250 = vector.extract_strided_slice %216 {offsets = [0, 0, 192], sizes = [2, 32, 64], strides = [1, 1, 1]} : vector<2x32x384xf32> to vector<2x32x64xf32>
    %251 = arith.truncf %250 : vector<2x32x64xf32> to vector<2x32x64xbf16>
    %252 = vector.extract_strided_slice %216 {offsets = [0, 0, 320], sizes = [2, 32, 64], strides = [1, 1, 1]} : vector<2x32x384xf32> to vector<2x32x64xf32>
    %253 = arith.truncf %252 : vector<2x32x64xf32> to vector<2x32x64xbf16>
    "tpu.trace_start"() <{level = 10 : i32, message = "bqd,bkd->bqk"}> : () -> ()
    %cst_100 = arith.constant dense<0.000000e+00> : vector<2x32x32xf32>
    %254 = tpu.matmul %249, %251, %cst_100 {dimension_numbers = #tpu.dot_dimension_numbers<[2], [2], [1], [1], [0, 0, 0, 1, 1, 1], [0], [0]>} : vector<2x32x64xbf16>, vector<2x32x64xbf16>, vector<2x32x32xf32> -> vector<2x32x32xf32>
    "tpu.trace_stop"() : () -> ()
    %cst_101 = arith.constant 1.250000e-01 : f32
    %255 = vector.broadcast %cst_101 : f32 to vector<2x32x32xf32>
    %256 = arith.mulf %254, %255 : vector<2x32x32xf32>
    %cst_102 = arith.constant -1.000000e+30 : f32
    %257 = vector.shape_cast %21 : vector<1x1x32xi1> to vector<1x1x32xi1>
    %258 = vector.broadcast %257 : vector<1x1x32xi1> to vector<2x32x32xi1>
    %259 = vector.broadcast %cst_102 : f32 to vector<2x32x32xf32>
    %260 = arith.select %258, %259, %256 : vector<2x32x32xi1>, vector<2x32x32xf32>
    %cst_103 = arith.constant dense<0xFF800000> : vector<2x32xf32>
    %261 = vector.multi_reduction <maximumf>, %260, %cst_103 [2] : vector<2x32x32xf32> to vector<2x32xf32>
    %262 = vector.shape_cast %261 : vector<2x32xf32> to vector<2x32x1xf32>
    %263 = vector.broadcast %262 : vector<2x32x1xf32> to vector<2x32x32xf32>
    %264 = arith.subf %260, %263 : vector<2x32x32xf32>
    %265 = math.exp %264 : vector<2x32x32xf32>
    %cst_104 = arith.constant dense<0.000000e+00> : vector<2x32xf32>
    %266 = vector.multi_reduction <add>, %265, %cst_104 [2] : vector<2x32x32xf32> to vector<2x32xf32>
    %267 = vector.shape_cast %266 : vector<2x32xf32> to vector<2x32x1xf32>
    %268 = tpu.reciprocal %267 {approx = true} : vector<2x32x1xf32> -> vector<2x32x1xf32>
    %269 = vector.broadcast %268 : vector<2x32x1xf32> to vector<2x32x32xf32>
    %270 = arith.mulf %265, %269 : vector<2x32x32xf32>
    %271 = arith.truncf %270 : vector<2x32x32xf32> to vector<2x32x32xbf16>
    "tpu.trace_start"() <{level = 10 : i32, message = "bqk,bkd->bqd"}> : () -> ()
    %cst_105 = arith.constant dense<0.000000e+00> : vector<2x32x64xf32>
    %272 = tpu.matmul %271, %253, %cst_105 {dimension_numbers = #tpu.dot_dimension_numbers<[2], [1], [1], [2], [0, 0, 0, 1, 1, 2], [0], [0]>} : vector<2x32x32xbf16>, vector<2x32x64xbf16>, vector<2x32x64xf32> -> vector<2x32x64xf32>
    "tpu.trace_stop"() : () -> ()
    %273 = vector.shape_cast %272 : vector<2x32x64xf32> to vector<64x64xf32>
    %274 = arith.truncf %273 : vector<64x64xf32> to vector<64x64xbf16>
    %275 = vector.extract_strided_slice %218 {offsets = [64, 0], sizes = [64, 30], strides = [1, 1]} : vector<128x30xbf16> to vector<64x30xbf16>
    %cst_106 = arith.constant dense<0.000000e+00> : vector<64x30xf32>
    %276 = tpu.matmul %274, %275, %cst_106 {dimension_numbers = #tpu.dot_dimension_numbers<[1], [0], [0], [1], [0, 0, 1, 1], [], []>} : vector<64x64xbf16>, vector<64x30xbf16>, vector<64x30xf32> -> vector<64x30xf32>
    %277 = arith.addf %247, %276 : vector<64x30xf32>
    %c1_107 = arith.constant 1 : index
    %c0_108 = arith.constant 0 : index
    %c0_109 = arith.constant 0 : index
    %278 = vector.load %arg10[%c1_107, %c0_108, %c0_109] : memref<4x1x30xf32, #tpu.memory_space<vmem>>, vector<1x1x30xf32>
    %279 = vector.shape_cast %278 : vector<1x1x30xf32> to vector<1x30xf32>
    %280 = vector.broadcast %279 : vector<1x30xf32> to vector<64x30xf32>
    %281 = arith.addf %277, %280 : vector<64x30xf32>
    %282 = vector.shape_cast %281 : vector<64x30xf32> to vector<2x32x30xf32>
    %283 = arith.addf %182, %282 : vector<2x32x30xf32>
    %c1_110 = arith.constant 1 : index
    %c0_111 = arith.constant 0 : index
    %c0_112 = arith.constant 0 : index
    %284 = vector.load %arg11[%c1_110, %c0_111, %c0_112] : memref<4x1x30xf32, #tpu.memory_space<vmem>>, vector<1x1x30xf32>
    %285 = vector.shape_cast %284 : vector<1x1x30xf32> to vector<1x30xf32>
    %c1_113 = arith.constant 1 : index
    %c0_114 = arith.constant 0 : index
    %c0_115 = arith.constant 0 : index
    %286 = vector.load %arg12[%c1_113, %c0_114, %c0_115] : memref<4x1x30xf32, #tpu.memory_space<vmem>>, vector<1x1x30xf32>
    %287 = vector.shape_cast %286 : vector<1x1x30xf32> to vector<1x30xf32>
    %cst_116 = arith.constant dense<0.000000e+00> : vector<2x32xf32>
    %288 = vector.multi_reduction <add>, %283, %cst_116 [2] : vector<2x32x30xf32> to vector<2x32xf32>
    %289 = vector.shape_cast %288 : vector<2x32xf32> to vector<2x32x1xf32>
    %cst_117 = arith.constant 3.000000e+01 : f32
    %290 = vector.broadcast %cst_117 : f32 to vector<2x32x1xf32>
    %291 = arith.divf %289, %290 : vector<2x32x1xf32>
    %292 = vector.broadcast %291 : vector<2x32x1xf32> to vector<2x32x30xf32>
    %293 = arith.subf %283, %292 : vector<2x32x30xf32>
    %294 = arith.mulf %293, %293 : vector<2x32x30xf32>
    %cst_118 = arith.constant dense<0.000000e+00> : vector<2x32xf32>
    %295 = vector.multi_reduction <add>, %294, %cst_118 [2] : vector<2x32x30xf32> to vector<2x32xf32>
    %296 = vector.shape_cast %295 : vector<2x32xf32> to vector<2x32x1xf32>
    %cst_119 = arith.constant 3.000000e+01 : f32
    %297 = vector.broadcast %cst_119 : f32 to vector<2x32x1xf32>
    %298 = arith.divf %296, %297 : vector<2x32x1xf32>
    %299 = vector.broadcast %291 : vector<2x32x1xf32> to vector<2x32x30xf32>
    %300 = arith.subf %283, %299 : vector<2x32x30xf32>
    %cst_120 = arith.constant 9.99999974E-6 : f32
    %301 = vector.broadcast %cst_120 : f32 to vector<2x32x1xf32>
    %302 = arith.addf %298, %301 : vector<2x32x1xf32>
    %303 = math.rsqrt %302 : vector<2x32x1xf32>
    %304 = vector.broadcast %303 : vector<2x32x1xf32> to vector<2x32x30xf32>
    %305 = arith.mulf %300, %304 : vector<2x32x30xf32>
    %306 = vector.shape_cast %285 : vector<1x30xf32> to vector<1x1x30xf32>
    %307 = vector.broadcast %306 : vector<1x1x30xf32> to vector<2x32x30xf32>
    %308 = arith.mulf %305, %307 : vector<2x32x30xf32>
    %309 = vector.shape_cast %287 : vector<1x30xf32> to vector<1x1x30xf32>
    %310 = vector.broadcast %309 : vector<1x1x30xf32> to vector<2x32x30xf32>
    %311 = arith.addf %308, %310 : vector<2x32x30xf32>
    %312 = vector.shape_cast %311 : vector<2x32x30xf32> to vector<64x30xf32>
    %313 = arith.truncf %312 : vector<64x30xf32> to vector<64x30xbf16>
    %c1_121 = arith.constant 1 : index
    %c0_122 = arith.constant 0 : index
    %c0_123 = arith.constant 0 : index
    %314 = vector.load %arg13[%c1_121, %c0_122, %c0_123] : memref<4x30x256xbf16, #tpu.memory_space<vmem>>, vector<1x30x256xbf16>
    %315 = vector.shape_cast %314 : vector<1x30x256xbf16> to vector<30x256xbf16>
    %cst_124 = arith.constant dense<0.000000e+00> : vector<64x256xf32>
    %316 = tpu.matmul %313, %315, %cst_124 {dimension_numbers = #tpu.dot_dimension_numbers<[1], [0], [0], [1], [0, 0, 1, 1], [], []>} : vector<64x30xbf16>, vector<30x256xbf16>, vector<64x256xf32> -> vector<64x256xf32>
    %c1_125 = arith.constant 1 : index
    %c0_126 = arith.constant 0 : index
    %c0_127 = arith.constant 0 : index
    %317 = vector.load %arg14[%c1_125, %c0_126, %c0_127] : memref<4x1x256xf32, #tpu.memory_space<vmem>>, vector<1x1x256xf32>
    %318 = vector.shape_cast %317 : vector<1x1x256xf32> to vector<1x256xf32>
    %319 = vector.broadcast %318 : vector<1x256xf32> to vector<64x256xf32>
    %320 = arith.addf %316, %319 : vector<64x256xf32>
    %321 = arith.mulf %320, %320 : vector<64x256xf32>
    %322 = arith.mulf %320, %321 : vector<64x256xf32>
    %cst_128 = arith.constant 4.471500e-02 : f32
    %323 = vector.broadcast %cst_128 : f32 to vector<64x256xf32>
    %324 = arith.mulf %323, %322 : vector<64x256xf32>
    %325 = arith.addf %320, %324 : vector<64x256xf32>
    %cst_129 = arith.constant 0.797884583 : f32
    %326 = vector.broadcast %cst_129 : f32 to vector<64x256xf32>
    %327 = arith.mulf %326, %325 : vector<64x256xf32>
    %328 = math.tanh %327 : vector<64x256xf32>
    %cst_130 = arith.constant 1.000000e+00 : f32
    %329 = vector.broadcast %cst_130 : f32 to vector<64x256xf32>
    %330 = arith.addf %329, %328 : vector<64x256xf32>
    %cst_131 = arith.constant 5.000000e-01 : f32
    %331 = vector.broadcast %cst_131 : f32 to vector<64x256xf32>
    %332 = arith.mulf %331, %330 : vector<64x256xf32>
    %333 = arith.mulf %320, %332 : vector<64x256xf32>
    %334 = arith.truncf %333 : vector<64x256xf32> to vector<64x256xbf16>
    %c1_132 = arith.constant 1 : index
    %c0_133 = arith.constant 0 : index
    %c0_134 = arith.constant 0 : index
    %335 = vector.load %arg15[%c1_132, %c0_133, %c0_134] : memref<4x256x30xbf16, #tpu.memory_space<vmem>>, vector<1x256x30xbf16>
    %336 = vector.shape_cast %335 : vector<1x256x30xbf16> to vector<256x30xbf16>
    %cst_135 = arith.constant dense<0.000000e+00> : vector<64x30xf32>
    %337 = tpu.matmul %334, %336, %cst_135 {dimension_numbers = #tpu.dot_dimension_numbers<[1], [0], [0], [1], [0, 0, 1, 1], [], []>} : vector<64x256xbf16>, vector<256x30xbf16>, vector<64x30xf32> -> vector<64x30xf32>
    %c1_136 = arith.constant 1 : index
    %c0_137 = arith.constant 0 : index
    %c0_138 = arith.constant 0 : index
    %338 = vector.load %arg16[%c1_136, %c0_137, %c0_138] : memref<4x1x30xf32, #tpu.memory_space<vmem>>, vector<1x1x30xf32>
    %339 = vector.shape_cast %338 : vector<1x1x30xf32> to vector<1x30xf32>
    %340 = vector.broadcast %339 : vector<1x30xf32> to vector<64x30xf32>
    %341 = arith.addf %337, %340 : vector<64x30xf32>
    %342 = vector.shape_cast %341 : vector<64x30xf32> to vector<2x32x30xf32>
    %343 = arith.addf %283, %342 : vector<2x32x30xf32>
    %c2 = arith.constant 2 : index
    %c0_139 = arith.constant 0 : index
    %c0_140 = arith.constant 0 : index
    %344 = vector.load %arg6[%c2, %c0_139, %c0_140] : memref<4x1x30xf32, #tpu.memory_space<vmem>>, vector<1x1x30xf32>
    %345 = vector.shape_cast %344 : vector<1x1x30xf32> to vector<1x30xf32>
    %c2_141 = arith.constant 2 : index
    %c0_142 = arith.constant 0 : index
    %c0_143 = arith.constant 0 : index
    %346 = vector.load %arg7[%c2_141, %c0_142, %c0_143] : memref<4x1x30xf32, #tpu.memory_space<vmem>>, vector<1x1x30xf32>
    %347 = vector.shape_cast %346 : vector<1x1x30xf32> to vector<1x30xf32>
    %cst_144 = arith.constant dense<0.000000e+00> : vector<2x32xf32>
    %348 = vector.multi_reduction <add>, %343, %cst_144 [2] : vector<2x32x30xf32> to vector<2x32xf32>
    %349 = vector.shape_cast %348 : vector<2x32xf32> to vector<2x32x1xf32>
    %cst_145 = arith.constant 3.000000e+01 : f32
    %350 = vector.broadcast %cst_145 : f32 to vector<2x32x1xf32>
    %351 = arith.divf %349, %350 : vector<2x32x1xf32>
    %352 = vector.broadcast %351 : vector<2x32x1xf32> to vector<2x32x30xf32>
    %353 = arith.subf %343, %352 : vector<2x32x30xf32>
    %354 = arith.mulf %353, %353 : vector<2x32x30xf32>
    %cst_146 = arith.constant dense<0.000000e+00> : vector<2x32xf32>
    %355 = vector.multi_reduction <add>, %354, %cst_146 [2] : vector<2x32x30xf32> to vector<2x32xf32>
    %356 = vector.shape_cast %355 : vector<2x32xf32> to vector<2x32x1xf32>
    %cst_147 = arith.constant 3.000000e+01 : f32
    %357 = vector.broadcast %cst_147 : f32 to vector<2x32x1xf32>
    %358 = arith.divf %356, %357 : vector<2x32x1xf32>
    %359 = vector.broadcast %351 : vector<2x32x1xf32> to vector<2x32x30xf32>
    %360 = arith.subf %343, %359 : vector<2x32x30xf32>
    %cst_148 = arith.constant 9.99999974E-6 : f32
    %361 = vector.broadcast %cst_148 : f32 to vector<2x32x1xf32>
    %362 = arith.addf %358, %361 : vector<2x32x1xf32>
    %363 = math.rsqrt %362 : vector<2x32x1xf32>
    %364 = vector.broadcast %363 : vector<2x32x1xf32> to vector<2x32x30xf32>
    %365 = arith.mulf %360, %364 : vector<2x32x30xf32>
    %366 = vector.shape_cast %345 : vector<1x30xf32> to vector<1x1x30xf32>
    %367 = vector.broadcast %366 : vector<1x1x30xf32> to vector<2x32x30xf32>
    %368 = arith.mulf %365, %367 : vector<2x32x30xf32>
    %369 = vector.shape_cast %347 : vector<1x30xf32> to vector<1x1x30xf32>
    %370 = vector.broadcast %369 : vector<1x1x30xf32> to vector<2x32x30xf32>
    %371 = arith.addf %368, %370 : vector<2x32x30xf32>
    %372 = vector.shape_cast %371 : vector<2x32x30xf32> to vector<64x30xf32>
    %373 = arith.truncf %372 : vector<64x30xf32> to vector<64x30xbf16>
    %c2_149 = arith.constant 2 : index
    %c0_150 = arith.constant 0 : index
    %c0_151 = arith.constant 0 : index
    %374 = vector.load %arg8[%c2_149, %c0_150, %c0_151] : memref<4x30x384xbf16, #tpu.memory_space<vmem>>, vector<1x30x384xbf16>
    %375 = vector.shape_cast %374 : vector<1x30x384xbf16> to vector<30x384xbf16>
    %cst_152 = arith.constant dense<0.000000e+00> : vector<64x384xf32>
    %376 = tpu.matmul %373, %375, %cst_152 {dimension_numbers = #tpu.dot_dimension_numbers<[1], [0], [0], [1], [0, 0, 1, 1], [], []>} : vector<64x30xbf16>, vector<30x384xbf16>, vector<64x384xf32> -> vector<64x384xf32>
    %377 = vector.shape_cast %376 : vector<64x384xf32> to vector<2x32x384xf32>
    %c2_153 = arith.constant 2 : index
    %c0_154 = arith.constant 0 : index
    %c0_155 = arith.constant 0 : index
    %378 = vector.load %arg9[%c2_153, %c0_154, %c0_155] : memref<4x128x30xbf16, #tpu.memory_space<vmem>>, vector<1x128x30xbf16>
    %379 = vector.shape_cast %378 : vector<1x128x30xbf16> to vector<128x30xbf16>
    %380 = vector.extract_strided_slice %377 {offsets = [0, 0, 0], sizes = [2, 32, 64], strides = [1, 1, 1]} : vector<2x32x384xf32> to vector<2x32x64xf32>
    %381 = arith.truncf %380 : vector<2x32x64xf32> to vector<2x32x64xbf16>
    %382 = vector.extract_strided_slice %377 {offsets = [0, 0, 128], sizes = [2, 32, 64], strides = [1, 1, 1]} : vector<2x32x384xf32> to vector<2x32x64xf32>
    %383 = arith.truncf %382 : vector<2x32x64xf32> to vector<2x32x64xbf16>
    %384 = vector.extract_strided_slice %377 {offsets = [0, 0, 256], sizes = [2, 32, 64], strides = [1, 1, 1]} : vector<2x32x384xf32> to vector<2x32x64xf32>
    %385 = arith.truncf %384 : vector<2x32x64xf32> to vector<2x32x64xbf16>
    "tpu.trace_start"() <{level = 10 : i32, message = "bqd,bkd->bqk"}> : () -> ()
    %cst_156 = arith.constant dense<0.000000e+00> : vector<2x32x32xf32>
    %386 = tpu.matmul %381, %383, %cst_156 {dimension_numbers = #tpu.dot_dimension_numbers<[2], [2], [1], [1], [0, 0, 0, 1, 1, 1], [0], [0]>} : vector<2x32x64xbf16>, vector<2x32x64xbf16>, vector<2x32x32xf32> -> vector<2x32x32xf32>
    "tpu.trace_stop"() : () -> ()
    %cst_157 = arith.constant 1.250000e-01 : f32
    %387 = vector.broadcast %cst_157 : f32 to vector<2x32x32xf32>
    %388 = arith.mulf %386, %387 : vector<2x32x32xf32>
    %cst_158 = arith.constant -1.000000e+30 : f32
    %389 = vector.shape_cast %21 : vector<1x1x32xi1> to vector<1x1x32xi1>
    %390 = vector.broadcast %389 : vector<1x1x32xi1> to vector<2x32x32xi1>
    %391 = vector.broadcast %cst_158 : f32 to vector<2x32x32xf32>
    %392 = arith.select %390, %391, %388 : vector<2x32x32xi1>, vector<2x32x32xf32>
    %cst_159 = arith.constant dense<0xFF800000> : vector<2x32xf32>
    %393 = vector.multi_reduction <maximumf>, %392, %cst_159 [2] : vector<2x32x32xf32> to vector<2x32xf32>
    %394 = vector.shape_cast %393 : vector<2x32xf32> to vector<2x32x1xf32>
    %395 = vector.broadcast %394 : vector<2x32x1xf32> to vector<2x32x32xf32>
    %396 = arith.subf %392, %395 : vector<2x32x32xf32>
    %397 = math.exp %396 : vector<2x32x32xf32>
    %cst_160 = arith.constant dense<0.000000e+00> : vector<2x32xf32>
    %398 = vector.multi_reduction <add>, %397, %cst_160 [2] : vector<2x32x32xf32> to vector<2x32xf32>
    %399 = vector.shape_cast %398 : vector<2x32xf32> to vector<2x32x1xf32>
    %400 = tpu.reciprocal %399 {approx = true} : vector<2x32x1xf32> -> vector<2x32x1xf32>
    %401 = vector.broadcast %400 : vector<2x32x1xf32> to vector<2x32x32xf32>
    %402 = arith.mulf %397, %401 : vector<2x32x32xf32>
    %403 = arith.truncf %402 : vector<2x32x32xf32> to vector<2x32x32xbf16>
    "tpu.trace_start"() <{level = 10 : i32, message = "bqk,bkd->bqd"}> : () -> ()
    %cst_161 = arith.constant dense<0.000000e+00> : vector<2x32x64xf32>
    %404 = tpu.matmul %403, %385, %cst_161 {dimension_numbers = #tpu.dot_dimension_numbers<[2], [1], [1], [2], [0, 0, 0, 1, 1, 2], [0], [0]>} : vector<2x32x32xbf16>, vector<2x32x64xbf16>, vector<2x32x64xf32> -> vector<2x32x64xf32>
    "tpu.trace_stop"() : () -> ()
    %405 = vector.shape_cast %404 : vector<2x32x64xf32> to vector<64x64xf32>
    %406 = arith.truncf %405 : vector<64x64xf32> to vector<64x64xbf16>
    %407 = vector.extract_strided_slice %379 {offsets = [0, 0], sizes = [64, 30], strides = [1, 1]} : vector<128x30xbf16> to vector<64x30xbf16>
    %cst_162 = arith.constant dense<0.000000e+00> : vector<64x30xf32>
    %408 = tpu.matmul %406, %407, %cst_162 {dimension_numbers = #tpu.dot_dimension_numbers<[1], [0], [0], [1], [0, 0, 1, 1], [], []>} : vector<64x64xbf16>, vector<64x30xbf16>, vector<64x30xf32> -> vector<64x30xf32>
    %409 = vector.extract_strided_slice %377 {offsets = [0, 0, 64], sizes = [2, 32, 64], strides = [1, 1, 1]} : vector<2x32x384xf32> to vector<2x32x64xf32>
    %410 = arith.truncf %409 : vector<2x32x64xf32> to vector<2x32x64xbf16>
    %411 = vector.extract_strided_slice %377 {offsets = [0, 0, 192], sizes = [2, 32, 64], strides = [1, 1, 1]} : vector<2x32x384xf32> to vector<2x32x64xf32>
    %412 = arith.truncf %411 : vector<2x32x64xf32> to vector<2x32x64xbf16>
    %413 = vector.extract_strided_slice %377 {offsets = [0, 0, 320], sizes = [2, 32, 64], strides = [1, 1, 1]} : vector<2x32x384xf32> to vector<2x32x64xf32>
    %414 = arith.truncf %413 : vector<2x32x64xf32> to vector<2x32x64xbf16>
    "tpu.trace_start"() <{level = 10 : i32, message = "bqd,bkd->bqk"}> : () -> ()
    %cst_163 = arith.constant dense<0.000000e+00> : vector<2x32x32xf32>
    %415 = tpu.matmul %410, %412, %cst_163 {dimension_numbers = #tpu.dot_dimension_numbers<[2], [2], [1], [1], [0, 0, 0, 1, 1, 1], [0], [0]>} : vector<2x32x64xbf16>, vector<2x32x64xbf16>, vector<2x32x32xf32> -> vector<2x32x32xf32>
    "tpu.trace_stop"() : () -> ()
    %cst_164 = arith.constant 1.250000e-01 : f32
    %416 = vector.broadcast %cst_164 : f32 to vector<2x32x32xf32>
    %417 = arith.mulf %415, %416 : vector<2x32x32xf32>
    %cst_165 = arith.constant -1.000000e+30 : f32
    %418 = vector.shape_cast %21 : vector<1x1x32xi1> to vector<1x1x32xi1>
    %419 = vector.broadcast %418 : vector<1x1x32xi1> to vector<2x32x32xi1>
    %420 = vector.broadcast %cst_165 : f32 to vector<2x32x32xf32>
    %421 = arith.select %419, %420, %417 : vector<2x32x32xi1>, vector<2x32x32xf32>
    %cst_166 = arith.constant dense<0xFF800000> : vector<2x32xf32>
    %422 = vector.multi_reduction <maximumf>, %421, %cst_166 [2] : vector<2x32x32xf32> to vector<2x32xf32>
    %423 = vector.shape_cast %422 : vector<2x32xf32> to vector<2x32x1xf32>
    %424 = vector.broadcast %423 : vector<2x32x1xf32> to vector<2x32x32xf32>
    %425 = arith.subf %421, %424 : vector<2x32x32xf32>
    %426 = math.exp %425 : vector<2x32x32xf32>
    %cst_167 = arith.constant dense<0.000000e+00> : vector<2x32xf32>
    %427 = vector.multi_reduction <add>, %426, %cst_167 [2] : vector<2x32x32xf32> to vector<2x32xf32>
    %428 = vector.shape_cast %427 : vector<2x32xf32> to vector<2x32x1xf32>
    %429 = tpu.reciprocal %428 {approx = true} : vector<2x32x1xf32> -> vector<2x32x1xf32>
    %430 = vector.broadcast %429 : vector<2x32x1xf32> to vector<2x32x32xf32>
    %431 = arith.mulf %426, %430 : vector<2x32x32xf32>
    %432 = arith.truncf %431 : vector<2x32x32xf32> to vector<2x32x32xbf16>
    "tpu.trace_start"() <{level = 10 : i32, message = "bqk,bkd->bqd"}> : () -> ()
    %cst_168 = arith.constant dense<0.000000e+00> : vector<2x32x64xf32>
    %433 = tpu.matmul %432, %414, %cst_168 {dimension_numbers = #tpu.dot_dimension_numbers<[2], [1], [1], [2], [0, 0, 0, 1, 1, 2], [0], [0]>} : vector<2x32x32xbf16>, vector<2x32x64xbf16>, vector<2x32x64xf32> -> vector<2x32x64xf32>
    "tpu.trace_stop"() : () -> ()
    %434 = vector.shape_cast %433 : vector<2x32x64xf32> to vector<64x64xf32>
    %435 = arith.truncf %434 : vector<64x64xf32> to vector<64x64xbf16>
    %436 = vector.extract_strided_slice %379 {offsets = [64, 0], sizes = [64, 30], strides = [1, 1]} : vector<128x30xbf16> to vector<64x30xbf16>
    %cst_169 = arith.constant dense<0.000000e+00> : vector<64x30xf32>
    %437 = tpu.matmul %435, %436, %cst_169 {dimension_numbers = #tpu.dot_dimension_numbers<[1], [0], [0], [1], [0, 0, 1, 1], [], []>} : vector<64x64xbf16>, vector<64x30xbf16>, vector<64x30xf32> -> vector<64x30xf32>
    %438 = arith.addf %408, %437 : vector<64x30xf32>
    %c2_170 = arith.constant 2 : index
    %c0_171 = arith.constant 0 : index
    %c0_172 = arith.constant 0 : index
    %439 = vector.load %arg10[%c2_170, %c0_171, %c0_172] : memref<4x1x30xf32, #tpu.memory_space<vmem>>, vector<1x1x30xf32>
    %440 = vector.shape_cast %439 : vector<1x1x30xf32> to vector<1x30xf32>
    %441 = vector.broadcast %440 : vector<1x30xf32> to vector<64x30xf32>
    %442 = arith.addf %438, %441 : vector<64x30xf32>
    %443 = vector.shape_cast %442 : vector<64x30xf32> to vector<2x32x30xf32>
    %444 = arith.addf %343, %443 : vector<2x32x30xf32>
    %c2_173 = arith.constant 2 : index
    %c0_174 = arith.constant 0 : index
    %c0_175 = arith.constant 0 : index
    %445 = vector.load %arg11[%c2_173, %c0_174, %c0_175] : memref<4x1x30xf32, #tpu.memory_space<vmem>>, vector<1x1x30xf32>
    %446 = vector.shape_cast %445 : vector<1x1x30xf32> to vector<1x30xf32>
    %c2_176 = arith.constant 2 : index
    %c0_177 = arith.constant 0 : index
    %c0_178 = arith.constant 0 : index
    %447 = vector.load %arg12[%c2_176, %c0_177, %c0_178] : memref<4x1x30xf32, #tpu.memory_space<vmem>>, vector<1x1x30xf32>
    %448 = vector.shape_cast %447 : vector<1x1x30xf32> to vector<1x30xf32>
    %cst_179 = arith.constant dense<0.000000e+00> : vector<2x32xf32>
    %449 = vector.multi_reduction <add>, %444, %cst_179 [2] : vector<2x32x30xf32> to vector<2x32xf32>
    %450 = vector.shape_cast %449 : vector<2x32xf32> to vector<2x32x1xf32>
    %cst_180 = arith.constant 3.000000e+01 : f32
    %451 = vector.broadcast %cst_180 : f32 to vector<2x32x1xf32>
    %452 = arith.divf %450, %451 : vector<2x32x1xf32>
    %453 = vector.broadcast %452 : vector<2x32x1xf32> to vector<2x32x30xf32>
    %454 = arith.subf %444, %453 : vector<2x32x30xf32>
    %455 = arith.mulf %454, %454 : vector<2x32x30xf32>
    %cst_181 = arith.constant dense<0.000000e+00> : vector<2x32xf32>
    %456 = vector.multi_reduction <add>, %455, %cst_181 [2] : vector<2x32x30xf32> to vector<2x32xf32>
    %457 = vector.shape_cast %456 : vector<2x32xf32> to vector<2x32x1xf32>
    %cst_182 = arith.constant 3.000000e+01 : f32
    %458 = vector.broadcast %cst_182 : f32 to vector<2x32x1xf32>
    %459 = arith.divf %457, %458 : vector<2x32x1xf32>
    %460 = vector.broadcast %452 : vector<2x32x1xf32> to vector<2x32x30xf32>
    %461 = arith.subf %444, %460 : vector<2x32x30xf32>
    %cst_183 = arith.constant 9.99999974E-6 : f32
    %462 = vector.broadcast %cst_183 : f32 to vector<2x32x1xf32>
    %463 = arith.addf %459, %462 : vector<2x32x1xf32>
    %464 = math.rsqrt %463 : vector<2x32x1xf32>
    %465 = vector.broadcast %464 : vector<2x32x1xf32> to vector<2x32x30xf32>
    %466 = arith.mulf %461, %465 : vector<2x32x30xf32>
    %467 = vector.shape_cast %446 : vector<1x30xf32> to vector<1x1x30xf32>
    %468 = vector.broadcast %467 : vector<1x1x30xf32> to vector<2x32x30xf32>
    %469 = arith.mulf %466, %468 : vector<2x32x30xf32>
    %470 = vector.shape_cast %448 : vector<1x30xf32> to vector<1x1x30xf32>
    %471 = vector.broadcast %470 : vector<1x1x30xf32> to vector<2x32x30xf32>
    %472 = arith.addf %469, %471 : vector<2x32x30xf32>
    %473 = vector.shape_cast %472 : vector<2x32x30xf32> to vector<64x30xf32>
    %474 = arith.truncf %473 : vector<64x30xf32> to vector<64x30xbf16>
    %c2_184 = arith.constant 2 : index
    %c0_185 = arith.constant 0 : index
    %c0_186 = arith.constant 0 : index
    %475 = vector.load %arg13[%c2_184, %c0_185, %c0_186] : memref<4x30x256xbf16, #tpu.memory_space<vmem>>, vector<1x30x256xbf16>
    %476 = vector.shape_cast %475 : vector<1x30x256xbf16> to vector<30x256xbf16>
    %cst_187 = arith.constant dense<0.000000e+00> : vector<64x256xf32>
    %477 = tpu.matmul %474, %476, %cst_187 {dimension_numbers = #tpu.dot_dimension_numbers<[1], [0], [0], [1], [0, 0, 1, 1], [], []>} : vector<64x30xbf16>, vector<30x256xbf16>, vector<64x256xf32> -> vector<64x256xf32>
    %c2_188 = arith.constant 2 : index
    %c0_189 = arith.constant 0 : index
    %c0_190 = arith.constant 0 : index
    %478 = vector.load %arg14[%c2_188, %c0_189, %c0_190] : memref<4x1x256xf32, #tpu.memory_space<vmem>>, vector<1x1x256xf32>
    %479 = vector.shape_cast %478 : vector<1x1x256xf32> to vector<1x256xf32>
    %480 = vector.broadcast %479 : vector<1x256xf32> to vector<64x256xf32>
    %481 = arith.addf %477, %480 : vector<64x256xf32>
    %482 = arith.mulf %481, %481 : vector<64x256xf32>
    %483 = arith.mulf %481, %482 : vector<64x256xf32>
    %cst_191 = arith.constant 4.471500e-02 : f32
    %484 = vector.broadcast %cst_191 : f32 to vector<64x256xf32>
    %485 = arith.mulf %484, %483 : vector<64x256xf32>
    %486 = arith.addf %481, %485 : vector<64x256xf32>
    %cst_192 = arith.constant 0.797884583 : f32
    %487 = vector.broadcast %cst_192 : f32 to vector<64x256xf32>
    %488 = arith.mulf %487, %486 : vector<64x256xf32>
    %489 = math.tanh %488 : vector<64x256xf32>
    %cst_193 = arith.constant 1.000000e+00 : f32
    %490 = vector.broadcast %cst_193 : f32 to vector<64x256xf32>
    %491 = arith.addf %490, %489 : vector<64x256xf32>
    %cst_194 = arith.constant 5.000000e-01 : f32
    %492 = vector.broadcast %cst_194 : f32 to vector<64x256xf32>
    %493 = arith.mulf %492, %491 : vector<64x256xf32>
    %494 = arith.mulf %481, %493 : vector<64x256xf32>
    %495 = arith.truncf %494 : vector<64x256xf32> to vector<64x256xbf16>
    %c2_195 = arith.constant 2 : index
    %c0_196 = arith.constant 0 : index
    %c0_197 = arith.constant 0 : index
    %496 = vector.load %arg15[%c2_195, %c0_196, %c0_197] : memref<4x256x30xbf16, #tpu.memory_space<vmem>>, vector<1x256x30xbf16>
    %497 = vector.shape_cast %496 : vector<1x256x30xbf16> to vector<256x30xbf16>
    %cst_198 = arith.constant dense<0.000000e+00> : vector<64x30xf32>
    %498 = tpu.matmul %495, %497, %cst_198 {dimension_numbers = #tpu.dot_dimension_numbers<[1], [0], [0], [1], [0, 0, 1, 1], [], []>} : vector<64x256xbf16>, vector<256x30xbf16>, vector<64x30xf32> -> vector<64x30xf32>
    %c2_199 = arith.constant 2 : index
    %c0_200 = arith.constant 0 : index
    %c0_201 = arith.constant 0 : index
    %499 = vector.load %arg16[%c2_199, %c0_200, %c0_201] : memref<4x1x30xf32, #tpu.memory_space<vmem>>, vector<1x1x30xf32>
    %500 = vector.shape_cast %499 : vector<1x1x30xf32> to vector<1x30xf32>
    %501 = vector.broadcast %500 : vector<1x30xf32> to vector<64x30xf32>
    %502 = arith.addf %498, %501 : vector<64x30xf32>
    %503 = vector.shape_cast %502 : vector<64x30xf32> to vector<2x32x30xf32>
    %504 = arith.addf %444, %503 : vector<2x32x30xf32>
    %c3 = arith.constant 3 : index
    %c0_202 = arith.constant 0 : index
    %c0_203 = arith.constant 0 : index
    %505 = vector.load %arg6[%c3, %c0_202, %c0_203] : memref<4x1x30xf32, #tpu.memory_space<vmem>>, vector<1x1x30xf32>
    %506 = vector.shape_cast %505 : vector<1x1x30xf32> to vector<1x30xf32>
    %c3_204 = arith.constant 3 : index
    %c0_205 = arith.constant 0 : index
    %c0_206 = arith.constant 0 : index
    %507 = vector.load %arg7[%c3_204, %c0_205, %c0_206] : memref<4x1x30xf32, #tpu.memory_space<vmem>>, vector<1x1x30xf32>
    %508 = vector.shape_cast %507 : vector<1x1x30xf32> to vector<1x30xf32>
    %cst_207 = arith.constant dense<0.000000e+00> : vector<2x32xf32>
    %509 = vector.multi_reduction <add>, %504, %cst_207 [2] : vector<2x32x30xf32> to vector<2x32xf32>
    %510 = vector.shape_cast %509 : vector<2x32xf32> to vector<2x32x1xf32>
    %cst_208 = arith.constant 3.000000e+01 : f32
    %511 = vector.broadcast %cst_208 : f32 to vector<2x32x1xf32>
    %512 = arith.divf %510, %511 : vector<2x32x1xf32>
    %513 = vector.broadcast %512 : vector<2x32x1xf32> to vector<2x32x30xf32>
    %514 = arith.subf %504, %513 : vector<2x32x30xf32>
    %515 = arith.mulf %514, %514 : vector<2x32x30xf32>
    %cst_209 = arith.constant dense<0.000000e+00> : vector<2x32xf32>
    %516 = vector.multi_reduction <add>, %515, %cst_209 [2] : vector<2x32x30xf32> to vector<2x32xf32>
    %517 = vector.shape_cast %516 : vector<2x32xf32> to vector<2x32x1xf32>
    %cst_210 = arith.constant 3.000000e+01 : f32
    %518 = vector.broadcast %cst_210 : f32 to vector<2x32x1xf32>
    %519 = arith.divf %517, %518 : vector<2x32x1xf32>
    %520 = vector.broadcast %512 : vector<2x32x1xf32> to vector<2x32x30xf32>
    %521 = arith.subf %504, %520 : vector<2x32x30xf32>
    %cst_211 = arith.constant 9.99999974E-6 : f32
    %522 = vector.broadcast %cst_211 : f32 to vector<2x32x1xf32>
    %523 = arith.addf %519, %522 : vector<2x32x1xf32>
    %524 = math.rsqrt %523 : vector<2x32x1xf32>
    %525 = vector.broadcast %524 : vector<2x32x1xf32> to vector<2x32x30xf32>
    %526 = arith.mulf %521, %525 : vector<2x32x30xf32>
    %527 = vector.shape_cast %506 : vector<1x30xf32> to vector<1x1x30xf32>
    %528 = vector.broadcast %527 : vector<1x1x30xf32> to vector<2x32x30xf32>
    %529 = arith.mulf %526, %528 : vector<2x32x30xf32>
    %530 = vector.shape_cast %508 : vector<1x30xf32> to vector<1x1x30xf32>
    %531 = vector.broadcast %530 : vector<1x1x30xf32> to vector<2x32x30xf32>
    %532 = arith.addf %529, %531 : vector<2x32x30xf32>
    %533 = vector.shape_cast %532 : vector<2x32x30xf32> to vector<64x30xf32>
    %534 = arith.truncf %533 : vector<64x30xf32> to vector<64x30xbf16>
    %c3_212 = arith.constant 3 : index
    %c0_213 = arith.constant 0 : index
    %c0_214 = arith.constant 0 : index
    %535 = vector.load %arg8[%c3_212, %c0_213, %c0_214] : memref<4x30x384xbf16, #tpu.memory_space<vmem>>, vector<1x30x384xbf16>
    %536 = vector.shape_cast %535 : vector<1x30x384xbf16> to vector<30x384xbf16>
    %cst_215 = arith.constant dense<0.000000e+00> : vector<64x384xf32>
    %537 = tpu.matmul %534, %536, %cst_215 {dimension_numbers = #tpu.dot_dimension_numbers<[1], [0], [0], [1], [0, 0, 1, 1], [], []>} : vector<64x30xbf16>, vector<30x384xbf16>, vector<64x384xf32> -> vector<64x384xf32>
    %538 = vector.shape_cast %537 : vector<64x384xf32> to vector<2x32x384xf32>
    %c3_216 = arith.constant 3 : index
    %c0_217 = arith.constant 0 : index
    %c0_218 = arith.constant 0 : index
    %539 = vector.load %arg9[%c3_216, %c0_217, %c0_218] : memref<4x128x30xbf16, #tpu.memory_space<vmem>>, vector<1x128x30xbf16>
    %540 = vector.shape_cast %539 : vector<1x128x30xbf16> to vector<128x30xbf16>
    %541 = vector.extract_strided_slice %538 {offsets = [0, 0, 0], sizes = [2, 32, 64], strides = [1, 1, 1]} : vector<2x32x384xf32> to vector<2x32x64xf32>
    %542 = arith.truncf %541 : vector<2x32x64xf32> to vector<2x32x64xbf16>
    %543 = vector.extract_strided_slice %538 {offsets = [0, 0, 128], sizes = [2, 32, 64], strides = [1, 1, 1]} : vector<2x32x384xf32> to vector<2x32x64xf32>
    %544 = arith.truncf %543 : vector<2x32x64xf32> to vector<2x32x64xbf16>
    %545 = vector.extract_strided_slice %538 {offsets = [0, 0, 256], sizes = [2, 32, 64], strides = [1, 1, 1]} : vector<2x32x384xf32> to vector<2x32x64xf32>
    %546 = arith.truncf %545 : vector<2x32x64xf32> to vector<2x32x64xbf16>
    "tpu.trace_start"() <{level = 10 : i32, message = "bqd,bkd->bqk"}> : () -> ()
    %cst_219 = arith.constant dense<0.000000e+00> : vector<2x32x32xf32>
    %547 = tpu.matmul %542, %544, %cst_219 {dimension_numbers = #tpu.dot_dimension_numbers<[2], [2], [1], [1], [0, 0, 0, 1, 1, 1], [0], [0]>} : vector<2x32x64xbf16>, vector<2x32x64xbf16>, vector<2x32x32xf32> -> vector<2x32x32xf32>
    "tpu.trace_stop"() : () -> ()
    %cst_220 = arith.constant 1.250000e-01 : f32
    %548 = vector.broadcast %cst_220 : f32 to vector<2x32x32xf32>
    %549 = arith.mulf %547, %548 : vector<2x32x32xf32>
    %cst_221 = arith.constant -1.000000e+30 : f32
    %550 = vector.shape_cast %21 : vector<1x1x32xi1> to vector<1x1x32xi1>
    %551 = vector.broadcast %550 : vector<1x1x32xi1> to vector<2x32x32xi1>
    %552 = vector.broadcast %cst_221 : f32 to vector<2x32x32xf32>
    %553 = arith.select %551, %552, %549 : vector<2x32x32xi1>, vector<2x32x32xf32>
    %cst_222 = arith.constant dense<0xFF800000> : vector<2x32xf32>
    %554 = vector.multi_reduction <maximumf>, %553, %cst_222 [2] : vector<2x32x32xf32> to vector<2x32xf32>
    %555 = vector.shape_cast %554 : vector<2x32xf32> to vector<2x32x1xf32>
    %556 = vector.broadcast %555 : vector<2x32x1xf32> to vector<2x32x32xf32>
    %557 = arith.subf %553, %556 : vector<2x32x32xf32>
    %558 = math.exp %557 : vector<2x32x32xf32>
    %cst_223 = arith.constant dense<0.000000e+00> : vector<2x32xf32>
    %559 = vector.multi_reduction <add>, %558, %cst_223 [2] : vector<2x32x32xf32> to vector<2x32xf32>
    %560 = vector.shape_cast %559 : vector<2x32xf32> to vector<2x32x1xf32>
    %561 = tpu.reciprocal %560 {approx = true} : vector<2x32x1xf32> -> vector<2x32x1xf32>
    %562 = vector.broadcast %561 : vector<2x32x1xf32> to vector<2x32x32xf32>
    %563 = arith.mulf %558, %562 : vector<2x32x32xf32>
    %564 = arith.truncf %563 : vector<2x32x32xf32> to vector<2x32x32xbf16>
    "tpu.trace_start"() <{level = 10 : i32, message = "bqk,bkd->bqd"}> : () -> ()
    %cst_224 = arith.constant dense<0.000000e+00> : vector<2x32x64xf32>
    %565 = tpu.matmul %564, %546, %cst_224 {dimension_numbers = #tpu.dot_dimension_numbers<[2], [1], [1], [2], [0, 0, 0, 1, 1, 2], [0], [0]>} : vector<2x32x32xbf16>, vector<2x32x64xbf16>, vector<2x32x64xf32> -> vector<2x32x64xf32>
    "tpu.trace_stop"() : () -> ()
    %566 = vector.shape_cast %565 : vector<2x32x64xf32> to vector<64x64xf32>
    %567 = arith.truncf %566 : vector<64x64xf32> to vector<64x64xbf16>
    %568 = vector.extract_strided_slice %540 {offsets = [0, 0], sizes = [64, 30], strides = [1, 1]} : vector<128x30xbf16> to vector<64x30xbf16>
    %cst_225 = arith.constant dense<0.000000e+00> : vector<64x30xf32>
    %569 = tpu.matmul %567, %568, %cst_225 {dimension_numbers = #tpu.dot_dimension_numbers<[1], [0], [0], [1], [0, 0, 1, 1], [], []>} : vector<64x64xbf16>, vector<64x30xbf16>, vector<64x30xf32> -> vector<64x30xf32>
    %570 = vector.extract_strided_slice %538 {offsets = [0, 0, 64], sizes = [2, 32, 64], strides = [1, 1, 1]} : vector<2x32x384xf32> to vector<2x32x64xf32>
    %571 = arith.truncf %570 : vector<2x32x64xf32> to vector<2x32x64xbf16>
    %572 = vector.extract_strided_slice %538 {offsets = [0, 0, 192], sizes = [2, 32, 64], strides = [1, 1, 1]} : vector<2x32x384xf32> to vector<2x32x64xf32>
    %573 = arith.truncf %572 : vector<2x32x64xf32> to vector<2x32x64xbf16>
    %574 = vector.extract_strided_slice %538 {offsets = [0, 0, 320], sizes = [2, 32, 64], strides = [1, 1, 1]} : vector<2x32x384xf32> to vector<2x32x64xf32>
    %575 = arith.truncf %574 : vector<2x32x64xf32> to vector<2x32x64xbf16>
    "tpu.trace_start"() <{level = 10 : i32, message = "bqd,bkd->bqk"}> : () -> ()
    %cst_226 = arith.constant dense<0.000000e+00> : vector<2x32x32xf32>
    %576 = tpu.matmul %571, %573, %cst_226 {dimension_numbers = #tpu.dot_dimension_numbers<[2], [2], [1], [1], [0, 0, 0, 1, 1, 1], [0], [0]>} : vector<2x32x64xbf16>, vector<2x32x64xbf16>, vector<2x32x32xf32> -> vector<2x32x32xf32>
    "tpu.trace_stop"() : () -> ()
    %cst_227 = arith.constant 1.250000e-01 : f32
    %577 = vector.broadcast %cst_227 : f32 to vector<2x32x32xf32>
    %578 = arith.mulf %576, %577 : vector<2x32x32xf32>
    %cst_228 = arith.constant -1.000000e+30 : f32
    %579 = vector.shape_cast %21 : vector<1x1x32xi1> to vector<1x1x32xi1>
    %580 = vector.broadcast %579 : vector<1x1x32xi1> to vector<2x32x32xi1>
    %581 = vector.broadcast %cst_228 : f32 to vector<2x32x32xf32>
    %582 = arith.select %580, %581, %578 : vector<2x32x32xi1>, vector<2x32x32xf32>
    %cst_229 = arith.constant dense<0xFF800000> : vector<2x32xf32>
    %583 = vector.multi_reduction <maximumf>, %582, %cst_229 [2] : vector<2x32x32xf32> to vector<2x32xf32>
    %584 = vector.shape_cast %583 : vector<2x32xf32> to vector<2x32x1xf32>
    %585 = vector.broadcast %584 : vector<2x32x1xf32> to vector<2x32x32xf32>
    %586 = arith.subf %582, %585 : vector<2x32x32xf32>
    %587 = math.exp %586 : vector<2x32x32xf32>
    %cst_230 = arith.constant dense<0.000000e+00> : vector<2x32xf32>
    %588 = vector.multi_reduction <add>, %587, %cst_230 [2] : vector<2x32x32xf32> to vector<2x32xf32>
    %589 = vector.shape_cast %588 : vector<2x32xf32> to vector<2x32x1xf32>
    %590 = tpu.reciprocal %589 {approx = true} : vector<2x32x1xf32> -> vector<2x32x1xf32>
    %591 = vector.broadcast %590 : vector<2x32x1xf32> to vector<2x32x32xf32>
    %592 = arith.mulf %587, %591 : vector<2x32x32xf32>
    %593 = arith.truncf %592 : vector<2x32x32xf32> to vector<2x32x32xbf16>
    "tpu.trace_start"() <{level = 10 : i32, message = "bqk,bkd->bqd"}> : () -> ()
    %cst_231 = arith.constant dense<0.000000e+00> : vector<2x32x64xf32>
    %594 = tpu.matmul %593, %575, %cst_231 {dimension_numbers = #tpu.dot_dimension_numbers<[2], [1], [1], [2], [0, 0, 0, 1, 1, 2], [0], [0]>} : vector<2x32x32xbf16>, vector<2x32x64xbf16>, vector<2x32x64xf32> -> vector<2x32x64xf32>
    "tpu.trace_stop"() : () -> ()
    %595 = vector.shape_cast %594 : vector<2x32x64xf32> to vector<64x64xf32>
    %596 = arith.truncf %595 : vector<64x64xf32> to vector<64x64xbf16>
    %597 = vector.extract_strided_slice %540 {offsets = [64, 0], sizes = [64, 30], strides = [1, 1]} : vector<128x30xbf16> to vector<64x30xbf16>
    %cst_232 = arith.constant dense<0.000000e+00> : vector<64x30xf32>
    %598 = tpu.matmul %596, %597, %cst_232 {dimension_numbers = #tpu.dot_dimension_numbers<[1], [0], [0], [1], [0, 0, 1, 1], [], []>} : vector<64x64xbf16>, vector<64x30xbf16>, vector<64x30xf32> -> vector<64x30xf32>
    %599 = arith.addf %569, %598 : vector<64x30xf32>
    %c3_233 = arith.constant 3 : index
    %c0_234 = arith.constant 0 : index
    %c0_235 = arith.constant 0 : index
    %600 = vector.load %arg10[%c3_233, %c0_234, %c0_235] : memref<4x1x30xf32, #tpu.memory_space<vmem>>, vector<1x1x30xf32>
    %601 = vector.shape_cast %600 : vector<1x1x30xf32> to vector<1x30xf32>
    %602 = vector.broadcast %601 : vector<1x30xf32> to vector<64x30xf32>
    %603 = arith.addf %599, %602 : vector<64x30xf32>
    %604 = vector.shape_cast %603 : vector<64x30xf32> to vector<2x32x30xf32>
    %605 = arith.addf %504, %604 : vector<2x32x30xf32>
    %c3_236 = arith.constant 3 : index
    %c0_237 = arith.constant 0 : index
    %c0_238 = arith.constant 0 : index
    %606 = vector.load %arg11[%c3_236, %c0_237, %c0_238] : memref<4x1x30xf32, #tpu.memory_space<vmem>>, vector<1x1x30xf32>
    %607 = vector.shape_cast %606 : vector<1x1x30xf32> to vector<1x30xf32>
    %c3_239 = arith.constant 3 : index
    %c0_240 = arith.constant 0 : index
    %c0_241 = arith.constant 0 : index
    %608 = vector.load %arg12[%c3_239, %c0_240, %c0_241] : memref<4x1x30xf32, #tpu.memory_space<vmem>>, vector<1x1x30xf32>
    %609 = vector.shape_cast %608 : vector<1x1x30xf32> to vector<1x30xf32>
    %cst_242 = arith.constant dense<0.000000e+00> : vector<2x32xf32>
    %610 = vector.multi_reduction <add>, %605, %cst_242 [2] : vector<2x32x30xf32> to vector<2x32xf32>
    %611 = vector.shape_cast %610 : vector<2x32xf32> to vector<2x32x1xf32>
    %cst_243 = arith.constant 3.000000e+01 : f32
    %612 = vector.broadcast %cst_243 : f32 to vector<2x32x1xf32>
    %613 = arith.divf %611, %612 : vector<2x32x1xf32>
    %614 = vector.broadcast %613 : vector<2x32x1xf32> to vector<2x32x30xf32>
    %615 = arith.subf %605, %614 : vector<2x32x30xf32>
    %616 = arith.mulf %615, %615 : vector<2x32x30xf32>
    %cst_244 = arith.constant dense<0.000000e+00> : vector<2x32xf32>
    %617 = vector.multi_reduction <add>, %616, %cst_244 [2] : vector<2x32x30xf32> to vector<2x32xf32>
    %618 = vector.shape_cast %617 : vector<2x32xf32> to vector<2x32x1xf32>
    %cst_245 = arith.constant 3.000000e+01 : f32
    %619 = vector.broadcast %cst_245 : f32 to vector<2x32x1xf32>
    %620 = arith.divf %618, %619 : vector<2x32x1xf32>
    %621 = vector.broadcast %613 : vector<2x32x1xf32> to vector<2x32x30xf32>
    %622 = arith.subf %605, %621 : vector<2x32x30xf32>
    %cst_246 = arith.constant 9.99999974E-6 : f32
    %623 = vector.broadcast %cst_246 : f32 to vector<2x32x1xf32>
    %624 = arith.addf %620, %623 : vector<2x32x1xf32>
    %625 = math.rsqrt %624 : vector<2x32x1xf32>
    %626 = vector.broadcast %625 : vector<2x32x1xf32> to vector<2x32x30xf32>
    %627 = arith.mulf %622, %626 : vector<2x32x30xf32>
    %628 = vector.shape_cast %607 : vector<1x30xf32> to vector<1x1x30xf32>
    %629 = vector.broadcast %628 : vector<1x1x30xf32> to vector<2x32x30xf32>
    %630 = arith.mulf %627, %629 : vector<2x32x30xf32>
    %631 = vector.shape_cast %609 : vector<1x30xf32> to vector<1x1x30xf32>
    %632 = vector.broadcast %631 : vector<1x1x30xf32> to vector<2x32x30xf32>
    %633 = arith.addf %630, %632 : vector<2x32x30xf32>
    %634 = vector.shape_cast %633 : vector<2x32x30xf32> to vector<64x30xf32>
    %635 = arith.truncf %634 : vector<64x30xf32> to vector<64x30xbf16>
    %c3_247 = arith.constant 3 : index
    %c0_248 = arith.constant 0 : index
    %c0_249 = arith.constant 0 : index
    %636 = vector.load %arg13[%c3_247, %c0_248, %c0_249] : memref<4x30x256xbf16, #tpu.memory_space<vmem>>, vector<1x30x256xbf16>
    %637 = vector.shape_cast %636 : vector<1x30x256xbf16> to vector<30x256xbf16>
    %cst_250 = arith.constant dense<0.000000e+00> : vector<64x256xf32>
    %638 = tpu.matmul %635, %637, %cst_250 {dimension_numbers = #tpu.dot_dimension_numbers<[1], [0], [0], [1], [0, 0, 1, 1], [], []>} : vector<64x30xbf16>, vector<30x256xbf16>, vector<64x256xf32> -> vector<64x256xf32>
    %c3_251 = arith.constant 3 : index
    %c0_252 = arith.constant 0 : index
    %c0_253 = arith.constant 0 : index
    %639 = vector.load %arg14[%c3_251, %c0_252, %c0_253] : memref<4x1x256xf32, #tpu.memory_space<vmem>>, vector<1x1x256xf32>
    %640 = vector.shape_cast %639 : vector<1x1x256xf32> to vector<1x256xf32>
    %641 = vector.broadcast %640 : vector<1x256xf32> to vector<64x256xf32>
    %642 = arith.addf %638, %641 : vector<64x256xf32>
    %643 = arith.mulf %642, %642 : vector<64x256xf32>
    %644 = arith.mulf %642, %643 : vector<64x256xf32>
    %cst_254 = arith.constant 4.471500e-02 : f32
    %645 = vector.broadcast %cst_254 : f32 to vector<64x256xf32>
    %646 = arith.mulf %645, %644 : vector<64x256xf32>
    %647 = arith.addf %642, %646 : vector<64x256xf32>
    %cst_255 = arith.constant 0.797884583 : f32
    %648 = vector.broadcast %cst_255 : f32 to vector<64x256xf32>
    %649 = arith.mulf %648, %647 : vector<64x256xf32>
    %650 = math.tanh %649 : vector<64x256xf32>
    %cst_256 = arith.constant 1.000000e+00 : f32
    %651 = vector.broadcast %cst_256 : f32 to vector<64x256xf32>
    %652 = arith.addf %651, %650 : vector<64x256xf32>
    %cst_257 = arith.constant 5.000000e-01 : f32
    %653 = vector.broadcast %cst_257 : f32 to vector<64x256xf32>
    %654 = arith.mulf %653, %652 : vector<64x256xf32>
    %655 = arith.mulf %642, %654 : vector<64x256xf32>
    %656 = arith.truncf %655 : vector<64x256xf32> to vector<64x256xbf16>
    %c3_258 = arith.constant 3 : index
    %c0_259 = arith.constant 0 : index
    %c0_260 = arith.constant 0 : index
    %657 = vector.load %arg15[%c3_258, %c0_259, %c0_260] : memref<4x256x30xbf16, #tpu.memory_space<vmem>>, vector<1x256x30xbf16>
    %658 = vector.shape_cast %657 : vector<1x256x30xbf16> to vector<256x30xbf16>
    %cst_261 = arith.constant dense<0.000000e+00> : vector<64x30xf32>
    %659 = tpu.matmul %656, %658, %cst_261 {dimension_numbers = #tpu.dot_dimension_numbers<[1], [0], [0], [1], [0, 0, 1, 1], [], []>} : vector<64x256xbf16>, vector<256x30xbf16>, vector<64x30xf32> -> vector<64x30xf32>
    %c3_262 = arith.constant 3 : index
    %c0_263 = arith.constant 0 : index
    %c0_264 = arith.constant 0 : index
    %660 = vector.load %arg16[%c3_262, %c0_263, %c0_264] : memref<4x1x30xf32, #tpu.memory_space<vmem>>, vector<1x1x30xf32>
    %661 = vector.shape_cast %660 : vector<1x1x30xf32> to vector<1x30xf32>
    %662 = vector.broadcast %661 : vector<1x30xf32> to vector<64x30xf32>
    %663 = arith.addf %659, %662 : vector<64x30xf32>
    %664 = vector.shape_cast %663 : vector<64x30xf32> to vector<2x32x30xf32>
    %665 = arith.addf %605, %664 : vector<2x32x30xf32>
    %666 = vector.extract_strided_slice %665 {offsets = [0, 0, 0], sizes = [2, 1, 30], strides = [1, 1, 1]} : vector<2x32x30xf32> to vector<2x1x30xf32>
    %667 = vector.shape_cast %666 : vector<2x1x30xf32> to vector<2x30xf32>
    %c0_265 = arith.constant 0 : index
    %c0_266 = arith.constant 0 : index
    %668 = vector.load %arg17[%c0_265, %c0_266] : memref<1x30xf32, #tpu.memory_space<vmem>>, vector<1x30xf32>
    %c0_267 = arith.constant 0 : index
    %c0_268 = arith.constant 0 : index
    %669 = vector.load %arg18[%c0_267, %c0_268] : memref<1x30xf32, #tpu.memory_space<vmem>>, vector<1x30xf32>
    %cst_269 = arith.constant dense<0.000000e+00> : vector<2xf32>
    %670 = vector.multi_reduction <add>, %667, %cst_269 [1] : vector<2x30xf32> to vector<2xf32>
    %671 = vector.shape_cast %670 : vector<2xf32> to vector<2x1xf32>
    %cst_270 = arith.constant 3.000000e+01 : f32
    %672 = vector.broadcast %cst_270 : f32 to vector<2x1xf32>
    %673 = arith.divf %671, %672 : vector<2x1xf32>
    %674 = vector.broadcast %673 : vector<2x1xf32> to vector<2x30xf32>
    %675 = arith.subf %667, %674 : vector<2x30xf32>
    %676 = arith.mulf %675, %675 : vector<2x30xf32>
    %cst_271 = arith.constant dense<0.000000e+00> : vector<2xf32>
    %677 = vector.multi_reduction <add>, %676, %cst_271 [1] : vector<2x30xf32> to vector<2xf32>
    %678 = vector.shape_cast %677 : vector<2xf32> to vector<2x1xf32>
    %cst_272 = arith.constant 3.000000e+01 : f32
    %679 = vector.broadcast %cst_272 : f32 to vector<2x1xf32>
    %680 = arith.divf %678, %679 : vector<2x1xf32>
    %681 = vector.broadcast %673 : vector<2x1xf32> to vector<2x30xf32>
    %682 = arith.subf %667, %681 : vector<2x30xf32>
    %cst_273 = arith.constant 9.99999974E-6 : f32
    %683 = vector.broadcast %cst_273 : f32 to vector<2x1xf32>
    %684 = arith.addf %680, %683 : vector<2x1xf32>
    %685 = math.rsqrt %684 : vector<2x1xf32>
    %686 = vector.broadcast %685 : vector<2x1xf32> to vector<2x30xf32>
    %687 = arith.mulf %682, %686 : vector<2x30xf32>
    %688 = vector.broadcast %668 : vector<1x30xf32> to vector<2x30xf32>
    %689 = arith.mulf %687, %688 : vector<2x30xf32>
    %690 = vector.broadcast %669 : vector<1x30xf32> to vector<2x30xf32>
    %691 = arith.addf %689, %690 : vector<2x30xf32>
    %692 = arith.truncf %691 : vector<2x30xf32> to vector<2x30xbf16>
    %c0_274 = arith.constant 0 : index
    %c0_275 = arith.constant 0 : index
    %693 = vector.load %arg19[%c0_274, %c0_275] : memref<30x128xbf16, #tpu.memory_space<vmem>>, vector<30x128xbf16>
    %cst_276 = arith.constant dense<0.000000e+00> : vector<2x128xf32>
    %694 = tpu.matmul %692, %693, %cst_276 {dimension_numbers = #tpu.dot_dimension_numbers<[1], [0], [0], [1], [0, 0, 1, 1], [], []>} : vector<2x30xbf16>, vector<30x128xbf16>, vector<2x128xf32> -> vector<2x128xf32>
    %c0_277 = arith.constant 0 : index
    %c0_278 = arith.constant 0 : index
    %695 = vector.load %arg20[%c0_277, %c0_278] : memref<1x128xf32, #tpu.memory_space<vmem>>, vector<1x128xf32>
    %696 = vector.broadcast %695 : vector<1x128xf32> to vector<2x128xf32>
    %697 = arith.addf %694, %696 : vector<2x128xf32>
    %c0_279 = arith.constant 0 : index
    %c0_280 = arith.constant 0 : index
    %698 = vector.load %arg21[%c0_279, %c0_280] : memref<2x128xf32, #tpu.memory_space<vmem>>, vector<2x128xf32>
    tpu.vector_store %arg21[%c0_279, %c0_280], %697 {strides = array<i32>} : memref<2x128xf32, #tpu.memory_space<vmem>>, vector<2x128xf32>,
    return
  }
  func.func @transform_0(%arg0: i32) -> (i32, i32, i32) {
    %c0_i32 = arith.constant 0 : i32
    %c0_i32_0 = arith.constant 0 : i32
    %c0_i32_1 = arith.constant 0 : i32
    return %arg0, %c0_i32, %c0_i32_0 : i32, i32, i32
  }
  func.func @transform_1(%arg0: i32) -> (i32, i32) {
    %c0_i32 = arith.constant 0 : i32
    %c0_i32_0 = arith.constant 0 : i32
    %c0_i32_1 = arith.constant 0 : i32
    return %c0_i32, %c0_i32_0 : i32, i32
  }
  func.func @transform_2(%arg0: i32) -> (i32, i32) {
    %c0_i32 = arith.constant 0 : i32
    %c0_i32_0 = arith.constant 0 : i32
    %c0_i32_1 = arith.constant 0 : i32
    return %c0_i32, %c0_i32_0 : i32, i32
  }
  func.func @transform_3(%arg0: i32) -> (i32, i32, i32) {
    %c0_i32 = arith.constant 0 : i32
    %c0_i32_0 = arith.constant 0 : i32
    %c0_i32_1 = arith.constant 0 : i32
    %c0_i32_2 = arith.constant 0 : i32
    return %c0_i32, %c0_i32_0, %c0_i32_1 : i32, i32, i32
  }
  func.func @transform_4(%arg0: i32) -> (i32, i32, i32) {
    %c0_i32 = arith.constant 0 : i32
    %c0_i32_0 = arith.constant 0 : i32
    %c0_i32_1 = arith.constant 0 : i32
    %c0_i32_2 = arith.constant 0 : i32
    return %c0_i32, %c0_i32_0, %c0_i32_1 : i32, i32, i32
  }
  func.func @transform_5(%arg0: i32) -> (i32, i32, i32) {
    %c0_i32 = arith.constant 0 : i32
    %c0_i32_0 = arith.constant 0 : i32
    %c0_i32_1 = arith.constant 0 : i32
    %c0_i32_2 = arith.constant 0 : i32
    return %c0_i32, %c0_i32_0, %c0_i32_1 : i32, i32, i32
  }
  func.func @transform_6(%arg0: i32) -> (i32, i32, i32) {
    %c0_i32 = arith.constant 0 : i32
    %c0_i32_0 = arith.constant 0 : i32
    %c0_i32_1 = arith.constant 0 : i32
    %c0_i32_2 = arith.constant 0 : i32
    return %c0_i32, %c0_i32_0, %c0_i32_1 : i32, i32, i32
  }
  func.func @transform_7(%arg0: i32) -> (i32, i32, i32) {
    %c0_i32 = arith.constant 0 : i32
    %c0_i32_0 = arith.constant 0 : i32
    %c0_i32_1 = arith.constant 0 : i32
    %c0_i32_2 = arith.constant 0 : i32
    return %c0_i32, %c0_i32_0, %c0_i32_1 : i32, i32, i32
  }
  func.func @transform_8(%arg0: i32) -> (i32, i32, i32) {
    %c0_i32 = arith.constant 0 : i32
    %c0_i32_0 = arith.constant 0 : i32
    %c0_i32_1 = arith.constant 0 : i32
    %c0_i32_2 = arith.constant 0 : i32
    return %c0_i32, %c0_i32_0, %c0_i32_1 : i32, i32, i32
  }
  func.func @transform_9(%arg0: i32) -> (i32, i32, i32) {
    %c0_i32 = arith.constant 0 : i32
    %c0_i32_0 = arith.constant 0 : i32
    %c0_i32_1 = arith.constant 0 : i32
    %c0_i32_2 = arith.constant 0 : i32
    return %c0_i32, %c0_i32_0, %c0_i32_1 : i32, i32, i32
  }
  func.func @transform_10(%arg0: i32) -> (i32, i32, i32) {
    %c0_i32 = arith.constant 0 : i32
    %c0_i32_0 = arith.constant 0 : i32
    %c0_i32_1 = arith.constant 0 : i32
    %c0_i32_2 = arith.constant 0 : i32
    return %c0_i32, %c0_i32_0, %c0_i32_1 : i32, i32, i32
  }
  func.func @transform_11(%arg0: i32) -> (i32, i32, i32) {
    %c0_i32 = arith.constant 0 : i32
    %c0_i32_0 = arith.constant 0 : i32
    %c0_i32_1 = arith.constant 0 : i32
    %c0_i32_2 = arith.constant 0 : i32
    return %c0_i32, %c0_i32_0, %c0_i32_1 : i32, i32, i32
  }
  func.func @transform_12(%arg0: i32) -> (i32, i32, i32) {
    %c0_i32 = arith.constant 0 : i32
    %c0_i32_0 = arith.constant 0 : i32
    %c0_i32_1 = arith.constant 0 : i32
    %c0_i32_2 = arith.constant 0 : i32
    return %c0_i32, %c0_i32_0, %c0_i32_1 : i32, i32, i32
  }
  func.func @transform_13(%arg0: i32) -> (i32, i32, i32) {
    %c0_i32 = arith.constant 0 : i32
    %c0_i32_0 = arith.constant 0 : i32
    %c0_i32_1 = arith.constant 0 : i32
    %c0_i32_2 = arith.constant 0 : i32
    return %c0_i32, %c0_i32_0, %c0_i32_1 : i32, i32, i32
  }
  func.func @transform_14(%arg0: i32) -> (i32, i32, i32) {
    %c0_i32 = arith.constant 0 : i32
    %c0_i32_0 = arith.constant 0 : i32
    %c0_i32_1 = arith.constant 0 : i32
    %c0_i32_2 = arith.constant 0 : i32
    return %c0_i32, %c0_i32_0, %c0_i32_1 : i32, i32, i32
  }
  func.func @transform_15(%arg0: i32) -> (i32, i32, i32) {
    %c0_i32 = arith.constant 0 : i32
    %c0_i32_0 = arith.constant 0 : i32
    %c0_i32_1 = arith.constant 0 : i32
    %c0_i32_2 = arith.constant 0 : i32
    return %c0_i32, %c0_i32_0, %c0_i32_1 : i32, i32, i32
  }
  func.func @transform_16(%arg0: i32) -> (i32, i32) {
    %c0_i32 = arith.constant 0 : i32
    %c0_i32_0 = arith.constant 0 : i32
    %c0_i32_1 = arith.constant 0 : i32
    return %c0_i32, %c0_i32_0 : i32, i32
  }
  func.func @transform_17(%arg0: i32) -> (i32, i32) {
    %c0_i32 = arith.constant 0 : i32
    %c0_i32_0 = arith.constant 0 : i32
    %c0_i32_1 = arith.constant 0 : i32
    return %c0_i32, %c0_i32_0 : i32, i32
  }
  func.func @transform_18(%arg0: i32) -> (i32, i32) {
    %c0_i32 = arith.constant 0 : i32
    %c0_i32_0 = arith.constant 0 : i32
    %c0_i32_1 = arith.constant 0 : i32
    return %c0_i32, %c0_i32_0 : i32, i32
  }
  func.func @transform_19(%arg0: i32) -> (i32, i32) {
    %c0_i32 = arith.constant 0 : i32
    %c0_i32_0 = arith.constant 0 : i32
    %c0_i32_1 = arith.constant 0 : i32
    return %c0_i32, %c0_i32_0 : i32, i32
  }
  func.func @transform_20(%arg0: i32) -> (i32, i32) {
    %c0_i32 = arith.constant 0 : i32
    %c0_i32_0 = arith.constant 0 : i32
    return %arg0, %c0_i32 : i32, i32
  }
}

</mosaic_0001>

<bundles_post_ra>
// kernel: net8_forward.1
= control target key start
LH: loop header
LB: loop body
LE: loop exit
PB: predicated region body
PF: predicated region fallthrough
CT: control target
= control target key end

     0   :  { %s13276_s0 = inlined_call_operand.vmem [shape: f32[2,32,12], index: 0, kind: input, shape index: {}]   ;;  %s13277_s1 = inlined_call_operand.vmem [shape: bf16[12,30], index: 1, kind: input, shape index: {}]   ;;  %s13278_s2 = inlined_call_operand.vmem [shape: f32[1,30], index: 2, kind: input, shape index: {}]   ;;  %s13279_s3 = inlined_call_operand.vmem [shape: f32[1,1,30], index: 3, kind: input, shape index: {}]   ;;  %s13280_s4 = inlined_call_operand.vmem [shape: f32[1,32,30], index: 4, kind: input, shape index: {}]   ;;  %s13281_s5 = inlined_call_operand.vmem [shape: f32[4,1,30], index: 5, kind: input, shape index: {}]   ;;  %s13282_s6 = inlined_call_operand.vmem [shape: f32[4,1,30], index: 6, kind: input, shape index: {}]   ;;  %s13283_s7 = inlined_call_operand.vmem [shape: bf16[4,30,384], index: 7, kind: input, shape index: {}]   ;;  %s13284_s8 = inlined_call_operand.vmem [shape: bf16[4,128,30], index: 8, kind: input, shape index: {}]   ;;  %s13285_s9 = inlined_call_operand.vmem [shape: f32[4,1,30], index: 9, kind: input, shape index: {}]   ;;  %s13286_s10 = inlined_call_operand.vmem [shape: f32[4,1,30], index: 10, kind: input, shape index: {}]   ;;  %s13287_s11 = inlined_call_operand.vmem [shape: f32[4,1,30], index: 11, kind: input, shape index: {}]   ;;  %s13288_s12 = inlined_call_operand.vmem [shape: bf16[4,30,256], index: 12, kind: input, shape index: {}]   ;;  %s13289_s13 = inlined_call_operand.vmem [shape: f32[4,1,256], index: 13, kind: input, shape index: {}]   ;;  %s13290_s14 = inlined_call_operand.vmem [shape: bf16[4,256,30], index: 14, kind: input, shape index: {}]   ;;  %s13291_s15 = inlined_call_operand.vmem [shape: f32[4,1,30], index: 15, kind: input, shape index: {}]   ;;  %s13292_s16 = inlined_call_operand.vmem [shape: f32[1,30], index: 16, kind: input, shape index: {}]   ;;  %s13293_s17 = inlined_call_operand.vmem [shape: f32[1,30], index: 17, kind: input, shape index: {}]   ;;  %s13294_s18 = inlined_call_operand.vmem [shape: bf16[30,128], index: 18, kind: input, shape index: {}]   ;;  %s13295_s19 = inlined_call_operand.vmem [shape: f32[1,128], index: 19, kind: input, shape index: {}]   ;;  %s13296_s20 = inlined_call_operand.hbm [shape: f32[2,128], index: 20, kind: output, shape index: {}]  }
   0x1   :  { %13299 = sst [smem:[#allocation5_spill]] %s13276_s0 }
   0x2   :  { %13300 = sst [smem:[#allocation6_spill]] %s13277_s1 }
   0x3   :  { %13301 = sst [smem:[#allocation7_spill]] %s13278_s2 }
   0x4   :  { %13302 = sst [smem:[#allocation8_spill]] %s13279_s3 }
   0x5   :  { %13303 = sst [smem:[#allocation9_spill]] %s13280_s4 }
   0x6   :  { %s13304_s23 = sld [smem:[#allocation6_spill]]  ;;  %vm106_vm0 = vcmask 1045504   ;;  %s13305_s25 = sld [smem:[#allocation5_spill]]  ;;  %vm93_vm1 = vcmask 97280  }
   0xc   :  { %v9574_v0 = vld [vmem:[%s13304_s23] sm:$0x3f]   ;;  %v68_v2 = vld [vmem:[%s13305_s25 + $0x8] sm:$0xff]  ;;  %v69_v3 = vld [vmem:[%s13305_s25 + $0x10] sm:$0xff] }
   0xd   :  { %v67_v1 = vld [vmem:[%s13305_s25] sm:$0xff]  ;;  %9532 = vmatprep.subr.msk.bf16.mxu1 %vm106_vm0, %v9574_v0  ;;  %v108_v4 = vsel %vm106_vm0, %v9574_v0, 0  ;;  %v70_v6 = vld [vmem:[%s13305_s25 + $0x18] sm:$0xff]  ;;  %v72_v8 = vld [vmem:[%s13305_s25 + $0x28] sm:$0xff] }
   0xe   :  { %v75_v5 = vpack.c.bf16 %v68_v2, %v67_v1  ;;  %v71_v7 = vld [vmem:[%s13305_s25 + $0x20] sm:$0xff]  ;;  %9051 = vmatpush3.bf16.msra.mxu1 %v108_v4  ;;  %v76_v9 = vpack.c.bf16 %v70_v6, %v69_v3  ;;  %v73_v11 = vld [vmem:[%s13305_s25 + $0x30] sm:$0xff]  ;;  %v74_v12 = vld [vmem:[%s13305_s25 + $0x38] sm:$0xff] }
   0xf   :  { %v77_v10 = vpack.c.bf16 %v72_v8, %v71_v7  ;;  %v78_v13 = vpack.c.bf16 %v74_v12, %v73_v11 }
  0x10   :  { %9052 = vmatprep.mubr.msk.bf16.mxu1 %vm93_vm1, %v75_v5 }
  0x11   :  { %9053 = vmatmul.mubr.msk.bf16.vlgmr.msra.gmra.mrb[0].mxu1 %vm93_vm1, %v76_v9 }
  0x12   :  { %9056 = vmatprep.mubr.msk.bf16.mxu1 %vm93_vm1, %v77_v10 }
  0x19   :  { %9057 = vmatmul.mubr.msk.bf16.gmra.mrb[4].mxu1 %vm93_vm1, %v78_v13 }
  0x1a   :  { %25 = vsyncpa [#allocation3], 0  ;;  %v175_v14 = vlaneseq  ;;  %s13306_s27 = sld [smem:[#allocation7_spill]]  ;;  %s13307_s25 = sld [smem:[#allocation9_spill]]  ;;  %vm216_vm3 = vcmask 244736   ;;  %vm403_vm4 = vcmask 1046528  }
  0x1b   :  { %s13308_s0 = sld [smem:[#allocation8_spill]]  ;;  %vm579_vm5 = vcmask 523264   ;;  %vm720_vm7 = vcmask 261120   ;;  %s10268_s26 = smov 64   ;;  %vm7999_vm8 = vcmask 1041409   ;;  %vm8002_vm9 = vcmask 238592  }
  0x1c   :  { %v10409_v15 = vshrl.u32 %v175_v14, 7  ;;  %vm10270_vm10 = vmmov 0  }
  0x1e   :  { %vm187_vm2 = vcmp.eq.s32.totalorder %v10409_v15, 0 }
  0x20   :  { %v8140_v16 = vld [vmem:[%s13306_s27] ss:$0 sm:$0xff]  ;;  %v201_v18 = vld [vmem:[%s13307_s25 + $0x10] sm:$0xff]  ;;  %v202_v24 = vld [vmem:[%s13307_s25 + $0x18] sm:$0xff] }
  0x21   :  { %v8146_v21 = vld [vmem:[%s13308_s0] ss:$0 sm:$0xff]  ;;  %v200_v31 = vld [vmem:[%s13307_s25 + $0x8] sm:$0xff] }
  0x22   :  { %v199_v25 = vld [vmem:[%s13307_s25] sm:$0xff] }
  0xe4   :  { %v9054_v17 = vpop.f32.mrb[0].mxu1 }
  0xe5   :  { %v153_v19 = vadd.f32 %v9054_v17, %v8140_v16  ;;  %v144_v20 = vpop.f32.mrb[1].mxu1 }
  0xe6   :  { %v145_v22 = vadd.f32 %v8140_v16, %v144_v20  ;;  %v9055_v23 = vpop.f32.mrb[2].mxu1 }
  0xe7   :  { %v10427_v26 = vadd.f32 %v201_v18, %v153_v19  ;;  %v156_v27 = vadd.f32 %v9055_v23, %v8140_v16  ;;  %v147_v28 = vpop.f32.mrb[3].mxu1 }
  0xe8   :  { %v191_v29 = vsel %vm187_vm2, %v8146_v21, %v145_v22  ;;  %v148_v30 = vadd.f32 %v8140_v16, %v147_v28 }
  0xe9   :  { %v10434_v32 = vadd.f32 %v202_v24, %v156_v27  ;;  %v223_v33 = vsel %vm216_vm3, %v10427_v26, 0.0  ;;  %v10438_v34 = vadd.f32 %v199_v25, %v191_v29 }
  0xea   :  { %224 = vadd.xlane.f32.xlu1 %v223_v33  ;;  %v10440_v35 = vadd.f32 %v200_v31, %v148_v30 }
  0xeb   :  { %v217_v36 = vsel %vm216_vm3, %v10438_v34, 0.0  ;;  %v226_v40 = vsel %vm216_vm3, %v10434_v32, 0.0 }
  0xec   :  { %v9058_v37 = vpop.f32.mrb[4].mxu1  ;;  %218 = vadd.xlane.f32.xlu0 %v217_v36  ;;  %v220_v45 = vsel %vm216_vm3, %v10440_v35, 0.0 }
  0xed   :  { %v169_v38 = vadd.f32 %v9058_v37, %v8140_v16  ;;  %v160_v39 = vpop.f32.mrb[5].mxu1 }
  0xee   :  { %v161_v41 = vadd.f32 %v8140_v16, %v160_v39  ;;  %227 = vadd.xlane.f32.xlu1 %v226_v40  ;;  %v9059_v42 = vpop.f32.mrb[6].mxu1  ;;  %v9575_v39 = vld [vmem:[%s13283_s7] ss:$12 sps:$4 sm:$0xff]   ;;  %v9578_v40 = vld [vmem:[%s13283_s7 + $0x1c] ss:$12 sps:$4 sm:$0x7f]  }
  0xef   :  { %v172_v43 = vadd.f32 %v9059_v42, %v8140_v16  ;;  %v163_v44 = vpop.f32.mrb[7].mxu1  ;;  %v10450_v48 = vadd.f32 %v201_v18, %v169_v38  ;;  %v9577_v38 = vld [vmem:[%s13283_s7 + $0x4] ss:$12 sps:$4 sm:$0xff]  }
  0xf0   :  { %v195_v46 = vsel %vm187_vm2, %v8146_v21, %v161_v41  ;;  %v164_v47 = vadd.f32 %v8140_v16, %v163_v44  ;;  %221 = vadd.xlane.f32.xlu0 %v220_v45  ;;  %413 = vmatprep.subr.bf16.mxu1 %v9577_v38  ;;  %v9580_v41 = vld [vmem:[%s13283_s7 + $0x8] ss:$12 sps:$4 sm:$0xff]   ;;  %v9581_v42 = vld [vmem:[%s13283_s7 + $0x18] ss:$12 sps:$4 sm:$0x7f]   ;;  %v10267_v44 = vmov 0  }
  0xf1   :  { %v10452_v49 = vadd.f32 %v199_v25, %v195_v46  ;;  %v10454_v50 = vadd.f32 %v202_v24, %v172_v43  ;;  %v235_v54 = vsel %vm216_vm3, %v10450_v48, 0.0  ;;  %414 = vmatpush1.bf16.msra.mxu1 %v9575_v39  ;;  %9060 = vmatprep.subr.bf16.mxu0 %v9580_v41  ;;  %v405_v43 = vsel %vm403_vm4, %v9581_v42, 0  ;;  %v9582_v45 = vld [vmem:[%s13283_s7 + $0x20] ss:$12 sps:$4 sm:$0x7f]  }
  0xf2   :  { %v10456_v51 = vadd.f32 %v200_v31, %v164_v47  ;;  %8155 = vmatprep.subr.msk.bf16.mxu1 %vm403_vm4, %v9578_v40  ;;  %9061 = vmatpush3.bf16.msra.mxu0 %v9580_v41  ;;  %v411_v46 = vsel %vm403_vm4, %v9582_v45, 0 }
  0xf3   :  { %v229_v52 = vsel %vm216_vm3, %v10452_v49, 0.0  ;;  %v238_v55 = vsel %vm216_vm3, %v10454_v50, 0.0  ;;  %445 = vmatprep.mubr.bf16.mxu1 %v10267_v44  ;;  %9533 = vmatprep.subr.msk.bf16.mxu0 %vm403_vm4, %v9582_v45 }
  0xf4   :  { %230 = vadd.xlane.f32.xlu0 %v229_v52  ;;  %v232_v53 = vsel %vm216_vm3, %v10456_v51, 0.0 }
  0xf5   :  { %233 = vadd.xlane.f32.xlu1 %v232_v53  ;;  %416 = vmatpush1.bf16.msra.mxu1 %v405_v43 }
  0xf6   :  { %9063 = vmatpush3.bf16.msra.mxu0 %v411_v46 }
  0xf8   :  { %236 = vadd.xlane.f32.xlu0 %v235_v54 }
  0xf9   :  { %239 = vadd.xlane.f32.xlu1 %v238_v55 }
 0x177   :  { %v225_v56 = vpop.xlane.xlu1 %224 }
 0x178   :  { %v244_v57 = vmul.f32 0.033333335, %v225_v56 }
 0x179   :  { %v219_v58 = vpop.xlane.xlu0 %218 }
 0x17a   :  { %v242_v59 = vmul.f32 0.033333335, %v219_v58  ;;  %v10467_v61 = vsub.f32 %v10427_v26, %v244_v57 }
 0x17b   :  { %v228_v60 = vpop.xlane.xlu1 %227 }
 0x17c   :  { %v10470_v62 = vsub.f32 %v10438_v34, %v242_v59  ;;  %v245_v63 = vmul.f32 0.033333335, %v228_v60  ;;  %v260_v6 = vmul.f32 %v10467_v61, %v10467_v61 }
 0x17d   :  { %v222_v0 = vpop.xlane.xlu0 %221 }
 0x17e   :  { %v243_v1 = vmul.f32 0.033333335, %v222_v0  ;;  %v258_v2 = vmul.f32 %v10470_v62, %v10470_v62  ;;  %v10475_v3 = vsub.f32 %v10434_v32, %v245_v63  ;;  %v272_v13 = vsel %vm216_vm3, %v260_v6, 0.0 }
 0x180   :  { %v10478_v4 = vsub.f32 %v10440_v35, %v243_v1  ;;  %v266_v5 = vsel %vm216_vm3, %v258_v2, 0.0  ;;  %v261_v17 = vmul.f32 %v10475_v3, %v10475_v3 }
 0x181   :  { %267 = vadd.xlane.f32.xlu0 %v266_v5  ;;  %v231_v7 = vpop.xlane.xlu0 %230 }
 0x182   :  { %v246_v8 = vmul.f32 0.033333335, %v231_v7  ;;  %v234_v9 = vpop.xlane.xlu1 %233  ;;  %v259_v10 = vmul.f32 %v10478_v4, %v10478_v4  ;;  %v275_v25 = vsel %vm216_vm3, %v261_v17, 0.0 }
 0x183   :  { %v247_v11 = vmul.f32 0.033333335, %v234_v9 }
 0x184   :  { %v10486_v12 = vsub.f32 %v10452_v49, %v246_v8  ;;  %v269_v16 = vsel %vm216_vm3, %v259_v10, 0.0 }
 0x185   :  { %v10493_v18 = vsub.f32 %v10456_v51, %v247_v11  ;;  %273 = vadd.xlane.f32.xlu0 %v272_v13  ;;  %270 = vadd.xlane.f32.xlu1 %v269_v16  ;;  %v237_v19 = vpop.xlane.xlu0 %236 }
 0x186   :  { %v248_v20 = vmul.f32 0.033333335, %v237_v19  ;;  %v240_v21 = vpop.xlane.xlu1 %239  ;;  %v262_v22 = vmul.f32 %v10486_v12, %v10486_v12  ;;  %v8147_v19 = vld [vmem:[%s13281_s5] ss:$0 sm:$0xff] }
 0x187   :  { %v249_v23 = vmul.f32 0.033333335, %v240_v21  ;;  %v263_v28 = vmul.f32 %v10493_v18, %v10493_v18 }
 0x188   :  { %v10498_v24 = vsub.f32 %v10450_v48, %v248_v20  ;;  %v278_v27 = vsel %vm216_vm3, %v262_v22, 0.0 }
 0x189   :  { %v10505_v29 = vsub.f32 %v10454_v50, %v249_v23  ;;  %276 = vadd.xlane.f32.xlu1 %v275_v25  ;;  %279 = vadd.xlane.f32.xlu0 %v278_v27  ;;  %v281_v31 = vsel %vm216_vm3, %v263_v28, 0.0  ;;  %v8148_v28 = vld [vmem:[%s13282_s6] ss:$0 sm:$0xff] }
 0x18a   :  { %v264_v30 = vmul.f32 %v10498_v24, %v10498_v24 }
 0x18b   :  { %v265_v36 = vmul.f32 %v10505_v29, %v10505_v29 }
 0x18c   :  { %v284_v33 = vsel %vm216_vm3, %v264_v30, 0.0 }
 0x18d   :  { %282 = vadd.xlane.f32.xlu1 %v281_v31  ;;  %285 = vadd.xlane.f32.xlu0 %v284_v33  ;;  %v287_v37 = vsel %vm216_vm3, %v265_v36, 0.0 }
 0x191   :  { %288 = vadd.xlane.f32.xlu1 %v287_v37 }
 0x20e   :  { %v268_v47 = vpop.xlane.xlu0 %267 }
 0x20f   :  { %v290_v52 = vmul.f32 0.033333335, %v268_v47 }
 0x211   :  { %v298_v53 = vadd.f32 1e-05, %v290_v52 }
 0x212   :  { %v271_v54 = vpop.xlane.xlu1 %270  ;;  %v274_v55 = vpop.xlane.xlu0 %273 }
 0x213   :  { %9729 = vrsqrt.f32 %v298_v53  ;;  %v291_v56 = vmul.f32 0.033333335, %v271_v54  ;;  %v292_v57 = vmul.f32 0.033333335, %v274_v55 }
 0x215   :  { %v299_v58 = vadd.f32 1e-05, %v291_v56  ;;  %v300_v59 = vadd.f32 1e-05, %v292_v57 }
 0x216   :  { %v277_v60 = vpop.xlane.xlu1 %276  ;;  %v280_v63 = vpop.xlane.xlu0 %279 }
 0x217   :  { %9731 = vrsqrt.f32 %v299_v58  ;;  %v293_v0 = vmul.f32 0.033333335, %v277_v60  ;;  %v294_v1 = vmul.f32 0.033333335, %v280_v63 }
 0x218   :  { %9733 = vrsqrt.f32 %v300_v59 }
 0x219   :  { %v301_v2 = vadd.f32 1e-05, %v293_v0  ;;  %v302_v5 = vadd.f32 1e-05, %v294_v1 }
 0x21a   :  { %v283_v6 = vpop.xlane.xlu1 %282  ;;  %v286_v7 = vpop.xlane.xlu0 %285 }
 0x21b   :  { %9735 = vrsqrt.f32 %v301_v2  ;;  %v295_v8 = vmul.f32 0.033333335, %v283_v6  ;;  %v296_v9 = vmul.f32 0.033333335, %v286_v7 }
 0x21c   :  { %9737 = vrsqrt.f32 %v302_v5 }
 0x21d   :  { %v9730_v10 = vpop.eup %9729  ;;  %v303_v11 = vadd.f32 1e-05, %v295_v8  ;;  %v304_v13 = vadd.f32 1e-05, %v296_v9 }
 0x21e   :  { %v314_v16 = vmul.f32 %v9730_v10, %v10470_v62  ;;  %v289_v17 = vpop.xlane.xlu1 %288 }
 0x21f   :  { %9739 = vrsqrt.f32 %v303_v11  ;;  %v297_v20 = vmul.f32 0.033333335, %v289_v17 }
 0x220   :  { %9741 = vrsqrt.f32 %v304_v13  ;;  %v328_v25 = vmul.f32 %v8147_v19, %v314_v16 }
 0x221   :  { %v9732_v21 = vpop.eup %9731  ;;  %v305_v22 = vadd.f32 1e-05, %v297_v20 }
 0x222   :  { %v9734_v23 = vpop.eup %9733  ;;  %v315_v27 = vmul.f32 %v9732_v21, %v10478_v4  ;;  %v342_v37 = vadd.f32 %v8148_v28, %v328_v25 }
 0x223   :  { %9743 = vrsqrt.f32 %v305_v22  ;;  %v316_v62 = vmul.f32 %v9734_v23, %v10467_v61 }
 0x224   :  { %v329_v30 = vmul.f32 %v8147_v19, %v315_v27 }
 0x225   :  { %v9736_v31 = vpop.eup %9735  ;;  %v330_v33 = vmul.f32 %v8147_v19, %v316_v62 }
 0x226   :  { %v9738_v36 = vpop.eup %9737  ;;  %v343_v38 = vadd.f32 %v8148_v28, %v329_v30  ;;  %v317_v39 = vmul.f32 %v9736_v31, %v10475_v3 }
 0x227   :  { %v318_v40 = vmul.f32 %v9738_v36, %v10486_v12  ;;  %v344_v43 = vadd.f32 %v8148_v28, %v330_v33 }
 0x228   :  { %v350_v41 = vpack.c.bf16 %v343_v38, %v342_v37  ;;  %v331_v42 = vmul.f32 %v8147_v19, %v317_v39 }
 0x229   :  { %v9740_v4 = vpop.eup %9739  ;;  %v332_v47 = vmul.f32 %v8147_v19, %v318_v40 }
 0x22a   :  { %v9742_v45 = vpop.eup %9741  ;;  %8156 = vmatmul.mubr.msk.bf16.vlgmr.msra.gmra.mrb[8].mxu1 %vm216_vm3, %v350_v41  ;;  %9064 = vmatprep.mubr.msk.bf16.mxu0 %vm216_vm3, %v350_v41  ;;  %v345_v61 = vadd.f32 %v8148_v28, %v331_v42  ;;  %v319_v46 = vmul.f32 %v9740_v4, %v10493_v18 }
 0x22b   :  { %455 = vmatprep.mubr.bf16.mxu1 %v10267_v44  ;;  %v320_v52 = vmul.f32 %v9742_v45, %v10498_v24  ;;  %v346_v54 = vadd.f32 %v8148_v28, %v332_v47 }
 0x22c   :  { %v351_v3 = vpack.c.bf16 %v345_v61, %v344_v43  ;;  %v333_v53 = vmul.f32 %v8147_v19, %v319_v46 }
 0x22d   :  { %v9744_v12 = vpop.eup %9743  ;;  %v334_v57 = vmul.f32 %v8147_v19, %v320_v52  ;;  %v10619_v52 = vand.u32 127, %v175_v14 }
 0x22e   :  { %9065 = vmatmul.mubr.msk.bf16.vlgmr.msra.gmra.mrb[0].mxu0 %vm216_vm3, %v351_v3  ;;  %v347_v55 = vadd.f32 %v8148_v28, %v333_v53  ;;  %v321_v56 = vmul.f32 %v9744_v12, %v10505_v29 }
 0x22f   :  { %v348_v18 = vadd.f32 %v8148_v28, %v334_v57  ;;  %vm213_vm6 = vcmp.ge.s32.totalorder %v10619_v52, 31 }
 0x230   :  { %v352_v58 = vpack.c.bf16 %v347_v55, %v346_v54  ;;  %v335_v59 = vmul.f32 %v8147_v19, %v321_v56 }
 0x232   :  { %8157 = vmatmul.mubr.msk.bf16.gmra.mrb[12].mxu1 %vm216_vm3, %v351_v3  ;;  %9068 = vmatprep.mubr.msk.bf16.mxu0 %vm216_vm3, %v352_v58  ;;  %v349_v60 = vadd.f32 %v8148_v28, %v335_v59 }
 0x233   :  { %465 = vmatprep.mubr.bf16.mxu1 %v10267_v44 }
 0x234   :  { %v353_v24 = vpack.c.bf16 %v349_v60, %v348_v18 }
 0x236   :  { %9069 = vmatmul.mubr.msk.bf16.gmra.mrb[4].mxu0 %vm216_vm3, %v353_v24 }
 0x23a   :  { %8158 = vmatmul.mubr.msk.bf16.gmra.mrb[16].mxu1 %vm216_vm3, %v352_v58 }
 0x23b   :  { %475 = vmatprep.mubr.bf16.mxu1 %v10267_v44 }
 0x242   :  { %8159 = vmatmul.mubr.msk.bf16.gmra.mrb[20].mxu1 %vm216_vm3, %v353_v24 }
 0x2fd   :  { %v447_v29 = vpop.f32.mrb[8].mxu1 }
 0x2fe   :  { %v449_v63 = vpop.f32.mrb[9].mxu1 }
 0x2ff   :  { %v451_v0 = vpop.f32.mrb[10].mxu1 }
 0x300   :  { %v10562_v1 = vpack.c.bf16 %v451_v0, %v447_v29  ;;  %v453_v2 = vpop.f32.mrb[11].mxu1 }
 0x301   :  { %v10564_v5 = vpack.c.bf16 %v453_v2, %v449_v63  ;;  %v9066_v6 = vpop.f32.mrb[0].mxu0 }
 0x302   :  { %v520_v7 = vpop.f32.mrb[1].mxu0  ;;  %9076 = vmatprep.mubr.msk.bf16.mxu0 %vm579_vm5, %v10562_v1 }
 0x303   :  { %v9067_v8 = vpop.f32.mrb[2].mxu0  ;;  %9534 = vmatprep.subr.msk.bf16.mxu0 %vm579_vm5, %v10564_v5  ;;  %v587_v9 = vsel %vm579_vm5, %v10564_v5, 0 }
 0x304   :  { %v10572_v10 = vpack.c.bf16 %v9067_v8, %v9066_v6  ;;  %v523_v11 = vpop.f32.mrb[3].mxu0  ;;  %9073 = vmatpush3.bf16.xpose.msra.mxu0 %v587_v9 }
 0x305   :  { %v10574_v13 = vpack.c.bf16 %v523_v11, %v520_v7  ;;  %v457_v16 = vpop.f32.mrb[12].mxu1 }
 0x306   :  { %v459_v17 = vpop.f32.mrb[13].mxu1 }
 0x307   :  { %v461_v19 = vpop.f32.mrb[14].mxu1 }
 0x308   :  { %v10576_v20 = vpack.c.bf16 %v461_v19, %v457_v16  ;;  %v463_v21 = vpop.f32.mrb[15].mxu1 }
 0x309   :  { %v10578_v22 = vpack.c.bf16 %v463_v21, %v459_v17  ;;  %v9070_v23 = vpop.f32.mrb[4].mxu0 }
 0x30a   :  { %v536_v25 = vpop.f32.mrb[5].mxu0 }
 0x30b   :  { %v9071_v27 = vpop.f32.mrb[6].mxu0  ;;  %9535 = vmatprep.subr.msk.bf16.mxu0 %vm579_vm5, %v10578_v22  ;;  %v590_v28 = vsel %vm579_vm5, %v10578_v22, 0 }
 0x30c   :  { %v10584_v62 = vpack.c.bf16 %v9071_v27, %v9070_v23  ;;  %v539_v30 = vpop.f32.mrb[7].mxu0  ;;  %9075 = vmatpush3.bf16.xpose.msra.mxu0 %v590_v28 }
 0x30d   :  { %v10586_v31 = vpack.c.bf16 %v539_v30, %v536_v25  ;;  %v467_v33 = vpop.f32.mrb[16].mxu1  ;;  %9088 = vmatprep.subr.bf16.mxu0 %v10574_v13 }
 0x30e   :  { %v469_v36 = vpop.f32.mrb[17].mxu1 }
 0x30f   :  { %v471_v37 = vpop.f32.mrb[18].mxu1 }
 0x310   :  { %v10589_v38 = vpack.c.bf16 %v471_v37, %v467_v33  ;;  %v473_v39 = vpop.f32.mrb[19].mxu1 }
 0x311   :  { %v10591_v40 = vpack.c.bf16 %v473_v39, %v469_v36 }
 0x312   :  { %9084 = vmatprep.mubr.msk.bf16.mxu1 %vm579_vm5, %v10589_v38 }
 0x313   :  { %9077 = vmatmul.mubr.msk.bf16.vlgmr.msra.gmra.mrb[8].mxu0 %vm579_vm5, %v10576_v20  ;;  %9536 = vmatprep.subr.msk.bf16.mxu1 %vm579_vm5, %v10591_v40  ;;  %v648_v41 = vsel %vm579_vm5, %v10591_v40, 0 }
 0x314   :  { %9081 = vmatpush3.bf16.xpose.msra.mxu1 %v648_v41  ;;  %9089 = vmatpush3.bf16.msra.mxu0 %v10574_v13 }
 0x315   :  { %v477_v42 = vpop.f32.mrb[20].mxu1  ;;  %9090 = vmatprep.subr.bf16.mxu0 %v10572_v10 }
 0x316   :  { %v479_v4 = vpop.f32.mrb[21].mxu1 }
 0x317   :  { %v481_v43 = vpop.f32.mrb[22].mxu1 }
 0x318   :  { %v10603_v45 = vpack.c.bf16 %v481_v43, %v477_v42  ;;  %v483_v61 = vpop.f32.mrb[23].mxu1  ;;  %9091 = vmatpush3.bf16.msra.mxu0 %v10572_v10 }
 0x319   :  { %v10606_v46 = vpack.c.bf16 %v483_v61, %v479_v4 }
 0x31b   :  { %9537 = vmatprep.subr.msk.bf16.mxu1 %vm579_vm5, %v10606_v46  ;;  %v651_v47 = vsel %vm579_vm5, %v10606_v46, 0 }
 0x31c   :  { %9083 = vmatpush3.bf16.xpose.msra.mxu1 %v651_v47 }
 0x31d   :  { %9096 = vmatprep.subr.bf16.mxu1 %v10586_v31 }
 0x323   :  { %9085 = vmatmul.mubr.msk.bf16.vlgmr.msra.gmra.mrb[24].mxu1 %vm579_vm5, %v10603_v45 }
 0x324   :  { %9097 = vmatpush3.bf16.msra.mxu1 %v10586_v31 }
 0x325   :  { %9098 = vmatprep.subr.bf16.mxu1 %v10584_v62 }
 0x328   :  { %9099 = vmatpush3.bf16.msra.mxu1 %v10584_v62 }
 0x3e6   :  { %v9078_v3 = vpop.f32.mrb[8].mxu0 }
 0x3e7   :  { %v626_v53 = vpop.f32.mrb[9].mxu0  ;;  %v704_v12 = vmul.f32 0.125, %v9078_v3 }
 0x3e8   :  { %v702_v54 = vmul.f32 0.125, %v626_v53  ;;  %v9079_v55 = vpop.f32.mrb[10].mxu0 }
 0x3e9   :  { %v629_v56 = vpop.f32.mrb[11].mxu0  ;;  %v705_v57 = vmul.f32 0.125, %v9079_v55  ;;  %v714_v60 = vsel %vm213_vm6, -1e+30, %v704_v12 }
 0x3ea   :  { %v703_v58 = vmul.f32 0.125, %v629_v56  ;;  %v712_v59 = vsel %vm213_vm6, -1e+30, %v702_v54  ;;  %v727_v63 = vsel %vm720_vm7, %v714_v60, -inf }
 0x3eb   :  { %v721_v18 = vsel %vm720_vm7, %v712_v59, -inf  ;;  %v715_v29 = vsel %vm213_vm6, -1e+30, %v705_v57 }
 0x3ec   :  { %722 = vmax.xlane.f32.xlu0 %v721_v18  ;;  %v713_v14 = vsel %vm213_vm6, -1e+30, %v703_v58  ;;  %v730_v0 = vsel %vm720_vm7, %v715_v29, -inf }
 0x3ed   :  { %v724_v24 = vsel %vm720_vm7, %v713_v14, -inf }
 0x3ee   :  { %725 = vmax.xlane.f32.xlu1 %v724_v24 }
 0x3f0   :  { %728 = vmax.xlane.f32.xlu0 %v727_v63 }
 0x3f2   :  { %731 = vmax.xlane.f32.xlu1 %v730_v0 }
 0x3f6   :  { %v9086_v2 = vpop.f32.mrb[24].mxu1 }
 0x3f7   :  { %v687_v6 = vpop.f32.mrb[25].mxu1  ;;  %v708_v7 = vmul.f32 0.125, %v9086_v2 }
 0x3f8   :  { %v706_v8 = vmul.f32 0.125, %v687_v6  ;;  %v9087_v9 = vpop.f32.mrb[26].mxu1 }
 0x3f9   :  { %v690_v11 = vpop.f32.mrb[27].mxu1  ;;  %v709_v16 = vmul.f32 0.125, %v9087_v9  ;;  %v718_v25 = vsel %vm213_vm6, -1e+30, %v708_v7 }
 0x3fa   :  { %v707_v17 = vmul.f32 0.125, %v690_v11  ;;  %v716_v19 = vsel %vm213_vm6, -1e+30, %v706_v8  ;;  %v739_v30 = vsel %vm720_vm7, %v718_v25, -inf }
 0x3fb   :  { %v733_v21 = vsel %vm720_vm7, %v716_v19, -inf  ;;  %v719_v28 = vsel %vm213_vm6, -1e+30, %v709_v16 }
 0x3fc   :  { %734 = vmax.xlane.f32.xlu0 %v733_v21  ;;  %v717_v23 = vsel %vm213_vm6, -1e+30, %v707_v17  ;;  %v742_v33 = vsel %vm720_vm7, %v719_v28, -inf }
 0x3fd   :  { %v736_v27 = vsel %vm720_vm7, %v717_v23, -inf }
 0x3fe   :  { %737 = vmax.xlane.f32.xlu1 %v736_v27 }
 0x400   :  { %740 = vmax.xlane.f32.xlu0 %v739_v30 }
 0x402   :  { %743 = vmax.xlane.f32.xlu1 %v742_v33 }
 0x479   :  { %v723_v36 = vpop.xlane.xlu0 %722 }
 0x47a   :  { %v745_v37 = vsub.f32 %v712_v59, %v723_v36 }
 0x47b   :  { %v726_v39 = vpop.xlane.xlu1 %725 }
 0x47c   :  { %v746_v42 = vsub.f32 %v713_v14, %v726_v39  ;;  %v753_v43 = vmul.f32 1.442695, %v745_v37 }
 0x47d   :  { %v729_v41 = vpop.xlane.xlu0 %728 }
 0x47e   :  { %v747_v4 = vsub.f32 %v714_v60, %v729_v41  ;;  %v755_v53 = vmul.f32 1.442695, %v746_v42 }
 0x47f   :  { %v732_v61 = vpop.xlane.xlu1 %731 }
 0x480   :  { %v757_v47 = vmul.f32 1.442695, %v747_v4  ;;  %v748_v3 = vsub.f32 %v715_v29, %v732_v61 }
 0x482   :  { %9745 = vpow2.f32 %v757_v47  ;;  %v759_v12 = vmul.f32 1.442695, %v748_v3 }
 0x483   :  { %9747 = vpow2.f32 %v753_v43 }
 0x484   :  { %9749 = vpow2.f32 %v759_v12 }
 0x485   :  { %9751 = vpow2.f32 %v755_v53 }
 0x489   :  { %v735_v54 = vpop.xlane.xlu0 %734 }
 0x48a   :  { %v749_v56 = vsub.f32 %v716_v19, %v735_v54 }
 0x48b   :  { %v738_v11 = vpop.xlane.xlu1 %737 }
 0x48c   :  { %v10646_v55 = vpop.eup %9745  ;;  %v761_v29 = vmul.f32 1.442695, %v749_v56  ;;  %v750_v19 = vsub.f32 %v717_v23, %v738_v11 }
 0x48d   :  { %v10648_v57 = vpop.eup %9747  ;;  %v741_v58 = vpop.xlane.xlu0 %740  ;;  %v775_v59 = vsel %vm720_vm7, %v10646_v55, 0.0 }
 0x48e   :  { %v9750_v18 = vpop.eup %9749  ;;  %v751_v14 = vsub.f32 %v718_v25, %v741_v58  ;;  %776 = vadd.xlane.f32.xlu0 %v775_v59  ;;  %v769_v0 = vsel %vm720_vm7, %v10648_v57, 0.0  ;;  %v763_v25 = vmul.f32 1.442695, %v750_v19 }
 0x48f   :  { %v778_v60 = vsel %vm720_vm7, %v9750_v18, 0.0  ;;  %v9752_v24 = vpop.eup %9751  ;;  %v744_v16 = vpop.xlane.xlu1 %743 }
 0x490   :  { %v765_v63 = vmul.f32 1.442695, %v751_v14  ;;  %779 = vadd.xlane.f32.xlu1 %v778_v60  ;;  %v772_v2 = vsel %vm720_vm7, %v9752_v24, 0.0  ;;  %v752_v17 = vsub.f32 %v719_v28, %v744_v16 }
 0x492   :  { %9753 = vpow2.f32 %v765_v63  ;;  %770 = vadd.xlane.f32.xlu0 %v769_v0  ;;  %v767_v21 = vmul.f32 1.442695, %v752_v17 }
 0x493   :  { %9755 = vpow2.f32 %v761_v29 }
 0x494   :  { %773 = vadd.xlane.f32.xlu1 %v772_v2  ;;  %9757 = vpow2.f32 %v767_v21 }
 0x495   :  { %9759 = vpow2.f32 %v763_v25 }
 0x49c   :  { %v10656_v6 = vpop.eup %9753 }
 0x49d   :  { %v787_v7 = vsel %vm720_vm7, %v10656_v6, 0.0  ;;  %v10660_v8 = vpop.eup %9755 }
 0x49e   :  { %788 = vadd.xlane.f32.xlu0 %v787_v7  ;;  %v781_v9 = vsel %vm720_vm7, %v10660_v8, 0.0 }
 0x4a2   :  { %782 = vadd.xlane.f32.xlu0 %v781_v9 }
 0x4a5   :  { %937 = vrot.lane.b32.xlu1 %v10578_v22, %s10268_s26  ;;  %v9758_v22 = vpop.eup %9757 }
 0x4a6   :  { %v9760_v27 = vpop.eup %9759 }
 0x4a7   :  { %v784_v28 = vsel %vm720_vm7, %v9760_v27, 0.0 }
 0x4a9   :  { %1008 = vrot.lane.b32.xlu1 %v10591_v40, %s10268_s26  ;;  %v790_v40 = vsel %vm720_vm7, %v9758_v22, 0.0 }
 0x4b8   :  { %935 = vrot.lane.b32.xlu0 %v10564_v5, %s10268_s26 }
 0x4bc   :  { %931 = vrot.lane.b32.xlu0 %v10576_v20, %s10268_s26 }
 0x4c0   :  { %1002 = vrot.lane.b32.xlu0 %v10589_v38, %s10268_s26 }
 0x4cd   :  { %791 = vadd.xlane.f32.xlu1 %v790_v40 }
 0x4d1   :  { %785 = vadd.xlane.f32.xlu1 %v784_v28 }
 0x4e2   :  { %929 = vrot.lane.b32.xlu1 %v10562_v1, %s10268_s26 }
 0x4e6   :  { %1010 = vrot.lane.b32.xlu1 %v10606_v46, %s10268_s26 }
 0x4ea   :  { %1004 = vrot.lane.b32.xlu1 %v10603_v45, %s10268_s26 }
 0x51b   :  { %v777_v5 = vpop.xlane.xlu0 %776 }
 0x51d   :  { %v780_v20 = vpop.xlane.xlu1 %779 }
 0x51e   :  { %9761 = vrcp.f32 %v780_v20 }
 0x51f   :  { %v771_v38 = vpop.xlane.xlu0 %770 }
 0x520   :  { %9763 = vrcp.f32 %v771_v38 }
 0x521   :  { %9765 = vrcp.f32 %v777_v5  ;;  %v774_v23 = vpop.xlane.xlu1 %773 }
 0x522   :  { %9767 = vrcp.f32 %v774_v23 }
 0x525   :  { %v938_v30 = vpop.permute.xlu1 %937 }
 0x526   :  { %v949_v12 = vsel %vm579_vm5, %v938_v30, 0 }
 0x528   :  { %v9762_v33 = vpop.eup %9761 }
 0x529   :  { %v1009_v36 = vpop.permute.xlu1 %1008  ;;  %v804_v41 = vmul.f32 %v9762_v33, %v9750_v18 }
 0x52a   :  { %v9764_v37 = vpop.eup %9763  ;;  %9540 = vmatprep.subr.msk.bf16.mxu1 %vm579_vm5, %v1009_v36  ;;  %v1019_v9 = vsel %vm579_vm5, %v1009_v36, 0 }
 0x52b   :  { %v9766_v1 = vpop.eup %9765  ;;  %v789_v39 = vpop.xlane.xlu0 %788  ;;  %v801_v45 = vmul.f32 %v9764_v37, %v10648_v57 }
 0x52c   :  { %v9768_v46 = vpop.eup %9767  ;;  %v803_v4 = vmul.f32 %v9766_v1, %v10646_v55 }
 0x52d   :  { %v802_v42 = vmul.f32 %v9768_v46, %v9752_v24 }
 0x52e   :  { %v810_v47 = vpack.c.bf16 %v804_v41, %v803_v4 }
 0x52f   :  { %v783_v43 = vpop.xlane.xlu0 %782  ;;  %v809_v61 = vpack.c.bf16 %v802_v42, %v801_v45 }
 0x531   :  { %9092 = vmatprep.mubr.msk.bf16.mxu0 %vm720_vm7, %v809_v61 }
 0x532   :  { %9093 = vmatmul.mubr.msk.bf16.vlgmr.msra.gmra.mrb[12].mxu0 %vm720_vm7, %v810_v47 }
 0x533   :  { %v936_v3 = vpop.permute.xlu0 %935 }
 0x534   :  { %9538 = vmatprep.subr.msk.bf16.mxu0 %vm579_vm5, %v936_v3  ;;  %v946_v53 = vsel %vm579_vm5, %v936_v3, 0 }
 0x535   :  { %9105 = vmatpush3.bf16.xpose.msra.mxu0 %v946_v53 }
 0x536   :  { %9539 = vmatprep.subr.msk.bf16.mxu0 %vm579_vm5, %v938_v30 }
 0x537   :  { %v932_v57 = vpop.permute.xlu0 %931 }
 0x53b   :  { %v1003_v7 = vpop.permute.xlu0 %1002 }
 0x53d   :  { %9107 = vmatpush3.bf16.xpose.msra.mxu0 %v949_v12 }
 0x55a   :  { %v792_v54 = vpop.xlane.xlu1 %791 }
 0x55b   :  { %9769 = vrcp.f32 %v792_v54 }
 0x55c   :  { %9771 = vrcp.f32 %v783_v43 }
 0x55d   :  { %9773 = vrcp.f32 %v789_v39 }
 0x55e   :  { %v786_v55 = vpop.xlane.xlu1 %785 }
 0x55f   :  { %9775 = vrcp.f32 %v786_v55 }
 0x562   :  { %v930_v56 = vpop.permute.xlu1 %929 }
 0x563   :  { %9108 = vmatprep.mubr.msk.bf16.mxu0 %vm579_vm5, %v930_v56 }
 0x564   :  { %9109 = vmatmul.mubr.msk.bf16.vlgmr.msra.gmra.mrb[16].mxu0 %vm579_vm5, %v932_v57 }
 0x565   :  { %v9770_v58 = vpop.eup %9769 }
 0x566   :  { %v9772_v59 = vpop.eup %9771  ;;  %v808_v60 = vmul.f32 %v9770_v58, %v9758_v22  ;;  %v1011_v11 = vpop.permute.xlu1 %1010 }
 0x567   :  { %v9774_v18 = vpop.eup %9773  ;;  %v805_v24 = vmul.f32 %v9772_v59, %v10660_v8  ;;  %v1022_v8 = vsel %vm579_vm5, %v1011_v11, 0 }
 0x568   :  { %v807_v63 = vmul.f32 %v9774_v18, %v10656_v6 }
 0x569   :  { %v9776_v14 = vpop.eup %9775 }
 0x56a   :  { %v806_v29 = vmul.f32 %v9776_v14, %v9760_v27  ;;  %v812_v2 = vpack.c.bf16 %v808_v60, %v807_v63  ;;  %v1005_v16 = vpop.permute.xlu1 %1004 }
 0x56c   :  { %v811_v0 = vpack.c.bf16 %v806_v29, %v805_v24 }
 0x56e   :  { %9100 = vmatprep.mubr.msk.bf16.mxu1 %vm720_vm7, %v811_v0 }
 0x56f   :  { %9101 = vmatmul.mubr.msk.bf16.vlgmr.msra.gmra.mrb[28].mxu1 %vm720_vm7, %v812_v2 }
 0x570   :  { %9113 = vmatpush3.bf16.xpose.msra.mxu1 %v1019_v9  ;;  %9116 = vmatprep.mubr.msk.bf16.mxu1 %vm579_vm5, %v1003_v7 }
 0x571   :  { %9541 = vmatprep.subr.msk.bf16.mxu1 %vm579_vm5, %v1011_v11 }
 0x578   :  { %9115 = vmatpush3.bf16.xpose.msra.mxu1 %v1022_v8 }
 0x57f   :  { %9117 = vmatmul.mubr.msk.bf16.vlgmr.msra.gmra.mrb[32].mxu1 %vm579_vm5, %v1005_v16 }
 0x605   :  { %v10702_v6 = vpop.f32.mrb[12].mxu0 }
 0x606   :  { %v10704_v17 = vpop.f32.mrb[13].mxu0 }
 0x607   :  { %v10706_v19 = vpop.f32.mrb[14].mxu0 }
 0x608   :  { %v924_v21 = vpack.c.bf16 %v10706_v19, %v10702_v6  ;;  %v10710_v25 = vpop.f32.mrb[15].mxu0 }
 0x609   :  { %v923_v22 = vpack.c.bf16 %v10710_v25, %v10704_v17  ;;  %v8196_v17 = vld [vmem:[%s13285_s9] ss:$0 sm:$0xff] }
 0x637   :  { %v9110_v40 = vpop.f32.mrb[16].mxu0 }
 0x638   :  { %v985_v27 = vpop.f32.mrb[17].mxu0  ;;  %v1075_v28 = vmul.f32 0.125, %v9110_v40 }
 0x639   :  { %v1073_v5 = vmul.f32 0.125, %v985_v27  ;;  %v9111_v20 = vpop.f32.mrb[18].mxu0 }
 0x63a   :  { %v988_v38 = vpop.f32.mrb[19].mxu0  ;;  %v1076_v36 = vmul.f32 0.125, %v9111_v20  ;;  %v1083_v1 = vsel %vm213_vm6, -1e+30, %v1075_v28 }
 0x63b   :  { %v1074_v23 = vmul.f32 0.125, %v988_v38  ;;  %v1081_v30 = vsel %vm213_vm6, -1e+30, %v1073_v5  ;;  %v1095_v46 = vsel %vm720_vm7, %v1083_v1, -inf }
 0x63c   :  { %v1089_v33 = vsel %vm720_vm7, %v1081_v30, -inf  ;;  %v1084_v41 = vsel %vm213_vm6, -1e+30, %v1076_v36 }
 0x63d   :  { %1090 = vmax.xlane.f32.xlu0 %v1089_v33  ;;  %v1082_v37 = vsel %vm213_vm6, -1e+30, %v1074_v23  ;;  %v1098_v43 = vsel %vm720_vm7, %v1084_v41, -inf }
 0x63e   :  { %v1092_v39 = vsel %vm720_vm7, %v1082_v37, -inf }
 0x63f   :  { %1093 = vmax.xlane.f32.xlu1 %v1092_v39 }
 0x641   :  { %1096 = vmax.xlane.f32.xlu0 %v1095_v46 }
 0x642   :  { %v10725_v45 = vpop.f32.mrb[28].mxu1 }
 0x643   :  { %v10727_v42 = vpop.f32.mrb[29].mxu1 }
 0x644   :  { %v10729_v4 = vpop.f32.mrb[30].mxu1 }
 0x645   :  { %v926_v61 = vpack.c.bf16 %v10729_v4, %v10725_v45  ;;  %v10734_v47 = vpop.f32.mrb[31].mxu1  ;;  %1099 = vmax.xlane.f32.xlu0 %v1098_v43 }
 0x646   :  { %v925_v3 = vpack.c.bf16 %v10734_v47, %v10727_v42 }
 0x652   :  { %v9118_v53 = vpop.f32.mrb[32].mxu1 }
 0x653   :  { %v1058_v12 = vpop.f32.mrb[33].mxu1  ;;  %v1079_v54 = vmul.f32 0.125, %v9118_v53 }
 0x654   :  { %v1077_v55 = vmul.f32 0.125, %v1058_v12  ;;  %v9119_v56 = vpop.f32.mrb[34].mxu1 }
 0x655   :  { %v1061_v57 = vpop.f32.mrb[35].mxu1  ;;  %v1080_v58 = vmul.f32 0.125, %v9119_v56  ;;  %v1087_v24 = vsel %vm213_vm6, -1e+30, %v1079_v54 }
 0x656   :  { %v1078_v59 = vmul.f32 0.125, %v1061_v57  ;;  %v1085_v18 = vsel %vm213_vm6, -1e+30, %v1077_v55  ;;  %v1107_v0 = vsel %vm720_vm7, %v1087_v24, -inf }
 0x657   :  { %v1101_v14 = vsel %vm720_vm7, %v1085_v18, -inf  ;;  %v1088_v63 = vsel %vm213_vm6, -1e+30, %v1080_v58 }
 0x658   :  { %1102 = vmax.xlane.f32.xlu0 %v1101_v14  ;;  %v1086_v60 = vsel %vm213_vm6, -1e+30, %v1078_v59  ;;  %v1110_v2 = vsel %vm720_vm7, %v1088_v63, -inf }
 0x659   :  { %v1104_v29 = vsel %vm720_vm7, %v1086_v60, -inf }
 0x65a   :  { %1105 = vmax.xlane.f32.xlu1 %v1104_v29 }
 0x65c   :  { %1108 = vmax.xlane.f32.xlu0 %v1107_v0 }
 0x65e   :  { %1111 = vmax.xlane.f32.xlu1 %v1110_v2 }
 0x6ca   :  { %v1091_v7 = vpop.xlane.xlu0 %1090 }
 0x6cb   :  { %v1113_v9 = vsub.f32 %v1081_v30, %v1091_v7 }
 0x6cc   :  { %v1094_v11 = vpop.xlane.xlu1 %1093 }
 0x6cd   :  { %v1121_v40 = vmul.f32 1.442695, %v1113_v9  ;;  %v1114_v27 = vsub.f32 %v1082_v37, %v1094_v11 }
 0x6ce   :  { %v1097_v8 = vpop.xlane.xlu0 %1096 }
 0x6cf   :  { %v1115_v16 = vsub.f32 %v1083_v1, %v1097_v8  ;;  %v1123_v38 = vmul.f32 1.442695, %v1114_v27 }
 0x6d1   :  { %v1125_v28 = vmul.f32 1.442695, %v1115_v16 }
 0x6d2   :  { %v1100_v5 = vpop.xlane.xlu0 %1099 }
 0x6d3   :  { %9777 = vpow2.f32 %v1125_v28  ;;  %v1116_v20 = vsub.f32 %v1084_v41, %v1100_v5 }
 0x6d4   :  { %9779 = vpow2.f32 %v1121_v40 }
 0x6d5   :  { %v1127_v23 = vmul.f32 1.442695, %v1116_v20 }
 0x6d7   :  { %9781 = vpow2.f32 %v1127_v23 }
 0x6d8   :  { %9783 = vpow2.f32 %v1123_v38 }
 0x6dd   :  { %v10750_v33 = vpop.eup %9777 }
 0x6de   :  { %v1143_v36 = vsel %vm720_vm7, %v10750_v33, 0.0  ;;  %v9780_v30 = vpop.eup %9779 }
 0x6df   :  { %1144 = vadd.xlane.f32.xlu0 %v1143_v36  ;;  %v1137_v37 = vsel %vm720_vm7, %v9780_v30, 0.0 }
 0x6e1   :  { %v10754_v39 = vpop.eup %9781 }
 0x6e2   :  { %v1146_v1 = vsel %vm720_vm7, %v10754_v39, 0.0  ;;  %v9784_v46 = vpop.eup %9783 }
 0x6e3   :  { %1138 = vadd.xlane.f32.xlu0 %v1137_v37  ;;  %1147 = vadd.xlane.f32.xlu1 %v1146_v1  ;;  %v1140_v43 = vsel %vm720_vm7, %v9784_v46, 0.0 }
 0x6e5   :  { %v1103_v41 = vpop.xlane.xlu0 %1102 }
 0x6e6   :  { %v1117_v53 = vsub.f32 %v1085_v18, %v1103_v41 }
 0x6e7   :  { %1141 = vadd.xlane.f32.xlu1 %v1140_v43  ;;  %v1106_v14 = vpop.xlane.xlu1 %1105 }
 0x6e8   :  { %v1129_v55 = vmul.f32 1.442695, %v1117_v53  ;;  %v1118_v0 = vsub.f32 %v1086_v60, %v1106_v14  ;;  %v9584_v53 = vld [vmem:[%s13284_s8 + $0x28] sm:$0xff]  }
 0x6e9   :  { %v1109_v12 = vpop.xlane.xlu0 %1108 }
 0x6ea   :  { %v1119_v54 = vsub.f32 %v1087_v24, %v1109_v12  ;;  %v1131_v7 = vmul.f32 1.442695, %v1118_v0 }
 0x6eb   :  { %v1112_v24 = vpop.xlane.xlu1 %1111 }
 0x6ec   :  { %v1133_v56 = vmul.f32 1.442695, %v1119_v54  ;;  %v1120_v29 = vsub.f32 %v1088_v63, %v1112_v24 }
 0x6ee   :  { %9785 = vpow2.f32 %v1133_v56  ;;  %v1135_v2 = vmul.f32 1.442695, %v1120_v29 }
 0x6ef   :  { %9787 = vpow2.f32 %v1129_v55 }
 0x6f0   :  { %9789 = vpow2.f32 %v1135_v2 }
 0x6f1   :  { %9791 = vpow2.f32 %v1131_v7 }
 0x6f8   :  { %v10760_v57 = vpop.eup %9785  ;;  %1185 = vrot.lane.b32.xlu1 %v10572_v10, %s10268_s26 }
 0x6f9   :  { %v1155_v58 = vsel %vm720_vm7, %v10760_v57, 0.0  ;;  %v10766_v59 = vpop.eup %9787 }
 0x6fa   :  { %1156 = vadd.xlane.f32.xlu0 %v1155_v58  ;;  %v1149_v18 = vsel %vm720_vm7, %v10766_v59, 0.0  ;;  %v9790_v10 = vpop.eup %9789 }
 0x6fb   :  { %v1158_v9 = vsel %vm720_vm7, %v9790_v10, 0.0  ;;  %v9792_v11 = vpop.eup %9791 }
 0x6fc   :  { %1246 = vrot.lane.b32.xlu1 %v10586_v31, %s10268_s26  ;;  %v1152_v31 = vsel %vm720_vm7, %v9792_v11, 0.0 }
 0x6fe   :  { %1150 = vadd.xlane.f32.xlu0 %v1149_v18 }
 0x714   :  { %1183 = vrot.lane.b32.xlu0 %v10574_v13, %s10268_s26 }
 0x720   :  { %1159 = vadd.xlane.f32.xlu1 %v1158_v9  ;;  %v9586_v9 = vld [vmem:[%s13284_s8 + $0x38] sm:$0xff]  }
 0x724   :  { %1153 = vadd.xlane.f32.xlu1 %v1152_v31 }
 0x735   :  { %1248 = vrot.lane.b32.xlu1 %v10584_v62, %s10268_s26 }
 0x76c   :  { %v1145_v63 = vpop.xlane.xlu0 %1144 }
 0x770   :  { %v1139_v60 = vpop.xlane.xlu0 %1138  ;;  %v1148_v8 = vpop.xlane.xlu1 %1147 }
 0x771   :  { %9793 = vrcp.f32 %v1139_v60 }
 0x774   :  { %v1142_v16 = vpop.xlane.xlu1 %1141 }
 0x775   :  { %9795 = vrcp.f32 %v1142_v16  ;;  %v9589_v16 = vld [vmem:[%s13284_s8 + $0x10] sm:$0xff]  }
 0x776   :  { %9797 = vrcp.f32 %v1148_v8  ;;  %v9588_v8 = vld [vmem:[%s13284_s8 + $0x8] sm:$0xff]  }
 0x777   :  { %9799 = vrcp.f32 %v1145_v63 }
 0x778   :  { %v1186_v40 = vpop.permute.xlu1 %1185 }
 0x77b   :  { %v9794_v27 = vpop.eup %9793 }
 0x77c   :  { %v1247_v13 = vpop.permute.xlu1 %1246  ;;  %v1169_v5 = vmul.f32 %v9794_v27, %v9780_v30  ;;  %v9583_v30 = vld [vmem:[%s13284_s8 + $0x20] sm:$0xff]  }
 0x77d   :  { %9128 = vmatprep.subr.bf16.mxu1 %v1247_v13 }
 0x77e   :  { %9129 = vmatpush3.bf16.msra.mxu1 %v1247_v13 }
 0x77f   :  { %v9796_v28 = vpop.eup %9795 }
 0x780   :  { %v1170_v20 = vmul.f32 %v9796_v28, %v9784_v46  ;;  %v9798_v36 = vpop.eup %9797 }
 0x781   :  { %v9800_v1 = vpop.eup %9799  ;;  %v1172_v41 = vmul.f32 %v9798_v36, %v10754_v39  ;;  %v9585_v39 = vld [vmem:[%s13284_s8 + $0x30] sm:$0xff]  }
 0x782   :  { %v1177_v38 = vpack.c.bf16 %v1170_v20, %v1169_v5  ;;  %v1171_v46 = vmul.f32 %v9800_v1, %v10750_v33 }
 0x784   :  { %9124 = vmatprep.mubr.msk.bf16.mxu0 %vm720_vm7, %v1177_v38  ;;  %v1178_v43 = vpack.c.bf16 %v1172_v41, %v1171_v46 }
 0x787   :  { %v1157_v62 = vpop.xlane.xlu0 %1156 }
 0x78b   :  { %v1151_v23 = vpop.xlane.xlu0 %1150 }
 0x78f   :  { %v1184_v37 = vpop.permute.xlu0 %1183 }
 0x790   :  { %9120 = vmatprep.subr.bf16.mxu0 %v1184_v37 }
 0x791   :  { %9121 = vmatpush3.bf16.msra.mxu0 %v1184_v37 }
 0x792   :  { %9122 = vmatprep.subr.bf16.mxu0 %v1186_v40 }
 0x795   :  { %9123 = vmatpush3.bf16.msra.mxu0 %v1186_v40  ;;  %v9590_v40 = vld [vmem:[%s13284_s8 + $0x18] sm:$0xff]  }
 0x796   :  { %9136 = vmatprep.subr.bf16.mxu0 %v9583_v30 }
 0x798   :  { %9125 = vmatmul.mubr.msk.bf16.vlgmr.msra.gmra.mrb[20].mxu0 %vm720_vm7, %v1178_v43 }
 0x799   :  { %9137 = vmatpush3.bf16.msra.mxu0 %v9583_v30 }
 0x79a   :  { %9138 = vmatprep.subr.bf16.mxu0 %v9584_v53 }
 0x79d   :  { %9139 = vmatpush3.bf16.msra.mxu0 %v9584_v53 }
 0x79e   :  { %9140 = vmatprep.subr.bf16.mxu0 %v9585_v39 }
 0x7a1   :  { %9141 = vmatpush3.bf16.msra.mxu0 %v9585_v39 }
 0x7a2   :  { %9142 = vmatprep.subr.bf16.mxu0 %v9586_v9 }
 0x7a5   :  { %9143 = vmatpush3.bf16.msra.mxu0 %v9586_v9 }
 0x7ad   :  { %v1160_v12 = vpop.xlane.xlu1 %1159 }
 0x7ae   :  { %9801 = vrcp.f32 %v1160_v12 }
 0x7af   :  { %9803 = vrcp.f32 %v1151_v23 }
 0x7b0   :  { %9805 = vrcp.f32 %v1157_v62 }
 0x7b1   :  { %v1154_v33 = vpop.xlane.xlu1 %1153 }
 0x7b2   :  { %9807 = vrcp.f32 %v1154_v33 }
 0x7b5   :  { %v1249_v54 = vpop.permute.xlu1 %1248 }
 0x7b6   :  { %9130 = vmatprep.subr.bf16.mxu1 %v1249_v54 }
 0x7b7   :  { %9131 = vmatpush3.bf16.msra.mxu1 %v1249_v54 }
 0x7b8   :  { %v9802_v55 = vpop.eup %9801 }
 0x7b9   :  { %v9804_v56 = vpop.eup %9803  ;;  %v1176_v14 = vmul.f32 %v9802_v55, %v9790_v10 }
 0x7ba   :  { %v9806_v58 = vpop.eup %9805  ;;  %v1173_v24 = vmul.f32 %v9804_v56, %v10766_v59  ;;  %v9587_v59 = vld [vmem:[%s13284_s8] sm:$0xff]  }
 0x7bb   :  { %v1175_v0 = vmul.f32 %v9806_v58, %v10760_v57  ;;  %9152 = vmatprep.subr.bf16.mxu0 %v9587_v59 }
 0x7bc   :  { %v9808_v18 = vpop.eup %9807 }
 0x7bd   :  { %v1174_v29 = vmul.f32 %v9808_v18, %v9792_v11  ;;  %v1180_v7 = vpack.c.bf16 %v1176_v14, %v1175_v0 }
 0x7bf   :  { %v1179_v2 = vpack.c.bf16 %v1174_v29, %v1173_v24 }
 0x7c1   :  { %9132 = vmatprep.mubr.msk.bf16.mxu1 %vm720_vm7, %v1179_v2 }
 0x7c2   :  { %9133 = vmatmul.mubr.msk.bf16.vlgmr.msra.gmra.mrb[36].mxu1 %vm720_vm7, %v1180_v7 }
 0x7c3   :  { %1758 = vmatprep.mubr.bf16.mxu1 %v10267_v44 }
 0x86b   :  { %v9126_v57 = vpop.f32.mrb[20].mxu0 }
 0x86c   :  { %v1229_v10 = vpop.f32.mrb[21].mxu0 }
 0x86d   :  { %v9127_v11 = vpop.f32.mrb[22].mxu0 }
 0x86e   :  { %v1308_v31 = vpack.c.bf16 %v9127_v11, %v9126_v57  ;;  %v1232_v63 = vpop.f32.mrb[23].mxu0 }
 0x86f   :  { %v1307_v60 = vpack.c.bf16 %v1232_v63, %v1229_v10 }
 0x871   :  { %9144 = vmatprep.mubr.msk.bf16.mxu0 %vm579_vm5, %v1307_v60 }
 0x872   :  { %9145 = vmatmul.mubr.msk.bf16.vlgmr.msra.gmra.mrb[24].mxu0 %vm579_vm5, %v1308_v31 }
 0x873   :  { %9153 = vmatpush3.bf16.msra.mxu0 %v9587_v59 }
 0x874   :  { %9154 = vmatprep.subr.bf16.mxu0 %v9588_v8 }
 0x877   :  { %9155 = vmatpush3.bf16.msra.mxu0 %v9588_v8 }
 0x878   :  { %9156 = vmatprep.subr.bf16.mxu0 %v9589_v16 }
 0x87b   :  { %9157 = vmatpush3.bf16.msra.mxu0 %v9589_v16 }
 0x87c   :  { %9158 = vmatprep.subr.bf16.mxu0 %v9590_v40 }
 0x87f   :  { %9159 = vmatpush3.bf16.msra.mxu0 %v9590_v40 }
 0x895   :  { %v9134_v13 = vpop.f32.mrb[36].mxu1 }
 0x896   :  { %v1292_v27 = vpop.f32.mrb[37].mxu1 }
 0x897   :  { %v9135_v28 = vpop.f32.mrb[38].mxu1 }
 0x898   :  { %v1310_v5 = vpack.c.bf16 %v9135_v28, %v9134_v13  ;;  %v1295_v20 = vpop.f32.mrb[39].mxu1 }
 0x899   :  { %v1309_v38 = vpack.c.bf16 %v1295_v20, %v1292_v27 }
 0x89b   :  { %9148 = vmatprep.mubr.msk.bf16.mxu0 %vm579_vm5, %v1309_v38 }
 0x89c   :  { %9149 = vmatmul.mubr.msk.bf16.gmra.mrb[28].mxu0 %vm579_vm5, %v1310_v5 }
 0x89d   :  { %9160 = vmatprep.mubr.msk.bf16.mxu0 %vm579_vm5, %v923_v22 }
 0x8a4   :  { %9161 = vmatmul.mubr.msk.bf16.vlgmr.msra.gmra.mrb[24].mxu0 %vm579_vm5, %v924_v21 }
 0x8a5   :  { %9164 = vmatprep.mubr.msk.bf16.mxu0 %vm579_vm5, %v925_v3 }
 0x8ac   :  { %9165 = vmatmul.mubr.msk.bf16.gmra.mrb[28].mxu0 %vm579_vm5, %v926_v61 }
 0x8ad   :  { %2390 = vmatprep.mubr.bf16.mxu0 %v10267_v44 }
 0x977   :  { %v9162_v25 = vpop.f32.mrb[24].mxu0 }
 0x978   :  { %v1482_v6 = vpop.f32.mrb[25].mxu0  ;;  %v1522_v19 = vadd.f32 %v9162_v25, %v8196_v17 }
 0x979   :  { %v1520_v21 = vadd.f32 %v8196_v17, %v1482_v6  ;;  %v9163_v22 = vpop.f32.mrb[26].mxu0 }
 0x97a   :  { %v1485_v62 = vpop.f32.mrb[27].mxu0  ;;  %v10839_v45 = vadd.f32 %v1522_v19, %v10427_v26  ;;  %v1523_v4 = vadd.f32 %v9163_v22, %v8196_v17 }
 0x97b   :  { %v10836_v42 = vadd.f32 %v1520_v21, %v10438_v34  ;;  %v1521_v47 = vadd.f32 %v8196_v17, %v1485_v62 }
 0x97c   :  { %v10849_v34 = vadd.f32 %v1523_v4, %v10434_v32  ;;  %v1544_v41 = vsel %vm216_vm3, %v10839_v45, 0.0 }
 0x97d   :  { %v10842_v61 = vadd.f32 %v1521_v47, %v10440_v35  ;;  %v1538_v3 = vsel %vm216_vm3, %v10836_v42, 0.0 }
 0x97e   :  { %1539 = vadd.xlane.f32.xlu0 %v1538_v3  ;;  %v1547_v32 = vsel %vm216_vm3, %v10849_v34, 0.0 }
 0x97f   :  { %v9166_v23 = vpop.f32.mrb[28].mxu0  ;;  %v1541_v36 = vsel %vm216_vm3, %v10842_v61, 0.0 }
 0x980   :  { %1542 = vadd.xlane.f32.xlu1 %v1541_v36  ;;  %v1498_v37 = vpop.f32.mrb[29].mxu0  ;;  %v1526_v43 = vadd.f32 %v9166_v23, %v8196_v17 }
 0x981   :  { %v1524_v1 = vadd.f32 %v8196_v17, %v1498_v37  ;;  %v9167_v26 = vpop.f32.mrb[30].mxu0  ;;  %v9593_v37 = vld [vmem:[%s13288_s12 + $0x4] ss:$8 sps:$4 sm:$0xff]  }
 0x982   :  { %1545 = vadd.xlane.f32.xlu0 %v1544_v41  ;;  %v1501_v35 = vpop.f32.mrb[31].mxu0  ;;  %v1527_v30 = vadd.f32 %v9167_v26, %v8196_v17  ;;  %v10867_v54 = vadd.f32 %v1526_v43, %v10450_v48  ;;  %1726 = vmatprep.subr.bf16.mxu1 %v9593_v37  ;;  %v9594_v26 = vld [vmem:[%s13288_s12 + $0x14] ss:$8 sps:$4 sm:$0x7f]  }
 0x983   :  { %v1525_v46 = vadd.f32 %v8196_v17, %v1501_v35  ;;  %v10854_v53 = vadd.f32 %v1524_v1, %v10452_v49  ;;  %v9591_v1 = vld [vmem:[%s13288_s12] ss:$8 sps:$4 sm:$0xff]   ;;  %v9596_v41 = vld [vmem:[%s13288_s12 + $0x10] ss:$8 sps:$4 sm:$0x7f]  }
 0x984   :  { %v10862_v12 = vadd.f32 %v1527_v30, %v10454_v50  ;;  %v1556_v55 = vsel %vm216_vm3, %v10867_v54, 0.0  ;;  %1727 = vmatpush1.bf16.msra.mxu1 %v9591_v1  ;;  %v1721_v35 = vsel %vm403_vm4, %v9596_v41, 0 }
 0x985   :  { %v10857_v39 = vadd.f32 %v1525_v46, %v10456_v51  ;;  %v1550_v49 = vsel %vm216_vm3, %v10854_v53, 0.0  ;;  %8203 = vmatprep.subr.msk.bf16.mxu1 %vm403_vm4, %v9594_v26 }
 0x986   :  { %1548 = vadd.xlane.f32.xlu0 %v1547_v32  ;;  %v1559_v51 = vsel %vm216_vm3, %v10862_v12, 0.0 }
 0x987   :  { %v1553_v33 = vsel %vm216_vm3, %v10857_v39, 0.0 }
 0x988   :  { %1554 = vadd.xlane.f32.xlu1 %v1553_v33  ;;  %1729 = vmatpush1.bf16.msra.mxu1 %v1721_v35 }
 0x98a   :  { %1551 = vadd.xlane.f32.xlu0 %v1550_v49 }
 0x98c   :  { %1560 = vadd.xlane.f32.xlu1 %v1559_v51 }
 0x98e   :  { %1557 = vadd.xlane.f32.xlu0 %v1556_v55 }
 0xa0b   :  { %v1540_v50 = vpop.xlane.xlu0 %1539 }
 0xa0c   :  { %v1562_v56 = vmul.f32 0.033333335, %v1540_v50 }
 0xa0d   :  { %v1543_v58 = vpop.xlane.xlu1 %1542 }
 0xa0e   :  { %v10876_v18 = vsub.f32 %v10836_v42, %v1562_v56  ;;  %v1563_v48 = vmul.f32 0.033333335, %v1543_v58 }
 0xa0f   :  { %v1546_v14 = vpop.xlane.xlu0 %1545 }
 0xa10   :  { %v10879_v24 = vsub.f32 %v10842_v61, %v1563_v48  ;;  %v1564_v29 = vmul.f32 0.033333335, %v1546_v14  ;;  %v1578_v0 = vmul.f32 %v10876_v18, %v10876_v18 }
 0xa12   :  { %v10884_v2 = vsub.f32 %v10839_v45, %v1564_v29  ;;  %v1586_v7 = vsel %vm216_vm3, %v1578_v0, 0.0  ;;  %v1579_v9 = vmul.f32 %v10879_v24, %v10879_v24 }
 0xa13   :  { %v1549_v59 = vpop.xlane.xlu0 %1548  ;;  %1587 = vadd.xlane.f32.xlu0 %v1586_v7 }
 0xa14   :  { %v1565_v57 = vmul.f32 0.033333335, %v1549_v59  ;;  %v1589_v10 = vsel %vm216_vm3, %v1579_v9, 0.0  ;;  %v1580_v11 = vmul.f32 %v10884_v2, %v10884_v2  ;;  %v8197_v59 = vld [vmem:[%s13286_s10] ss:$0 sm:$0xff] }
 0xa15   :  { %1590 = vadd.xlane.f32.xlu1 %v1589_v10  ;;  %v1555_v31 = vpop.xlane.xlu1 %1554 }
 0xa16   :  { %v10893_v63 = vsub.f32 %v10849_v34, %v1565_v57  ;;  %v1567_v60 = vmul.f32 0.033333335, %v1555_v31  ;;  %v1592_v8 = vsel %vm216_vm3, %v1580_v11, 0.0 }
 0xa17   :  { %1593 = vadd.xlane.f32.xlu0 %v1592_v8  ;;  %v1552_v16 = vpop.xlane.xlu0 %1551 }
 0xa18   :  { %v10897_v40 = vsub.f32 %v10857_v39, %v1567_v60  ;;  %v1566_v13 = vmul.f32 0.033333335, %v1552_v16  ;;  %v1581_v27 = vmul.f32 %v10893_v63, %v10893_v63 }
 0xa19   :  { %v1561_v28 = vpop.xlane.xlu1 %1560 }
 0xa1a   :  { %v10902_v5 = vsub.f32 %v10854_v53, %v1566_v13  ;;  %v1569_v20 = vmul.f32 0.033333335, %v1561_v28  ;;  %v1595_v38 = vsel %vm216_vm3, %v1581_v27, 0.0  ;;  %v1583_v17 = vmul.f32 %v10897_v40, %v10897_v40 }
 0xa1b   :  { %v1558_v25 = vpop.xlane.xlu0 %1557  ;;  %1596 = vadd.xlane.f32.xlu1 %v1595_v38 }
 0xa1c   :  { %v10908_v6 = vsub.f32 %v10862_v12, %v1569_v20  ;;  %v1568_v19 = vmul.f32 0.033333335, %v1558_v25  ;;  %v1582_v21 = vmul.f32 %v10902_v5, %v10902_v5  ;;  %v1601_v47 = vsel %vm216_vm3, %v1583_v17, 0.0  ;;  %v8198_v25 = vld [vmem:[%s13287_s11] ss:$0 sm:$0xff] }
 0xa1e   :  { %v10913_v22 = vsub.f32 %v10867_v54, %v1568_v19  ;;  %v1598_v62 = vsel %vm216_vm3, %v1582_v21, 0.0  ;;  %v1585_v4 = vmul.f32 %v10908_v6, %v10908_v6 }
 0xa1f   :  { %1599 = vadd.xlane.f32.xlu0 %v1598_v62  ;;  %1602 = vadd.xlane.f32.xlu1 %v1601_v47 }
 0xa20   :  { %v1584_v3 = vmul.f32 %v10913_v22, %v10913_v22  ;;  %v1607_v36 = vsel %vm216_vm3, %v1585_v4, 0.0 }
 0xa22   :  { %v1604_v23 = vsel %vm216_vm3, %v1584_v3, 0.0 }
 0xa23   :  { %1605 = vadd.xlane.f32.xlu0 %v1604_v23  ;;  %1608 = vadd.xlane.f32.xlu1 %v1607_v36 }
 0xaa0   :  { %v1588_v30 = vpop.xlane.xlu0 %1587 }
 0xaa1   :  { %v1610_v46 = vmul.f32 0.033333335, %v1588_v30 }
 0xaa2   :  { %v1591_v43 = vpop.xlane.xlu1 %1590 }
 0xaa3   :  { %v1618_v32 = vadd.f32 1e-05, %v1610_v46  ;;  %v1611_v33 = vmul.f32 0.033333335, %v1591_v43 }
 0xaa4   :  { %v1594_v49 = vpop.xlane.xlu0 %1593 }
 0xaa5   :  { %9809 = vrsqrt.f32 %v1618_v32  ;;  %v1619_v51 = vadd.f32 1e-05, %v1611_v33  ;;  %v1612_v55 = vmul.f32 0.033333335, %v1594_v49 }
 0xaa7   :  { %9811 = vrsqrt.f32 %v1619_v51  ;;  %v1620_v50 = vadd.f32 1e-05, %v1612_v55 }
 0xaa8   :  { %v1597_v56 = vpop.xlane.xlu1 %1596 }
 0xaa9   :  { %9813 = vrsqrt.f32 %v1620_v50  ;;  %v1613_v58 = vmul.f32 0.033333335, %v1597_v56 }
 0xaab   :  { %v1621_v48 = vadd.f32 1e-05, %v1613_v58 }
 0xaac   :  { %v1600_v14 = vpop.xlane.xlu0 %1599  ;;  %v1603_v29 = vpop.xlane.xlu1 %1602 }
 0xaad   :  { %9815 = vrsqrt.f32 %v1621_v48  ;;  %v1614_v0 = vmul.f32 0.033333335, %v1600_v14  ;;  %v1615_v7 = vmul.f32 0.033333335, %v1603_v29  ;;  %v9597_v48 = vld [vmem:[%s13290_s14 + $0x40] sm:$0xff]   ;;  %v9600_v14 = vld [vmem:[%s13290_s14 + $0x8] sm:$0xff]  }
 0xaae   :  { %8725 = vmatprep.subr.bf16.mxu1 %v9597_v48  ;;  %v9601_v29 = vld [vmem:[%s13290_s14 + $0x50] sm:$0xff]  }
 0xaaf   :  { %v9810_v9 = vpop.eup %9809  ;;  %v1622_v57 = vadd.f32 1e-05, %v1614_v0  ;;  %v1623_v10 = vadd.f32 1e-05, %v1615_v7  ;;  %v9602_v0 = vld [vmem:[%s13290_s14 + $0x10] sm:$0xff]   ;;  %v9603_v7 = vld [vmem:[%s13290_s14 + $0x58] sm:$0xff]  }
 0xab0   :  { %v1634_v11 = vmul.f32 %v9810_v9, %v10876_v18  ;;  %v1606_v31 = vpop.xlane.xlu0 %1605  ;;  %v1609_v60 = vpop.xlane.xlu1 %1608  ;;  %v9604_v9 = vld [vmem:[%s13290_s14 + $0x18] sm:$0xff]  }
 0xab1   :  { %v9812_v8 = vpop.eup %9811  ;;  %9817 = vrsqrt.f32 %v1622_v57  ;;  %v1616_v16 = vmul.f32 0.033333335, %v1606_v31  ;;  %v1617_v13 = vmul.f32 0.033333335, %v1609_v60  ;;  %v9606_v57 = vld [vmem:[%s13290_s14 + $0x20] sm:$0xff]   ;;  %v9609_v31 = vld [vmem:[%s13290_s14 + $0x70] sm:$0xff]  }
 0xab2   :  { %v1648_v27 = vmul.f32 %v8197_v59, %v1634_v11  ;;  %v1635_v28 = vmul.f32 %v9812_v8, %v10879_v24  ;;  %9819 = vrsqrt.f32 %v1623_v10  ;;  %v9607_v10 = vld [vmem:[%s13290_s14 + $0x68] sm:$0xff]   ;;  %v9610_v60 = vld [vmem:[%s13290_s14 + $0x30] sm:$0xff]   ;;  %v9611_v8 = vld [vmem:[%s13290_s14 + $0x78] sm:$0xff]  }
 0xab3   :  { %v9814_v20 = vpop.eup %9813  ;;  %v1624_v38 = vadd.f32 1e-05, %v1616_v16  ;;  %v1625_v17 = vadd.f32 1e-05, %v1617_v13  ;;  %v9608_v11 = vld [vmem:[%s13290_s14 + $0x28] sm:$0xff]   ;;  %v9612_v16 = vld [vmem:[%s13290_s14 + $0x38] sm:$0xff]  }
 0xab4   :  { %v1649_v19 = vmul.f32 %v8197_v59, %v1635_v28  ;;  %v1662_v18 = vadd.f32 %v8198_v25, %v1648_v27  ;;  %v1636_v62 = vmul.f32 %v9814_v20, %v10884_v2  ;;  %v11007_v13 = vsub.s32 0, %v10409_v15  ;;  %v1678_v28 = vld [vmem:[%s13289_s13] sm:$0x3] }
 0xab5   :  { %9821 = vrsqrt.f32 %v1624_v38  ;;  %v11010_v27 = vsub.s32 1, %v10409_v15 }
 0xab6   :  { %v1663_v21 = vadd.f32 %v8198_v25, %v1649_v19  ;;  %9823 = vrsqrt.f32 %v1625_v17  ;;  %v1650_v24 = vmul.f32 %v8197_v59, %v1636_v62  ;;  %v11016_v20 = vrot.slane %v1678_v28, %v11007_v13 }
 0xab7   :  { %v9816_v47 = vpop.eup %9815  ;;  %v11019_v38 = vrot.slane %v1678_v28, %v11010_v27 }
 0xab8   :  { %v1670_v4 = vpack.c.bf16 %v1663_v21, %v1662_v18  ;;  %v1637_v3 = vmul.f32 %v9816_v47, %v10893_v63  ;;  %v1664_v35 = vadd.f32 %v8198_v25, %v1650_v24 }
 0xaba   :  { %8204 = vmatmul.mubr.msk.bf16.vlgmr.msra.gmra.mrb[40].mxu1 %vm216_vm3, %v1670_v4  ;;  %v1651_v23 = vmul.f32 %v8197_v59, %v1637_v3 }
 0xabb   :  { %v9818_v36 = vpop.eup %9817  ;;  %1768 = vmatprep.mubr.bf16.mxu1 %v10267_v44 }
 0xabc   :  { %v9820_v37 = vpop.eup %9819  ;;  %v1665_v1 = vadd.f32 %v8198_v25, %v1651_v23  ;;  %v1638_v26 = vmul.f32 %v9818_v36, %v10902_v5 }
 0xabd   :  { %v1639_v41 = vmul.f32 %v9820_v37, %v10897_v40 }
 0xabe   :  { %v1671_v30 = vpack.c.bf16 %v1665_v1, %v1664_v35  ;;  %v1652_v46 = vmul.f32 %v8197_v59, %v1638_v26 }
 0xabf   :  { %v9822_v2 = vpop.eup %9821  ;;  %v1653_v43 = vmul.f32 %v8197_v59, %v1639_v41 }
 0xac0   :  { %v9824_v32 = vpop.eup %9823  ;;  %v1666_v63 = vadd.f32 %v8198_v25, %v1652_v46  ;;  %v1640_v49 = vmul.f32 %v9822_v2, %v10913_v22  ;;  %v9599_v22 = vld [vmem:[%s13290_s14 + $0x48] sm:$0xff]  }
 0xac1   :  { %v1667_v33 = vadd.f32 %v8198_v25, %v1653_v43  ;;  %v1641_v51 = vmul.f32 %v9824_v32, %v10908_v6  ;;  %v9598_v6 = vld [vmem:[%s13290_s14] sm:$0xff]  }
 0xac2   :  { %8205 = vmatmul.mubr.msk.bf16.gmra.mrb[44].mxu1 %vm216_vm3, %v1671_v30  ;;  %v1654_v5 = vmul.f32 %v8197_v59, %v1640_v49 }
 0xac3   :  { %1778 = vmatprep.mubr.bf16.mxu1 %v10267_v44  ;;  %v1672_v55 = vpack.c.bf16 %v1667_v33, %v1666_v63  ;;  %v1655_v50 = vmul.f32 %v8197_v59, %v1641_v51  ;;  %8726 = vmatpush3.bf16.msra.mxu1 %v9598_v6  ;;  %v9605_v59 = vld [vmem:[%s13290_s14 + $0x60] sm:$0xff]  }
 0xac4   :  { %v1668_v40 = vadd.f32 %v8198_v25, %v1654_v5  ;;  %8727 = vmatprep.subr.bf16.mxu1 %v9599_v22 }
 0xac5   :  { %v1669_v56 = vadd.f32 %v8198_v25, %v1655_v50 }
 0xac7   :  { %v1673_v58 = vpack.c.bf16 %v1669_v56, %v1668_v40  ;;  %8728 = vmatpush3.bf16.msra.mxu1 %v9600_v14 }
 0xac8   :  { %8729 = vmatprep.subr.bf16.mxu1 %v9601_v29 }
 0xaca   :  { %8206 = vmatmul.mubr.msk.bf16.gmra.mrb[48].mxu1 %vm216_vm3, %v1672_v55 }
 0xacb   :  { %1788 = vmatprep.mubr.bf16.mxu1 %v10267_v44  ;;  %8730 = vmatpush3.bf16.msra.mxu1 %v9602_v0 }
 0xacc   :  { %8731 = vmatprep.subr.bf16.mxu1 %v9603_v7 }
 0xacf   :  { %8732 = vmatpush3.bf16.msra.mxu1 %v9604_v9 }
 0xad0   :  { %8733 = vmatprep.subr.bf16.mxu1 %v9605_v59 }
 0xad2   :  { %8207 = vmatmul.mubr.msk.bf16.gmra.mrb[52].mxu1 %vm216_vm3, %v1673_v58 }
 0xad3   :  { %8734 = vmatpush3.bf16.msra.mxu1 %v9606_v57 }
 0xad4   :  { %8735 = vmatprep.subr.bf16.mxu1 %v9607_v10 }
 0xad7   :  { %8736 = vmatpush3.bf16.msra.mxu1 %v9608_v11 }
 0xad8   :  { %8737 = vmatprep.subr.bf16.mxu1 %v9609_v31 }
 0xadb   :  { %8738 = vmatpush3.bf16.msra.mxu1 %v9610_v60 }
 0xadc   :  { %8739 = vmatprep.subr.bf16.mxu1 %v9611_v8 }
 0xadf   :  { %8740 = vmatpush3.bf16.msra.mxu1 %v9612_v16 }
 0xb8d   :  { %v1760_v17 = vpop.f32.mrb[40].mxu1 }
 0xb8e   :  { %v11022_v25 = vadd.f32 %v1760_v17, %v11016_v20  ;;  %v1762_v19 = vpop.f32.mrb[41].mxu1 }
 0xb8f   :  { %v11025_v18 = vadd.f32 %v1762_v19, %v11019_v38  ;;  %v1764_v15 = vpop.f32.mrb[42].mxu1 }
 0xb90   :  { %v1799_v21 = vmul.f32 %v11022_v25, %v11022_v25  ;;  %v11030_v62 = vadd.f32 %v1764_v15, %v11016_v20  ;;  %v1766_v47 = vpop.f32.mrb[43].mxu1 }
 0xb91   :  { %v1800_v4 = vmul.f32 %v11025_v18, %v11025_v18  ;;  %v11035_v3 = vadd.f32 %v1766_v47, %v11019_v38 }
 0xb92   :  { %v1815_v24 = vmul.f32 %v1799_v21, %v11022_v25  ;;  %v1801_v23 = vmul.f32 %v11030_v62, %v11030_v62 }
 0xb93   :  { %v1816_v36 = vmul.f32 %v1800_v4, %v11025_v18  ;;  %v1802_v37 = vmul.f32 %v11035_v3, %v11035_v3 }
 0xb94   :  { %v1831_v1 = vmul.f32 0.044715, %v1815_v24  ;;  %v1817_v26 = vmul.f32 %v1801_v23, %v11030_v62 }
 0xb95   :  { %v1832_v41 = vmul.f32 0.044715, %v1816_v36  ;;  %v1818_v35 = vmul.f32 %v1802_v37, %v11035_v3  ;;  %v1770_v2 = vpop.f32.mrb[44].mxu1 }
 0xb96   :  { %v1847_v30 = vadd.f32 %v1831_v1, %v11022_v25  ;;  %v1833_v46 = vmul.f32 0.044715, %v1817_v26  ;;  %v11047_v43 = vadd.f32 %v1770_v2, %v11016_v20  ;;  %v1772_v32 = vpop.f32.mrb[45].mxu1 }
 0xb97   :  { %v1848_v63 = vadd.f32 %v1832_v41, %v11025_v18  ;;  %v1834_v33 = vmul.f32 0.044715, %v1818_v35  ;;  %v11051_v49 = vadd.f32 %v1772_v32, %v11019_v38  ;;  %v1774_v51 = vpop.f32.mrb[46].mxu1 }
 0xb98   :  { %v1863_v55 = vmul.f32 0.7978846, %v1847_v30  ;;  %v1849_v5 = vadd.f32 %v1833_v46, %v11030_v62  ;;  %v1803_v50 = vmul.f32 %v11047_v43, %v11047_v43  ;;  %v11057_v40 = vadd.f32 %v1774_v51, %v11016_v20  ;;  %v1776_v56 = vpop.f32.mrb[47].mxu1 }
 0xb99   :  { %v1864_v58 = vmul.f32 0.7978846, %v1848_v63  ;;  %v1850_v48 = vadd.f32 %v1834_v33, %v11035_v3  ;;  %v1804_v6 = vmul.f32 %v11051_v49, %v11051_v49  ;;  %v11063_v22 = vadd.f32 %v1776_v56, %v11019_v38 }
 0xb9a   :  { %9825 = vtanh.f32 %v1863_v55  ;;  %v1865_v14 = vmul.f32 0.7978846, %v1849_v5  ;;  %v1819_v29 = vmul.f32 %v1803_v50, %v11047_v43  ;;  %v1805_v0 = vmul.f32 %v11057_v40, %v11057_v40 }
 0xb9b   :  { %9827 = vtanh.f32 %v1864_v58  ;;  %v1866_v7 = vmul.f32 0.7978846, %v1850_v48  ;;  %v1820_v9 = vmul.f32 %v1804_v6, %v11051_v49  ;;  %v1806_v59 = vmul.f32 %v11063_v22, %v11063_v22 }
 0xb9c   :  { %9829 = vtanh.f32 %v1865_v14  ;;  %v1835_v57 = vmul.f32 0.044715, %v1819_v29  ;;  %v1821_v10 = vmul.f32 %v1805_v0, %v11057_v40 }
 0xb9d   :  { %v1836_v11 = vmul.f32 0.044715, %v1820_v9  ;;  %v1822_v31 = vmul.f32 %v1806_v59, %v11063_v22  ;;  %v1780_v60 = vpop.f32.mrb[48].mxu1  ;;  %9831 = vtanh.f32 %v1866_v7 }
 0xb9e   :  { %v1851_v8 = vadd.f32 %v1835_v57, %v11047_v43  ;;  %v1837_v16 = vmul.f32 0.044715, %v1821_v10  ;;  %v11075_v28 = vadd.f32 %v1780_v60, %v11016_v20  ;;  %v1782_v17 = vpop.f32.mrb[49].mxu1 }
 0xb9f   :  { %v1852_v19 = vadd.f32 %v1836_v11, %v11051_v49  ;;  %v1838_v15 = vmul.f32 0.044715, %v1822_v31  ;;  %v11079_v21 = vadd.f32 %v1782_v17, %v11019_v38  ;;  %v1784_v47 = vpop.f32.mrb[50].mxu1 }
 0xba0   :  { %v1867_v4 = vmul.f32 0.7978846, %v1851_v8  ;;  %v1853_v24 = vadd.f32 %v1837_v16, %v11057_v40  ;;  %v1807_v23 = vmul.f32 %v11075_v28, %v11075_v28  ;;  %v11085_v36 = vadd.f32 %v1784_v47, %v11016_v20  ;;  %v1786_v37 = vpop.f32.mrb[51].mxu1 }
 0xba1   :  { %v1868_v1 = vmul.f32 0.7978846, %v1852_v19  ;;  %v1854_v26 = vadd.f32 %v1838_v15, %v11063_v22  ;;  %v1808_v41 = vmul.f32 %v11079_v21, %v11079_v21  ;;  %v11091_v35 = vadd.f32 %v1786_v37, %v11019_v38 }
 0xba2   :  { %9833 = vtanh.f32 %v1867_v4  ;;  %v1869_v2 = vmul.f32 0.7978846, %v1853_v24  ;;  %v1823_v30 = vmul.f32 %v1807_v23, %v11075_v28  ;;  %v1809_v46 = vmul.f32 %v11085_v36, %v11085_v36 }
 0xba3   :  { %9835 = vtanh.f32 %v1868_v1  ;;  %v1870_v32 = vmul.f32 0.7978846, %v1854_v26  ;;  %v1824_v63 = vmul.f32 %v1808_v41, %v11079_v21  ;;  %v1810_v33 = vmul.f32 %v11091_v35, %v11091_v35 }
 0xba4   :  { %v9826_v51 = vpop.eup %9825  ;;  %9837 = vtanh.f32 %v1869_v2  ;;  %v1839_v55 = vmul.f32 0.044715, %v1823_v30  ;;  %v1825_v5 = vmul.f32 %v1809_v46, %v11085_v36 }
 0xba5   :  { %v9828_v50 = vpop.eup %9827  ;;  %v1895_v56 = vadd.f32 1.0, %v9826_v51  ;;  %9839 = vtanh.f32 %v1870_v32  ;;  %v1840_v58 = vmul.f32 0.044715, %v1824_v63  ;;  %v1826_v48 = vmul.f32 %v1810_v33, %v11091_v35  ;;  %v1790_v6 = vpop.f32.mrb[52].mxu1 }
 0xba6   :  { %v9830_v14 = vpop.eup %9829  ;;  %v1855_v29 = vadd.f32 %v1839_v55, %v11075_v28  ;;  %v1841_v0 = vmul.f32 0.044715, %v1825_v5  ;;  %v11103_v7 = vadd.f32 %v1790_v6, %v11016_v20  ;;  %v1792_v9 = vpop.f32.mrb[53].mxu1  ;;  %v1896_v59 = vadd.f32 1.0, %v9828_v50 }
 0xba7   :  { %v1911_v57 = vmul.f32 0.5, %v1895_v56  ;;  %v1897_v10 = vadd.f32 1.0, %v9830_v14  ;;  %v1856_v11 = vadd.f32 %v1840_v58, %v11079_v21  ;;  %v1842_v31 = vmul.f32 0.044715, %v1826_v48  ;;  %v1794_v60 = vpop.f32.mrb[54].mxu1  ;;  %v9832_v47 = vpop.eup %9831 }
 0xba8   :  { %v1871_v8 = vmul.f32 0.7978846, %v1855_v29  ;;  %v1857_v16 = vadd.f32 %v1841_v0, %v11085_v36  ;;  %v1811_v17 = vmul.f32 %v11103_v7, %v11103_v7  ;;  %v11110_v19 = vadd.f32 %v1792_v9, %v11019_v38  ;;  %v1796_v15 = vpop.f32.mrb[55].mxu1 }
 0xba9   :  { %v1927_v4 = vmul.f32 %v1911_v57, %v11022_v25  ;;  %v1913_v24 = vmul.f32 0.5, %v1897_v10  ;;  %v1872_v23 = vmul.f32 0.7978846, %v1856_v11  ;;  %v1858_v37 = vadd.f32 %v1842_v31, %v11091_v35 }
 0xbaa   :  { %9841 = vtanh.f32 %v1871_v8  ;;  %v1873_v1 = vmul.f32 0.7978846, %v1857_v16  ;;  %v1827_v26 = vmul.f32 %v1811_v17, %v11103_v7  ;;  %v1812_v41 = vmul.f32 %v11110_v19, %v11110_v19 }
 0xbab   :  { %v1929_v2 = vmul.f32 %v1913_v24, %v11030_v62  ;;  %9843 = vtanh.f32 %v1872_v23  ;;  %v1874_v30 = vmul.f32 0.7978846, %v1858_v37  ;;  %v11119_v46 = vadd.f32 %v1794_v60, %v11016_v20 }
 0xbac   :  { %v9834_v32 = vpop.eup %9833  ;;  %9845 = vtanh.f32 %v1873_v1  ;;  %v1843_v25 = vmul.f32 0.044715, %v1827_v26  ;;  %v1828_v63 = vmul.f32 %v1812_v41, %v11110_v19  ;;  %v11123_v33 = vadd.f32 %v1796_v15, %v11019_v38 }
 0xbad   :  { %v9836_v51 = vpop.eup %9835  ;;  %v1943_v55 = vpack.c.bf16 %v1929_v2, %v1927_v4  ;;  %9847 = vtanh.f32 %v1874_v30  ;;  %v1813_v5 = vmul.f32 %v11119_v46, %v11119_v46  ;;  %v1898_v62 = vadd.f32 1.0, %v9832_v47 }
 0xbae   :  { %v9838_v50 = vpop.eup %9837  ;;  %v1859_v56 = vadd.f32 %v1843_v25, %v11103_v7  ;;  %v1844_v20 = vmul.f32 0.044715, %v1828_v63  ;;  %v1814_v58 = vmul.f32 %v11123_v33, %v11123_v33  ;;  %v1912_v48 = vmul.f32 0.5, %v1896_v59 }
 0xbaf   :  { %v9840_v6 = vpop.eup %9839  ;;  %v1829_v14 = vmul.f32 %v1813_v5, %v11119_v46  ;;  %v1914_v38 = vmul.f32 0.5, %v1898_v62  ;;  %v1900_v29 = vadd.f32 1.0, %v9836_v51  ;;  %v1899_v0 = vadd.f32 1.0, %v9834_v32 }
 0xbb0   :  { %v1875_v9 = vmul.f32 0.7978846, %v1859_v56  ;;  %v1860_v57 = vadd.f32 %v1844_v20, %v11110_v19  ;;  %v1830_v10 = vmul.f32 %v1814_v58, %v11123_v33  ;;  %v1928_v11 = vmul.f32 %v1912_v48, %v11025_v18 }
 0xbb1   :  { %v1845_v31 = vmul.f32 0.044715, %v1829_v14  ;;  %v1930_v60 = vmul.f32 %v1914_v38, %v11035_v3  ;;  %v1902_v8 = vadd.f32 1.0, %v9840_v6  ;;  %v1916_v16 = vmul.f32 0.5, %v1900_v29 }
 0xbb2   :  { %9849 = vtanh.f32 %v1875_v9  ;;  %v1876_v59 = vmul.f32 0.7978846, %v1860_v57  ;;  %v1846_v17 = vmul.f32 0.044715, %v1830_v10  ;;  %v1901_v15 = vadd.f32 1.0, %v9838_v50 }
 0xbb3   :  { %v1861_v47 = vadd.f32 %v1845_v31, %v11119_v46  ;;  %v1944_v4 = vpack.c.bf16 %v1930_v60, %v1928_v11  ;;  %v1918_v24 = vmul.f32 0.5, %v1902_v8  ;;  %v1915_v1 = vmul.f32 0.5, %v1899_v0 }
 0xbb4   :  { %v9842_v23 = vpop.eup %9841  ;;  %9851 = vtanh.f32 %v1876_v59  ;;  %v1862_v37 = vadd.f32 %v1846_v17, %v11123_v33  ;;  %v1917_v26 = vmul.f32 0.5, %v1901_v15  ;;  %v1932_v3 = vmul.f32 %v1916_v16, %v11051_v49 }
 0xbb5   :  { %v9844_v18 = vpop.eup %9843  ;;  %v1877_v41 = vmul.f32 0.7978846, %v1861_v47  ;;  %2118 = vmatprep.mubr.bf16.mxu1 %v1944_v4  ;;  %v1934_v2 = vmul.f32 %v1918_v24, %v11063_v22  ;;  %v1903_v30 = vadd.f32 1.0, %v9842_v23  ;;  %v1931_v63 = vmul.f32 %v1915_v1, %v11047_v43  ;;  %v8208_v23 = vld [vmem:[%s13291_s15] ss:$0 sm:$0xff] }
 0xbb6   :  { %v9846_v32 = vpop.eup %9845  ;;  %v1878_v25 = vmul.f32 0.7978846, %v1862_v37  ;;  %2119 = vmatmul.mubr.bf16.vlgmr.msra.gmra.mrb[56].mxu1 %v1943_v55  ;;  %v1933_v51 = vmul.f32 %v1917_v26, %v11057_v40  ;;  %v1904_v5 = vadd.f32 1.0, %v9844_v18 }
 0xbb7   :  { %v9848_v62 = vpop.eup %9847  ;;  %9853 = vtanh.f32 %v1877_v41  ;;  %v1946_v50 = vpack.c.bf16 %v1934_v2, %v1932_v3  ;;  %v1905_v56 = vadd.f32 1.0, %v9846_v32  ;;  %v1919_v20 = vmul.f32 0.5, %v1903_v30 }
 0xbb8   :  { %9855 = vtanh.f32 %v1878_v25  ;;  %v1945_v58 = vpack.c.bf16 %v1933_v51, %v1931_v63  ;;  %v1906_v48 = vadd.f32 1.0, %v9848_v62  ;;  %v1920_v49 = vmul.f32 0.5, %v1904_v5 }
 0xbb9   :  { %2126 = vmatprep.mubr.bf16.mxu1 %v1946_v50  ;;  %v1921_v22 = vmul.f32 0.5, %v1905_v56  ;;  %v1935_v14 = vmul.f32 %v1919_v20, %v11075_v28 }
 0xbba   :  { %v1922_v6 = vmul.f32 0.5, %v1906_v48  ;;  %v1936_v40 = vmul.f32 %v1920_v49, %v11079_v21 }
 0xbbb   :  { %v1937_v55 = vmul.f32 %v1921_v22, %v11085_v36 }
 0xbbc   :  { %v9850_v43 = vpop.eup %9849  ;;  %v1938_v38 = vmul.f32 %v1922_v6, %v11091_v35 }
 0xbbd   :  { %v1947_v29 = vpack.c.bf16 %v1937_v55, %v1935_v14  ;;  %v1907_v57 = vadd.f32 1.0, %v9850_v43 }
 0xbbe   :  { %v9852_v0 = vpop.eup %9851  ;;  %2127 = vmatmul.mubr.bf16.gmra.mrb[60].mxu1 %v1945_v58  ;;  %v1948_v9 = vpack.c.bf16 %v1938_v38, %v1936_v40 }
 0xbbf   :  { %v1908_v10 = vadd.f32 1.0, %v9852_v0  ;;  %v1923_v8 = vmul.f32 0.5, %v1907_v57 }
 0xbc0   :  { %2134 = vmatprep.mubr.bf16.mxu1 %v1948_v9 }
 0xbc1   :  { %v9854_v11 = vpop.eup %9853  ;;  %v1924_v28 = vmul.f32 0.5, %v1908_v10  ;;  %v1939_v21 = vmul.f32 %v1923_v8, %v11103_v7 }
 0xbc2   :  { %v9856_v31 = vpop.eup %9855  ;;  %v1909_v60 = vadd.f32 1.0, %v9854_v11 }
 0xbc3   :  { %v1910_v16 = vadd.f32 1.0, %v9856_v31  ;;  %v1940_v17 = vmul.f32 %v1924_v28, %v11110_v19 }
 0xbc4   :  { %v1925_v59 = vmul.f32 0.5, %v1909_v60 }
 0xbc5   :  { %v1926_v36 = vmul.f32 0.5, %v1910_v16 }
 0xbc6   :  { %2135 = vmatmul.mubr.bf16.gmra.mrb[64].mxu1 %v1947_v29  ;;  %v1941_v35 = vmul.f32 %v1925_v59, %v11119_v46 }
 0xbc7   :  { %v1942_v15 = vmul.f32 %v1926_v36, %v11123_v33 }
 0xbc8   :  { %v1949_v47 = vpack.c.bf16 %v1941_v35, %v1939_v21 }
 0xbc9   :  { %v1950_v4 = vpack.c.bf16 %v1942_v15, %v1940_v17 }
 0xbcb   :  { %2142 = vmatprep.mubr.bf16.mxu1 %v1950_v4 }
 0xbce   :  { %2143 = vmatmul.mubr.bf16.gmra.mrb[68].mxu1 %v1949_v47 }
 0xc89   :  { %v8741_v24 = vpop.f32.mrb[56].mxu1 }
 0xc8a   :  { %v8742_v37 = vpop.f32.mrb[57].mxu1 }
 0xc8b   :  { %v8743_v1 = vadd.f32 %v8742_v37, %v8741_v24  ;;  %v8744_v26 = vpop.f32.mrb[58].mxu1 }
 0xc8c   :  { %v8745_v18 = vpop.f32.mrb[59].mxu1 }
 0xc8d   :  { %v2121_v7 = vadd.f32 %v8743_v1, %v8208_v23  ;;  %v8746_v41 = vadd.f32 %v8745_v18, %v8744_v26 }
 0xc8f   :  { %v11153_v46 = vadd.f32 %v2121_v7, %v10836_v42  ;;  %v2124_v19 = vadd.f32 %v8746_v41, %v8208_v23 }
 0xc91   :  { %v11156_v33 = vadd.f32 %v2124_v19, %v10842_v61  ;;  %v8747_v3 = vpop.f32.mrb[60].mxu1  ;;  %v2163_v2 = vsel %vm216_vm3, %v11153_v46, 0.0 }
 0xc92   :  { %v8748_v30 = vpop.f32.mrb[61].mxu1  ;;  %2164 = vadd.xlane.f32.xlu0 %v2163_v2 }
 0xc93   :  { %v8749_v32 = vadd.f32 %v8748_v30, %v8747_v3  ;;  %v8750_v25 = vpop.f32.mrb[62].mxu1  ;;  %v2166_v63 = vsel %vm216_vm3, %v11156_v33, 0.0 }
 0xc94   :  { %v8751_v51 = vpop.f32.mrb[63].mxu1  ;;  %2167 = vadd.xlane.f32.xlu1 %v2166_v63 }
 0xc95   :  { %v2129_v5 = vadd.f32 %v8749_v32, %v8208_v23  ;;  %v8752_v42 = vadd.f32 %v8751_v51, %v8750_v25 }
 0xc97   :  { %v11163_v62 = vadd.f32 %v2129_v5, %v10839_v45  ;;  %v2132_v61 = vadd.f32 %v8752_v42, %v8208_v23 }
 0xc99   :  { %v11166_v50 = vadd.f32 %v2132_v61, %v10849_v34  ;;  %v8753_v56 = vpop.f32.mrb[64].mxu1  ;;  %v2169_v20 = vsel %vm216_vm3, %v11163_v62, 0.0 }
 0xc9a   :  { %v8754_v58 = vpop.f32.mrb[65].mxu1  ;;  %2170 = vadd.xlane.f32.xlu0 %v2169_v20 }
 0xc9b   :  { %v8755_v48 = vadd.f32 %v8754_v58, %v8753_v56  ;;  %v8756_v49 = vpop.f32.mrb[66].mxu1  ;;  %v2172_v22 = vsel %vm216_vm3, %v11166_v50, 0.0 }
 0xc9c   :  { %v8757_v6 = vpop.f32.mrb[67].mxu1  ;;  %2173 = vadd.xlane.f32.xlu1 %v2172_v22 }
 0xc9d   :  { %v2137_v14 = vadd.f32 %v8755_v48, %v8208_v23  ;;  %v8758_v45 = vadd.f32 %v8757_v6, %v8756_v49 }
 0xc9f   :  { %v11173_v55 = vadd.f32 %v2137_v14, %v10854_v53  ;;  %v2140_v34 = vadd.f32 %v8758_v45, %v8208_v23 }
 0xca1   :  { %v11176_v43 = vadd.f32 %v2140_v34, %v10857_v39  ;;  %v8759_v40 = vpop.f32.mrb[68].mxu1  ;;  %v2175_v38 = vsel %vm216_vm3, %v11173_v55, 0.0 }
 0xca2   :  { %2176 = vadd.xlane.f32.xlu0 %v2175_v38  ;;  %v8760_v29 = vpop.f32.mrb[69].mxu1  ;;  %v9613_v38 = vld [vmem:[%s13283_s7 + $0x30] ss:$12 sps:$4 sm:$0xff]  }
 0xca3   :  { %v8761_v0 = vadd.f32 %v8760_v29, %v8759_v40  ;;  %v8762_v9 = vpop.f32.mrb[70].mxu1  ;;  %v2178_v57 = vsel %vm216_vm3, %v11176_v43, 0.0  ;;  %v9615_v40 = vld [vmem:[%s13283_s7 + $0x34] ss:$12 sps:$4 sm:$0xff]  }
 0xca4   :  { %2179 = vadd.xlane.f32.xlu1 %v2178_v57  ;;  %v8763_v10 = vpop.f32.mrb[71].mxu1  ;;  %2358 = vmatprep.subr.bf16.mxu0 %v9615_v40  ;;  %v9616_v29 = vld [vmem:[%s13283_s7 + $0x4c] ss:$12 sps:$4 sm:$0x7f]  }
 0xca5   :  { %v2145_v11 = vadd.f32 %v8761_v0, %v8208_v23  ;;  %v8764_v53 = vadd.f32 %v8763_v10, %v8762_v9  ;;  %2359 = vmatpush1.bf16.msra.mxu0 %v9613_v38  ;;  %v9618_v0 = vld [vmem:[%s13283_s7 + $0x48] ss:$12 sps:$4 sm:$0x7f]   ;;  %v9619_v57 = vld [vmem:[%s13283_s7 + $0x38] ss:$12 sps:$4 sm:$0xff]  }
 0xca6   :  { %8243 = vmatprep.subr.msk.bf16.mxu0 %vm403_vm4, %v9616_v29  ;;  %v2350_v9 = vsel %vm403_vm4, %v9618_v0, 0  ;;  %9168 = vmatprep.subr.bf16.mxu1 %v9619_v57  ;;  %v9620_v10 = vld [vmem:[%s13283_s7 + $0x50] ss:$12 sps:$4 sm:$0x7f]  }
 0xca7   :  { %v11183_v31 = vadd.f32 %v2145_v11, %v10867_v54  ;;  %v2148_v39 = vadd.f32 %v8764_v53, %v8208_v23  ;;  %9169 = vmatpush3.bf16.msra.mxu1 %v9619_v57  ;;  %v2356_v11 = vsel %vm403_vm4, %v9620_v10, 0 }
 0xca8   :  { %9542 = vmatprep.subr.msk.bf16.mxu1 %vm403_vm4, %v9620_v10 }
 0xca9   :  { %v11186_v60 = vadd.f32 %v2148_v39, %v10862_v12  ;;  %v2181_v8 = vsel %vm216_vm3, %v11183_v31, 0.0  ;;  %2361 = vmatpush1.bf16.msra.mxu0 %v2350_v9 }
 0xcaa   :  { %2182 = vadd.xlane.f32.xlu0 %v2181_v8 }
 0xcab   :  { %v2184_v16 = vsel %vm216_vm3, %v11186_v60, 0.0  ;;  %9171 = vmatpush3.bf16.msra.mxu1 %v2356_v11 }
 0xcac   :  { %2185 = vadd.xlane.f32.xlu1 %v2184_v16 }
 0xd1f   :  { %v2165_v28 = vpop.xlane.xlu0 %2164 }
 0xd20   :  { %v2187_v59 = vmul.f32 0.033333335, %v2165_v28 }
 0xd21   :  { %v2168_v36 = vpop.xlane.xlu1 %2167 }
 0xd22   :  { %v11193_v21 = vsub.f32 %v11153_v46, %v2187_v59  ;;  %v2188_v54 = vmul.f32 0.033333335, %v2168_v36 }
 0xd24   :  { %v11196_v35 = vsub.f32 %v11156_v33, %v2188_v54  ;;  %v2203_v12 = vmul.f32 %v11193_v21, %v11193_v21 }
 0xd26   :  { %v2211_v17 = vsel %vm216_vm3, %v2203_v12, 0.0  ;;  %v2204_v15 = vmul.f32 %v11196_v35, %v11196_v35 }
 0xd27   :  { %v2171_v47 = vpop.xlane.xlu0 %2170  ;;  %2212 = vadd.xlane.f32.xlu0 %v2211_v17 }
 0xd28   :  { %v2189_v4 = vmul.f32 0.033333335, %v2171_v47  ;;  %v2214_v24 = vsel %vm216_vm3, %v2204_v15, 0.0 }
 0xd29   :  { %v2174_v23 = vpop.xlane.xlu1 %2173  ;;  %2215 = vadd.xlane.f32.xlu1 %v2214_v24  ;;  %v8227_v24 = vld [vmem:[%s13281_s5 + $0x1] ss:$0 sm:$0xff] }
 0xd2a   :  { %v11205_v37 = vsub.f32 %v11163_v62, %v2189_v4  ;;  %v2190_v1 = vmul.f32 0.033333335, %v2174_v23 }
 0xd2c   :  { %v11208_v26 = vsub.f32 %v11166_v50, %v2190_v1  ;;  %v2205_v18 = vmul.f32 %v11205_v37, %v11205_v37 }
 0xd2e   :  { %v2217_v7 = vsel %vm216_vm3, %v2205_v18, 0.0  ;;  %v2206_v41 = vmul.f32 %v11208_v26, %v11208_v26 }
 0xd2f   :  { %v2177_v19 = vpop.xlane.xlu0 %2176  ;;  %2218 = vadd.xlane.f32.xlu0 %v2217_v7 }
 0xd30   :  { %v2191_v3 = vmul.f32 0.033333335, %v2177_v19  ;;  %v2220_v2 = vsel %vm216_vm3, %v2206_v41, 0.0 }
 0xd31   :  { %v2180_v30 = vpop.xlane.xlu1 %2179  ;;  %2221 = vadd.xlane.f32.xlu1 %v2220_v2  ;;  %v8228_v2 = vld [vmem:[%s13282_s6 + $0x1] ss:$0 sm:$0xff] }
 0xd32   :  { %v11217_v32 = vsub.f32 %v11173_v55, %v2191_v3  ;;  %v2192_v25 = vmul.f32 0.033333335, %v2180_v30 }
 0xd34   :  { %v11220_v63 = vsub.f32 %v11176_v43, %v2192_v25  ;;  %v2207_v51 = vmul.f32 %v11217_v32, %v11217_v32 }
 0xd36   :  { %v2223_v5 = vsel %vm216_vm3, %v2207_v51, 0.0  ;;  %v2208_v42 = vmul.f32 %v11220_v63, %v11220_v63 }
 0xd37   :  { %2224 = vadd.xlane.f32.xlu0 %v2223_v5  ;;  %v2183_v61 = vpop.xlane.xlu0 %2182 }
 0xd38   :  { %v2193_v56 = vmul.f32 0.033333335, %v2183_v61  ;;  %v2226_v20 = vsel %vm216_vm3, %v2208_v42, 0.0 }
 0xd39   :  { %2227 = vadd.xlane.f32.xlu1 %v2226_v20  ;;  %v2186_v58 = vpop.xlane.xlu1 %2185 }
 0xd3a   :  { %v11229_v48 = vsub.f32 %v11183_v31, %v2193_v56  ;;  %v2194_v49 = vmul.f32 0.033333335, %v2186_v58 }
 0xd3c   :  { %v11232_v22 = vsub.f32 %v11186_v60, %v2194_v49  ;;  %v2209_v6 = vmul.f32 %v11229_v48, %v11229_v48 }
 0xd3e   :  { %v2229_v14 = vsel %vm216_vm3, %v2209_v6, 0.0  ;;  %v2210_v45 = vmul.f32 %v11232_v22, %v11232_v22 }
 0xd3f   :  { %2230 = vadd.xlane.f32.xlu0 %v2229_v14 }
 0xd40   :  { %v2232_v34 = vsel %vm216_vm3, %v2210_v45, 0.0 }
 0xd41   :  { %2233 = vadd.xlane.f32.xlu1 %v2232_v34 }
 0xdb4   :  { %v2213_v53 = vpop.xlane.xlu0 %2212 }
 0xdb5   :  { %v2235_v39 = vmul.f32 0.033333335, %v2213_v53 }
 0xdb6   :  { %v2216_v8 = vpop.xlane.xlu1 %2215 }
 0xdb7   :  { %v2243_v16 = vadd.f32 1e-05, %v2235_v39  ;;  %v2236_v28 = vmul.f32 0.033333335, %v2216_v8 }
 0xdb9   :  { %9857 = vrsqrt.f32 %v2243_v16  ;;  %v2244_v59 = vadd.f32 1e-05, %v2236_v28 }
 0xdbb   :  { %9859 = vrsqrt.f32 %v2244_v59 }
 0xdbc   :  { %v2219_v36 = vpop.xlane.xlu0 %2218 }
 0xdbd   :  { %v2237_v54 = vmul.f32 0.033333335, %v2219_v36 }
 0xdbe   :  { %v2222_v12 = vpop.xlane.xlu1 %2221 }
 0xdbf   :  { %v2245_v17 = vadd.f32 1e-05, %v2237_v54  ;;  %v2238_v15 = vmul.f32 0.033333335, %v2222_v12 }
 0xdc1   :  { %9861 = vrsqrt.f32 %v2245_v17  ;;  %v2246_v47 = vadd.f32 1e-05, %v2238_v15 }
 0xdc3   :  { %v9858_v4 = vpop.eup %9857  ;;  %9863 = vrsqrt.f32 %v2246_v47 }
 0xdc4   :  { %v2259_v23 = vmul.f32 %v9858_v4, %v11193_v21  ;;  %v2225_v1 = vpop.xlane.xlu0 %2224 }
 0xdc5   :  { %v9860_v18 = vpop.eup %9859  ;;  %v2239_v7 = vmul.f32 0.033333335, %v2225_v1 }
 0xdc6   :  { %v2273_v41 = vmul.f32 %v8227_v24, %v2259_v23  ;;  %v2260_v19 = vmul.f32 %v9860_v18, %v11196_v35  ;;  %v2228_v3 = vpop.xlane.xlu1 %2227 }
 0xdc7   :  { %v2247_v30 = vadd.f32 1e-05, %v2239_v7  ;;  %v2240_v25 = vmul.f32 0.033333335, %v2228_v3 }
 0xdc8   :  { %v2274_v51 = vmul.f32 %v8227_v24, %v2260_v19  ;;  %v2287_v42 = vadd.f32 %v8228_v2, %v2273_v41 }
 0xdc9   :  { %9865 = vrsqrt.f32 %v2247_v30  ;;  %v2248_v5 = vadd.f32 1e-05, %v2240_v25 }
 0xdca   :  { %v2288_v61 = vadd.f32 %v8228_v2, %v2274_v51 }
 0xdcb   :  { %v9862_v56 = vpop.eup %9861  ;;  %9867 = vrsqrt.f32 %v2248_v5 }
 0xdcc   :  { %v2231_v21 = vpop.xlane.xlu0 %2230  ;;  %v2295_v20 = vpack.c.bf16 %v2288_v61, %v2287_v42  ;;  %v2261_v58 = vmul.f32 %v9862_v56, %v11205_v37 }
 0xdcd   :  { %v9864_v49 = vpop.eup %9863  ;;  %v2241_v35 = vmul.f32 0.033333335, %v2231_v21 }
 0xdce   :  { %v2234_v6 = vpop.xlane.xlu1 %2233  ;;  %8244 = vmatmul.mubr.msk.bf16.vlgmr.msra.gmra.mrb[32].mxu0 %vm216_vm3, %v2295_v20  ;;  %9172 = vmatprep.mubr.msk.bf16.mxu1 %vm216_vm3, %v2295_v20  ;;  %v2262_v14 = vmul.f32 %v9864_v49, %v11208_v26  ;;  %v2275_v45 = vmul.f32 %v8227_v24, %v2261_v58 }
 0xdcf   :  { %v2249_v34 = vadd.f32 1e-05, %v2241_v35  ;;  %v2242_v40 = vmul.f32 0.033333335, %v2234_v6  ;;  %2400 = vmatprep.mubr.bf16.mxu0 %v10267_v44 }
 0xdd0   :  { %v2276_v38 = vmul.f32 %v8227_v24, %v2262_v14  ;;  %v2289_v0 = vadd.f32 %v8228_v2, %v2275_v45 }
 0xdd1   :  { %9869 = vrsqrt.f32 %v2249_v34  ;;  %v2250_v29 = vadd.f32 1e-05, %v2242_v40 }
 0xdd2   :  { %v2290_v9 = vadd.f32 %v8228_v2, %v2276_v38 }
 0xdd3   :  { %v9866_v37 = vpop.eup %9865  ;;  %9871 = vrsqrt.f32 %v2250_v29 }
 0xdd4   :  { %v2296_v57 = vpack.c.bf16 %v2290_v9, %v2289_v0  ;;  %v2263_v10 = vmul.f32 %v9866_v37, %v11217_v32 }
 0xdd5   :  { %v9868_v11 = vpop.eup %9867 }
 0xdd6   :  { %8245 = vmatmul.mubr.msk.bf16.gmra.mrb[36].mxu0 %vm216_vm3, %v2296_v57  ;;  %9173 = vmatmul.mubr.msk.bf16.vlgmr.msra.gmra.mrb[72].mxu1 %vm216_vm3, %v2296_v57  ;;  %v2264_v26 = vmul.f32 %v9868_v11, %v11220_v63  ;;  %v2277_v53 = vmul.f32 %v8227_v24, %v2263_v10 }
 0xdd7   :  { %2410 = vmatprep.mubr.bf16.mxu0 %v10267_v44 }
 0xdd8   :  { %v2278_v39 = vmul.f32 %v8227_v24, %v2264_v26  ;;  %v2291_v8 = vadd.f32 %v8228_v2, %v2277_v53 }
 0xdda   :  { %v2292_v16 = vadd.f32 %v8228_v2, %v2278_v39 }
 0xddb   :  { %v9870_v28 = vpop.eup %9869 }
 0xddc   :  { %v2297_v59 = vpack.c.bf16 %v2292_v16, %v2291_v8  ;;  %v2265_v36 = vmul.f32 %v9870_v28, %v11229_v48 }
 0xddd   :  { %v9872_v54 = vpop.eup %9871 }
 0xdde   :  { %8246 = vmatmul.mubr.msk.bf16.gmra.mrb[40].mxu0 %vm216_vm3, %v2297_v59  ;;  %9176 = vmatprep.mubr.msk.bf16.mxu1 %vm216_vm3, %v2297_v59  ;;  %v2266_v32 = vmul.f32 %v9872_v54, %v11232_v22  ;;  %v2279_v12 = vmul.f32 %v8227_v24, %v2265_v36 }
 0xddf   :  { %2420 = vmatprep.mubr.bf16.mxu0 %v10267_v44 }
 0xde0   :  { %v2280_v63 = vmul.f32 %v8227_v24, %v2266_v32  ;;  %v2293_v17 = vadd.f32 %v8228_v2, %v2279_v12 }
 0xde2   :  { %v2294_v15 = vadd.f32 %v8228_v2, %v2280_v63 }
 0xde4   :  { %v2298_v47 = vpack.c.bf16 %v2294_v15, %v2293_v17 }
 0xde6   :  { %8247 = vmatmul.mubr.msk.bf16.gmra.mrb[44].mxu0 %vm216_vm3, %v2298_v47  ;;  %9177 = vmatmul.mubr.msk.bf16.gmra.mrb[76].mxu1 %vm216_vm3, %v2298_v47 }
 0xea1   :  { %v2392_v4 = vpop.f32.mrb[32].mxu0 }
 0xea2   :  { %v2394_v48 = vpop.f32.mrb[33].mxu0 }
 0xea3   :  { %v2396_v23 = vpop.f32.mrb[34].mxu0 }
 0xea4   :  { %v11287_v1 = vpack.c.bf16 %v2396_v23, %v2392_v4  ;;  %v2398_v18 = vpop.f32.mrb[35].mxu0 }
 0xea5   :  { %v11289_v7 = vpack.c.bf16 %v2398_v18, %v2394_v48 }
 0xea6   :  { %9184 = vmatprep.mubr.msk.bf16.mxu0 %vm579_vm5, %v11287_v1 }
 0xea7   :  { %9543 = vmatprep.subr.msk.bf16.mxu0 %vm579_vm5, %v11289_v7  ;;  %v2532_v22 = vsel %vm579_vm5, %v11289_v7, 0 }
 0xea8   :  { %9181 = vmatpush3.bf16.xpose.msra.mxu0 %v2532_v22 }
 0xea9   :  { %v2402_v24 = vpop.f32.mrb[36].mxu0  ;;  %v9174_v41 = vpop.f32.mrb[72].mxu1 }
 0xeaa   :  { %v2404_v19 = vpop.f32.mrb[37].mxu0  ;;  %v2465_v3 = vpop.f32.mrb[73].mxu1 }
 0xeab   :  { %v2406_v2 = vpop.f32.mrb[38].mxu0  ;;  %v9175_v30 = vpop.f32.mrb[74].mxu1 }
 0xeac   :  { %v11297_v25 = vpack.c.bf16 %v2406_v2, %v2402_v24  ;;  %v11299_v51 = vpack.c.bf16 %v9175_v30, %v9174_v41  ;;  %v2408_v5 = vpop.f32.mrb[39].mxu0  ;;  %v2468_v42 = vpop.f32.mrb[75].mxu1 }
 0xead   :  { %v11301_v61 = vpack.c.bf16 %v2408_v5, %v2404_v19  ;;  %v11303_v56 = vpack.c.bf16 %v2468_v42, %v2465_v3 }
 0xeaf   :  { %9544 = vmatprep.subr.msk.bf16.mxu0 %vm579_vm5, %v11301_v61  ;;  %v2535_v21 = vsel %vm579_vm5, %v11301_v61, 0 }
 0xeb0   :  { %9183 = vmatpush3.bf16.xpose.msra.mxu0 %v2535_v21 }
 0xeb1   :  { %v2412_v20 = vpop.f32.mrb[40].mxu0  ;;  %9196 = vmatprep.subr.bf16.mxu0 %v11303_v56 }
 0xeb2   :  { %v2414_v58 = vpop.f32.mrb[41].mxu0 }
 0xeb3   :  { %v2416_v49 = vpop.f32.mrb[42].mxu0 }
 0xeb4   :  { %v11310_v35 = vpack.c.bf16 %v2416_v49, %v2412_v20  ;;  %v2418_v6 = vpop.f32.mrb[43].mxu0 }
 0xeb5   :  { %v11312_v14 = vpack.c.bf16 %v2418_v6, %v2414_v58 }
 0xeb6   :  { %9192 = vmatprep.mubr.msk.bf16.mxu1 %vm579_vm5, %v11310_v35 }
 0xeb7   :  { %9185 = vmatmul.mubr.msk.bf16.vlgmr.msra.gmra.mrb[48].mxu0 %vm579_vm5, %v11297_v25  ;;  %9545 = vmatprep.subr.msk.bf16.mxu1 %vm579_vm5, %v11312_v14  ;;  %v2593_v45 = vsel %vm579_vm5, %v11312_v14, 0 }
 0xeb8   :  { %9189 = vmatpush3.bf16.xpose.msra.mxu1 %v2593_v45  ;;  %9197 = vmatpush3.bf16.msra.mxu0 %v11303_v56 }
 0xeb9   :  { %v2422_v34 = vpop.f32.mrb[44].mxu0  ;;  %v9178_v40 = vpop.f32.mrb[76].mxu1  ;;  %9198 = vmatprep.subr.bf16.mxu0 %v11299_v51 }
 0xeba   :  { %v2424_v38 = vpop.f32.mrb[45].mxu0  ;;  %v2481_v29 = vpop.f32.mrb[77].mxu1 }
 0xebb   :  { %v2426_v0 = vpop.f32.mrb[46].mxu0  ;;  %v9179_v9 = vpop.f32.mrb[78].mxu1 }
 0xebc   :  { %v11324_v37 = vpack.c.bf16 %v2426_v0, %v2422_v34  ;;  %v11326_v57 = vpack.c.bf16 %v9179_v9, %v9178_v40  ;;  %v2428_v10 = vpop.f32.mrb[47].mxu0  ;;  %v2484_v11 = vpop.f32.mrb[79].mxu1  ;;  %9199 = vmatpush3.bf16.msra.mxu0 %v11299_v51 }
 0xebd   :  { %v11329_v26 = vpack.c.bf16 %v2428_v10, %v2424_v38  ;;  %v11331_v53 = vpack.c.bf16 %v2484_v11, %v2481_v29 }
 0xebf   :  { %9546 = vmatprep.subr.msk.bf16.mxu1 %vm579_vm5, %v11329_v26  ;;  %9204 = vmatprep.subr.bf16.mxu0 %v11331_v53  ;;  %v2596_v39 = vsel %vm579_vm5, %v11329_v26, 0 }
 0xec0   :  { %9191 = vmatpush3.bf16.xpose.msra.mxu1 %v2596_v39 }
 0xec7   :  { %9193 = vmatmul.mubr.msk.bf16.vlgmr.msra.gmra.mrb[80].mxu1 %vm579_vm5, %v11324_v37 }
 0xf8a   :  { %v9186_v8 = vpop.f32.mrb[48].mxu0 }
 0xf8b   :  { %v2571_v16 = vpop.f32.mrb[49].mxu0  ;;  %v2649_v28 = vmul.f32 0.125, %v9186_v8 }
 0xf8c   :  { %v2647_v59 = vmul.f32 0.125, %v2571_v16  ;;  %v9187_v36 = vpop.f32.mrb[50].mxu0 }
 0xf8d   :  { %v2574_v54 = vpop.f32.mrb[51].mxu0  ;;  %v2650_v32 = vmul.f32 0.125, %v9187_v36  ;;  %v2657_v47 = vsel %vm213_vm6, -1e+30, %v2649_v28 }
 0xf8e   :  { %v2648_v12 = vmul.f32 0.125, %v2574_v54  ;;  %v2655_v63 = vsel %vm213_vm6, -1e+30, %v2647_v59  ;;  %v2669_v23 = vsel %vm720_vm7, %v2657_v47, -inf }
 0xf8f   :  { %v2663_v17 = vsel %vm720_vm7, %v2655_v63, -inf  ;;  %v2658_v48 = vsel %vm213_vm6, -1e+30, %v2650_v32 }
 0xf90   :  { %2664 = vmax.xlane.f32.xlu0 %v2663_v17  ;;  %v2656_v15 = vsel %vm213_vm6, -1e+30, %v2648_v12  ;;  %v2672_v18 = vsel %vm720_vm7, %v2658_v48, -inf }
 0xf91   :  { %v2666_v4 = vsel %vm720_vm7, %v2656_v15, -inf }
 0xf92   :  { %2667 = vmax.xlane.f32.xlu1 %v2666_v4 }
 0xf94   :  { %2670 = vmax.xlane.f32.xlu0 %v2669_v23 }
 0xf96   :  { %2673 = vmax.xlane.f32.xlu1 %v2672_v18 }
 0xf9a   :  { %v9194_v22 = vpop.f32.mrb[80].mxu1 }
 0xf9b   :  { %v2632_v24 = vpop.f32.mrb[81].mxu1  ;;  %v2653_v41 = vmul.f32 0.125, %v9194_v22 }
 0xf9c   :  { %v2651_v19 = vmul.f32 0.125, %v2632_v24  ;;  %v9195_v3 = vpop.f32.mrb[82].mxu1 }
 0xf9d   :  { %v2635_v2 = vpop.f32.mrb[83].mxu1  ;;  %v2654_v30 = vmul.f32 0.125, %v9195_v3  ;;  %v2661_v20 = vsel %vm213_vm6, -1e+30, %v2653_v41 }
 0xf9e   :  { %v2652_v5 = vmul.f32 0.125, %v2635_v2  ;;  %v2659_v42 = vsel %vm213_vm6, -1e+30, %v2651_v19  ;;  %v2681_v45 = vsel %vm720_vm7, %v2661_v20, -inf }
 0xf9f   :  { %v2675_v21 = vsel %vm720_vm7, %v2659_v42, -inf  ;;  %v2662_v6 = vsel %vm213_vm6, -1e+30, %v2654_v30 }
 0xfa0   :  { %2676 = vmax.xlane.f32.xlu0 %v2675_v21  ;;  %v2660_v58 = vsel %vm213_vm6, -1e+30, %v2652_v5  ;;  %v2684_v34 = vsel %vm720_vm7, %v2662_v6, -inf }
 0xfa1   :  { %v2678_v49 = vsel %vm720_vm7, %v2660_v58, -inf }
 0xfa2   :  { %2679 = vmax.xlane.f32.xlu1 %v2678_v49 }
 0xfa4   :  { %2682 = vmax.xlane.f32.xlu0 %v2681_v45 }
 0xfa6   :  { %2685 = vmax.xlane.f32.xlu1 %v2684_v34 }
0x101d   :  { %v2665_v40 = vpop.xlane.xlu0 %2664 }
0x101e   :  { %v2687_v38 = vsub.f32 %v2655_v63, %v2665_v40 }
0x101f   :  { %v2668_v29 = vpop.xlane.xlu1 %2667 }
0x1020   :  { %v2688_v9 = vsub.f32 %v2656_v15, %v2668_v29  ;;  %v2695_v11 = vmul.f32 1.442695, %v2687_v38 }
0x1021   :  { %v2671_v0 = vpop.xlane.xlu0 %2670 }
0x1022   :  { %v2689_v10 = vsub.f32 %v2657_v47, %v2671_v0  ;;  %v2697_v28 = vmul.f32 1.442695, %v2688_v9 }
0x1023   :  { %v2674_v39 = vpop.xlane.xlu1 %2673 }
0x1024   :  { %v2699_v8 = vmul.f32 1.442695, %v2689_v10  ;;  %v2690_v16 = vsub.f32 %v2658_v48, %v2674_v39 }
0x1026   :  { %9873 = vpow2.f32 %v2699_v8  ;;  %v2701_v59 = vmul.f32 1.442695, %v2690_v16 }
0x1027   :  { %9875 = vpow2.f32 %v2695_v11 }
0x1028   :  { %9877 = vpow2.f32 %v2701_v59 }
0x1029   :  { %9879 = vpow2.f32 %v2697_v28 }
0x102d   :  { %v2677_v36 = vpop.xlane.xlu0 %2676 }
0x102e   :  { %v2691_v32 = vsub.f32 %v2659_v42, %v2677_v36 }
0x102f   :  { %v2680_v30 = vpop.xlane.xlu1 %2679 }
0x1030   :  { %v11364_v54 = vpop.eup %9873  ;;  %v2703_v23 = vmul.f32 1.442695, %v2691_v32  ;;  %v2692_v21 = vsub.f32 %v2660_v58, %v2680_v30 }
0x1031   :  { %v9876_v12 = vpop.eup %9875  ;;  %v2683_v63 = vpop.xlane.xlu0 %2682  ;;  %v2717_v17 = vsel %vm720_vm7, %v11364_v54, 0.0 }
0x1032   :  { %v9878_v15 = vpop.eup %9877  ;;  %v2693_v47 = vsub.f32 %v2661_v20, %v2683_v63  ;;  %2718 = vadd.xlane.f32.xlu0 %v2717_v17  ;;  %v2711_v22 = vsel %vm720_vm7, %v9876_v12, 0.0  ;;  %v2705_v49 = vmul.f32 1.442695, %v2692_v21 }
0x1033   :  { %v2720_v4 = vsel %vm720_vm7, %v9878_v15, 0.0  ;;  %v9880_v48 = vpop.eup %9879  ;;  %v2686_v5 = vpop.xlane.xlu1 %2685 }
0x1034   :  { %v2707_v18 = vmul.f32 1.442695, %v2693_v47  ;;  %2721 = vadd.xlane.f32.xlu1 %v2720_v4  ;;  %v2714_v24 = vsel %vm720_vm7, %v9880_v48, 0.0  ;;  %v2694_v42 = vsub.f32 %v2662_v6, %v2686_v5 }
0x1036   :  { %9881 = vpow2.f32 %v2707_v18  ;;  %2712 = vadd.xlane.f32.xlu0 %v2711_v22  ;;  %v2709_v20 = vmul.f32 1.442695, %v2694_v42 }
0x1037   :  { %9883 = vpow2.f32 %v2703_v23 }
0x1038   :  { %2715 = vadd.xlane.f32.xlu1 %v2714_v24  ;;  %9885 = vpow2.f32 %v2709_v20 }
0x1039   :  { %9887 = vpow2.f32 %v2705_v49 }
0x1040   :  { %v11371_v41 = vpop.eup %9881 }
0x1041   :  { %v2729_v19 = vsel %vm720_vm7, %v11371_v41, 0.0  ;;  %v11375_v3 = vpop.eup %9883 }
0x1042   :  { %2730 = vadd.xlane.f32.xlu0 %v2729_v19  ;;  %v2723_v2 = vsel %vm720_vm7, %v11375_v3, 0.0 }
0x1046   :  { %2724 = vadd.xlane.f32.xlu0 %v2723_v2 }
0x1049   :  { %2879 = vrot.lane.b32.xlu1 %v11301_v61, %s10268_s26  ;;  %v9886_v61 = vpop.eup %9885 }
0x104a   :  { %v9888_v45 = vpop.eup %9887 }
0x104b   :  { %v2726_v6 = vsel %vm720_vm7, %v9888_v45, 0.0 }
0x104d   :  { %2950 = vrot.lane.b32.xlu1 %v11312_v14, %s10268_s26  ;;  %v2732_v14 = vsel %vm720_vm7, %v9886_v61, 0.0 }
0x105c   :  { %2877 = vrot.lane.b32.xlu0 %v11289_v7, %s10268_s26 }
0x1060   :  { %2873 = vrot.lane.b32.xlu0 %v11297_v25, %s10268_s26 }
0x1064   :  { %2944 = vrot.lane.b32.xlu0 %v11310_v35, %s10268_s26 }
0x1071   :  { %2733 = vadd.xlane.f32.xlu1 %v2732_v14 }
0x1075   :  { %2727 = vadd.xlane.f32.xlu1 %v2726_v6 }
0x1086   :  { %2871 = vrot.lane.b32.xlu1 %v11287_v1, %s10268_s26 }
0x108a   :  { %2952 = vrot.lane.b32.xlu1 %v11329_v26, %s10268_s26 }
0x108e   :  { %2946 = vrot.lane.b32.xlu1 %v11324_v37, %s10268_s26 }
0x10bf   :  { %v2719_v7 = vpop.xlane.xlu0 %2718 }
0x10c1   :  { %v2722_v25 = vpop.xlane.xlu1 %2721 }
0x10c2   :  { %9889 = vrcp.f32 %v2722_v25 }
0x10c3   :  { %v2713_v35 = vpop.xlane.xlu0 %2712 }
0x10c4   :  { %9891 = vrcp.f32 %v2713_v35 }
0x10c5   :  { %9893 = vrcp.f32 %v2719_v7  ;;  %v2716_v58 = vpop.xlane.xlu1 %2715 }
0x10c6   :  { %9895 = vrcp.f32 %v2716_v58 }
0x10c9   :  { %v2880_v8 = vpop.permute.xlu1 %2879 }
0x10ca   :  { %v2891_v36 = vsel %vm579_vm5, %v2880_v8, 0 }
0x10cc   :  { %v9890_v34 = vpop.eup %9889 }
0x10cd   :  { %v2746_v1 = vmul.f32 %v9890_v34, %v9878_v15  ;;  %v2951_v59 = vpop.permute.xlu1 %2950 }
0x10ce   :  { %v9892_v40 = vpop.eup %9891  ;;  %v2961_v30 = vsel %vm579_vm5, %v2951_v59, 0 }
0x10cf   :  { %v9894_v38 = vpop.eup %9893  ;;  %v2731_v29 = vpop.xlane.xlu0 %2730  ;;  %v2743_v9 = vmul.f32 %v9892_v40, %v9876_v12 }
0x10d0   :  { %v9896_v0 = vpop.eup %9895  ;;  %v2745_v26 = vmul.f32 %v9894_v38, %v11364_v54 }
0x10d1   :  { %v2744_v10 = vmul.f32 %v9896_v0, %v9880_v48 }
0x10d2   :  { %v2752_v39 = vpack.c.bf16 %v2746_v1, %v2745_v26 }
0x10d3   :  { %v2725_v11 = vpop.xlane.xlu0 %2724  ;;  %v2751_v37 = vpack.c.bf16 %v2744_v10, %v2743_v9 }
0x10d5   :  { %9200 = vmatprep.mubr.msk.bf16.mxu0 %vm720_vm7, %v2751_v37 }
0x10d6   :  { %9201 = vmatmul.mubr.msk.bf16.vlgmr.msra.gmra.mrb[52].mxu0 %vm720_vm7, %v2752_v39 }
0x10d7   :  { %9205 = vmatpush3.bf16.msra.mxu0 %v11331_v53  ;;  %v2878_v16 = vpop.permute.xlu0 %2877 }
0x10d8   :  { %9206 = vmatprep.subr.bf16.mxu0 %v11326_v57  ;;  %9547 = vmatprep.subr.msk.bf16.mxu1 %vm579_vm5, %v2878_v16  ;;  %v2888_v28 = vsel %vm579_vm5, %v2878_v16, 0 }
0x10d9   :  { %9213 = vmatpush3.bf16.xpose.msra.mxu1 %v2888_v28 }
0x10da   :  { %9548 = vmatprep.subr.msk.bf16.mxu1 %vm579_vm5, %v2880_v8 }
0x10db   :  { %9207 = vmatpush3.bf16.msra.mxu0 %v11326_v57  ;;  %v2874_v63 = vpop.permute.xlu0 %2873 }
0x10dc   :  { %9549 = vmatprep.subr.msk.bf16.mxu0 %vm579_vm5, %v2951_v59 }
0x10df   :  { %v2945_v2 = vpop.permute.xlu0 %2944 }
0x10e1   :  { %9215 = vmatpush3.bf16.xpose.msra.mxu1 %v2891_v36 }
0x10fe   :  { %v2734_v54 = vpop.xlane.xlu1 %2733 }
0x10ff   :  { %9897 = vrcp.f32 %v2734_v54 }
0x1100   :  { %9899 = vrcp.f32 %v2725_v11 }
0x1101   :  { %9901 = vrcp.f32 %v2731_v29 }
0x1102   :  { %v2728_v32 = vpop.xlane.xlu1 %2727 }
0x1103   :  { %9903 = vrcp.f32 %v2728_v32 }
0x1106   :  { %v2872_v12 = vpop.permute.xlu1 %2871 }
0x1107   :  { %9216 = vmatprep.mubr.msk.bf16.mxu1 %vm579_vm5, %v2872_v12 }
0x1108   :  { %9217 = vmatmul.mubr.msk.bf16.vlgmr.msra.gmra.mrb[84].mxu1 %vm579_vm5, %v2874_v63 }
0x1109   :  { %v9898_v17 = vpop.eup %9897 }
0x110a   :  { %v9900_v15 = vpop.eup %9899  ;;  %v2750_v48 = vmul.f32 %v9898_v17, %v9886_v61  ;;  %v2953_v5 = vpop.permute.xlu1 %2952 }
0x110b   :  { %v9902_v47 = vpop.eup %9901  ;;  %v2747_v23 = vmul.f32 %v9900_v15, %v11375_v3  ;;  %v2964_v3 = vsel %vm579_vm5, %v2953_v5, 0 }
0x110c   :  { %v2749_v22 = vmul.f32 %v9902_v47, %v11371_v41 }
0x110d   :  { %v9904_v4 = vpop.eup %9903 }
0x110e   :  { %v2748_v18 = vmul.f32 %v9904_v4, %v9888_v45  ;;  %v2754_v19 = vpack.c.bf16 %v2750_v48, %v2749_v22  ;;  %v2947_v42 = vpop.permute.xlu1 %2946 }
0x1110   :  { %v2753_v24 = vpack.c.bf16 %v2748_v18, %v2747_v23 }
0x1112   :  { %9208 = vmatprep.mubr.msk.bf16.mxu0 %vm720_vm7, %v2753_v24 }
0x1113   :  { %9209 = vmatmul.mubr.msk.bf16.vlgmr.msra.gmra.mrb[56].mxu0 %vm720_vm7, %v2754_v19 }
0x1114   :  { %9221 = vmatpush3.bf16.xpose.msra.mxu0 %v2961_v30  ;;  %9224 = vmatprep.mubr.msk.bf16.mxu0 %vm579_vm5, %v2945_v2 }
0x1115   :  { %9550 = vmatprep.subr.msk.bf16.mxu0 %vm579_vm5, %v2953_v5 }
0x111c   :  { %9223 = vmatpush3.bf16.xpose.msra.mxu0 %v2964_v3 }
0x1123   :  { %9225 = vmatmul.mubr.msk.bf16.vlgmr.msra.gmra.mrb[60].mxu0 %vm579_vm5, %v2947_v42 }
0x11a9   :  { %v11419_v41 = vpop.f32.mrb[52].mxu0 }
0x11aa   :  { %v11421_v21 = vpop.f32.mrb[53].mxu0 }
0x11ab   :  { %v11423_v20 = vpop.f32.mrb[54].mxu0 }
0x11ac   :  { %v2866_v49 = vpack.c.bf16 %v11423_v20, %v11419_v41  ;;  %v11427_v61 = vpop.f32.mrb[55].mxu0 }
0x11ad   :  { %v2865_v14 = vpack.c.bf16 %v11427_v61, %v11421_v21  ;;  %v8301_v21 = vld [vmem:[%s13285_s9 + $0x1] ss:$0 sm:$0xff] }
0x11db   :  { %v9218_v45 = vpop.f32.mrb[84].mxu1 }
0x11dc   :  { %v2927_v6 = vpop.f32.mrb[85].mxu1  ;;  %v3017_v7 = vmul.f32 0.125, %v9218_v45 }
0x11dd   :  { %v3015_v25 = vmul.f32 0.125, %v2927_v6  ;;  %v9219_v35 = vpop.f32.mrb[86].mxu1 }
0x11de   :  { %v2930_v58 = vpop.f32.mrb[87].mxu1  ;;  %v3025_v29 = vsel %vm213_vm6, -1e+30, %v3017_v7  ;;  %v3018_v0 = vmul.f32 0.125, %v9219_v35 }
0x11df   :  { %v3023_v34 = vsel %vm213_vm6, -1e+30, %v3015_v25  ;;  %v3016_v40 = vmul.f32 0.125, %v2930_v58  ;;  %v3037_v10 = vsel %vm720_vm7, %v3025_v29, -inf }
0x11e0   :  { %v3031_v38 = vsel %vm720_vm7, %v3023_v34, -inf  ;;  %v3026_v26 = vsel %vm213_vm6, -1e+30, %v3018_v0 }
0x11e1   :  { %v3024_v1 = vsel %vm213_vm6, -1e+30, %v3016_v40  ;;  %3032 = vmax.xlane.f32.xlu0 %v3031_v38  ;;  %v3040_v8 = vsel %vm720_vm7, %v3026_v26, -inf }
0x11e2   :  { %v3034_v9 = vsel %vm720_vm7, %v3024_v1, -inf }
0x11e3   :  { %3035 = vmax.xlane.f32.xlu1 %v3034_v9 }
0x11e5   :  { %3038 = vmax.xlane.f32.xlu0 %v3037_v10 }
0x11e6   :  { %v11442_v11 = vpop.f32.mrb[56].mxu0 }
0x11e7   :  { %v11444_v37 = vpop.f32.mrb[57].mxu0 }
0x11e8   :  { %v11446_v39 = vpop.f32.mrb[58].mxu0 }
0x11e9   :  { %v2868_v16 = vpack.c.bf16 %v11446_v39, %v11442_v11  ;;  %v11451_v28 = vpop.f32.mrb[59].mxu0  ;;  %3041 = vmax.xlane.f32.xlu0 %v3040_v8 }
0x11ea   :  { %v2867_v59 = vpack.c.bf16 %v11451_v28, %v11444_v37 }
0x11f6   :  { %v9226_v36 = vpop.f32.mrb[60].mxu0 }
0x11f7   :  { %v3000_v54 = vpop.f32.mrb[61].mxu0  ;;  %v3021_v32 = vmul.f32 0.125, %v9226_v36 }
0x11f8   :  { %v3019_v12 = vmul.f32 0.125, %v3000_v54  ;;  %v9227_v63 = vpop.f32.mrb[62].mxu0 }
0x11f9   :  { %v3003_v17 = vpop.f32.mrb[63].mxu0  ;;  %v3022_v47 = vmul.f32 0.125, %v9227_v63  ;;  %v3029_v23 = vsel %vm213_vm6, -1e+30, %v3021_v32 }
0x11fa   :  { %v3027_v15 = vsel %vm213_vm6, -1e+30, %v3019_v12  ;;  %v3020_v4 = vmul.f32 0.125, %v3003_v17  ;;  %v3049_v19 = vsel %vm720_vm7, %v3029_v23, -inf }
0x11fb   :  { %v3043_v48 = vsel %vm720_vm7, %v3027_v15, -inf  ;;  %v3030_v24 = vsel %vm213_vm6, -1e+30, %v3022_v47 }
0x11fc   :  { %v3028_v18 = vsel %vm213_vm6, -1e+30, %v3020_v4  ;;  %3044 = vmax.xlane.f32.xlu0 %v3043_v48  ;;  %v3052_v2 = vsel %vm720_vm7, %v3030_v24, -inf }
0x11fd   :  { %v3046_v22 = vsel %vm720_vm7, %v3028_v18, -inf }
0x11fe   :  { %3047 = vmax.xlane.f32.xlu1 %v3046_v22 }
0x1200   :  { %3050 = vmax.xlane.f32.xlu0 %v3049_v19 }
0x1202   :  { %3053 = vmax.xlane.f32.xlu1 %v3052_v2 }
0x126e   :  { %v3033_v30 = vpop.xlane.xlu0 %3032 }
0x126f   :  { %v3055_v5 = vsub.f32 %v3023_v34, %v3033_v30 }
0x1270   :  { %v3036_v3 = vpop.xlane.xlu1 %3035 }
0x1271   :  { %v3063_v42 = vmul.f32 1.442695, %v3055_v5  ;;  %v3056_v45 = vsub.f32 %v3024_v1, %v3036_v3 }
0x1272   :  { %v3039_v6 = vpop.xlane.xlu0 %3038 }
0x1273   :  { %9905 = vpow2.f32 %v3063_v42  ;;  %v3065_v7 = vmul.f32 1.442695, %v3056_v45  ;;  %v3057_v25 = vsub.f32 %v3025_v29, %v3039_v6 }
0x1275   :  { %9907 = vpow2.f32 %v3065_v7  ;;  %v3067_v35 = vmul.f32 1.442695, %v3057_v25 }
0x1276   :  { %v3042_v58 = vpop.xlane.xlu0 %3041 }
0x1277   :  { %9909 = vpow2.f32 %v3067_v35  ;;  %v3058_v40 = vsub.f32 %v3026_v26, %v3042_v58 }
0x1279   :  { %v3069_v38 = vmul.f32 1.442695, %v3058_v40 }
0x127b   :  { %9911 = vpow2.f32 %v3069_v38 }
0x127d   :  { %v9906_v0 = vpop.eup %9905 }
0x127e   :  { %v3079_v9 = vsel %vm720_vm7, %v9906_v0, 0.0 }
0x127f   :  { %v9908_v10 = vpop.eup %9907  ;;  %3080 = vadd.xlane.f32.xlu0 %v3079_v9 }
0x1280   :  { %v3082_v34 = vsel %vm720_vm7, %v9908_v10, 0.0 }
0x1281   :  { %v11469_v8 = vpop.eup %9909  ;;  %3083 = vadd.xlane.f32.xlu1 %v3082_v34 }
0x1282   :  { %v3085_v29 = vsel %vm720_vm7, %v11469_v8, 0.0 }
0x1283   :  { %3086 = vadd.xlane.f32.xlu0 %v3085_v29 }
0x1285   :  { %v9912_v1 = vpop.eup %9911 }
0x1286   :  { %v3088_v36 = vsel %vm720_vm7, %v9912_v1, 0.0 }
0x1287   :  { %3089 = vadd.xlane.f32.xlu1 %v3088_v36 }
0x1289   :  { %v3045_v26 = vpop.xlane.xlu0 %3044 }
0x128a   :  { %v3059_v54 = vsub.f32 %v3027_v15, %v3045_v26 }
0x128b   :  { %v3048_v15 = vpop.xlane.xlu1 %3047 }
0x128c   :  { %v3071_v63 = vmul.f32 1.442695, %v3059_v54  ;;  %v3060_v2 = vsub.f32 %v3028_v18, %v3048_v15 }
0x128d   :  { %v3051_v32 = vpop.xlane.xlu0 %3050 }
0x128e   :  { %v3061_v12 = vsub.f32 %v3029_v23, %v3051_v32  ;;  %v3073_v30 = vmul.f32 1.442695, %v3060_v2  ;;  %v9622_v32 = vld [vmem:[%s13284_s8 + $0x68] sm:$0xff]  }
0x128f   :  { %v3054_v22 = vpop.xlane.xlu1 %3053 }
0x1290   :  { %v3075_v17 = vmul.f32 1.442695, %v3061_v12  ;;  %v3062_v19 = vsub.f32 %v3030_v24, %v3054_v22 }
0x1292   :  { %9913 = vpow2.f32 %v3075_v17 }
0x1293   :  { %9915 = vpow2.f32 %v3071_v63 }
0x1298   :  { %3127 = vrot.lane.b32.xlu1 %v11299_v51, %s10268_s26  ;;  %v3077_v51 = vmul.f32 1.442695, %v3062_v19 }
0x129a   :  { %9917 = vpow2.f32 %v3077_v51 }
0x129b   :  { %9919 = vpow2.f32 %v3073_v30 }
0x129c   :  { %v11476_v47 = vpop.eup %9913  ;;  %3188 = vrot.lane.b32.xlu1 %v11331_v53, %s10268_s26 }
0x129d   :  { %v3097_v4 = vsel %vm720_vm7, %v11476_v47, 0.0  ;;  %v11482_v48 = vpop.eup %9915 }
0x129e   :  { %3098 = vadd.xlane.f32.xlu0 %v3097_v4  ;;  %v3091_v23 = vsel %vm720_vm7, %v11482_v48, 0.0 }
0x12a2   :  { %3092 = vadd.xlane.f32.xlu0 %v3091_v23 }
0x12a4   :  { %v9918_v53 = vpop.eup %9917 }
0x12a5   :  { %v3100_v5 = vsel %vm720_vm7, %v9918_v53, 0.0  ;;  %v9920_v3 = vpop.eup %9919 }
0x12a6   :  { %v3094_v42 = vsel %vm720_vm7, %v9920_v3, 0.0 }
0x12b8   :  { %3125 = vrot.lane.b32.xlu0 %v11303_v56, %s10268_s26 }
0x12c0   :  { %3101 = vadd.xlane.f32.xlu1 %v3100_v5 }
0x12c4   :  { %3095 = vadd.xlane.f32.xlu1 %v3094_v42  ;;  %v9624_v42 = vld [vmem:[%s13284_s8 + $0x78] sm:$0xff]  }
0x12d5   :  { %3190 = vrot.lane.b32.xlu1 %v11326_v57, %s10268_s26 }
0x130c   :  { %v3081_v24 = vpop.xlane.xlu0 %3080 }
0x130d   :  { %9921 = vrcp.f32 %v3081_v24 }
0x130e   :  { %v3084_v18 = vpop.xlane.xlu1 %3083 }
0x130f   :  { %9923 = vrcp.f32 %v3084_v18 }
0x1310   :  { %v3087_v38 = vpop.xlane.xlu0 %3086 }
0x1314   :  { %v3090_v45 = vpop.xlane.xlu1 %3089 }
0x1315   :  { %9925 = vrcp.f32 %v3090_v45 }
0x1316   :  { %9927 = vrcp.f32 %v3087_v38 }
0x1317   :  { %v9922_v6 = vpop.eup %9921 }
0x1318   :  { %v3128_v7 = vpop.permute.xlu1 %3127  ;;  %v3111_v56 = vmul.f32 %v9922_v6, %v9906_v0  ;;  %v9621_v0 = vld [vmem:[%s13284_s8 + $0x60] sm:$0xff]   ;;  %v9626_v6 = vld [vmem:[%s13284_s8 + $0x48] sm:$0xff]  }
0x1319   :  { %v9924_v25 = vpop.eup %9923 }
0x131a   :  { %v3112_v35 = vmul.f32 %v9924_v25, %v9908_v10  ;;  %v9628_v25 = vld [vmem:[%s13284_s8 + $0x58] sm:$0xff]  }
0x131c   :  { %v3189_v58 = vpop.permute.xlu1 %3188  ;;  %v3119_v40 = vpack.c.bf16 %v3112_v35, %v3111_v56 }
0x131d   :  { %9236 = vmatprep.subr.bf16.mxu0 %v3189_v58 }
0x131e   :  { %9232 = vmatprep.mubr.msk.bf16.mxu1 %vm720_vm7, %v3119_v40  ;;  %9237 = vmatpush3.bf16.msra.mxu0 %v3189_v58 }
0x131f   :  { %v9926_v34 = vpop.eup %9925 }
0x1320   :  { %v9928_v36 = vpop.eup %9927  ;;  %v3114_v26 = vmul.f32 %v9926_v34, %v9912_v1  ;;  %v9623_v1 = vld [vmem:[%s13284_s8 + $0x70] sm:$0xff]  }
0x1321   :  { %v3113_v10 = vmul.f32 %v9928_v36, %v11469_v8 }
0x1323   :  { %v3120_v54 = vpack.c.bf16 %v3114_v26, %v3113_v10 }
0x132b   :  { %v3099_v57 = vpop.xlane.xlu0 %3098 }
0x132f   :  { %v3093_v9 = vpop.xlane.xlu0 %3092 }
0x1333   :  { %v3126_v29 = vpop.permute.xlu0 %3125 }
0x1334   :  { %9228 = vmatprep.subr.bf16.mxu1 %v3126_v29 }
0x1335   :  { %9229 = vmatpush3.bf16.msra.mxu1 %v3126_v29 }
0x1336   :  { %9230 = vmatprep.subr.bf16.mxu1 %v3128_v7 }
0x1339   :  { %9231 = vmatpush3.bf16.msra.mxu1 %v3128_v7  ;;  %v9627_v7 = vld [vmem:[%s13284_s8 + $0x50] sm:$0xff]  }
0x133a   :  { %9244 = vmatprep.subr.bf16.mxu1 %v9621_v0 }
0x133c   :  { %9233 = vmatmul.mubr.msk.bf16.vlgmr.msra.gmra.mrb[88].mxu1 %vm720_vm7, %v3120_v54 }
0x133d   :  { %9245 = vmatpush3.bf16.msra.mxu1 %v9621_v0 }
0x133e   :  { %9246 = vmatprep.subr.bf16.mxu1 %v9622_v32 }
0x1341   :  { %9247 = vmatpush3.bf16.msra.mxu1 %v9622_v32 }
0x1342   :  { %9248 = vmatprep.subr.bf16.mxu1 %v9623_v1 }
0x1345   :  { %9249 = vmatpush3.bf16.msra.mxu1 %v9623_v1 }
0x1346   :  { %9250 = vmatprep.subr.bf16.mxu1 %v9624_v42 }
0x1349   :  { %9251 = vmatpush3.bf16.msra.mxu1 %v9624_v42 }
0x134d   :  { %v3102_v12 = vpop.xlane.xlu1 %3101 }
0x134e   :  { %9929 = vrcp.f32 %v3102_v12 }
0x134f   :  { %9931 = vrcp.f32 %v3093_v9 }
0x1350   :  { %9933 = vrcp.f32 %v3099_v57 }
0x1351   :  { %v3096_v8 = vpop.xlane.xlu1 %3095 }
0x1352   :  { %9935 = vrcp.f32 %v3096_v8 }
0x1355   :  { %v3191_v63 = vpop.permute.xlu1 %3190 }
0x1356   :  { %9238 = vmatprep.subr.bf16.mxu0 %v3191_v63 }
0x1357   :  { %9239 = vmatpush3.bf16.msra.mxu0 %v3191_v63 }
0x1358   :  { %v9930_v17 = vpop.eup %9929 }
0x1359   :  { %v9932_v4 = vpop.eup %9931  ;;  %v3118_v22 = vmul.f32 %v9930_v17, %v9918_v53 }
0x135a   :  { %v9934_v15 = vpop.eup %9933  ;;  %v3115_v19 = vmul.f32 %v9932_v4, %v11482_v48  ;;  %v9625_v48 = vld [vmem:[%s13284_s8 + $0x40] sm:$0xff]  }
0x135b   :  { %v3117_v51 = vmul.f32 %v9934_v15, %v11476_v47  ;;  %9260 = vmatprep.subr.bf16.mxu1 %v9625_v48 }
0x135c   :  { %v9936_v23 = vpop.eup %9935 }
0x135d   :  { %v3116_v2 = vmul.f32 %v9936_v23, %v9920_v3  ;;  %v3122_v5 = vpack.c.bf16 %v3118_v22, %v3117_v51 }
0x135f   :  { %v3121_v30 = vpack.c.bf16 %v3116_v2, %v3115_v19 }
0x1361   :  { %9240 = vmatprep.mubr.msk.bf16.mxu0 %vm720_vm7, %v3121_v30 }
0x1362   :  { %9241 = vmatmul.mubr.msk.bf16.vlgmr.msra.gmra.mrb[64].mxu0 %vm720_vm7, %v3122_v5 }
0x1363   :  { %3705 = vmatprep.mubr.bf16.mxu0 %v10267_v44 }
0x140f   :  { %v9234_v47 = vpop.f32.mrb[88].mxu1 }
0x1410   :  { %v3171_v53 = vpop.f32.mrb[89].mxu1 }
0x1411   :  { %v9235_v3 = vpop.f32.mrb[90].mxu1 }
0x1412   :  { %v3250_v24 = vpack.c.bf16 %v9235_v3, %v9234_v47  ;;  %v3174_v18 = vpop.f32.mrb[91].mxu1 }
0x1413   :  { %v3249_v45 = vpack.c.bf16 %v3174_v18, %v3171_v53 }
0x1415   :  { %9252 = vmatprep.mubr.msk.bf16.mxu1 %vm579_vm5, %v3249_v45 }
0x1416   :  { %9253 = vmatmul.mubr.msk.bf16.vlgmr.msra.gmra.mrb[92].mxu1 %vm579_vm5, %v3250_v24 }
0x1417   :  { %9261 = vmatpush3.bf16.msra.mxu1 %v9625_v48 }
0x1418   :  { %9262 = vmatprep.subr.bf16.mxu1 %v9626_v6 }
0x141b   :  { %9263 = vmatpush3.bf16.msra.mxu1 %v9626_v6 }
0x141c   :  { %9264 = vmatprep.subr.bf16.mxu1 %v9627_v7 }
0x141f   :  { %9265 = vmatpush3.bf16.msra.mxu1 %v9627_v7 }
0x1420   :  { %9266 = vmatprep.subr.bf16.mxu1 %v9628_v25 }
0x1423   :  { %9267 = vmatpush3.bf16.msra.mxu1 %v9628_v25 }
0x1435   :  { %v9242_v56 = vpop.f32.mrb[64].mxu0 }
0x1436   :  { %v3234_v35 = vpop.f32.mrb[65].mxu0 }
0x1437   :  { %v9243_v58 = vpop.f32.mrb[66].mxu0 }
0x1438   :  { %v3252_v40 = vpack.c.bf16 %v9243_v58, %v9242_v56  ;;  %v3237_v38 = vpop.f32.mrb[67].mxu0 }
0x1439   :  { %v3251_v57 = vpack.c.bf16 %v3237_v38, %v3234_v35 }
0x143b   :  { %9256 = vmatprep.mubr.msk.bf16.mxu1 %vm579_vm5, %v3251_v57 }
0x143c   :  { %9257 = vmatmul.mubr.msk.bf16.gmra.mrb[96].mxu1 %vm579_vm5, %v3252_v40 }
0x143d   :  { %9268 = vmatprep.mubr.msk.bf16.mxu1 %vm579_vm5, %v2865_v14 }
0x1444   :  { %9269 = vmatmul.mubr.msk.bf16.vlgmr.msra.gmra.mrb[92].mxu1 %vm579_vm5, %v2866_v49 }
0x1445   :  { %9272 = vmatprep.mubr.msk.bf16.mxu1 %vm579_vm5, %v2867_v59 }
0x144c   :  { %9273 = vmatmul.mubr.msk.bf16.gmra.mrb[96].mxu1 %vm579_vm5, %v2868_v16 }
0x144d   :  { %4339 = vmatprep.mubr.bf16.mxu1 %v10267_v44 }
0x1517   :  { %v9270_v61 = vpop.f32.mrb[92].mxu1 }
0x1518   :  { %v3424_v41 = vpop.f32.mrb[93].mxu1  ;;  %v3465_v20 = vadd.f32 %v9270_v61, %v8301_v21 }
0x1519   :  { %v3463_v49 = vadd.f32 %v8301_v21, %v3424_v41  ;;  %v9271_v14 = vpop.f32.mrb[94].mxu1 }
0x151a   :  { %v3427_v9 = vpop.f32.mrb[95].mxu1  ;;  %v11552_v11 = vadd.f32 %v3465_v20, %v11163_v62  ;;  %v3466_v39 = vadd.f32 %v9271_v14, %v8301_v21 }
0x151b   :  { %v11549_v37 = vadd.f32 %v3463_v49, %v11153_v46  ;;  %v3464_v28 = vadd.f32 %v8301_v21, %v3427_v9 }
0x151c   :  { %v11562_v46 = vadd.f32 %v3466_v39, %v11166_v50  ;;  %v3489_v0 = vsel %vm216_vm3, %v11552_v11, 0.0 }
0x151d   :  { %v11555_v16 = vadd.f32 %v3464_v28, %v11156_v33  ;;  %v3483_v59 = vsel %vm216_vm3, %v11549_v37, 0.0 }
0x151e   :  { %3484 = vadd.xlane.f32.xlu0 %v3483_v59  ;;  %v3492_v50 = vsel %vm216_vm3, %v11562_v46, 0.0 }
0x151f   :  { %v9274_v34 = vpop.f32.mrb[96].mxu1  ;;  %v3486_v29 = vsel %vm216_vm3, %v11555_v16, 0.0 }
0x1520   :  { %3487 = vadd.xlane.f32.xlu1 %v3486_v29  ;;  %v3440_v36 = vpop.f32.mrb[97].mxu1  ;;  %v3469_v32 = vadd.f32 %v9274_v34, %v8301_v21 }
0x1521   :  { %v3467_v26 = vadd.f32 %v8301_v21, %v3440_v36  ;;  %v9275_v62 = vpop.f32.mrb[98].mxu1 }
0x1522   :  { %3490 = vadd.xlane.f32.xlu0 %v3489_v0  ;;  %v3443_v33 = vpop.f32.mrb[99].mxu1  ;;  %v3470_v10 = vadd.f32 %v9275_v62, %v8301_v21  ;;  %v11580_v17 = vadd.f32 %v3469_v32, %v11183_v31  ;;  %v9629_v62 = vld [vmem:[%s13288_s12 + $0x20] ss:$8 sps:$4 sm:$0xff]   ;;  %v9632_v0 = vld [vmem:[%s13288_s12 + $0x34] ss:$8 sps:$4 sm:$0x7f]  }
0x1523   :  { %v3468_v54 = vadd.f32 %v8301_v21, %v3443_v33  ;;  %v11567_v1 = vadd.f32 %v3467_v26, %v11173_v55  ;;  %v9631_v26 = vld [vmem:[%s13288_s12 + $0x24] ss:$8 sps:$4 sm:$0xff]   ;;  %v9634_v33 = vld [vmem:[%s13288_s12 + $0x30] ss:$8 sps:$4 sm:$0x7f]  }
0x1524   :  { %v11575_v8 = vadd.f32 %v3470_v10, %v11186_v60  ;;  %v3501_v4 = vsel %vm216_vm3, %v11580_v17, 0.0  ;;  %3673 = vmatprep.subr.bf16.mxu0 %v9631_v26  ;;  %v3668_v10 = vsel %vm403_vm4, %v9634_v33, 0 }
0x1525   :  { %v11570_v12 = vadd.f32 %v3468_v54, %v11176_v43  ;;  %v3495_v55 = vsel %vm216_vm3, %v11567_v1, 0.0  ;;  %3674 = vmatpush1.bf16.msra.mxu0 %v9629_v62 }
0x1526   :  { %3493 = vadd.xlane.f32.xlu0 %v3492_v50  ;;  %v3504_v43 = vsel %vm216_vm3, %v11575_v8, 0.0  ;;  %8315 = vmatprep.subr.msk.bf16.mxu0 %vm403_vm4, %v9632_v0 }
0x1527   :  { %v3498_v63 = vsel %vm216_vm3, %v11570_v12, 0.0 }
0x1528   :  { %3499 = vadd.xlane.f32.xlu1 %v3498_v63 }
0x1529   :  { %3676 = vmatpush1.bf16.msra.mxu0 %v3668_v10 }
0x152a   :  { %3496 = vadd.xlane.f32.xlu0 %v3495_v55 }
0x152c   :  { %3505 = vadd.xlane.f32.xlu1 %v3504_v43 }
0x152e   :  { %3502 = vadd.xlane.f32.xlu0 %v3501_v4 }
0x15ab   :  { %v3485_v60 = vpop.xlane.xlu0 %3484 }
0x15ac   :  { %v3507_v15 = vmul.f32 0.033333335, %v3485_v60 }
0x15ad   :  { %v3488_v23 = vpop.xlane.xlu1 %3487 }
0x15ae   :  { %v11589_v22 = vsub.f32 %v11549_v37, %v3507_v15  ;;  %v3508_v31 = vmul.f32 0.033333335, %v3488_v23 }
0x15af   :  { %v3491_v19 = vpop.xlane.xlu0 %3490 }
0x15b0   :  { %v11592_v2 = vsub.f32 %v11555_v16, %v3508_v31  ;;  %v3509_v51 = vmul.f32 0.033333335, %v3491_v19  ;;  %v3523_v30 = vmul.f32 %v11589_v22, %v11589_v22 }
0x15b2   :  { %v11597_v5 = vsub.f32 %v11552_v11, %v3509_v51  ;;  %v3531_v42 = vsel %vm216_vm3, %v3523_v30, 0.0  ;;  %v3524_v48 = vmul.f32 %v11592_v2, %v11592_v2 }
0x15b3   :  { %v3494_v47 = vpop.xlane.xlu0 %3493  ;;  %3532 = vadd.xlane.f32.xlu0 %v3531_v42 }
0x15b4   :  { %v3510_v53 = vmul.f32 0.033333335, %v3494_v47  ;;  %v3534_v3 = vsel %vm216_vm3, %v3524_v48, 0.0  ;;  %v3525_v24 = vmul.f32 %v11597_v5, %v11597_v5 }
0x15b5   :  { %3535 = vadd.xlane.f32.xlu1 %v3534_v3  ;;  %v3500_v18 = vpop.xlane.xlu1 %3499 }
0x15b6   :  { %v11606_v45 = vsub.f32 %v11562_v46, %v3510_v53  ;;  %v3512_v6 = vmul.f32 0.033333335, %v3500_v18  ;;  %v3537_v7 = vsel %vm216_vm3, %v3525_v24, 0.0  ;;  %v8304_v53 = vld [vmem:[%s13286_s10 + $0x1] ss:$0 sm:$0xff] }
0x15b7   :  { %3538 = vadd.xlane.f32.xlu0 %v3537_v7  ;;  %v3497_v25 = vpop.xlane.xlu0 %3496 }
0x15b8   :  { %v11610_v56 = vsub.f32 %v11570_v12, %v3512_v6  ;;  %v3511_v35 = vmul.f32 0.033333335, %v3497_v25  ;;  %v3526_v58 = vmul.f32 %v11606_v45, %v11606_v45 }
0x15b9   :  { %v3506_v40 = vpop.xlane.xlu1 %3505 }
0x15ba   :  { %v11615_v38 = vsub.f32 %v11567_v1, %v3511_v35  ;;  %v3514_v57 = vmul.f32 0.033333335, %v3506_v40  ;;  %v3540_v21 = vsel %vm216_vm3, %v3526_v58, 0.0  ;;  %v3528_v61 = vmul.f32 %v11610_v56, %v11610_v56 }
0x15bb   :  { %v3503_v41 = vpop.xlane.xlu0 %3502  ;;  %3541 = vadd.xlane.f32.xlu1 %v3540_v21 }
0x15bc   :  { %v11621_v20 = vsub.f32 %v11575_v8, %v3514_v57  ;;  %v3513_v49 = vmul.f32 0.033333335, %v3503_v41  ;;  %v3527_v14 = vmul.f32 %v11615_v38, %v11615_v38  ;;  %v3546_v39 = vsel %vm216_vm3, %v3528_v61, 0.0 }
0x15be   :  { %v11626_v9 = vsub.f32 %v11580_v17, %v3513_v49  ;;  %v3543_v28 = vsel %vm216_vm3, %v3527_v14, 0.0  ;;  %v3530_v59 = vmul.f32 %v11621_v20, %v11621_v20  ;;  %v8305_v49 = vld [vmem:[%s13287_s11 + $0x1] ss:$0 sm:$0xff] }
0x15bf   :  { %3544 = vadd.xlane.f32.xlu0 %v3543_v28  ;;  %3547 = vadd.xlane.f32.xlu1 %v3546_v39 }
0x15c0   :  { %v3529_v34 = vmul.f32 %v11626_v9, %v11626_v9  ;;  %v3552_v36 = vsel %vm216_vm3, %v3530_v59, 0.0 }
0x15c2   :  { %v3549_v29 = vsel %vm216_vm3, %v3529_v34, 0.0 }
0x15c3   :  { %3550 = vadd.xlane.f32.xlu0 %v3549_v29  ;;  %3553 = vadd.xlane.f32.xlu1 %v3552_v36 }
0x1640   :  { %v3533_v54 = vpop.xlane.xlu0 %3532 }
0x1641   :  { %v3555_v32 = vmul.f32 0.033333335, %v3533_v54 }
0x1642   :  { %v3536_v50 = vpop.xlane.xlu1 %3535 }
0x1643   :  { %v3563_v63 = vadd.f32 1e-05, %v3555_v32  ;;  %v3556_v55 = vmul.f32 0.033333335, %v3536_v50 }
0x1644   :  { %v3539_v43 = vpop.xlane.xlu0 %3538 }
0x1645   :  { %9937 = vrsqrt.f32 %v3563_v63  ;;  %v3564_v4 = vadd.f32 1e-05, %v3556_v55  ;;  %v3557_v60 = vmul.f32 0.033333335, %v3539_v43 }
0x1647   :  { %9939 = vrsqrt.f32 %v3564_v4  ;;  %v3565_v15 = vadd.f32 1e-05, %v3557_v60 }
0x1648   :  { %v3542_v23 = vpop.xlane.xlu1 %3541 }
0x1649   :  { %9941 = vrsqrt.f32 %v3565_v15  ;;  %v3558_v31 = vmul.f32 0.033333335, %v3542_v23 }
0x164b   :  { %v3566_v19 = vadd.f32 1e-05, %v3558_v31 }
0x164c   :  { %v3545_v51 = vpop.xlane.xlu0 %3544  ;;  %v3548_v30 = vpop.xlane.xlu1 %3547 }
0x164d   :  { %9943 = vrsqrt.f32 %v3566_v19  ;;  %v3559_v42 = vmul.f32 0.033333335, %v3545_v51  ;;  %v3560_v48 = vmul.f32 0.033333335, %v3548_v30  ;;  %v9635_v51 = vld [vmem:[%s13290_s14 + $0xc0] sm:$0xff]   ;;  %v9638_v30 = vld [vmem:[%s13290_s14 + $0x88] sm:$0xff]  }
0x164e   :  { %8819 = vmatprep.subr.bf16.mxu0 %v9635_v51 }
0x164f   :  { %v9938_v47 = vpop.eup %9937  ;;  %v3567_v3 = vadd.f32 1e-05, %v3559_v42  ;;  %v3568_v24 = vadd.f32 1e-05, %v3560_v48  ;;  %v9639_v42 = vld [vmem:[%s13290_s14 + $0xd0] sm:$0xff]  }
0x1650   :  { %v3579_v18 = vmul.f32 %v9938_v47, %v11589_v22  ;;  %v3551_v6 = vpop.xlane.xlu0 %3550  ;;  %v3554_v7 = vpop.xlane.xlu1 %3553  ;;  %v9640_v48 = vld [vmem:[%s13290_s14 + $0x90] sm:$0xff]   ;;  %v9641_v47 = vld [vmem:[%s13290_s14 + $0xd8] sm:$0xff]  }
0x1651   :  { %v9940_v25 = vpop.eup %9939  ;;  %9945 = vrsqrt.f32 %v3567_v3  ;;  %v3561_v35 = vmul.f32 0.033333335, %v3551_v6  ;;  %v3562_v58 = vmul.f32 0.033333335, %v3554_v7  ;;  %v9643_v3 = vld [vmem:[%s13290_s14 + $0xe0] sm:$0xff]   ;;  %v9646_v6 = vld [vmem:[%s13290_s14 + $0xa8] sm:$0xff]  }
0x1652   :  { %v3593_v40 = vmul.f32 %v8304_v53, %v3579_v18  ;;  %v3580_v57 = vmul.f32 %v9940_v25, %v11592_v2  ;;  %9947 = vrsqrt.f32 %v3568_v24  ;;  %v9644_v24 = vld [vmem:[%s13290_s14 + $0xa0] sm:$0xff]   ;;  %v9645_v18 = vld [vmem:[%s13290_s14 + $0xe8] sm:$0xff]   ;;  %v9647_v7 = vld [vmem:[%s13290_s14 + $0xf0] sm:$0xff]  }
0x1653   :  { %v9942_v21 = vpop.eup %9941  ;;  %v3569_v61 = vadd.f32 1e-05, %v3561_v35  ;;  %v3570_v41 = vadd.f32 1e-05, %v3562_v58  ;;  %v9648_v25 = vld [vmem:[%s13290_s14 + $0xb0] sm:$0xff]   ;;  %v9649_v35 = vld [vmem:[%s13290_s14 + $0xf8] sm:$0xff]  }
0x1654   :  { %v3594_v14 = vmul.f32 %v8304_v53, %v3580_v57  ;;  %v3607_v22 = vadd.f32 %v8305_v49, %v3593_v40  ;;  %v3581_v39 = vmul.f32 %v9942_v21, %v11597_v5  ;;  %v9650_v58 = vld [vmem:[%s13290_s14 + $0xb8] sm:$0xff]   ;;  %v8310_v40 = vld [vmem:[%s13289_s13 + $0x2] sm:$0x3] }
0x1655   :  { %9949 = vrsqrt.f32 %v3569_v61  ;;  %v11723_v57 = vrot.slane %v8310_v40, %v11007_v13  ;;  %v11726_v21 = vrot.slane %v8310_v40, %v11010_v27 }
0x1656   :  { %v3608_v28 = vadd.f32 %v8305_v49, %v3594_v14  ;;  %9951 = vrsqrt.f32 %v3570_v41  ;;  %v3595_v2 = vmul.f32 %v8304_v53, %v3581_v39 }
0x1657   :  { %v9944_v59 = vpop.eup %9943 }
0x1658   :  { %v3615_v34 = vpack.c.bf16 %v3608_v28, %v3607_v22  ;;  %v3582_v29 = vmul.f32 %v9944_v59, %v11606_v45  ;;  %v3609_v54 = vadd.f32 %v8305_v49, %v3595_v2 }
0x165a   :  { %8316 = vmatmul.mubr.msk.bf16.vlgmr.msra.gmra.mrb[68].mxu0 %vm216_vm3, %v3615_v34  ;;  %v3596_v36 = vmul.f32 %v8304_v53, %v3582_v29 }
0x165b   :  { %v9946_v26 = vpop.eup %9945  ;;  %3715 = vmatprep.mubr.bf16.mxu0 %v10267_v44 }
0x165c   :  { %v9948_v62 = vpop.eup %9947  ;;  %v3610_v0 = vadd.f32 %v8305_v49, %v3596_v36  ;;  %v3583_v33 = vmul.f32 %v9946_v26, %v11615_v38 }
0x165d   :  { %v3584_v10 = vmul.f32 %v9948_v62, %v11610_v56 }
0x165e   :  { %v3616_v32 = vpack.c.bf16 %v3610_v0, %v3609_v54  ;;  %v3597_v50 = vmul.f32 %v8304_v53, %v3583_v33 }
0x165f   :  { %v9950_v5 = vpop.eup %9949  ;;  %v3598_v63 = vmul.f32 %v8304_v53, %v3584_v10 }
0x1660   :  { %v9952_v55 = vpop.eup %9951  ;;  %v3611_v45 = vadd.f32 %v8305_v49, %v3597_v50  ;;  %v3585_v4 = vmul.f32 %v9950_v5, %v11626_v9  ;;  %v9637_v9 = vld [vmem:[%s13290_s14 + $0xc8] sm:$0xff]  }
0x1661   :  { %v3612_v43 = vadd.f32 %v8305_v49, %v3598_v63  ;;  %v3586_v60 = vmul.f32 %v9952_v55, %v11621_v20  ;;  %v9636_v20 = vld [vmem:[%s13290_s14 + $0x80] sm:$0xff]  }
0x1662   :  { %8317 = vmatmul.mubr.msk.bf16.gmra.mrb[72].mxu0 %vm216_vm3, %v3616_v32  ;;  %v3599_v38 = vmul.f32 %v8304_v53, %v3585_v4 }
0x1663   :  { %3725 = vmatprep.mubr.bf16.mxu0 %v10267_v44  ;;  %v3617_v15 = vpack.c.bf16 %v3612_v43, %v3611_v45  ;;  %v3600_v23 = vmul.f32 %v8304_v53, %v3586_v60  ;;  %8820 = vmatpush3.bf16.msra.mxu0 %v9636_v20  ;;  %v9642_v53 = vld [vmem:[%s13290_s14 + $0x98] sm:$0xff]  }
0x1664   :  { %v3613_v56 = vadd.f32 %v8305_v49, %v3599_v38  ;;  %8821 = vmatprep.subr.bf16.mxu0 %v9637_v9 }
0x1665   :  { %v3614_v31 = vadd.f32 %v8305_v49, %v3600_v23 }
0x1667   :  { %v3618_v19 = vpack.c.bf16 %v3614_v31, %v3613_v56  ;;  %8822 = vmatpush3.bf16.msra.mxu0 %v9638_v30 }
0x1668   :  { %8823 = vmatprep.subr.bf16.mxu0 %v9639_v42 }
0x166a   :  { %8318 = vmatmul.mubr.msk.bf16.gmra.mrb[76].mxu0 %vm216_vm3, %v3617_v15 }
0x166b   :  { %3735 = vmatprep.mubr.bf16.mxu0 %v10267_v44  ;;  %8824 = vmatpush3.bf16.msra.mxu0 %v9640_v48 }
0x166c   :  { %8825 = vmatprep.subr.bf16.mxu0 %v9641_v47 }
0x166f   :  { %8826 = vmatpush3.bf16.msra.mxu0 %v9642_v53 }
0x1670   :  { %8827 = vmatprep.subr.bf16.mxu0 %v9643_v3 }
0x1672   :  { %8319 = vmatmul.mubr.msk.bf16.gmra.mrb[80].mxu0 %vm216_vm3, %v3618_v19 }
0x1673   :  { %8828 = vmatpush3.bf16.msra.mxu0 %v9644_v24 }
0x1674   :  { %8829 = vmatprep.subr.bf16.mxu0 %v9645_v18 }
0x1677   :  { %8830 = vmatpush3.bf16.msra.mxu0 %v9646_v6 }
0x1678   :  { %8831 = vmatprep.subr.bf16.mxu0 %v9647_v7 }
0x167b   :  { %8832 = vmatpush3.bf16.msra.mxu0 %v9648_v25 }
0x167c   :  { %8833 = vmatprep.subr.bf16.mxu0 %v9649_v35 }
0x167f   :  { %8834 = vmatpush3.bf16.msra.mxu0 %v9650_v58 }
0x172d   :  { %v3707_v61 = vpop.f32.mrb[68].mxu0 }
0x172e   :  { %v11729_v41 = vadd.f32 %v3707_v61, %v11723_v57  ;;  %v3709_v49 = vpop.f32.mrb[69].mxu0 }
0x172f   :  { %v11732_v14 = vadd.f32 %v3709_v49, %v11726_v21  ;;  %v3711_v22 = vpop.f32.mrb[70].mxu0 }
0x1730   :  { %v3746_v28 = vmul.f32 %v11729_v41, %v11729_v41  ;;  %v11737_v39 = vadd.f32 %v3711_v22, %v11723_v57  ;;  %v3713_v59 = vpop.f32.mrb[71].mxu0 }
0x1731   :  { %v3747_v34 = vmul.f32 %v11732_v14, %v11732_v14  ;;  %v11742_v29 = vadd.f32 %v3713_v59, %v11726_v21 }
0x1732   :  { %v3762_v2 = vmul.f32 %v3746_v28, %v11729_v41  ;;  %v3748_v36 = vmul.f32 %v11737_v39, %v11737_v39 }
0x1733   :  { %v3763_v26 = vmul.f32 %v3747_v34, %v11732_v14  ;;  %v3749_v62 = vmul.f32 %v11742_v29, %v11742_v29 }
0x1734   :  { %v3778_v0 = vmul.f32 0.044715, %v3762_v2  ;;  %v3764_v33 = vmul.f32 %v3748_v36, %v11737_v39 }
0x1735   :  { %v3779_v10 = vmul.f32 0.044715, %v3763_v26  ;;  %v3765_v54 = vmul.f32 %v3749_v62, %v11742_v29  ;;  %v3717_v5 = vpop.f32.mrb[72].mxu0 }
0x1736   :  { %v3794_v32 = vadd.f32 %v3778_v0, %v11729_v41  ;;  %v3780_v50 = vmul.f32 0.044715, %v3764_v33  ;;  %v11754_v63 = vadd.f32 %v3717_v5, %v11723_v57  ;;  %v3719_v55 = vpop.f32.mrb[73].mxu0 }
0x1737   :  { %v3795_v45 = vadd.f32 %v3779_v10, %v11732_v14  ;;  %v3781_v43 = vmul.f32 0.044715, %v3765_v54  ;;  %v11758_v4 = vadd.f32 %v3719_v55, %v11726_v21  ;;  %v3721_v60 = vpop.f32.mrb[74].mxu0 }
0x1738   :  { %v3810_v15 = vmul.f32 0.7978846, %v3794_v32  ;;  %v3796_v38 = vadd.f32 %v3780_v50, %v11737_v39  ;;  %v3750_v23 = vmul.f32 %v11754_v63, %v11754_v63  ;;  %v11764_v56 = vadd.f32 %v3721_v60, %v11723_v57  ;;  %v3723_v31 = vpop.f32.mrb[75].mxu0 }
0x1739   :  { %v3811_v19 = vmul.f32 0.7978846, %v3795_v45  ;;  %v3797_v51 = vadd.f32 %v3781_v43, %v11742_v29  ;;  %v3751_v20 = vmul.f32 %v11758_v4, %v11758_v4  ;;  %v11770_v9 = vadd.f32 %v3723_v31, %v11726_v21 }
0x173a   :  { %9953 = vtanh.f32 %v3810_v15  ;;  %v3812_v30 = vmul.f32 0.7978846, %v3796_v38  ;;  %v3766_v42 = vmul.f32 %v3750_v23, %v11754_v63  ;;  %v3752_v48 = vmul.f32 %v11764_v56, %v11764_v56 }
0x173b   :  { %9955 = vtanh.f32 %v3811_v19  ;;  %v3813_v47 = vmul.f32 0.7978846, %v3797_v51  ;;  %v3767_v53 = vmul.f32 %v3751_v20, %v11758_v4  ;;  %v3753_v3 = vmul.f32 %v11770_v9, %v11770_v9 }
0x173c   :  { %9957 = vtanh.f32 %v3812_v30  ;;  %v3782_v24 = vmul.f32 0.044715, %v3766_v42  ;;  %v3768_v18 = vmul.f32 %v3752_v48, %v11764_v56 }
0x173d   :  { %v3783_v6 = vmul.f32 0.044715, %v3767_v53  ;;  %v3769_v7 = vmul.f32 %v3753_v3, %v11770_v9  ;;  %v3727_v25 = vpop.f32.mrb[76].mxu0  ;;  %9959 = vtanh.f32 %v3813_v47 }
0x173e   :  { %v3798_v35 = vadd.f32 %v3782_v24, %v11754_v63  ;;  %v3784_v58 = vmul.f32 0.044715, %v3768_v18  ;;  %v11782_v40 = vadd.f32 %v3727_v25, %v11723_v57  ;;  %v3729_v61 = vpop.f32.mrb[77].mxu0 }
0x173f   :  { %v3799_v49 = vadd.f32 %v3783_v6, %v11758_v4  ;;  %v3785_v22 = vmul.f32 0.044715, %v3769_v7  ;;  %v11786_v28 = vadd.f32 %v3729_v61, %v11726_v21  ;;  %v3731_v59 = vpop.f32.mrb[78].mxu0 }
0x1740   :  { %v3814_v34 = vmul.f32 0.7978846, %v3798_v35  ;;  %v3800_v2 = vadd.f32 %v3784_v58, %v11764_v56  ;;  %v3754_v36 = vmul.f32 %v11782_v40, %v11782_v40  ;;  %v11792_v26 = vadd.f32 %v3731_v59, %v11723_v57  ;;  %v3733_v62 = vpop.f32.mrb[79].mxu0 }
0x1741   :  { %v3815_v0 = vmul.f32 0.7978846, %v3799_v49  ;;  %v3801_v33 = vadd.f32 %v3785_v22, %v11770_v9  ;;  %v3755_v10 = vmul.f32 %v11786_v28, %v11786_v28  ;;  %v11798_v54 = vadd.f32 %v3733_v62, %v11726_v21 }
0x1742   :  { %9961 = vtanh.f32 %v3814_v34  ;;  %v3816_v5 = vmul.f32 0.7978846, %v3800_v2  ;;  %v3770_v32 = vmul.f32 %v3754_v36, %v11782_v40  ;;  %v3756_v50 = vmul.f32 %v11792_v26, %v11792_v26 }
0x1743   :  { %9963 = vtanh.f32 %v3815_v0  ;;  %v3817_v55 = vmul.f32 0.7978846, %v3801_v33  ;;  %v3771_v45 = vmul.f32 %v3755_v10, %v11786_v28  ;;  %v3757_v43 = vmul.f32 %v11798_v54, %v11798_v54 }
0x1744   :  { %v9954_v60 = vpop.eup %9953  ;;  %9965 = vtanh.f32 %v3816_v5  ;;  %v3786_v15 = vmul.f32 0.044715, %v3770_v32  ;;  %v3772_v38 = vmul.f32 %v3756_v50, %v11792_v26 }
0x1745   :  { %v9956_v23 = vpop.eup %9955  ;;  %v3842_v31 = vadd.f32 1.0, %v9954_v60  ;;  %9967 = vtanh.f32 %v3817_v55  ;;  %v3787_v19 = vmul.f32 0.044715, %v3771_v45  ;;  %v3773_v51 = vmul.f32 %v3757_v43, %v11798_v54  ;;  %v3737_v20 = vpop.f32.mrb[80].mxu0 }
0x1746   :  { %v9958_v30 = vpop.eup %9957  ;;  %v3802_v42 = vadd.f32 %v3786_v15, %v11782_v40  ;;  %v3788_v48 = vmul.f32 0.044715, %v3772_v38  ;;  %v11810_v47 = vadd.f32 %v3737_v20, %v11723_v57  ;;  %v3739_v53 = vpop.f32.mrb[81].mxu0  ;;  %v3843_v3 = vadd.f32 1.0, %v9956_v23 }
0x1747   :  { %v3858_v24 = vmul.f32 0.5, %v3842_v31  ;;  %v3844_v18 = vadd.f32 1.0, %v9958_v30  ;;  %v3803_v6 = vadd.f32 %v3787_v19, %v11786_v28  ;;  %v3789_v7 = vmul.f32 0.044715, %v3773_v51  ;;  %v3741_v25 = vpop.f32.mrb[82].mxu0  ;;  %v9960_v59 = vpop.eup %9959 }
0x1748   :  { %v3818_v35 = vmul.f32 0.7978846, %v3802_v42  ;;  %v3804_v58 = vadd.f32 %v3788_v48, %v11792_v26  ;;  %v3758_v61 = vmul.f32 %v11810_v47, %v11810_v47  ;;  %v11817_v49 = vadd.f32 %v3739_v53, %v11726_v21  ;;  %v3743_v22 = vpop.f32.mrb[83].mxu0 }
0x1749   :  { %v3874_v34 = vmul.f32 %v3858_v24, %v11729_v41  ;;  %v3860_v2 = vmul.f32 0.5, %v3844_v18  ;;  %v3819_v36 = vmul.f32 0.7978846, %v3803_v6  ;;  %v3805_v62 = vadd.f32 %v3789_v7, %v11798_v54 }
0x174a   :  { %9969 = vtanh.f32 %v3818_v35  ;;  %v3820_v0 = vmul.f32 0.7978846, %v3804_v58  ;;  %v3774_v33 = vmul.f32 %v3758_v61, %v11810_v47  ;;  %v3759_v10 = vmul.f32 %v11817_v49, %v11817_v49 }
0x174b   :  { %v3876_v5 = vmul.f32 %v3860_v2, %v11737_v39  ;;  %9971 = vtanh.f32 %v3819_v36  ;;  %v3821_v32 = vmul.f32 0.7978846, %v3805_v62  ;;  %v11826_v50 = vadd.f32 %v3741_v25, %v11723_v57 }
0x174c   :  { %v9962_v55 = vpop.eup %9961  ;;  %9973 = vtanh.f32 %v3820_v0  ;;  %v3790_v41 = vmul.f32 0.044715, %v3774_v33  ;;  %v3775_v45 = vmul.f32 %v3759_v10, %v11817_v49  ;;  %v11830_v43 = vadd.f32 %v3743_v22, %v11726_v21 }
0x174d   :  { %v9964_v60 = vpop.eup %9963  ;;  %v3890_v15 = vpack.c.bf16 %v3876_v5, %v3874_v34  ;;  %9975 = vtanh.f32 %v3821_v32  ;;  %v3760_v38 = vmul.f32 %v11826_v50, %v11826_v50  ;;  %v3845_v39 = vadd.f32 1.0, %v9960_v59 }
0x174e   :  { %v9966_v23 = vpop.eup %9965  ;;  %v3806_v31 = vadd.f32 %v3790_v41, %v11810_v47  ;;  %v3791_v57 = vmul.f32 0.044715, %v3775_v45  ;;  %v3761_v19 = vmul.f32 %v11830_v43, %v11830_v43  ;;  %v3859_v51 = vmul.f32 0.5, %v3843_v3 }
0x174f   :  { %v9968_v20 = vpop.eup %9967  ;;  %v3776_v30 = vmul.f32 %v3760_v38, %v11826_v50  ;;  %v3861_v21 = vmul.f32 0.5, %v3845_v39  ;;  %v3847_v42 = vadd.f32 1.0, %v9964_v60  ;;  %v3846_v48 = vadd.f32 1.0, %v9962_v55 }
0x1750   :  { %v3822_v53 = vmul.f32 0.7978846, %v3806_v31  ;;  %v3807_v24 = vadd.f32 %v3791_v57, %v11817_v49  ;;  %v3777_v18 = vmul.f32 %v3761_v19, %v11830_v43  ;;  %v3875_v6 = vmul.f32 %v3859_v51, %v11732_v14 }
0x1751   :  { %v3792_v7 = vmul.f32 0.044715, %v3776_v30  ;;  %v3877_v25 = vmul.f32 %v3861_v21, %v11742_v29  ;;  %v3849_v35 = vadd.f32 1.0, %v9968_v20  ;;  %v3863_v58 = vmul.f32 0.5, %v3847_v42 }
0x1752   :  { %9977 = vtanh.f32 %v3822_v53  ;;  %v3823_v3 = vmul.f32 0.7978846, %v3807_v24  ;;  %v3793_v61 = vmul.f32 0.044715, %v3777_v18  ;;  %v3848_v22 = vadd.f32 1.0, %v9966_v23 }
0x1753   :  { %v3808_v59 = vadd.f32 %v3792_v7, %v11826_v50  ;;  %v3891_v34 = vpack.c.bf16 %v3877_v25, %v3875_v6  ;;  %v3865_v2 = vmul.f32 0.5, %v3849_v35  ;;  %v3862_v0 = vmul.f32 0.5, %v3846_v48 }
0x1754   :  { %v9970_v36 = vpop.eup %9969  ;;  %9979 = vtanh.f32 %v3823_v3  ;;  %v3809_v62 = vadd.f32 %v3793_v61, %v11830_v43  ;;  %v3864_v33 = vmul.f32 0.5, %v3848_v22  ;;  %v3879_v29 = vmul.f32 %v3863_v58, %v11758_v4 }
0x1755   :  { %v9972_v14 = vpop.eup %9971  ;;  %v3824_v10 = vmul.f32 0.7978846, %v3808_v59  ;;  %4067 = vmatprep.mubr.bf16.mxu0 %v3891_v34  ;;  %v3881_v5 = vmul.f32 %v3865_v2, %v11770_v9  ;;  %v3850_v32 = vadd.f32 1.0, %v9970_v36  ;;  %v3878_v45 = vmul.f32 %v3862_v0, %v11754_v63  ;;  %v8353_v36 = vld [vmem:[%s13291_s15 + $0x1] ss:$0 sm:$0xff] }
0x1756   :  { %v9974_v55 = vpop.eup %9973  ;;  %v3825_v41 = vmul.f32 0.7978846, %v3809_v62  ;;  %4068 = vmatmul.mubr.bf16.vlgmr.msra.gmra.mrb[84].mxu0 %v3890_v15  ;;  %v3880_v60 = vmul.f32 %v3864_v33, %v11764_v56  ;;  %v3851_v38 = vadd.f32 1.0, %v9972_v14 }
0x1757   :  { %v9976_v39 = vpop.eup %9975  ;;  %9981 = vtanh.f32 %v3824_v10  ;;  %v3893_v23 = vpack.c.bf16 %v3881_v5, %v3879_v29  ;;  %v3852_v31 = vadd.f32 1.0, %v9974_v55  ;;  %v3866_v57 = vmul.f32 0.5, %v3850_v32 }
0x1758   :  { %9983 = vtanh.f32 %v3825_v41  ;;  %v3892_v19 = vpack.c.bf16 %v3880_v60, %v3878_v45  ;;  %v3853_v51 = vadd.f32 1.0, %v9976_v39  ;;  %v3867_v4 = vmul.f32 0.5, %v3851_v38 }
0x1759   :  { %4075 = vmatprep.mubr.bf16.mxu0 %v3893_v23  ;;  %v3868_v9 = vmul.f32 0.5, %v3852_v31  ;;  %v3882_v30 = vmul.f32 %v3866_v57, %v11782_v40 }
0x175a   :  { %v3869_v20 = vmul.f32 0.5, %v3853_v51  ;;  %v3883_v56 = vmul.f32 %v3867_v4, %v11786_v28 }
0x175b   :  { %v3884_v15 = vmul.f32 %v3868_v9, %v11792_v26 }
0x175c   :  { %v9978_v63 = vpop.eup %9977  ;;  %v3885_v21 = vmul.f32 %v3869_v20, %v11798_v54 }
0x175d   :  { %v3894_v42 = vpack.c.bf16 %v3884_v15, %v3882_v30  ;;  %v3854_v24 = vadd.f32 1.0, %v9978_v63 }
0x175e   :  { %v9980_v48 = vpop.eup %9979  ;;  %4076 = vmatmul.mubr.bf16.gmra.mrb[88].mxu0 %v3892_v19  ;;  %v3895_v53 = vpack.c.bf16 %v3885_v21, %v3883_v56 }
0x175f   :  { %v3855_v18 = vadd.f32 1.0, %v9980_v48  ;;  %v3870_v35 = vmul.f32 0.5, %v3854_v24 }
0x1760   :  { %4083 = vmatprep.mubr.bf16.mxu0 %v3895_v53 }
0x1761   :  { %v9982_v6 = vpop.eup %9981  ;;  %v3871_v40 = vmul.f32 0.5, %v3855_v18  ;;  %v3886_v28 = vmul.f32 %v3870_v35, %v11810_v47 }
0x1762   :  { %v9984_v7 = vpop.eup %9983  ;;  %v3856_v25 = vadd.f32 1.0, %v9982_v6 }
0x1763   :  { %v3857_v58 = vadd.f32 1.0, %v9984_v7  ;;  %v3887_v61 = vmul.f32 %v3871_v40, %v11817_v49 }
0x1764   :  { %v3872_v3 = vmul.f32 0.5, %v3856_v25 }
0x1765   :  { %v3873_v26 = vmul.f32 0.5, %v3857_v58 }
0x1766   :  { %4084 = vmatmul.mubr.bf16.gmra.mrb[92].mxu0 %v3894_v42  ;;  %v3888_v54 = vmul.f32 %v3872_v3, %v11826_v50 }
0x1767   :  { %v3889_v22 = vmul.f32 %v3873_v26, %v11830_v43 }
0x1768   :  { %v3896_v59 = vpack.c.bf16 %v3888_v54, %v3886_v28 }
0x1769   :  { %v3897_v34 = vpack.c.bf16 %v3889_v22, %v3887_v61 }
0x176b   :  { %4091 = vmatprep.mubr.bf16.mxu0 %v3897_v34 }
0x176e   :  { %4092 = vmatmul.mubr.bf16.gmra.mrb[96].mxu0 %v3896_v59 }
0x1829   :  { %v8835_v2 = vpop.f32.mrb[84].mxu0 }
0x182a   :  { %v8836_v62 = vpop.f32.mrb[85].mxu0 }
0x182b   :  { %v8837_v0 = vadd.f32 %v8836_v62, %v8835_v2  ;;  %v8838_v33 = vpop.f32.mrb[86].mxu0 }
0x182c   :  { %v8839_v14 = vpop.f32.mrb[87].mxu0 }
0x182d   :  { %v4070_v47 = vadd.f32 %v8837_v0, %v8353_v36  ;;  %v8840_v10 = vadd.f32 %v8839_v14, %v8838_v33 }
0x182f   :  { %v11860_v50 = vadd.f32 %v4070_v47, %v11549_v37  ;;  %v4073_v49 = vadd.f32 %v8840_v10, %v8353_v36 }
0x1831   :  { %v11863_v43 = vadd.f32 %v4073_v49, %v11555_v16  ;;  %v8841_v29 = vpop.f32.mrb[88].mxu0  ;;  %v4112_v5 = vsel %vm216_vm3, %v11860_v50, 0.0 }
0x1832   :  { %v8842_v32 = vpop.f32.mrb[89].mxu0  ;;  %4113 = vadd.xlane.f32.xlu0 %v4112_v5 }
0x1833   :  { %v8843_v55 = vadd.f32 %v8842_v32, %v8841_v29  ;;  %v8844_v41 = vpop.f32.mrb[90].mxu0  ;;  %v4115_v45 = vsel %vm216_vm3, %v11863_v43, 0.0 }
0x1834   :  { %v8845_v60 = vpop.f32.mrb[91].mxu0  ;;  %4116 = vadd.xlane.f32.xlu1 %v4115_v45 }
0x1835   :  { %v4078_v38 = vadd.f32 %v8843_v55, %v8353_v36  ;;  %v8846_v37 = vadd.f32 %v8845_v60, %v8844_v41 }
0x1837   :  { %v11870_v39 = vadd.f32 %v4078_v38, %v11552_v11  ;;  %v4081_v16 = vadd.f32 %v8846_v37, %v8353_v36 }
0x1839   :  { %v11873_v23 = vadd.f32 %v4081_v16, %v11562_v46  ;;  %v8847_v31 = vpop.f32.mrb[92].mxu0  ;;  %v4118_v57 = vsel %vm216_vm3, %v11870_v39, 0.0 }
0x183a   :  { %v8848_v19 = vpop.f32.mrb[93].mxu0  ;;  %4119 = vadd.xlane.f32.xlu0 %v4118_v57 }
0x183b   :  { %v8849_v51 = vadd.f32 %v8848_v19, %v8847_v31  ;;  %v8850_v4 = vpop.f32.mrb[94].mxu0  ;;  %v4121_v9 = vsel %vm216_vm3, %v11873_v23, 0.0 }
0x183c   :  { %v8851_v20 = vpop.f32.mrb[95].mxu0  ;;  %4122 = vadd.xlane.f32.xlu1 %v4121_v9 }
0x183d   :  { %v4086_v30 = vadd.f32 %v8849_v51, %v8353_v36  ;;  %v8852_v11 = vadd.f32 %v8851_v20, %v8850_v4 }
0x183f   :  { %v11880_v15 = vadd.f32 %v4086_v30, %v11567_v1  ;;  %v4089_v46 = vadd.f32 %v8852_v11, %v8353_v36 }
0x1841   :  { %v11883_v63 = vadd.f32 %v4089_v46, %v11570_v12  ;;  %v8853_v56 = vpop.f32.mrb[96].mxu0  ;;  %v4124_v21 = vsel %vm216_vm3, %v11880_v15, 0.0 }
0x1842   :  { %4125 = vadd.xlane.f32.xlu0 %v4124_v21  ;;  %v8854_v42 = vpop.f32.mrb[97].mxu0  ;;  %v9651_v21 = vld [vmem:[%s13283_s7 + $0x60] ss:$12 sps:$4 sm:$0xff]  }
0x1843   :  { %v8855_v48 = vadd.f32 %v8854_v42, %v8853_v56  ;;  %v8856_v53 = vpop.f32.mrb[98].mxu0  ;;  %v4127_v24 = vsel %vm216_vm3, %v11883_v63, 0.0  ;;  %v9653_v56 = vld [vmem:[%s13283_s7 + $0x64] ss:$12 sps:$4 sm:$0xff]  }
0x1844   :  { %4128 = vadd.xlane.f32.xlu1 %v4127_v24  ;;  %v8857_v18 = vpop.f32.mrb[99].mxu0  ;;  %4307 = vmatprep.subr.bf16.mxu1 %v9653_v56  ;;  %v9654_v42 = vld [vmem:[%s13283_s7 + $0x7c] ss:$12 sps:$4 sm:$0x7f]  }
0x1845   :  { %v4094_v6 = vadd.f32 %v8855_v48, %v8353_v36  ;;  %v8858_v1 = vadd.f32 %v8857_v18, %v8856_v53  ;;  %4308 = vmatpush1.bf16.msra.mxu1 %v9651_v21  ;;  %v9656_v48 = vld [vmem:[%s13283_s7 + $0x78] ss:$12 sps:$4 sm:$0x7f]   ;;  %v9657_v24 = vld [vmem:[%s13283_s7 + $0x68] ss:$12 sps:$4 sm:$0xff]  }
0x1846   :  { %8388 = vmatprep.subr.msk.bf16.mxu1 %vm403_vm4, %v9654_v42  ;;  %v4299_v53 = vsel %vm403_vm4, %v9656_v48, 0  ;;  %9276 = vmatprep.subr.bf16.mxu0 %v9657_v24  ;;  %v9658_v18 = vld [vmem:[%s13283_s7 + $0x80] ss:$12 sps:$4 sm:$0x7f]  }
0x1847   :  { %v11890_v7 = vadd.f32 %v4094_v6, %v11580_v17  ;;  %v4097_v12 = vadd.f32 %v8858_v1, %v8353_v36  ;;  %9277 = vmatpush3.bf16.msra.mxu0 %v9657_v24  ;;  %v4305_v6 = vsel %vm403_vm4, %v9658_v18, 0 }
0x1848   :  { %9551 = vmatprep.subr.msk.bf16.mxu0 %vm403_vm4, %v9658_v18 }
0x1849   :  { %v11893_v25 = vadd.f32 %v4097_v12, %v11575_v8  ;;  %v4130_v35 = vsel %vm216_vm3, %v11890_v7, 0.0  ;;  %4310 = vmatpush1.bf16.msra.mxu1 %v4299_v53 }
0x184a   :  { %4131 = vadd.xlane.f32.xlu0 %v4130_v35 }
0x184b   :  { %v4133_v58 = vsel %vm216_vm3, %v11893_v25, 0.0  ;;  %9279 = vmatpush3.bf16.msra.mxu0 %v4305_v6 }
0x184c   :  { %4134 = vadd.xlane.f32.xlu1 %v4133_v58 }
0x18bf   :  { %v4114_v40 = vpop.xlane.xlu0 %4113 }
0x18c0   :  { %v4136_v3 = vmul.f32 0.033333335, %v4114_v40 }
0x18c1   :  { %v4117_v26 = vpop.xlane.xlu1 %4116 }
0x18c2   :  { %v11900_v28 = vsub.f32 %v11860_v50, %v4136_v3  ;;  %v4137_v17 = vmul.f32 0.033333335, %v4117_v26 }
0x18c4   :  { %v11903_v54 = vsub.f32 %v11863_v43, %v4137_v17  ;;  %v4152_v8 = vmul.f32 %v11900_v28, %v11900_v28 }
0x18c6   :  { %v4160_v61 = vsel %vm216_vm3, %v4152_v8, 0.0  ;;  %v4153_v22 = vmul.f32 %v11903_v54, %v11903_v54 }
0x18c7   :  { %v4120_v59 = vpop.xlane.xlu0 %4119  ;;  %4161 = vadd.xlane.f32.xlu0 %v4160_v61 }
0x18c8   :  { %v4138_v34 = vmul.f32 0.033333335, %v4120_v59  ;;  %v4163_v2 = vsel %vm216_vm3, %v4153_v22, 0.0 }
0x18c9   :  { %v4123_v36 = vpop.xlane.xlu1 %4122  ;;  %4164 = vadd.xlane.f32.xlu1 %v4163_v2  ;;  %v8372_v2 = vld [vmem:[%s13281_s5 + $0x2] ss:$0 sm:$0xff] }
0x18ca   :  { %v11912_v62 = vsub.f32 %v11870_v39, %v4138_v34  ;;  %v4139_v0 = vmul.f32 0.033333335, %v4123_v36 }
0x18cc   :  { %v11915_v33 = vsub.f32 %v11873_v23, %v4139_v0  ;;  %v4154_v14 = vmul.f32 %v11912_v62, %v11912_v62 }
0x18ce   :  { %v4166_v47 = vsel %vm216_vm3, %v4154_v14, 0.0  ;;  %v4155_v10 = vmul.f32 %v11915_v33, %v11915_v33 }
0x18cf   :  { %v4126_v49 = vpop.xlane.xlu0 %4125  ;;  %4167 = vadd.xlane.f32.xlu0 %v4166_v47 }
0x18d0   :  { %v4140_v29 = vmul.f32 0.033333335, %v4126_v49  ;;  %v4169_v5 = vsel %vm216_vm3, %v4155_v10, 0.0 }
0x18d1   :  { %v4129_v32 = vpop.xlane.xlu1 %4128  ;;  %4170 = vadd.xlane.f32.xlu1 %v4169_v5  ;;  %v8373_v5 = vld [vmem:[%s13282_s6 + $0x2] ss:$0 sm:$0xff] }
0x18d2   :  { %v11924_v55 = vsub.f32 %v11880_v15, %v4140_v29  ;;  %v4141_v41 = vmul.f32 0.033333335, %v4129_v32 }
0x18d4   :  { %v11927_v45 = vsub.f32 %v11883_v63, %v4141_v41  ;;  %v4156_v60 = vmul.f32 %v11924_v55, %v11924_v55 }
0x18d6   :  { %v4172_v38 = vsel %vm216_vm3, %v4156_v60, 0.0  ;;  %v4157_v37 = vmul.f32 %v11927_v45, %v11927_v45 }
0x18d7   :  { %4173 = vadd.xlane.f32.xlu0 %v4172_v38  ;;  %v4132_v16 = vpop.xlane.xlu0 %4131 }
0x18d8   :  { %v4142_v31 = vmul.f32 0.033333335, %v4132_v16  ;;  %v4175_v57 = vsel %vm216_vm3, %v4157_v37, 0.0 }
0x18d9   :  { %4176 = vadd.xlane.f32.xlu1 %v4175_v57  ;;  %v4135_v19 = vpop.xlane.xlu1 %4134 }
0x18da   :  { %v11936_v51 = vsub.f32 %v11890_v7, %v4142_v31  ;;  %v4143_v4 = vmul.f32 0.033333335, %v4135_v19 }
0x18dc   :  { %v11939_v9 = vsub.f32 %v11893_v25, %v4143_v4  ;;  %v4158_v20 = vmul.f32 %v11936_v51, %v11936_v51 }
0x18de   :  { %v4178_v30 = vsel %vm216_vm3, %v4158_v20, 0.0  ;;  %v4159_v11 = vmul.f32 %v11939_v9, %v11939_v9 }
0x18df   :  { %4179 = vadd.xlane.f32.xlu0 %v4178_v30 }
0x18e0   :  { %v4181_v46 = vsel %vm216_vm3, %v4159_v11, 0.0 }
0x18e1   :  { %4182 = vadd.xlane.f32.xlu1 %v4181_v46 }
0x1954   :  { %v4162_v1 = vpop.xlane.xlu0 %4161 }
0x1955   :  { %v4184_v12 = vmul.f32 0.033333335, %v4162_v1 }
0x1956   :  { %v4165_v35 = vpop.xlane.xlu1 %4164 }
0x1957   :  { %v4192_v58 = vadd.f32 1e-05, %v4184_v12  ;;  %v4185_v40 = vmul.f32 0.033333335, %v4165_v35 }
0x1959   :  { %9985 = vrsqrt.f32 %v4192_v58  ;;  %v4193_v3 = vadd.f32 1e-05, %v4185_v40 }
0x195b   :  { %9987 = vrsqrt.f32 %v4193_v3 }
0x195c   :  { %v4168_v26 = vpop.xlane.xlu0 %4167 }
0x195d   :  { %v4186_v17 = vmul.f32 0.033333335, %v4168_v26 }
0x195e   :  { %v4171_v8 = vpop.xlane.xlu1 %4170 }
0x195f   :  { %v4194_v61 = vadd.f32 1e-05, %v4186_v17  ;;  %v4187_v22 = vmul.f32 0.033333335, %v4171_v8 }
0x1961   :  { %9989 = vrsqrt.f32 %v4194_v61  ;;  %v4195_v59 = vadd.f32 1e-05, %v4187_v22 }
0x1963   :  { %v9986_v34 = vpop.eup %9985  ;;  %9991 = vrsqrt.f32 %v4195_v59 }
0x1964   :  { %v4208_v36 = vmul.f32 %v9986_v34, %v11900_v28  ;;  %v4174_v0 = vpop.xlane.xlu0 %4173 }
0x1965   :  { %v9988_v14 = vpop.eup %9987  ;;  %v4188_v47 = vmul.f32 0.033333335, %v4174_v0 }
0x1966   :  { %v4222_v10 = vmul.f32 %v8372_v2, %v4208_v36  ;;  %v4209_v49 = vmul.f32 %v9988_v14, %v11903_v54  ;;  %v4177_v29 = vpop.xlane.xlu1 %4176 }
0x1967   :  { %v4196_v32 = vadd.f32 1e-05, %v4188_v47  ;;  %v4189_v41 = vmul.f32 0.033333335, %v4177_v29 }
0x1968   :  { %v4223_v60 = vmul.f32 %v8372_v2, %v4209_v49  ;;  %v4236_v37 = vadd.f32 %v8373_v5, %v4222_v10 }
0x1969   :  { %9993 = vrsqrt.f32 %v4196_v32  ;;  %v4197_v38 = vadd.f32 1e-05, %v4189_v41 }
0x196a   :  { %v4237_v16 = vadd.f32 %v8373_v5, %v4223_v60 }
0x196b   :  { %v9990_v31 = vpop.eup %9989  ;;  %9995 = vrsqrt.f32 %v4197_v38 }
0x196c   :  { %v4180_v28 = vpop.xlane.xlu0 %4179  ;;  %v4244_v57 = vpack.c.bf16 %v4237_v16, %v4236_v37  ;;  %v4210_v19 = vmul.f32 %v9990_v31, %v11912_v62 }
0x196d   :  { %v9992_v4 = vpop.eup %9991  ;;  %v4190_v54 = vmul.f32 0.033333335, %v4180_v28 }
0x196e   :  { %v4183_v20 = vpop.xlane.xlu1 %4182  ;;  %8389 = vmatmul.mubr.msk.bf16.vlgmr.msra.gmra.mrb[100].mxu1 %vm216_vm3, %v4244_v57  ;;  %9280 = vmatprep.mubr.msk.bf16.mxu0 %vm216_vm3, %v4244_v57  ;;  %v4211_v30 = vmul.f32 %v9992_v4, %v11915_v33  ;;  %v4224_v11 = vmul.f32 %v8372_v2, %v4210_v19 }
0x196f   :  { %v4198_v46 = vadd.f32 1e-05, %v4190_v54  ;;  %v4191_v56 = vmul.f32 0.033333335, %v4183_v20  ;;  %4349 = vmatprep.mubr.bf16.mxu1 %v10267_v44 }
0x1970   :  { %v4225_v21 = vmul.f32 %v8372_v2, %v4211_v30  ;;  %v4238_v48 = vadd.f32 %v8373_v5, %v4224_v11 }
0x1971   :  { %9997 = vrsqrt.f32 %v4198_v46  ;;  %v4199_v42 = vadd.f32 1e-05, %v4191_v56 }
0x1972   :  { %v4239_v53 = vadd.f32 %v8373_v5, %v4225_v21 }
0x1973   :  { %v9994_v62 = vpop.eup %9993  ;;  %9999 = vrsqrt.f32 %v4199_v42 }
0x1974   :  { %v4245_v24 = vpack.c.bf16 %v4239_v53, %v4238_v48  ;;  %v4212_v18 = vmul.f32 %v9994_v62, %v11924_v55 }
0x1975   :  { %v9996_v6 = vpop.eup %9995 }
0x1976   :  { %8390 = vmatmul.mubr.msk.bf16.gmra.mrb[104].mxu1 %vm216_vm3, %v4245_v24  ;;  %9281 = vmatmul.mubr.msk.bf16.vlgmr.msra.gmra.mrb[100].mxu0 %vm216_vm3, %v4245_v24  ;;  %v4213_v33 = vmul.f32 %v9996_v6, %v11927_v45  ;;  %v4226_v1 = vmul.f32 %v8372_v2, %v4212_v18 }
0x1977   :  { %4359 = vmatprep.mubr.bf16.mxu1 %v10267_v44 }
0x1978   :  { %v4227_v12 = vmul.f32 %v8372_v2, %v4213_v33  ;;  %v4240_v35 = vadd.f32 %v8373_v5, %v4226_v1 }
0x197a   :  { %v4241_v58 = vadd.f32 %v8373_v5, %v4227_v12 }
0x197b   :  { %v9998_v40 = vpop.eup %9997 }
0x197c   :  { %v4246_v3 = vpack.c.bf16 %v4241_v58, %v4240_v35  ;;  %v4214_v26 = vmul.f32 %v9998_v40, %v11936_v51 }
0x197d   :  { %v10000_v17 = vpop.eup %9999 }
0x197e   :  { %8391 = vmatmul.mubr.msk.bf16.gmra.mrb[108].mxu1 %vm216_vm3, %v4246_v3  ;;  %9284 = vmatprep.mubr.msk.bf16.mxu0 %vm216_vm3, %v4246_v3  ;;  %v4215_v55 = vmul.f32 %v10000_v17, %v11939_v9  ;;  %v4228_v8 = vmul.f32 %v8372_v2, %v4214_v26 }
0x197f   :  { %4369 = vmatprep.mubr.bf16.mxu1 %v10267_v44 }
0x1980   :  { %v4229_v45 = vmul.f32 %v8372_v2, %v4215_v55  ;;  %v4242_v61 = vadd.f32 %v8373_v5, %v4228_v8 }
0x1982   :  { %v4243_v22 = vadd.f32 %v8373_v5, %v4229_v45 }
0x1984   :  { %v4247_v59 = vpack.c.bf16 %v4243_v22, %v4242_v61 }
0x1986   :  { %8392 = vmatmul.mubr.msk.bf16.gmra.mrb[112].mxu1 %vm216_vm3, %v4247_v59  ;;  %9285 = vmatmul.mubr.msk.bf16.gmra.mrb[104].mxu0 %vm216_vm3, %v4247_v59 }
0x1a41   :  { %v4341_v34 = vpop.f32.mrb[100].mxu1 }
0x1a42   :  { %v4343_v51 = vpop.f32.mrb[101].mxu1 }
0x1a43   :  { %v4345_v36 = vpop.f32.mrb[102].mxu1 }
0x1a44   :  { %v11994_v0 = vpack.c.bf16 %v4345_v36, %v4341_v34  ;;  %v4347_v14 = vpop.f32.mrb[103].mxu1 }
0x1a45   :  { %v11996_v47 = vpack.c.bf16 %v4347_v14, %v4343_v51 }
0x1a46   :  { %9292 = vmatprep.mubr.msk.bf16.mxu1 %vm579_vm5, %v11994_v0 }
0x1a47   :  { %9552 = vmatprep.subr.msk.bf16.mxu1 %vm579_vm5, %v11996_v47  ;;  %v4481_v9 = vsel %vm579_vm5, %v11996_v47, 0 }
0x1a48   :  { %9289 = vmatpush3.bf16.xpose.msra.mxu1 %v4481_v9 }
0x1a49   :  { %v4351_v2 = vpop.f32.mrb[104].mxu1  ;;  %v9282_v10 = vpop.f32.mrb[100].mxu0 }
0x1a4a   :  { %v4353_v49 = vpop.f32.mrb[105].mxu1  ;;  %v4414_v29 = vpop.f32.mrb[101].mxu0 }
0x1a4b   :  { %v4355_v5 = vpop.f32.mrb[106].mxu1  ;;  %v9283_v32 = vpop.f32.mrb[102].mxu0 }
0x1a4c   :  { %v12004_v41 = vpack.c.bf16 %v4355_v5, %v4351_v2  ;;  %v12006_v60 = vpack.c.bf16 %v9283_v32, %v9282_v10  ;;  %v4357_v38 = vpop.f32.mrb[107].mxu1  ;;  %v4417_v37 = vpop.f32.mrb[103].mxu0 }
0x1a4d   :  { %v12008_v16 = vpack.c.bf16 %v4357_v38, %v4353_v49  ;;  %v12010_v31 = vpack.c.bf16 %v4417_v37, %v4414_v29 }
0x1a4f   :  { %9553 = vmatprep.subr.msk.bf16.mxu1 %vm579_vm5, %v12008_v16  ;;  %v4484_v28 = vsel %vm579_vm5, %v12008_v16, 0 }
0x1a50   :  { %9291 = vmatpush3.bf16.xpose.msra.mxu1 %v4484_v28 }
0x1a51   :  { %v4361_v57 = vpop.f32.mrb[108].mxu1  ;;  %9304 = vmatprep.subr.bf16.mxu1 %v12010_v31 }
0x1a52   :  { %v4363_v19 = vpop.f32.mrb[109].mxu1 }
0x1a53   :  { %v4365_v4 = vpop.f32.mrb[110].mxu1 }
0x1a54   :  { %v12017_v54 = vpack.c.bf16 %v4365_v4, %v4361_v57  ;;  %v4367_v20 = vpop.f32.mrb[111].mxu1 }
0x1a55   :  { %v12019_v30 = vpack.c.bf16 %v4367_v20, %v4363_v19 }
0x1a56   :  { %9300 = vmatprep.mubr.msk.bf16.mxu0 %vm579_vm5, %v12017_v54 }
0x1a57   :  { %9293 = vmatmul.mubr.msk.bf16.vlgmr.msra.gmra.mrb[116].mxu1 %vm579_vm5, %v12004_v41  ;;  %9554 = vmatprep.subr.msk.bf16.mxu0 %vm579_vm5, %v12019_v30  ;;  %v4542_v11 = vsel %vm579_vm5, %v12019_v30, 0 }
0x1a58   :  { %9297 = vmatpush3.bf16.xpose.msra.mxu0 %v4542_v11  ;;  %9305 = vmatpush3.bf16.msra.mxu1 %v12010_v31 }
0x1a59   :  { %v4371_v46 = vpop.f32.mrb[112].mxu1  ;;  %v9286_v56 = vpop.f32.mrb[104].mxu0  ;;  %9306 = vmatprep.subr.bf16.mxu1 %v12006_v60 }
0x1a5a   :  { %v4373_v21 = vpop.f32.mrb[113].mxu1  ;;  %v4430_v42 = vpop.f32.mrb[105].mxu0 }
0x1a5b   :  { %v4375_v48 = vpop.f32.mrb[114].mxu1  ;;  %v9287_v53 = vpop.f32.mrb[106].mxu0 }
0x1a5c   :  { %v12031_v62 = vpack.c.bf16 %v4375_v48, %v4371_v46  ;;  %v12033_v24 = vpack.c.bf16 %v9287_v53, %v9286_v56  ;;  %v4377_v18 = vpop.f32.mrb[115].mxu1  ;;  %v4433_v6 = vpop.f32.mrb[107].mxu0  ;;  %9307 = vmatpush3.bf16.msra.mxu1 %v12006_v60 }
0x1a5d   :  { %v12036_v33 = vpack.c.bf16 %v4377_v18, %v4373_v21  ;;  %v12038_v1 = vpack.c.bf16 %v4433_v6, %v4430_v42 }
0x1a5f   :  { %9555 = vmatprep.subr.msk.bf16.mxu0 %vm579_vm5, %v12036_v33  ;;  %9312 = vmatprep.subr.bf16.mxu1 %v12038_v1  ;;  %v4545_v12 = vsel %vm579_vm5, %v12036_v33, 0 }
0x1a60   :  { %9299 = vmatpush3.bf16.xpose.msra.mxu0 %v4545_v12 }
0x1a67   :  { %9301 = vmatmul.mubr.msk.bf16.vlgmr.msra.gmra.mrb[108].mxu0 %vm579_vm5, %v12031_v62 }
0x1b2a   :  { %v9294_v35 = vpop.f32.mrb[116].mxu1 }
0x1b2b   :  { %v4520_v58 = vpop.f32.mrb[117].mxu1  ;;  %v4598_v40 = vmul.f32 0.125, %v9294_v35 }
0x1b2c   :  { %v4596_v3 = vmul.f32 0.125, %v4520_v58  ;;  %v9295_v26 = vpop.f32.mrb[118].mxu1 }
0x1b2d   :  { %v4523_v17 = vpop.f32.mrb[119].mxu1  ;;  %v4599_v8 = vmul.f32 0.125, %v9295_v26  ;;  %v4606_v22 = vsel %vm213_vm6, -1e+30, %v4598_v40 }
0x1b2e   :  { %v4604_v55 = vsel %vm213_vm6, -1e+30, %v4596_v3  ;;  %v4597_v45 = vmul.f32 0.125, %v4523_v17  ;;  %v4618_v36 = vsel %vm720_vm7, %v4606_v22, -inf }
0x1b2f   :  { %v4612_v61 = vsel %vm720_vm7, %v4604_v55, -inf  ;;  %v4607_v51 = vsel %vm213_vm6, -1e+30, %v4599_v8 }
0x1b30   :  { %v4605_v59 = vsel %vm213_vm6, -1e+30, %v4597_v45  ;;  %4613 = vmax.xlane.f32.xlu0 %v4612_v61  ;;  %v4621_v14 = vsel %vm720_vm7, %v4607_v51, -inf }
0x1b31   :  { %v4615_v34 = vsel %vm720_vm7, %v4605_v59, -inf }
0x1b32   :  { %4616 = vmax.xlane.f32.xlu1 %v4615_v34 }
0x1b34   :  { %4619 = vmax.xlane.f32.xlu0 %v4618_v36 }
0x1b36   :  { %4622 = vmax.xlane.f32.xlu1 %v4621_v14 }
0x1b3a   :  { %v9302_v9 = vpop.f32.mrb[108].mxu0 }
0x1b3b   :  { %v4581_v2 = vpop.f32.mrb[109].mxu0  ;;  %v4602_v10 = vmul.f32 0.125, %v9302_v9 }
0x1b3c   :  { %v4600_v49 = vmul.f32 0.125, %v4581_v2  ;;  %v9303_v29 = vpop.f32.mrb[110].mxu0 }
0x1b3d   :  { %v4584_v5 = vpop.f32.mrb[111].mxu0  ;;  %v4603_v38 = vmul.f32 0.125, %v9303_v29  ;;  %v4610_v57 = vsel %vm213_vm6, -1e+30, %v4602_v10 }
0x1b3e   :  { %v4608_v32 = vsel %vm213_vm6, -1e+30, %v4600_v49  ;;  %v4601_v37 = vmul.f32 0.125, %v4584_v5  ;;  %v4630_v11 = vsel %vm720_vm7, %v4610_v57, -inf }
0x1b3f   :  { %v4624_v28 = vsel %vm720_vm7, %v4608_v32, -inf  ;;  %v4611_v20 = vsel %vm213_vm6, -1e+30, %v4603_v38 }
0x1b40   :  { %v4609_v19 = vsel %vm213_vm6, -1e+30, %v4601_v37  ;;  %4625 = vmax.xlane.f32.xlu0 %v4624_v28  ;;  %v4633_v46 = vsel %vm720_vm7, %v4611_v20, -inf }
0x1b41   :  { %v4627_v4 = vsel %vm720_vm7, %v4609_v19, -inf }
0x1b42   :  { %4628 = vmax.xlane.f32.xlu1 %v4627_v4 }
0x1b44   :  { %4631 = vmax.xlane.f32.xlu0 %v4630_v11 }
0x1b46   :  { %4634 = vmax.xlane.f32.xlu1 %v4633_v46 }
0x1bbd   :  { %v4614_v56 = vpop.xlane.xlu0 %4613 }
0x1bbe   :  { %v4636_v21 = vsub.f32 %v4604_v55, %v4614_v56 }
0x1bbf   :  { %v4617_v42 = vpop.xlane.xlu1 %4616 }
0x1bc0   :  { %v4637_v53 = vsub.f32 %v4605_v59, %v4617_v42  ;;  %v4644_v6 = vmul.f32 1.442695, %v4636_v21 }
0x1bc1   :  { %v4620_v48 = vpop.xlane.xlu0 %4619 }
0x1bc2   :  { %v4638_v18 = vsub.f32 %v4606_v22, %v4620_v48  ;;  %v4646_v40 = vmul.f32 1.442695, %v4637_v53 }
0x1bc3   :  { %v4623_v12 = vpop.xlane.xlu1 %4622 }
0x1bc4   :  { %v4648_v35 = vmul.f32 1.442695, %v4638_v18  ;;  %v4639_v58 = vsub.f32 %v4607_v51, %v4623_v12 }
0x1bc6   :  { %10001 = vpow2.f32 %v4648_v35  ;;  %v4650_v3 = vmul.f32 1.442695, %v4639_v58 }
0x1bc7   :  { %10003 = vpow2.f32 %v4644_v6 }
0x1bc8   :  { %10005 = vpow2.f32 %v4650_v3 }
0x1bc9   :  { %10007 = vpow2.f32 %v4646_v40 }
0x1bcd   :  { %v4626_v26 = vpop.xlane.xlu0 %4625 }
0x1bce   :  { %v4640_v8 = vsub.f32 %v4608_v32, %v4626_v26 }
0x1bcf   :  { %v4629_v32 = vpop.xlane.xlu1 %4628 }
0x1bd0   :  { %v12071_v17 = vpop.eup %10001  ;;  %v4652_v36 = vmul.f32 1.442695, %v4640_v8  ;;  %v4641_v28 = vsub.f32 %v4609_v19, %v4629_v32 }
0x1bd1   :  { %v10004_v45 = vpop.eup %10003  ;;  %v4632_v55 = vpop.xlane.xlu0 %4631  ;;  %v4666_v61 = vsel %vm720_vm7, %v12071_v17, 0.0 }
0x1bd2   :  { %v10006_v22 = vpop.eup %10005  ;;  %v4642_v59 = vsub.f32 %v4610_v57, %v4632_v55  ;;  %4667 = vadd.xlane.f32.xlu0 %v4666_v61  ;;  %v4660_v9 = vsel %vm720_vm7, %v10004_v45, 0.0  ;;  %v4654_v4 = vmul.f32 1.442695, %v4641_v28 }
0x1bd3   :  { %v4669_v34 = vsel %vm720_vm7, %v10006_v22, 0.0  ;;  %v10008_v51 = vpop.eup %10007  ;;  %v4635_v38 = vpop.xlane.xlu1 %4634 }
0x1bd4   :  { %v4656_v14 = vmul.f32 1.442695, %v4642_v59  ;;  %4670 = vadd.xlane.f32.xlu1 %v4669_v34  ;;  %v4663_v2 = vsel %vm720_vm7, %v10008_v51, 0.0  ;;  %v4643_v37 = vsub.f32 %v4611_v20, %v4635_v38 }
0x1bd6   :  { %10009 = vpow2.f32 %v4656_v14  ;;  %4661 = vadd.xlane.f32.xlu0 %v4660_v9  ;;  %v4658_v57 = vmul.f32 1.442695, %v4643_v37 }
0x1bd7   :  { %10011 = vpow2.f32 %v4652_v36 }
0x1bd8   :  { %4664 = vadd.xlane.f32.xlu1 %v4663_v2  ;;  %10013 = vpow2.f32 %v4658_v57 }
0x1bd9   :  { %10015 = vpow2.f32 %v4654_v4 }
0x1be0   :  { %v12078_v10 = vpop.eup %10009 }
0x1be1   :  { %v4678_v49 = vsel %vm720_vm7, %v12078_v10, 0.0  ;;  %v12082_v29 = vpop.eup %10011 }
0x1be2   :  { %4679 = vadd.xlane.f32.xlu0 %v4678_v49  ;;  %v4672_v5 = vsel %vm720_vm7, %v12082_v29, 0.0 }
0x1be6   :  { %4673 = vadd.xlane.f32.xlu0 %v4672_v5 }
0x1be9   :  { %4828 = vrot.lane.b32.xlu1 %v12008_v16, %s10268_s26  ;;  %v10014_v16 = vpop.eup %10013 }
0x1bea   :  { %v10016_v11 = vpop.eup %10015 }
0x1beb   :  { %v4675_v20 = vsel %vm720_vm7, %v10016_v11, 0.0 }
0x1bed   :  { %4899 = vrot.lane.b32.xlu1 %v12019_v30, %s10268_s26  ;;  %v4681_v30 = vsel %vm720_vm7, %v10014_v16, 0.0 }
0x1bfc   :  { %4826 = vrot.lane.b32.xlu0 %v11996_v47, %s10268_s26 }
0x1c00   :  { %4822 = vrot.lane.b32.xlu0 %v12004_v41, %s10268_s26 }
0x1c04   :  { %4893 = vrot.lane.b32.xlu0 %v12017_v54, %s10268_s26 }
0x1c11   :  { %4682 = vadd.xlane.f32.xlu1 %v4681_v30 }
0x1c15   :  { %4676 = vadd.xlane.f32.xlu1 %v4675_v20 }
0x1c26   :  { %4820 = vrot.lane.b32.xlu1 %v11994_v0, %s10268_s26 }
0x1c2a   :  { %4901 = vrot.lane.b32.xlu1 %v12036_v33, %s10268_s26 }
0x1c2e   :  { %4895 = vrot.lane.b32.xlu1 %v12031_v62, %s10268_s26 }
0x1c5f   :  { %v4668_v47 = vpop.xlane.xlu0 %4667 }
0x1c61   :  { %v4671_v41 = vpop.xlane.xlu1 %4670 }
0x1c62   :  { %10017 = vrcp.f32 %v4671_v41 }
0x1c63   :  { %v4662_v54 = vpop.xlane.xlu0 %4661 }
0x1c64   :  { %10019 = vrcp.f32 %v4662_v54 }
0x1c65   :  { %10021 = vrcp.f32 %v4668_v47  ;;  %v4665_v19 = vpop.xlane.xlu1 %4664 }
0x1c66   :  { %10023 = vrcp.f32 %v4665_v19 }
0x1c69   :  { %v4829_v35 = vpop.permute.xlu1 %4828 }
0x1c6a   :  { %v4840_v26 = vsel %vm579_vm5, %v4829_v35, 0 }
0x1c6c   :  { %v10018_v46 = vpop.eup %10017 }
0x1c6d   :  { %v4695_v0 = vmul.f32 %v10018_v46, %v10006_v22  ;;  %v4900_v3 = vpop.permute.xlu1 %4899 }
0x1c6e   :  { %v10020_v56 = vpop.eup %10019  ;;  %v4910_v32 = vsel %vm579_vm5, %v4900_v3, 0 }
0x1c6f   :  { %v10022_v21 = vpop.eup %10021  ;;  %v4680_v42 = vpop.xlane.xlu0 %4679  ;;  %v4692_v53 = vmul.f32 %v10020_v56, %v10004_v45 }
0x1c70   :  { %v10024_v48 = vpop.eup %10023  ;;  %v4694_v33 = vmul.f32 %v10022_v21, %v12071_v17 }
0x1c71   :  { %v4693_v18 = vmul.f32 %v10024_v48, %v10008_v51 }
0x1c72   :  { %v4701_v12 = vpack.c.bf16 %v4695_v0, %v4694_v33 }
0x1c73   :  { %v4674_v6 = vpop.xlane.xlu0 %4673  ;;  %v4700_v62 = vpack.c.bf16 %v4693_v18, %v4692_v53 }
0x1c75   :  { %9308 = vmatprep.mubr.msk.bf16.mxu1 %vm720_vm7, %v4700_v62 }
0x1c76   :  { %9309 = vmatmul.mubr.msk.bf16.vlgmr.msra.gmra.mrb[120].mxu1 %vm720_vm7, %v4701_v12 }
0x1c77   :  { %9313 = vmatpush3.bf16.msra.mxu1 %v12038_v1  ;;  %v4827_v58 = vpop.permute.xlu0 %4826 }
0x1c78   :  { %9314 = vmatprep.subr.bf16.mxu1 %v12033_v24  ;;  %9556 = vmatprep.subr.msk.bf16.mxu0 %vm579_vm5, %v4827_v58  ;;  %v4837_v40 = vsel %vm579_vm5, %v4827_v58, 0 }
0x1c79   :  { %9321 = vmatpush3.bf16.xpose.msra.mxu0 %v4837_v40 }
0x1c7a   :  { %9557 = vmatprep.subr.msk.bf16.mxu0 %vm579_vm5, %v4829_v35 }
0x1c7b   :  { %9315 = vmatpush3.bf16.msra.mxu1 %v12033_v24  ;;  %v4823_v55 = vpop.permute.xlu0 %4822 }
0x1c7c   :  { %9558 = vmatprep.subr.msk.bf16.mxu1 %vm579_vm5, %v4900_v3 }
0x1c7f   :  { %v4894_v5 = vpop.permute.xlu0 %4893 }
0x1c81   :  { %9323 = vmatpush3.bf16.xpose.msra.mxu0 %v4840_v26 }
0x1c9e   :  { %v4683_v17 = vpop.xlane.xlu1 %4682 }
0x1c9f   :  { %10025 = vrcp.f32 %v4683_v17 }
0x1ca0   :  { %10027 = vrcp.f32 %v4674_v6 }
0x1ca1   :  { %10029 = vrcp.f32 %v4680_v42 }
0x1ca2   :  { %v4677_v8 = vpop.xlane.xlu1 %4676 }
0x1ca3   :  { %10031 = vrcp.f32 %v4677_v8 }
0x1ca6   :  { %v4821_v45 = vpop.permute.xlu1 %4820 }
0x1ca7   :  { %9324 = vmatprep.mubr.msk.bf16.mxu0 %vm579_vm5, %v4821_v45 }
0x1ca8   :  { %9325 = vmatmul.mubr.msk.bf16.vlgmr.msra.gmra.mrb[112].mxu0 %vm579_vm5, %v4823_v55 }
0x1ca9   :  { %v10026_v61 = vpop.eup %10025 }
0x1caa   :  { %v10028_v22 = vpop.eup %10027  ;;  %v4699_v51 = vmul.f32 %v10026_v61, %v10014_v16  ;;  %v4902_v38 = vpop.permute.xlu1 %4901 }
0x1cab   :  { %v10030_v59 = vpop.eup %10029  ;;  %v4696_v36 = vmul.f32 %v10028_v22, %v12082_v29  ;;  %v4913_v29 = vsel %vm579_vm5, %v4902_v38, 0 }
0x1cac   :  { %v4698_v9 = vmul.f32 %v10030_v59, %v12078_v10 }
0x1cad   :  { %v10032_v34 = vpop.eup %10031 }
0x1cae   :  { %v4697_v14 = vmul.f32 %v10032_v34, %v10016_v11  ;;  %v4703_v49 = vpack.c.bf16 %v4699_v51, %v4698_v9  ;;  %v4896_v37 = vpop.permute.xlu1 %4895 }
0x1cb0   :  { %v4702_v2 = vpack.c.bf16 %v4697_v14, %v4696_v36 }
0x1cb2   :  { %9316 = vmatprep.mubr.msk.bf16.mxu1 %vm720_vm7, %v4702_v2 }
0x1cb3   :  { %9317 = vmatmul.mubr.msk.bf16.vlgmr.msra.gmra.mrb[124].mxu1 %vm720_vm7, %v4703_v49 }
0x1cb4   :  { %9329 = vmatpush3.bf16.xpose.msra.mxu1 %v4910_v32  ;;  %9332 = vmatprep.mubr.msk.bf16.mxu1 %vm579_vm5, %v4894_v5 }
0x1cb5   :  { %9559 = vmatprep.subr.msk.bf16.mxu1 %vm579_vm5, %v4902_v38 }
0x1cbc   :  { %9331 = vmatpush3.bf16.xpose.msra.mxu1 %v4913_v29 }
0x1cc3   :  { %9333 = vmatmul.mubr.msk.bf16.vlgmr.msra.gmra.mrb[128].mxu1 %vm579_vm5, %v4896_v37 }
0x1d49   :  { %v12126_v10 = vpop.f32.mrb[120].mxu1 }
0x1d4a   :  { %v12128_v28 = vpop.f32.mrb[121].mxu1 }
0x1d4b   :  { %v12130_v57 = vpop.f32.mrb[122].mxu1 }
0x1d4c   :  { %v4815_v4 = vpack.c.bf16 %v12130_v57, %v12126_v10  ;;  %v12134_v16 = vpop.f32.mrb[123].mxu1 }
0x1d4d   :  { %v4814_v30 = vpack.c.bf16 %v12134_v16, %v12128_v28  ;;  %v8446_v28 = vld [vmem:[%s13285_s9 + $0x2] ss:$0 sm:$0xff] }
0x1d7b   :  { %v9326_v11 = vpop.f32.mrb[112].mxu0 }
0x1d7c   :  { %v4876_v20 = vpop.f32.mrb[113].mxu0  ;;  %v4966_v47 = vmul.f32 0.125, %v9326_v11 }
0x1d7d   :  { %v4964_v41 = vmul.f32 0.125, %v4876_v20  ;;  %v9327_v54 = vpop.f32.mrb[114].mxu0 }
0x1d7e   :  { %v4879_v19 = vpop.f32.mrb[115].mxu0  ;;  %v4974_v42 = vsel %vm213_vm6, -1e+30, %v4966_v47  ;;  %v4967_v48 = vmul.f32 0.125, %v9327_v54 }
0x1d7f   :  { %v4972_v46 = vsel %vm213_vm6, -1e+30, %v4964_v41  ;;  %v4965_v56 = vmul.f32 0.125, %v4879_v19  ;;  %v4986_v18 = vsel %vm720_vm7, %v4974_v42, -inf }
0x1d80   :  { %v4980_v21 = vsel %vm720_vm7, %v4972_v46, -inf  ;;  %v4975_v33 = vsel %vm213_vm6, -1e+30, %v4967_v48 }
0x1d81   :  { %v4973_v0 = vsel %vm213_vm6, -1e+30, %v4965_v56  ;;  %4981 = vmax.xlane.f32.xlu0 %v4980_v21  ;;  %v4989_v35 = vsel %vm720_vm7, %v4975_v33, -inf }
0x1d82   :  { %v4983_v53 = vsel %vm720_vm7, %v4973_v0, -inf }
0x1d83   :  { %4984 = vmax.xlane.f32.xlu1 %v4983_v53 }
0x1d85   :  { %4987 = vmax.xlane.f32.xlu0 %v4986_v18 }
0x1d86   :  { %v12149_v6 = vpop.f32.mrb[124].mxu1 }
0x1d87   :  { %v12151_v62 = vpop.f32.mrb[125].mxu1 }
0x1d88   :  { %v12153_v12 = vpop.f32.mrb[126].mxu1 }
0x1d89   :  { %v4817_v58 = vpack.c.bf16 %v12153_v12, %v12149_v6  ;;  %v12158_v40 = vpop.f32.mrb[127].mxu1  ;;  %4990 = vmax.xlane.f32.xlu0 %v4989_v35 }
0x1d8a   :  { %v4816_v3 = vpack.c.bf16 %v12158_v40, %v12151_v62 }
0x1d96   :  { %v9334_v26 = vpop.f32.mrb[128].mxu1 }
0x1d97   :  { %v4949_v17 = vpop.f32.mrb[129].mxu1  ;;  %v4970_v8 = vmul.f32 0.125, %v9334_v26 }
0x1d98   :  { %v4968_v45 = vmul.f32 0.125, %v4949_v17  ;;  %v9335_v55 = vpop.f32.mrb[130].mxu1 }
0x1d99   :  { %v4952_v61 = vpop.f32.mrb[131].mxu1  ;;  %v4971_v59 = vmul.f32 0.125, %v9335_v55  ;;  %v4978_v36 = vsel %vm213_vm6, -1e+30, %v4970_v8 }
0x1d9a   :  { %v4976_v22 = vsel %vm213_vm6, -1e+30, %v4968_v45  ;;  %v4969_v34 = vmul.f32 0.125, %v4952_v61  ;;  %v4998_v49 = vsel %vm720_vm7, %v4978_v36, -inf }
0x1d9b   :  { %v4992_v51 = vsel %vm720_vm7, %v4976_v22, -inf  ;;  %v4979_v2 = vsel %vm213_vm6, -1e+30, %v4971_v59 }
0x1d9c   :  { %v4977_v14 = vsel %vm213_vm6, -1e+30, %v4969_v34  ;;  %4993 = vmax.xlane.f32.xlu0 %v4992_v51  ;;  %v5001_v5 = vsel %vm720_vm7, %v4979_v2, -inf }
0x1d9d   :  { %v4995_v9 = vsel %vm720_vm7, %v4977_v14, -inf }
0x1d9e   :  { %4996 = vmax.xlane.f32.xlu1 %v4995_v9 }
0x1da0   :  { %4999 = vmax.xlane.f32.xlu0 %v4998_v49 }
0x1da2   :  { %5002 = vmax.xlane.f32.xlu1 %v5001_v5 }
0x1e0e   :  { %v4982_v32 = vpop.xlane.xlu0 %4981 }
0x1e0f   :  { %v5004_v38 = vsub.f32 %v4972_v46, %v4982_v32 }
0x1e10   :  { %v4985_v29 = vpop.xlane.xlu1 %4984 }
0x1e11   :  { %v5012_v37 = vmul.f32 1.442695, %v5004_v38  ;;  %v5005_v11 = vsub.f32 %v4973_v0, %v4985_v29 }
0x1e12   :  { %v4988_v20 = vpop.xlane.xlu0 %4987 }
0x1e13   :  { %10033 = vpow2.f32 %v5012_v37  ;;  %v5014_v47 = vmul.f32 1.442695, %v5005_v11  ;;  %v5006_v41 = vsub.f32 %v4974_v42, %v4988_v20 }
0x1e15   :  { %10035 = vpow2.f32 %v5014_v47  ;;  %v5016_v54 = vmul.f32 1.442695, %v5006_v41 }
0x1e16   :  { %v4991_v19 = vpop.xlane.xlu0 %4990 }
0x1e17   :  { %10037 = vpow2.f32 %v5016_v54  ;;  %v5007_v56 = vsub.f32 %v4975_v33, %v4991_v19 }
0x1e19   :  { %v5018_v21 = vmul.f32 1.442695, %v5007_v56 }
0x1e1b   :  { %10039 = vpow2.f32 %v5018_v21 }
0x1e1d   :  { %v10034_v48 = vpop.eup %10033 }
0x1e1e   :  { %v5028_v53 = vsel %vm720_vm7, %v10034_v48, 0.0 }
0x1e1f   :  { %v10036_v18 = vpop.eup %10035  ;;  %5029 = vadd.xlane.f32.xlu0 %v5028_v53 }
0x1e20   :  { %v5031_v46 = vsel %vm720_vm7, %v10036_v18, 0.0 }
0x1e21   :  { %v12176_v35 = vpop.eup %10037  ;;  %5032 = vadd.xlane.f32.xlu1 %v5031_v46 }
0x1e22   :  { %v5034_v42 = vsel %vm720_vm7, %v12176_v35, 0.0 }
0x1e23   :  { %5035 = vadd.xlane.f32.xlu0 %v5034_v42 }
0x1e25   :  { %v10040_v0 = vpop.eup %10039 }
0x1e26   :  { %v5037_v26 = vsel %vm720_vm7, %v10040_v0, 0.0 }
0x1e27   :  { %5038 = vadd.xlane.f32.xlu1 %v5037_v26 }
0x1e29   :  { %v4994_v33 = vpop.xlane.xlu0 %4993 }
0x1e2a   :  { %v5008_v17 = vsub.f32 %v4976_v22, %v4994_v33 }
0x1e2b   :  { %v4997_v22 = vpop.xlane.xlu1 %4996 }
0x1e2c   :  { %v5020_v55 = vmul.f32 1.442695, %v5008_v17  ;;  %v5009_v5 = vsub.f32 %v4977_v14, %v4997_v22 }
0x1e2d   :  { %v5000_v8 = vpop.xlane.xlu0 %4999 }
0x1e2e   :  { %v5010_v45 = vsub.f32 %v4978_v36, %v5000_v8  ;;  %v5022_v32 = vmul.f32 1.442695, %v5009_v5  ;;  %v9660_v8 = vld [vmem:[%s13284_s8 + $0xa8] sm:$0xff]  }
0x1e2f   :  { %v5003_v9 = vpop.xlane.xlu1 %5002 }
0x1e30   :  { %v5024_v61 = vmul.f32 1.442695, %v5010_v45  ;;  %v5011_v49 = vsub.f32 %v4979_v2, %v5003_v9 }
0x1e32   :  { %10041 = vpow2.f32 %v5024_v61 }
0x1e33   :  { %10043 = vpow2.f32 %v5020_v55 }
0x1e38   :  { %5076 = vrot.lane.b32.xlu1 %v12006_v60, %s10268_s26  ;;  %v5026_v60 = vmul.f32 1.442695, %v5011_v49 }
0x1e3a   :  { %10045 = vpow2.f32 %v5026_v60 }
0x1e3b   :  { %10047 = vpow2.f32 %v5022_v32 }
0x1e3c   :  { %v12183_v59 = vpop.eup %10041  ;;  %5137 = vrot.lane.b32.xlu1 %v12038_v1, %s10268_s26 }
0x1e3d   :  { %v5046_v34 = vsel %vm720_vm7, %v12183_v59, 0.0  ;;  %v12189_v51 = vpop.eup %10043 }
0x1e3e   :  { %5047 = vadd.xlane.f32.xlu0 %v5046_v34  ;;  %v5040_v36 = vsel %vm720_vm7, %v12189_v51, 0.0 }
0x1e42   :  { %5041 = vadd.xlane.f32.xlu0 %v5040_v36 }
0x1e44   :  { %v10046_v1 = vpop.eup %10045 }
0x1e45   :  { %v5049_v38 = vsel %vm720_vm7, %v10046_v1, 0.0  ;;  %v10048_v29 = vpop.eup %10047 }
0x1e46   :  { %v5043_v37 = vsel %vm720_vm7, %v10048_v29, 0.0 }
0x1e58   :  { %5074 = vrot.lane.b32.xlu0 %v12010_v31, %s10268_s26 }
0x1e60   :  { %5050 = vadd.xlane.f32.xlu1 %v5049_v38 }
0x1e64   :  { %5044 = vadd.xlane.f32.xlu1 %v5043_v37  ;;  %v9662_v37 = vld [vmem:[%s13284_s8 + $0xb8] sm:$0xff]  }
0x1e75   :  { %5139 = vrot.lane.b32.xlu1 %v12033_v24, %s10268_s26 }
0x1eac   :  { %v5030_v2 = vpop.xlane.xlu0 %5029 }
0x1ead   :  { %10049 = vrcp.f32 %v5030_v2 }
0x1eae   :  { %v5033_v14 = vpop.xlane.xlu1 %5032 }
0x1eaf   :  { %10051 = vrcp.f32 %v5033_v14 }
0x1eb0   :  { %v5036_v21 = vpop.xlane.xlu0 %5035 }
0x1eb4   :  { %v5039_v11 = vpop.xlane.xlu1 %5038 }
0x1eb5   :  { %10053 = vrcp.f32 %v5039_v11 }
0x1eb6   :  { %10055 = vrcp.f32 %v5036_v21 }
0x1eb7   :  { %v10050_v20 = vpop.eup %10049 }
0x1eb8   :  { %v5077_v47 = vpop.permute.xlu1 %5076  ;;  %v5060_v31 = vmul.f32 %v10050_v20, %v10034_v48  ;;  %v9659_v48 = vld [vmem:[%s13284_s8 + $0xa0] sm:$0xff]   ;;  %v9664_v20 = vld [vmem:[%s13284_s8 + $0x88] sm:$0xff]  }
0x1eb9   :  { %v10052_v41 = vpop.eup %10051 }
0x1eba   :  { %v5061_v54 = vmul.f32 %v10052_v41, %v10036_v18  ;;  %v9666_v41 = vld [vmem:[%s13284_s8 + $0x98] sm:$0xff]  }
0x1ebc   :  { %v5138_v19 = vpop.permute.xlu1 %5137  ;;  %v5068_v56 = vpack.c.bf16 %v5061_v54, %v5060_v31 }
0x1ebd   :  { %9344 = vmatprep.subr.bf16.mxu1 %v5138_v19 }
0x1ebe   :  { %9340 = vmatprep.mubr.msk.bf16.mxu0 %vm720_vm7, %v5068_v56  ;;  %9345 = vmatpush3.bf16.msra.mxu1 %v5138_v19 }
0x1ebf   :  { %v10054_v46 = vpop.eup %10053 }
0x1ec0   :  { %v10056_v26 = vpop.eup %10055  ;;  %v5063_v33 = vmul.f32 %v10054_v46, %v10040_v0  ;;  %v9661_v0 = vld [vmem:[%s13284_s8 + $0xb0] sm:$0xff]  }
0x1ec1   :  { %v5062_v18 = vmul.f32 %v10056_v26, %v12176_v35 }
0x1ec3   :  { %v5069_v17 = vpack.c.bf16 %v5063_v33, %v5062_v18 }
0x1ecb   :  { %v5048_v24 = vpop.xlane.xlu0 %5047 }
0x1ecf   :  { %v5042_v53 = vpop.xlane.xlu0 %5041 }
0x1ed3   :  { %v5075_v42 = vpop.permute.xlu0 %5074 }
0x1ed4   :  { %9336 = vmatprep.subr.bf16.mxu0 %v5075_v42 }
0x1ed5   :  { %9337 = vmatpush3.bf16.msra.mxu0 %v5075_v42 }
0x1ed6   :  { %9338 = vmatprep.subr.bf16.mxu0 %v5077_v47 }
0x1ed9   :  { %9339 = vmatpush3.bf16.msra.mxu0 %v5077_v47  ;;  %v9665_v47 = vld [vmem:[%s13284_s8 + $0x90] sm:$0xff]  }
0x1eda   :  { %9352 = vmatprep.subr.bf16.mxu0 %v9659_v48 }
0x1edc   :  { %9341 = vmatmul.mubr.msk.bf16.vlgmr.msra.gmra.mrb[116].mxu0 %vm720_vm7, %v5069_v17 }
0x1edd   :  { %9353 = vmatpush3.bf16.msra.mxu0 %v9659_v48 }
0x1ede   :  { %9354 = vmatprep.subr.bf16.mxu0 %v9660_v8 }
0x1ee1   :  { %9355 = vmatpush3.bf16.msra.mxu0 %v9660_v8 }
0x1ee2   :  { %9356 = vmatprep.subr.bf16.mxu0 %v9661_v0 }
0x1ee5   :  { %9357 = vmatpush3.bf16.msra.mxu0 %v9661_v0 }
0x1ee6   :  { %9358 = vmatprep.subr.bf16.mxu0 %v9662_v37 }
0x1ee9   :  { %9359 = vmatpush3.bf16.msra.mxu0 %v9662_v37 }
0x1eed   :  { %v5051_v45 = vpop.xlane.xlu1 %5050 }
0x1eee   :  { %10057 = vrcp.f32 %v5051_v45 }
0x1eef   :  { %10059 = vrcp.f32 %v5042_v53 }
0x1ef0   :  { %10061 = vrcp.f32 %v5048_v24 }
0x1ef1   :  { %v5045_v35 = vpop.xlane.xlu1 %5044 }
0x1ef2   :  { %10063 = vrcp.f32 %v5045_v35 }
0x1ef5   :  { %v5140_v55 = vpop.permute.xlu1 %5139 }
0x1ef6   :  { %9346 = vmatprep.subr.bf16.mxu1 %v5140_v55 }
0x1ef7   :  { %9347 = vmatpush3.bf16.msra.mxu1 %v5140_v55 }
0x1ef8   :  { %v10058_v61 = vpop.eup %10057 }
0x1ef9   :  { %v10060_v34 = vpop.eup %10059  ;;  %v5067_v9 = vmul.f32 %v10058_v61, %v10046_v1 }
0x1efa   :  { %v10062_v22 = vpop.eup %10061  ;;  %v5064_v49 = vmul.f32 %v10060_v34, %v12189_v51  ;;  %v9663_v51 = vld [vmem:[%s13284_s8 + $0x80] sm:$0xff]  }
0x1efb   :  { %v5066_v60 = vmul.f32 %v10062_v22, %v12183_v59  ;;  %9368 = vmatprep.subr.bf16.mxu0 %v9663_v51 }
0x1efc   :  { %v10064_v36 = vpop.eup %10063 }
0x1efd   :  { %v5065_v5 = vmul.f32 %v10064_v36, %v10048_v29  ;;  %v5071_v38 = vpack.c.bf16 %v5067_v9, %v5066_v60 }
0x1eff   :  { %v5070_v32 = vpack.c.bf16 %v5065_v5, %v5064_v49 }
0x1f01   :  { %9348 = vmatprep.mubr.msk.bf16.mxu1 %vm720_vm7, %v5070_v32 }
0x1f02   :  { %9349 = vmatmul.mubr.msk.bf16.vlgmr.msra.gmra.mrb[132].mxu1 %vm720_vm7, %v5071_v38 }
0x1f03   :  { %5654 = vmatprep.mubr.bf16.mxu1 %v10267_v44 }
0x1faf   :  { %v9342_v59 = vpop.f32.mrb[116].mxu0 }
0x1fb0   :  { %v5120_v1 = vpop.f32.mrb[117].mxu0 }
0x1fb1   :  { %v9343_v29 = vpop.f32.mrb[118].mxu0 }
0x1fb2   :  { %v5199_v2 = vpack.c.bf16 %v9343_v29, %v9342_v59  ;;  %v5123_v14 = vpop.f32.mrb[119].mxu0 }
0x1fb3   :  { %v5198_v11 = vpack.c.bf16 %v5123_v14, %v5120_v1 }
0x1fb5   :  { %9360 = vmatprep.mubr.msk.bf16.mxu0 %vm579_vm5, %v5198_v11 }
0x1fb6   :  { %9361 = vmatmul.mubr.msk.bf16.vlgmr.msra.gmra.mrb[120].mxu0 %vm579_vm5, %v5199_v2 }
0x1fb7   :  { %9369 = vmatpush3.bf16.msra.mxu0 %v9663_v51 }
0x1fb8   :  { %9370 = vmatprep.subr.bf16.mxu0 %v9664_v20 }
0x1fbb   :  { %9371 = vmatpush3.bf16.msra.mxu0 %v9664_v20 }
0x1fbc   :  { %9372 = vmatprep.subr.bf16.mxu0 %v9665_v47 }
0x1fbf   :  { %9373 = vmatpush3.bf16.msra.mxu0 %v9665_v47 }
0x1fc0   :  { %9374 = vmatprep.subr.bf16.mxu0 %v9666_v41 }
0x1fc3   :  { %9375 = vmatpush3.bf16.msra.mxu0 %v9666_v41 }
0x1fd5   :  { %v9350_v31 = vpop.f32.mrb[132].mxu1 }
0x1fd6   :  { %v5183_v54 = vpop.f32.mrb[133].mxu1 }
0x1fd7   :  { %v9351_v19 = vpop.f32.mrb[134].mxu1 }
0x1fd8   :  { %v5201_v56 = vpack.c.bf16 %v9351_v19, %v9350_v31  ;;  %v5186_v21 = vpop.f32.mrb[135].mxu1 }
0x1fd9   :  { %v5200_v24 = vpack.c.bf16 %v5186_v21, %v5183_v54 }
0x1fdb   :  { %9364 = vmatprep.mubr.msk.bf16.mxu0 %vm579_vm5, %v5200_v24 }
0x1fdc   :  { %9365 = vmatmul.mubr.msk.bf16.gmra.mrb[124].mxu0 %vm579_vm5, %v5201_v56 }
0x1fdd   :  { %9376 = vmatprep.mubr.msk.bf16.mxu0 %vm579_vm5, %v4814_v30 }
0x1fe4   :  { %9377 = vmatmul.mubr.msk.bf16.vlgmr.msra.gmra.mrb[120].mxu0 %vm579_vm5, %v4815_v4 }
0x1fe5   :  { %9380 = vmatprep.mubr.msk.bf16.mxu0 %vm579_vm5, %v4816_v3 }
0x1fec   :  { %9381 = vmatmul.mubr.msk.bf16.gmra.mrb[124].mxu0 %vm579_vm5, %v4817_v58 }
0x1fed   :  { %6288 = vmatprep.mubr.bf16.mxu0 %v10267_v44 }
0x20b7   :  { %v9378_v16 = vpop.f32.mrb[120].mxu0 }
0x20b8   :  { %v5373_v10 = vpop.f32.mrb[121].mxu0  ;;  %v5414_v57 = vadd.f32 %v9378_v16, %v8446_v28 }
0x20b9   :  { %v5412_v4 = vadd.f32 %v8446_v28, %v5373_v10  ;;  %v9379_v30 = vpop.f32.mrb[122].mxu0 }
0x20ba   :  { %v5376_v53 = vpop.f32.mrb[123].mxu0  ;;  %v12259_v6 = vadd.f32 %v5414_v57, %v11870_v39  ;;  %v5415_v12 = vadd.f32 %v9379_v30, %v8446_v28 }
0x20bb   :  { %v12256_v62 = vadd.f32 %v5412_v4, %v11860_v50  ;;  %v5413_v40 = vadd.f32 %v8446_v28, %v5376_v53 }
0x20bc   :  { %v12269_v50 = vadd.f32 %v5415_v12, %v11873_v23  ;;  %v5438_v48 = vsel %vm216_vm3, %v12259_v6, 0.0 }
0x20bd   :  { %v12262_v58 = vadd.f32 %v5413_v40, %v11863_v43  ;;  %v5432_v3 = vsel %vm216_vm3, %v12256_v62, 0.0 }
0x20be   :  { %5433 = vadd.xlane.f32.xlu0 %v5432_v3  ;;  %v5441_v23 = vsel %vm216_vm3, %v12269_v50, 0.0 }
0x20bf   :  { %v9382_v46 = vpop.f32.mrb[124].mxu0  ;;  %v5435_v42 = vsel %vm216_vm3, %v12262_v58, 0.0 }
0x20c0   :  { %5436 = vadd.xlane.f32.xlu1 %v5435_v42  ;;  %v5389_v26 = vpop.f32.mrb[125].mxu0  ;;  %v5418_v8 = vadd.f32 %v9382_v46, %v8446_v28 }
0x20c1   :  { %v5416_v33 = vadd.f32 %v8446_v28, %v5389_v26  ;;  %v9383_v39 = vpop.f32.mrb[126].mxu0 }
0x20c2   :  { %5439 = vadd.xlane.f32.xlu0 %v5438_v48  ;;  %v5392_v43 = vpop.f32.mrb[127].mxu0  ;;  %v5419_v18 = vadd.f32 %v9383_v39, %v8446_v28  ;;  %v12287_v61 = vadd.f32 %v5418_v8, %v11890_v7  ;;  %v9667_v39 = vld [vmem:[%s13288_s12 + $0x40] ss:$8 sps:$4 sm:$0xff]   ;;  %v9670_v48 = vld [vmem:[%s13288_s12 + $0x54] ss:$8 sps:$4 sm:$0x7f]  }
0x20c3   :  { %v5417_v17 = vadd.f32 %v8446_v28, %v5392_v43  ;;  %v12274_v0 = vadd.f32 %v5416_v33, %v11880_v15  ;;  %v9669_v33 = vld [vmem:[%s13288_s12 + $0x44] ss:$8 sps:$4 sm:$0xff]   ;;  %v9672_v43 = vld [vmem:[%s13288_s12 + $0x50] ss:$8 sps:$4 sm:$0x7f]  }
0x20c4   :  { %v12282_v35 = vadd.f32 %v5419_v18, %v11893_v25  ;;  %v5450_v34 = vsel %vm216_vm3, %v12287_v61, 0.0  ;;  %5622 = vmatprep.subr.bf16.mxu1 %v9669_v33  ;;  %v5617_v18 = vsel %vm403_vm4, %v9672_v43, 0 }
0x20c5   :  { %v12277_v45 = vadd.f32 %v5417_v17, %v11883_v63  ;;  %v5444_v15 = vsel %vm216_vm3, %v12274_v0, 0.0  ;;  %5623 = vmatpush1.bf16.msra.mxu1 %v9667_v39 }
0x20c6   :  { %5442 = vadd.xlane.f32.xlu0 %v5441_v23  ;;  %v5453_v63 = vsel %vm216_vm3, %v12282_v35, 0.0  ;;  %8460 = vmatprep.subr.msk.bf16.mxu1 %vm403_vm4, %v9670_v48 }
0x20c7   :  { %v5447_v55 = vsel %vm216_vm3, %v12277_v45, 0.0 }
0x20c8   :  { %5448 = vadd.xlane.f32.xlu1 %v5447_v55 }
0x20c9   :  { %5625 = vmatpush1.bf16.msra.mxu1 %v5617_v18 }
0x20ca   :  { %5445 = vadd.xlane.f32.xlu0 %v5444_v15 }
0x20cc   :  { %5454 = vadd.xlane.f32.xlu1 %v5453_v63 }
0x20ce   :  { %5451 = vadd.xlane.f32.xlu0 %v5450_v34 }
0x214b   :  { %v5434_v25 = vpop.xlane.xlu0 %5433 }
0x214c   :  { %v5456_v22 = vmul.f32 0.033333335, %v5434_v25 }
0x214d   :  { %v5437_v36 = vpop.xlane.xlu1 %5436 }
0x214e   :  { %v12296_v9 = vsub.f32 %v12256_v62, %v5456_v22  ;;  %v5457_v7 = vmul.f32 0.033333335, %v5437_v36 }
0x214f   :  { %v5440_v49 = vpop.xlane.xlu0 %5439 }
0x2150   :  { %v12299_v5 = vsub.f32 %v12262_v58, %v5457_v7  ;;  %v5458_v60 = vmul.f32 0.033333335, %v5440_v49  ;;  %v5472_v32 = vmul.f32 %v12296_v9, %v12296_v9 }
0x2152   :  { %v12304_v38 = vsub.f32 %v12259_v6, %v5458_v60  ;;  %v5480_v37 = vsel %vm216_vm3, %v5472_v32, 0.0  ;;  %v5473_v51 = vmul.f32 %v12299_v5, %v12299_v5 }
0x2153   :  { %v5443_v59 = vpop.xlane.xlu0 %5442  ;;  %5481 = vadd.xlane.f32.xlu0 %v5480_v37 }
0x2154   :  { %v5459_v1 = vmul.f32 0.033333335, %v5443_v59  ;;  %v5483_v29 = vsel %vm216_vm3, %v5473_v51, 0.0  ;;  %v5474_v2 = vmul.f32 %v12304_v38, %v12304_v38 }
0x2155   :  { %5484 = vadd.xlane.f32.xlu1 %v5483_v29  ;;  %v5449_v14 = vpop.xlane.xlu1 %5448 }
0x2156   :  { %v12313_v11 = vsub.f32 %v12269_v50, %v5459_v1  ;;  %v5461_v20 = vmul.f32 0.033333335, %v5449_v14  ;;  %v5486_v47 = vsel %vm216_vm3, %v5474_v2, 0.0  ;;  %v8449_v1 = vld [vmem:[%s13286_s10 + $0x2] ss:$0 sm:$0xff] }
0x2157   :  { %5487 = vadd.xlane.f32.xlu0 %v5486_v47  ;;  %v5446_v41 = vpop.xlane.xlu0 %5445 }
0x2158   :  { %v12317_v31 = vsub.f32 %v12277_v45, %v5461_v20  ;;  %v5460_v54 = vmul.f32 0.033333335, %v5446_v41  ;;  %v5475_v19 = vmul.f32 %v12313_v11, %v12313_v11 }
0x2159   :  { %v5455_v56 = vpop.xlane.xlu1 %5454 }
0x215a   :  { %v12322_v21 = vsub.f32 %v12274_v0, %v5460_v54  ;;  %v5463_v24 = vmul.f32 0.033333335, %v5455_v56  ;;  %v5489_v28 = vsel %vm216_vm3, %v5475_v19, 0.0  ;;  %v5477_v16 = vmul.f32 %v12317_v31, %v12317_v31 }
0x215b   :  { %v5452_v10 = vpop.xlane.xlu0 %5451  ;;  %5490 = vadd.xlane.f32.xlu1 %v5489_v28 }
0x215c   :  { %v12328_v57 = vsub.f32 %v12282_v35, %v5463_v24  ;;  %v5462_v4 = vmul.f32 0.033333335, %v5452_v10  ;;  %v5476_v30 = vmul.f32 %v12322_v21, %v12322_v21  ;;  %v5495_v12 = vsel %vm216_vm3, %v5477_v16, 0.0 }
0x215e   :  { %v12333_v53 = vsub.f32 %v12287_v61, %v5462_v4  ;;  %v5492_v40 = vsel %vm216_vm3, %v5476_v30, 0.0  ;;  %v5479_v3 = vmul.f32 %v12328_v57, %v12328_v57  ;;  %v8450_v4 = vld [vmem:[%s13287_s11 + $0x2] ss:$0 sm:$0xff] }
0x215f   :  { %5493 = vadd.xlane.f32.xlu0 %v5492_v40  ;;  %5496 = vadd.xlane.f32.xlu1 %v5495_v12 }
0x2160   :  { %v5478_v46 = vmul.f32 %v12333_v53, %v12333_v53  ;;  %v5501_v26 = vsel %vm216_vm3, %v5479_v3, 0.0 }
0x2162   :  { %v5498_v42 = vsel %vm216_vm3, %v5478_v46, 0.0 }
0x2163   :  { %5499 = vadd.xlane.f32.xlu0 %v5498_v42  ;;  %5502 = vadd.xlane.f32.xlu1 %v5501_v26 }
0x21e0   :  { %v5482_v17 = vpop.xlane.xlu0 %5481 }
0x21e1   :  { %v5504_v8 = vmul.f32 0.033333335, %v5482_v17 }
0x21e2   :  { %v5485_v23 = vpop.xlane.xlu1 %5484 }
0x21e3   :  { %v5512_v55 = vadd.f32 1e-05, %v5504_v8  ;;  %v5505_v15 = vmul.f32 0.033333335, %v5485_v23 }
0x21e4   :  { %v5488_v63 = vpop.xlane.xlu0 %5487 }
0x21e5   :  { %10065 = vrsqrt.f32 %v5512_v55  ;;  %v5513_v34 = vadd.f32 1e-05, %v5505_v15  ;;  %v5506_v25 = vmul.f32 0.033333335, %v5488_v63 }
0x21e7   :  { %10067 = vrsqrt.f32 %v5513_v34  ;;  %v5514_v22 = vadd.f32 1e-05, %v5506_v25 }
0x21e8   :  { %v5491_v36 = vpop.xlane.xlu1 %5490 }
0x21e9   :  { %10069 = vrsqrt.f32 %v5514_v22  ;;  %v5507_v7 = vmul.f32 0.033333335, %v5491_v36 }
0x21eb   :  { %v5515_v49 = vadd.f32 1e-05, %v5507_v7 }
0x21ec   :  { %v5494_v60 = vpop.xlane.xlu0 %5493  ;;  %v5497_v32 = vpop.xlane.xlu1 %5496 }
0x21ed   :  { %10071 = vrsqrt.f32 %v5515_v49  ;;  %v5508_v37 = vmul.f32 0.033333335, %v5494_v60  ;;  %v5509_v51 = vmul.f32 0.033333335, %v5497_v32  ;;  %v9675_v60 = vld [vmem:[%s13290_s14 + $0x148] sm:$0xff]  }
0x21ee   :  { %v9676_v32 = vld [vmem:[%s13290_s14 + $0x108] sm:$0xff]  }
0x21ef   :  { %v10066_v59 = vpop.eup %10065  ;;  %v5516_v29 = vadd.f32 1e-05, %v5508_v37  ;;  %v5517_v2 = vadd.f32 1e-05, %v5509_v51  ;;  %v9677_v37 = vld [vmem:[%s13290_s14 + $0x150] sm:$0xff]  }
0x21f0   :  { %v5528_v14 = vmul.f32 %v10066_v59, %v12296_v9  ;;  %v5500_v20 = vpop.xlane.xlu0 %5499  ;;  %v5503_v47 = vpop.xlane.xlu1 %5502  ;;  %v9678_v51 = vld [vmem:[%s13290_s14 + $0x110] sm:$0xff]   ;;  %v9679_v59 = vld [vmem:[%s13290_s14 + $0x158] sm:$0xff]  }
0x21f1   :  { %v10068_v41 = vpop.eup %10067  ;;  %10073 = vrsqrt.f32 %v5516_v29  ;;  %v5510_v54 = vmul.f32 0.033333335, %v5500_v20  ;;  %v5511_v19 = vmul.f32 0.033333335, %v5503_v47  ;;  %v9681_v29 = vld [vmem:[%s13290_s14 + $0x160] sm:$0xff]   ;;  %v9684_v20 = vld [vmem:[%s13290_s14 + $0x128] sm:$0xff]  }
0x21f2   :  { %v5542_v56 = vmul.f32 %v8449_v1, %v5528_v14  ;;  %v5529_v24 = vmul.f32 %v10068_v41, %v12299_v5  ;;  %10075 = vrsqrt.f32 %v5517_v2  ;;  %v9682_v2 = vld [vmem:[%s13290_s14 + $0x120] sm:$0xff]   ;;  %v9683_v14 = vld [vmem:[%s13290_s14 + $0x168] sm:$0xff]   ;;  %v9685_v47 = vld [vmem:[%s13290_s14 + $0x170] sm:$0xff]  }
0x21f3   :  { %v10070_v28 = vpop.eup %10069  ;;  %v5518_v16 = vadd.f32 1e-05, %v5510_v54  ;;  %v5519_v10 = vadd.f32 1e-05, %v5511_v19  ;;  %v9686_v41 = vld [vmem:[%s13290_s14 + $0x130] sm:$0xff]   ;;  %v9687_v54 = vld [vmem:[%s13290_s14 + $0x178] sm:$0xff]  }
0x21f4   :  { %v5543_v30 = vmul.f32 %v8449_v1, %v5529_v24  ;;  %v5530_v9 = vmul.f32 %v10070_v28, %v12304_v38  ;;  %v5556_v40 = vadd.f32 %v8450_v4, %v5542_v56  ;;  %v9688_v19 = vld [vmem:[%s13290_s14 + $0x138] sm:$0xff]   ;;  %v8455_v56 = vld [vmem:[%s13289_s13 + $0x4] sm:$0x3] }
0x21f5   :  { %10077 = vrsqrt.f32 %v5518_v16  ;;  %v12430_v24 = vrot.slane %v8455_v56, %v11007_v13  ;;  %v12433_v28 = vrot.slane %v8455_v56, %v11010_v27 }
0x21f6   :  { %v5557_v12 = vadd.f32 %v8450_v4, %v5543_v30  ;;  %10079 = vrsqrt.f32 %v5519_v10  ;;  %v5544_v5 = vmul.f32 %v8449_v1, %v5530_v9 }
0x21f7   :  { %v10072_v3 = vpop.eup %10071 }
0x21f8   :  { %v5531_v46 = vmul.f32 %v10072_v3, %v12313_v11  ;;  %v5564_v42 = vpack.c.bf16 %v5557_v12, %v5556_v40  ;;  %v5558_v18 = vadd.f32 %v8450_v4, %v5544_v5 }
0x21fa   :  { %8461 = vmatmul.mubr.msk.bf16.vlgmr.msra.gmra.mrb[136].mxu1 %vm216_vm3, %v5564_v42  ;;  %v5545_v26 = vmul.f32 %v8449_v1, %v5531_v46 }
0x21fb   :  { %v10074_v33 = vpop.eup %10073  ;;  %5664 = vmatprep.mubr.bf16.mxu1 %v10267_v44 }
0x21fc   :  { %v10076_v39 = vpop.eup %10075  ;;  %v5532_v48 = vmul.f32 %v10074_v33, %v12322_v21  ;;  %v5559_v43 = vadd.f32 %v8450_v4, %v5545_v26 }
0x21fd   :  { %v5533_v38 = vmul.f32 %v10076_v39, %v12317_v31 }
0x21fe   :  { %v5565_v8 = vpack.c.bf16 %v5559_v43, %v5558_v18  ;;  %v5546_v23 = vmul.f32 %v8449_v1, %v5532_v48 }
0x21ff   :  { %v10078_v17 = vpop.eup %10077  ;;  %v5547_v55 = vmul.f32 %v8449_v1, %v5533_v38 }
0x2200   :  { %v10080_v11 = vpop.eup %10079  ;;  %v5534_v15 = vmul.f32 %v10078_v17, %v12333_v53  ;;  %v5560_v34 = vadd.f32 %v8450_v4, %v5546_v23  ;;  %v9673_v53 = vld [vmem:[%s13290_s14 + $0x140] sm:$0xff]  }
0x2201   :  { %v5535_v63 = vmul.f32 %v10080_v11, %v12328_v57  ;;  %v5561_v25 = vadd.f32 %v8450_v4, %v5547_v55  ;;  %v9674_v57 = vld [vmem:[%s13290_s14 + $0x100] sm:$0xff]   ;;  %8913 = vmatprep.subr.bf16.mxu1 %v9673_v53 }
0x2202   :  { %8462 = vmatmul.mubr.msk.bf16.gmra.mrb[140].mxu1 %vm216_vm3, %v5565_v8  ;;  %v5548_v22 = vmul.f32 %v8449_v1, %v5534_v15 }
0x2203   :  { %5674 = vmatprep.mubr.bf16.mxu1 %v10267_v44  ;;  %v5566_v21 = vpack.c.bf16 %v5561_v25, %v5560_v34  ;;  %v5549_v36 = vmul.f32 %v8449_v1, %v5535_v63  ;;  %8914 = vmatpush3.bf16.msra.mxu1 %v9674_v57  ;;  %v9680_v1 = vld [vmem:[%s13290_s14 + $0x118] sm:$0xff]  }
0x2204   :  { %v5562_v31 = vadd.f32 %v8450_v4, %v5548_v22  ;;  %8915 = vmatprep.subr.bf16.mxu1 %v9675_v60 }
0x2205   :  { %v5563_v7 = vadd.f32 %v8450_v4, %v5549_v36 }
0x2207   :  { %v5567_v49 = vpack.c.bf16 %v5563_v7, %v5562_v31  ;;  %8916 = vmatpush3.bf16.msra.mxu1 %v9676_v32 }
0x2208   :  { %8917 = vmatprep.subr.bf16.mxu1 %v9677_v37 }
0x220a   :  { %8463 = vmatmul.mubr.msk.bf16.gmra.mrb[144].mxu1 %vm216_vm3, %v5566_v21 }
0x220b   :  { %5684 = vmatprep.mubr.bf16.mxu1 %v10267_v44  ;;  %8918 = vmatpush3.bf16.msra.mxu1 %v9678_v51 }
0x220c   :  { %8919 = vmatprep.subr.bf16.mxu1 %v9679_v59 }
0x220f   :  { %8920 = vmatpush3.bf16.msra.mxu1 %v9680_v1 }
0x2210   :  { %8921 = vmatprep.subr.bf16.mxu1 %v9681_v29 }
0x2212   :  { %8464 = vmatmul.mubr.msk.bf16.gmra.mrb[148].mxu1 %vm216_vm3, %v5567_v49 }
0x2213   :  { %8922 = vmatpush3.bf16.msra.mxu1 %v9682_v2 }
0x2214   :  { %8923 = vmatprep.subr.bf16.mxu1 %v9683_v14 }
0x2217   :  { %8924 = vmatpush3.bf16.msra.mxu1 %v9684_v20 }
0x2218   :  { %8925 = vmatprep.subr.bf16.mxu1 %v9685_v47 }
0x221b   :  { %8926 = vmatpush3.bf16.msra.mxu1 %v9686_v41 }
0x221c   :  { %8927 = vmatprep.subr.bf16.mxu1 %v9687_v54 }
0x221f   :  { %8928 = vmatpush3.bf16.msra.mxu1 %v9688_v19 }
0x22cd   :  { %v5656_v16 = vpop.f32.mrb[136].mxu1 }
0x22ce   :  { %v12436_v10 = vadd.f32 %v5656_v16, %v12430_v24  ;;  %v5658_v4 = vpop.f32.mrb[137].mxu1 }
0x22cf   :  { %v12439_v30 = vadd.f32 %v5658_v4, %v12433_v28  ;;  %v5660_v9 = vpop.f32.mrb[138].mxu1 }
0x22d0   :  { %v5695_v40 = vmul.f32 %v12436_v10, %v12436_v10  ;;  %v12444_v12 = vadd.f32 %v5660_v9, %v12430_v24  ;;  %v5662_v3 = vpop.f32.mrb[139].mxu1 }
0x22d1   :  { %v5696_v46 = vmul.f32 %v12439_v30, %v12439_v30  ;;  %v12449_v42 = vadd.f32 %v5662_v3, %v12433_v28 }
0x22d2   :  { %v5711_v5 = vmul.f32 %v5695_v40, %v12436_v10  ;;  %v5697_v26 = vmul.f32 %v12444_v12, %v12444_v12 }
0x22d3   :  { %v5712_v33 = vmul.f32 %v5696_v46, %v12439_v30  ;;  %v5698_v39 = vmul.f32 %v12449_v42, %v12449_v42 }
0x22d4   :  { %v5727_v48 = vmul.f32 0.044715, %v5711_v5  ;;  %v5713_v43 = vmul.f32 %v5697_v26, %v12444_v12 }
0x22d5   :  { %v5728_v38 = vmul.f32 0.044715, %v5712_v33  ;;  %v5714_v18 = vmul.f32 %v5698_v39, %v12449_v42  ;;  %v5666_v17 = vpop.f32.mrb[140].mxu1 }
0x22d6   :  { %v5743_v8 = vadd.f32 %v5727_v48, %v12436_v10  ;;  %v5729_v23 = vmul.f32 0.044715, %v5713_v43  ;;  %v12461_v55 = vadd.f32 %v5666_v17, %v12430_v24  ;;  %v5668_v11 = vpop.f32.mrb[141].mxu1 }
0x22d7   :  { %v5744_v15 = vadd.f32 %v5728_v38, %v12439_v30  ;;  %v5730_v63 = vmul.f32 0.044715, %v5714_v18  ;;  %v12465_v34 = vadd.f32 %v5668_v11, %v12433_v28  ;;  %v5670_v25 = vpop.f32.mrb[142].mxu1 }
0x22d8   :  { %v5759_v21 = vmul.f32 0.7978846, %v5743_v8  ;;  %v5745_v22 = vadd.f32 %v5729_v23, %v12444_v12  ;;  %v5699_v36 = vmul.f32 %v12461_v55, %v12461_v55  ;;  %v12471_v31 = vadd.f32 %v5670_v25, %v12430_v24  ;;  %v5672_v7 = vpop.f32.mrb[143].mxu1 }
0x22d9   :  { %v5760_v49 = vmul.f32 0.7978846, %v5744_v15  ;;  %v5746_v53 = vadd.f32 %v5730_v63, %v12449_v42  ;;  %v5700_v57 = vmul.f32 %v12465_v34, %v12465_v34  ;;  %v12477_v60 = vadd.f32 %v5672_v7, %v12433_v28 }
0x22da   :  { %10081 = vtanh.f32 %v5759_v21  ;;  %v5761_v32 = vmul.f32 0.7978846, %v5745_v22  ;;  %v5715_v37 = vmul.f32 %v5699_v36, %v12461_v55  ;;  %v5701_v51 = vmul.f32 %v12471_v31, %v12471_v31 }
0x22db   :  { %10083 = vtanh.f32 %v5760_v49  ;;  %v5762_v59 = vmul.f32 0.7978846, %v5746_v53  ;;  %v5716_v1 = vmul.f32 %v5700_v57, %v12465_v34  ;;  %v5702_v29 = vmul.f32 %v12477_v60, %v12477_v60 }
0x22dc   :  { %10085 = vtanh.f32 %v5761_v32  ;;  %v5731_v2 = vmul.f32 0.044715, %v5715_v37  ;;  %v5717_v14 = vmul.f32 %v5701_v51, %v12471_v31 }
0x22dd   :  { %v5732_v20 = vmul.f32 0.044715, %v5716_v1  ;;  %v5718_v47 = vmul.f32 %v5702_v29, %v12477_v60  ;;  %v5676_v41 = vpop.f32.mrb[144].mxu1  ;;  %10087 = vtanh.f32 %v5762_v59 }
0x22de   :  { %v5747_v54 = vadd.f32 %v5731_v2, %v12461_v55  ;;  %v5733_v19 = vmul.f32 0.044715, %v5717_v14  ;;  %v12489_v56 = vadd.f32 %v5676_v41, %v12430_v24  ;;  %v5678_v16 = vpop.f32.mrb[145].mxu1 }
0x22df   :  { %v5748_v4 = vadd.f32 %v5732_v20, %v12465_v34  ;;  %v5734_v9 = vmul.f32 0.044715, %v5718_v47  ;;  %v12493_v40 = vadd.f32 %v5678_v16, %v12433_v28  ;;  %v5680_v3 = vpop.f32.mrb[146].mxu1 }
0x22e0   :  { %v5763_v46 = vmul.f32 0.7978846, %v5747_v54  ;;  %v5749_v5 = vadd.f32 %v5733_v19, %v12471_v31  ;;  %v5703_v26 = vmul.f32 %v12489_v56, %v12489_v56  ;;  %v12499_v33 = vadd.f32 %v5680_v3, %v12430_v24  ;;  %v5682_v39 = vpop.f32.mrb[147].mxu1 }
0x22e1   :  { %v5764_v48 = vmul.f32 0.7978846, %v5748_v4  ;;  %v5750_v43 = vadd.f32 %v5734_v9, %v12477_v60  ;;  %v5704_v38 = vmul.f32 %v12493_v40, %v12493_v40  ;;  %v12505_v18 = vadd.f32 %v5682_v39, %v12433_v28 }
0x22e2   :  { %10089 = vtanh.f32 %v5763_v46  ;;  %v5765_v17 = vmul.f32 0.7978846, %v5749_v5  ;;  %v5719_v8 = vmul.f32 %v5703_v26, %v12489_v56  ;;  %v5705_v23 = vmul.f32 %v12499_v33, %v12499_v33 }
0x22e3   :  { %10091 = vtanh.f32 %v5764_v48  ;;  %v5766_v11 = vmul.f32 0.7978846, %v5750_v43  ;;  %v5720_v15 = vmul.f32 %v5704_v38, %v12493_v40  ;;  %v5706_v63 = vmul.f32 %v12505_v18, %v12505_v18 }
0x22e4   :  { %v10082_v25 = vpop.eup %10081  ;;  %10093 = vtanh.f32 %v5765_v17  ;;  %v5735_v21 = vmul.f32 0.044715, %v5719_v8  ;;  %v5721_v22 = vmul.f32 %v5705_v23, %v12499_v33 }
0x22e5   :  { %v10084_v36 = vpop.eup %10083  ;;  %v5791_v7 = vadd.f32 1.0, %v10082_v25  ;;  %10095 = vtanh.f32 %v5766_v11  ;;  %v5736_v49 = vmul.f32 0.044715, %v5720_v15  ;;  %v5722_v53 = vmul.f32 %v5706_v63, %v12505_v18  ;;  %v5686_v57 = vpop.f32.mrb[148].mxu1 }
0x22e6   :  { %v10086_v32 = vpop.eup %10085  ;;  %v5751_v37 = vadd.f32 %v5735_v21, %v12489_v56  ;;  %v5737_v51 = vmul.f32 0.044715, %v5721_v22  ;;  %v12517_v59 = vadd.f32 %v5686_v57, %v12430_v24  ;;  %v5688_v1 = vpop.f32.mrb[149].mxu1  ;;  %v5792_v29 = vadd.f32 1.0, %v10084_v36 }
0x22e7   :  { %v5807_v2 = vmul.f32 0.5, %v5791_v7  ;;  %v5793_v14 = vadd.f32 1.0, %v10086_v32  ;;  %v5752_v20 = vadd.f32 %v5736_v49, %v12493_v40  ;;  %v5738_v47 = vmul.f32 0.044715, %v5722_v53  ;;  %v5690_v41 = vpop.f32.mrb[150].mxu1  ;;  %v10088_v3 = vpop.eup %10087 }
0x22e8   :  { %v5767_v54 = vmul.f32 0.7978846, %v5751_v37  ;;  %v5753_v19 = vadd.f32 %v5737_v51, %v12499_v33  ;;  %v5707_v16 = vmul.f32 %v12517_v59, %v12517_v59  ;;  %v12524_v4 = vadd.f32 %v5688_v1, %v12433_v28  ;;  %v5692_v9 = vpop.f32.mrb[151].mxu1 }
0x22e9   :  { %v5823_v46 = vmul.f32 %v5807_v2, %v12436_v10  ;;  %v5809_v5 = vmul.f32 0.5, %v5793_v14  ;;  %v5768_v26 = vmul.f32 0.7978846, %v5752_v20  ;;  %v5754_v39 = vadd.f32 %v5738_v47, %v12505_v18 }
0x22ea   :  { %10097 = vtanh.f32 %v5767_v54  ;;  %v5769_v48 = vmul.f32 0.7978846, %v5753_v19  ;;  %v5723_v43 = vmul.f32 %v5707_v16, %v12517_v59  ;;  %v5708_v38 = vmul.f32 %v12524_v4, %v12524_v4 }
0x22eb   :  { %v5825_v17 = vmul.f32 %v5809_v5, %v12444_v12  ;;  %10099 = vtanh.f32 %v5768_v26  ;;  %v5770_v8 = vmul.f32 0.7978846, %v5754_v39  ;;  %v12533_v23 = vadd.f32 %v5690_v41, %v12430_v24 }
0x22ec   :  { %v10090_v11 = vpop.eup %10089  ;;  %10101 = vtanh.f32 %v5769_v48  ;;  %v5739_v10 = vmul.f32 0.044715, %v5723_v43  ;;  %v5724_v15 = vmul.f32 %v5708_v38, %v12524_v4  ;;  %v12537_v63 = vadd.f32 %v5692_v9, %v12433_v28 }
0x22ed   :  { %v10092_v25 = vpop.eup %10091  ;;  %v5839_v21 = vpack.c.bf16 %v5825_v17, %v5823_v46  ;;  %10103 = vtanh.f32 %v5770_v8  ;;  %v5709_v22 = vmul.f32 %v12533_v23, %v12533_v23  ;;  %v5794_v12 = vadd.f32 1.0, %v10088_v3 }
0x22ee   :  { %v10094_v36 = vpop.eup %10093  ;;  %v5755_v7 = vadd.f32 %v5739_v10, %v12517_v59  ;;  %v5740_v24 = vmul.f32 0.044715, %v5724_v15  ;;  %v5710_v49 = vmul.f32 %v12537_v63, %v12537_v63  ;;  %v5808_v53 = vmul.f32 0.5, %v5792_v29 }
0x22ef   :  { %v10096_v57 = vpop.eup %10095  ;;  %v5725_v32 = vmul.f32 %v5709_v22, %v12533_v23  ;;  %v5810_v28 = vmul.f32 0.5, %v5794_v12  ;;  %v5796_v37 = vadd.f32 1.0, %v10092_v25  ;;  %v5795_v51 = vadd.f32 1.0, %v10090_v11 }
0x22f0   :  { %v5771_v1 = vmul.f32 0.7978846, %v5755_v7  ;;  %v5756_v2 = vadd.f32 %v5740_v24, %v12524_v4  ;;  %v5726_v14 = vmul.f32 %v5710_v49, %v12537_v63  ;;  %v5824_v20 = vmul.f32 %v5808_v53, %v12439_v30 }
0x22f1   :  { %v5741_v47 = vmul.f32 0.044715, %v5725_v32  ;;  %v5826_v41 = vmul.f32 %v5810_v28, %v12449_v42  ;;  %v5798_v54 = vadd.f32 1.0, %v10096_v57  ;;  %v5812_v19 = vmul.f32 0.5, %v5796_v37 }
0x22f2   :  { %10105 = vtanh.f32 %v5771_v1  ;;  %v5772_v29 = vmul.f32 0.7978846, %v5756_v2  ;;  %v5742_v16 = vmul.f32 0.044715, %v5726_v14  ;;  %v5797_v9 = vadd.f32 1.0, %v10094_v36 }
0x22f3   :  { %v5757_v3 = vadd.f32 %v5741_v47, %v12533_v23  ;;  %v5840_v46 = vpack.c.bf16 %v5826_v41, %v5824_v20  ;;  %v5814_v5 = vmul.f32 0.5, %v5798_v54  ;;  %v5811_v48 = vmul.f32 0.5, %v5795_v51 }
0x22f4   :  { %v10098_v26 = vpop.eup %10097  ;;  %10107 = vtanh.f32 %v5772_v29  ;;  %v5758_v39 = vadd.f32 %v5742_v16, %v12537_v63  ;;  %v5813_v43 = vmul.f32 0.5, %v5797_v9  ;;  %v5828_v42 = vmul.f32 %v5812_v19, %v12465_v34 }
0x22f5   :  { %v10100_v30 = vpop.eup %10099  ;;  %v5773_v38 = vmul.f32 0.7978846, %v5757_v3  ;;  %6016 = vmatprep.mubr.bf16.mxu1 %v5840_v46  ;;  %v5830_v17 = vmul.f32 %v5814_v5, %v12477_v60  ;;  %v5799_v8 = vadd.f32 1.0, %v10098_v26  ;;  %v5827_v15 = vmul.f32 %v5811_v48, %v12461_v55  ;;  %v8498_v26 = vld [vmem:[%s13291_s15 + $0x2] ss:$0 sm:$0xff] }
0x22f6   :  { %v10102_v11 = vpop.eup %10101  ;;  %v5774_v10 = vmul.f32 0.7978846, %v5758_v39  ;;  %6017 = vmatmul.mubr.bf16.vlgmr.msra.gmra.mrb[152].mxu1 %v5839_v21  ;;  %v5829_v25 = vmul.f32 %v5813_v43, %v12471_v31  ;;  %v5800_v22 = vadd.f32 1.0, %v10100_v30 }
0x22f7   :  { %v10104_v12 = vpop.eup %10103  ;;  %10109 = vtanh.f32 %v5773_v38  ;;  %v5842_v36 = vpack.c.bf16 %v5830_v17, %v5828_v42  ;;  %v5801_v7 = vadd.f32 1.0, %v10102_v11  ;;  %v5815_v24 = vmul.f32 0.5, %v5799_v8 }
0x22f8   :  { %10111 = vtanh.f32 %v5774_v10  ;;  %v5841_v49 = vpack.c.bf16 %v5829_v25, %v5827_v15  ;;  %v5802_v53 = vadd.f32 1.0, %v10104_v12  ;;  %v5816_v34 = vmul.f32 0.5, %v5800_v22 }
0x22f9   :  { %6024 = vmatprep.mubr.bf16.mxu1 %v5842_v36  ;;  %v5817_v60 = vmul.f32 0.5, %v5801_v7  ;;  %v5831_v32 = vmul.f32 %v5815_v24, %v12489_v56 }
0x22fa   :  { %v5818_v57 = vmul.f32 0.5, %v5802_v53  ;;  %v5832_v31 = vmul.f32 %v5816_v34, %v12493_v40 }
0x22fb   :  { %v5833_v21 = vmul.f32 %v5817_v60, %v12499_v33 }
0x22fc   :  { %v10106_v55 = vpop.eup %10105  ;;  %v5834_v28 = vmul.f32 %v5818_v57, %v12505_v18 }
0x22fd   :  { %v5843_v37 = vpack.c.bf16 %v5833_v21, %v5831_v32  ;;  %v5803_v2 = vadd.f32 1.0, %v10106_v55 }
0x22fe   :  { %v10108_v51 = vpop.eup %10107  ;;  %6025 = vmatmul.mubr.bf16.gmra.mrb[156].mxu1 %v5841_v49  ;;  %v5844_v1 = vpack.c.bf16 %v5834_v28, %v5832_v31 }
0x22ff   :  { %v5804_v14 = vadd.f32 1.0, %v10108_v51  ;;  %v5819_v54 = vmul.f32 0.5, %v5803_v2 }
0x2300   :  { %6032 = vmatprep.mubr.bf16.mxu1 %v5844_v1 }
0x2301   :  { %v10110_v20 = vpop.eup %10109  ;;  %v5820_v56 = vmul.f32 0.5, %v5804_v14  ;;  %v5835_v40 = vmul.f32 %v5819_v54, %v12517_v59 }
0x2302   :  { %v10112_v47 = vpop.eup %10111  ;;  %v5805_v41 = vadd.f32 1.0, %v10110_v20 }
0x2303   :  { %v5806_v19 = vadd.f32 1.0, %v10112_v47  ;;  %v5836_v16 = vmul.f32 %v5820_v56, %v12524_v4 }
0x2304   :  { %v5821_v29 = vmul.f32 0.5, %v5805_v41 }
0x2305   :  { %v5822_v33 = vmul.f32 0.5, %v5806_v19 }
0x2306   :  { %6033 = vmatmul.mubr.bf16.gmra.mrb[160].mxu1 %v5843_v37  ;;  %v5837_v18 = vmul.f32 %v5821_v29, %v12533_v23 }
0x2307   :  { %v5838_v9 = vmul.f32 %v5822_v33, %v12537_v63 }
0x2308   :  { %v5845_v3 = vpack.c.bf16 %v5837_v18, %v5835_v40 }
0x2309   :  { %v5846_v46 = vpack.c.bf16 %v5838_v9, %v5836_v16 }
0x230b   :  { %6040 = vmatprep.mubr.bf16.mxu1 %v5846_v46 }
0x230e   :  { %6041 = vmatmul.mubr.bf16.gmra.mrb[164].mxu1 %v5845_v3 }
0x23c9   :  { %v8929_v5 = vpop.f32.mrb[152].mxu1 }
0x23ca   :  { %v8930_v39 = vpop.f32.mrb[153].mxu1 }
0x23cb   :  { %v8931_v48 = vadd.f32 %v8930_v39, %v8929_v5  ;;  %v8932_v43 = vpop.f32.mrb[154].mxu1 }
0x23cc   :  { %v8933_v30 = vpop.f32.mrb[155].mxu1 }
0x23cd   :  { %v6019_v59 = vadd.f32 %v8931_v48, %v8498_v26  ;;  %v8934_v38 = vadd.f32 %v8933_v30, %v8932_v43 }
0x23cf   :  { %v12567_v23 = vadd.f32 %v6019_v59, %v12256_v62  ;;  %v6022_v4 = vadd.f32 %v8934_v38, %v8498_v26 }
0x23d1   :  { %v12570_v63 = vadd.f32 %v6022_v4, %v12262_v58  ;;  %v8935_v42 = vpop.f32.mrb[156].mxu1  ;;  %v6061_v17 = vsel %vm216_vm3, %v12567_v23, 0.0 }
0x23d2   :  { %v8936_v8 = vpop.f32.mrb[157].mxu1  ;;  %6062 = vadd.xlane.f32.xlu0 %v6061_v17 }
0x23d3   :  { %v8937_v11 = vadd.f32 %v8936_v8, %v8935_v42  ;;  %v8938_v10 = vpop.f32.mrb[158].mxu1  ;;  %v6064_v15 = vsel %vm216_vm3, %v12570_v63, 0.0 }
0x23d4   :  { %v8939_v25 = vpop.f32.mrb[159].mxu1  ;;  %6065 = vadd.xlane.f32.xlu1 %v6064_v15 }
0x23d5   :  { %v6027_v22 = vadd.f32 %v8937_v11, %v8498_v26  ;;  %v8940_v62 = vadd.f32 %v8939_v25, %v8938_v10 }
0x23d7   :  { %v12577_v12 = vadd.f32 %v6027_v22, %v12259_v6  ;;  %v6030_v58 = vadd.f32 %v8940_v62, %v8498_v26 }
0x23d9   :  { %v12580_v36 = vadd.f32 %v6030_v58, %v12269_v50  ;;  %v8941_v7 = vpop.f32.mrb[160].mxu1  ;;  %v6067_v24 = vsel %vm216_vm3, %v12577_v12, 0.0 }
0x23da   :  { %v8942_v49 = vpop.f32.mrb[161].mxu1  ;;  %6068 = vadd.xlane.f32.xlu0 %v6067_v24 }
0x23db   :  { %v8943_v53 = vadd.f32 %v8942_v49, %v8941_v7  ;;  %v8944_v34 = vpop.f32.mrb[162].mxu1  ;;  %v6070_v60 = vsel %vm216_vm3, %v12580_v36, 0.0 }
0x23dc   :  { %v8945_v57 = vpop.f32.mrb[163].mxu1  ;;  %6071 = vadd.xlane.f32.xlu1 %v6070_v60 }
0x23dd   :  { %v6035_v32 = vadd.f32 %v8943_v53, %v8498_v26  ;;  %v8946_v6 = vadd.f32 %v8945_v57, %v8944_v34 }
0x23df   :  { %v12587_v21 = vadd.f32 %v6035_v32, %v12274_v0  ;;  %v6038_v50 = vadd.f32 %v8946_v6, %v8498_v26 }
0x23e1   :  { %v12590_v55 = vadd.f32 %v6038_v50, %v12277_v45  ;;  %v8947_v31 = vpop.f32.mrb[164].mxu1  ;;  %v6073_v28 = vsel %vm216_vm3, %v12587_v21, 0.0 }
0x23e2   :  { %6074 = vadd.xlane.f32.xlu0 %v6073_v28  ;;  %v8948_v37 = vpop.f32.mrb[165].mxu1  ;;  %v9689_v28 = vld [vmem:[%s13283_s7 + $0x90] ss:$12 sps:$4 sm:$0xff]  }
0x23e3   :  { %v8949_v51 = vadd.f32 %v8948_v37, %v8947_v31  ;;  %v8950_v1 = vpop.f32.mrb[166].mxu1  ;;  %v6076_v2 = vsel %vm216_vm3, %v12590_v55, 0.0  ;;  %v9691_v31 = vld [vmem:[%s13283_s7 + $0x94] ss:$12 sps:$4 sm:$0xff]  }
0x23e4   :  { %6077 = vadd.xlane.f32.xlu1 %v6076_v2  ;;  %v8951_v14 = vpop.f32.mrb[167].mxu1  ;;  %6256 = vmatprep.subr.bf16.mxu0 %v9691_v31  ;;  %v9692_v37 = vld [vmem:[%s13283_s7 + $0xac] ss:$12 sps:$4 sm:$0x7f]  }
0x23e5   :  { %v6043_v20 = vadd.f32 %v8949_v51, %v8498_v26  ;;  %v8952_v0 = vadd.f32 %v8951_v14, %v8950_v1  ;;  %6257 = vmatpush1.bf16.msra.mxu0 %v9689_v28  ;;  %v9694_v51 = vld [vmem:[%s13283_s7 + $0xa8] ss:$12 sps:$4 sm:$0x7f]   ;;  %v9695_v2 = vld [vmem:[%s13283_s7 + $0x98] ss:$12 sps:$4 sm:$0xff]  }
0x23e6   :  { %8533 = vmatprep.subr.msk.bf16.mxu0 %vm403_vm4, %v9692_v37  ;;  %v6248_v1 = vsel %vm403_vm4, %v9694_v51, 0  ;;  %9384 = vmatprep.subr.bf16.mxu1 %v9695_v2  ;;  %v9696_v14 = vld [vmem:[%s13283_s7 + $0xb0] ss:$12 sps:$4 sm:$0x7f]  }
0x23e7   :  { %v12597_v47 = vadd.f32 %v6043_v20, %v12287_v61  ;;  %v6046_v45 = vadd.f32 %v8952_v0, %v8498_v26  ;;  %9385 = vmatpush3.bf16.msra.mxu1 %v9695_v2  ;;  %v6254_v20 = vsel %vm403_vm4, %v9696_v14, 0 }
0x23e8   :  { %9560 = vmatprep.subr.msk.bf16.mxu1 %vm403_vm4, %v9696_v14 }
0x23e9   :  { %v12600_v41 = vadd.f32 %v6046_v45, %v12282_v35  ;;  %v6079_v54 = vsel %vm216_vm3, %v12597_v47, 0.0  ;;  %6259 = vmatpush1.bf16.msra.mxu0 %v6248_v1 }
0x23ea   :  { %6080 = vadd.xlane.f32.xlu0 %v6079_v54 }
0x23eb   :  { %v6082_v19 = vsel %vm216_vm3, %v12600_v41, 0.0  ;;  %9387 = vmatpush3.bf16.msra.mxu1 %v6254_v20 }
0x23ec   :  { %6083 = vadd.xlane.f32.xlu1 %v6082_v19 }
0x245f   :  { %v6063_v56 = vpop.xlane.xlu0 %6062 }
0x2460   :  { %v6085_v29 = vmul.f32 0.033333335, %v6063_v56 }
0x2461   :  { %v6066_v33 = vpop.xlane.xlu1 %6065 }
0x2462   :  { %v12607_v40 = vsub.f32 %v12567_v23, %v6085_v29  ;;  %v6086_v61 = vmul.f32 0.033333335, %v6066_v33 }
0x2464   :  { %v12610_v18 = vsub.f32 %v12570_v63, %v6086_v61  ;;  %v6101_v35 = vmul.f32 %v12607_v40, %v12607_v40 }
0x2466   :  { %v6109_v16 = vsel %vm216_vm3, %v6101_v35, 0.0  ;;  %v6102_v9 = vmul.f32 %v12610_v18, %v12610_v18 }
0x2467   :  { %v6069_v3 = vpop.xlane.xlu0 %6068  ;;  %6110 = vadd.xlane.f32.xlu0 %v6109_v16 }
0x2468   :  { %v6087_v46 = vmul.f32 0.033333335, %v6069_v3  ;;  %v6112_v5 = vsel %vm216_vm3, %v6102_v9, 0.0 }
0x2469   :  { %v6072_v26 = vpop.xlane.xlu1 %6071  ;;  %6113 = vadd.xlane.f32.xlu1 %v6112_v5  ;;  %v8517_v5 = vld [vmem:[%s13281_s5 + $0x3] ss:$0 sm:$0xff] }
0x246a   :  { %v12619_v39 = vsub.f32 %v12577_v12, %v6087_v46  ;;  %v6088_v48 = vmul.f32 0.033333335, %v6072_v26 }
0x246c   :  { %v12622_v43 = vsub.f32 %v12580_v36, %v6088_v48  ;;  %v6103_v30 = vmul.f32 %v12619_v39, %v12619_v39 }
0x246e   :  { %v6115_v59 = vsel %vm216_vm3, %v6103_v30, 0.0  ;;  %v6104_v38 = vmul.f32 %v12622_v43, %v12622_v43 }
0x246f   :  { %v6075_v4 = vpop.xlane.xlu0 %6074  ;;  %6116 = vadd.xlane.f32.xlu0 %v6115_v59 }
0x2470   :  { %v6089_v42 = vmul.f32 0.033333335, %v6075_v4  ;;  %v6118_v17 = vsel %vm216_vm3, %v6104_v38, 0.0 }
0x2471   :  { %v6078_v8 = vpop.xlane.xlu1 %6077  ;;  %6119 = vadd.xlane.f32.xlu1 %v6118_v17  ;;  %v8518_v17 = vld [vmem:[%s13282_s6 + $0x3] ss:$0 sm:$0xff] }
0x2472   :  { %v12631_v11 = vsub.f32 %v12587_v21, %v6089_v42  ;;  %v6090_v10 = vmul.f32 0.033333335, %v6078_v8 }
0x2474   :  { %v12634_v15 = vsub.f32 %v12590_v55, %v6090_v10  ;;  %v6105_v25 = vmul.f32 %v12631_v11, %v12631_v11 }
0x2476   :  { %v6121_v22 = vsel %vm216_vm3, %v6105_v25, 0.0  ;;  %v6106_v62 = vmul.f32 %v12634_v15, %v12634_v15 }
0x2477   :  { %6122 = vadd.xlane.f32.xlu0 %v6121_v22  ;;  %v6081_v58 = vpop.xlane.xlu0 %6080 }
0x2478   :  { %v6091_v7 = vmul.f32 0.033333335, %v6081_v58  ;;  %v6124_v24 = vsel %vm216_vm3, %v6106_v62, 0.0 }
0x2479   :  { %6125 = vadd.xlane.f32.xlu1 %v6124_v24  ;;  %v6084_v49 = vpop.xlane.xlu1 %6083 }
0x247a   :  { %v12643_v53 = vsub.f32 %v12597_v47, %v6091_v7  ;;  %v6092_v34 = vmul.f32 0.033333335, %v6084_v49 }
0x247c   :  { %v12646_v60 = vsub.f32 %v12600_v41, %v6092_v34  ;;  %v6107_v57 = vmul.f32 %v12643_v53, %v12643_v53 }
0x247e   :  { %v6127_v32 = vsel %vm216_vm3, %v6107_v57, 0.0  ;;  %v6108_v6 = vmul.f32 %v12646_v60, %v12646_v60 }
0x247f   :  { %6128 = vadd.xlane.f32.xlu0 %v6127_v32 }
0x2480   :  { %v6130_v50 = vsel %vm216_vm3, %v6108_v6, 0.0 }
0x2481   :  { %6131 = vadd.xlane.f32.xlu1 %v6130_v50 }
0x24f4   :  { %v6111_v0 = vpop.xlane.xlu0 %6110 }
0x24f5   :  { %v6133_v45 = vmul.f32 0.033333335, %v6111_v0 }
0x24f6   :  { %v6114_v54 = vpop.xlane.xlu1 %6113 }
0x24f7   :  { %v6141_v19 = vadd.f32 1e-05, %v6133_v45  ;;  %v6134_v56 = vmul.f32 0.033333335, %v6114_v54 }
0x24f9   :  { %10113 = vrsqrt.f32 %v6141_v19  ;;  %v6142_v29 = vadd.f32 1e-05, %v6134_v56 }
0x24fb   :  { %10115 = vrsqrt.f32 %v6142_v29 }
0x24fc   :  { %v6117_v33 = vpop.xlane.xlu0 %6116 }
0x24fd   :  { %v6135_v61 = vmul.f32 0.033333335, %v6117_v33 }
0x24fe   :  { %v6120_v35 = vpop.xlane.xlu1 %6119 }
0x24ff   :  { %v6143_v16 = vadd.f32 1e-05, %v6135_v61  ;;  %v6136_v9 = vmul.f32 0.033333335, %v6120_v35 }
0x2501   :  { %10117 = vrsqrt.f32 %v6143_v16  ;;  %v6144_v3 = vadd.f32 1e-05, %v6136_v9 }
0x2503   :  { %v10114_v46 = vpop.eup %10113  ;;  %10119 = vrsqrt.f32 %v6144_v3 }
0x2504   :  { %v6157_v26 = vmul.f32 %v10114_v46, %v12607_v40  ;;  %v6123_v48 = vpop.xlane.xlu0 %6122 }
0x2505   :  { %v10116_v30 = vpop.eup %10115  ;;  %v6137_v59 = vmul.f32 0.033333335, %v6123_v48 }
0x2506   :  { %v6171_v38 = vmul.f32 %v8517_v5, %v6157_v26  ;;  %v6158_v4 = vmul.f32 %v10116_v30, %v12610_v18  ;;  %v6126_v42 = vpop.xlane.xlu1 %6125 }
0x2507   :  { %v6145_v8 = vadd.f32 1e-05, %v6137_v59  ;;  %v6138_v10 = vmul.f32 0.033333335, %v6126_v42 }
0x2508   :  { %v6172_v25 = vmul.f32 %v8517_v5, %v6158_v4  ;;  %v6185_v62 = vadd.f32 %v8518_v17, %v6171_v38 }
0x2509   :  { %10121 = vrsqrt.f32 %v6145_v8  ;;  %v6146_v22 = vadd.f32 1e-05, %v6138_v10 }
0x250a   :  { %v6186_v58 = vadd.f32 %v8518_v17, %v6172_v25 }
0x250b   :  { %v10118_v7 = vpop.eup %10117  ;;  %10123 = vrsqrt.f32 %v6146_v22 }
0x250c   :  { %v6159_v40 = vmul.f32 %v10118_v7, %v12619_v39  ;;  %v6129_v24 = vpop.xlane.xlu0 %6128  ;;  %v6193_v49 = vpack.c.bf16 %v6186_v58, %v6185_v62 }
0x250d   :  { %v10120_v34 = vpop.eup %10119  ;;  %v6139_v18 = vmul.f32 0.033333335, %v6129_v24 }
0x250e   :  { %v6160_v57 = vmul.f32 %v10120_v34, %v12622_v43  ;;  %v6132_v32 = vpop.xlane.xlu1 %6131  ;;  %8534 = vmatmul.mubr.msk.bf16.vlgmr.msra.gmra.mrb[128].mxu0 %vm216_vm3, %v6193_v49  ;;  %9388 = vmatprep.mubr.msk.bf16.mxu1 %vm216_vm3, %v6193_v49  ;;  %v6173_v6 = vmul.f32 %v8517_v5, %v6159_v40 }
0x250f   :  { %v6147_v50 = vadd.f32 1e-05, %v6139_v18  ;;  %v6140_v31 = vmul.f32 0.033333335, %v6132_v32  ;;  %6298 = vmatprep.mubr.bf16.mxu0 %v10267_v44 }
0x2510   :  { %v6174_v28 = vmul.f32 %v8517_v5, %v6160_v57  ;;  %v6187_v39 = vadd.f32 %v8518_v17, %v6173_v6 }
0x2511   :  { %10125 = vrsqrt.f32 %v6147_v50  ;;  %v6148_v37 = vadd.f32 1e-05, %v6140_v31 }
0x2512   :  { %v6188_v51 = vadd.f32 %v8518_v17, %v6174_v28 }
0x2513   :  { %v10122_v1 = vpop.eup %10121  ;;  %10127 = vrsqrt.f32 %v6148_v37 }
0x2514   :  { %v6161_v2 = vmul.f32 %v10122_v1, %v12631_v11  ;;  %v6194_v43 = vpack.c.bf16 %v6188_v51, %v6187_v39 }
0x2515   :  { %v10124_v14 = vpop.eup %10123 }
0x2516   :  { %v6162_v20 = vmul.f32 %v10124_v14, %v12634_v15  ;;  %8535 = vmatmul.mubr.msk.bf16.gmra.mrb[132].mxu0 %vm216_vm3, %v6194_v43  ;;  %9389 = vmatmul.mubr.msk.bf16.vlgmr.msra.gmra.mrb[168].mxu1 %vm216_vm3, %v6194_v43  ;;  %v6175_v0 = vmul.f32 %v8517_v5, %v6161_v2 }
0x2517   :  { %6308 = vmatprep.mubr.bf16.mxu0 %v10267_v44 }
0x2518   :  { %v6176_v45 = vmul.f32 %v8517_v5, %v6162_v20  ;;  %v6189_v54 = vadd.f32 %v8518_v17, %v6175_v0 }
0x251a   :  { %v6190_v19 = vadd.f32 %v8518_v17, %v6176_v45 }
0x251b   :  { %v10126_v56 = vpop.eup %10125 }
0x251c   :  { %v6163_v29 = vmul.f32 %v10126_v56, %v12643_v53  ;;  %v6195_v33 = vpack.c.bf16 %v6190_v19, %v6189_v54 }
0x251d   :  { %v10128_v61 = vpop.eup %10127 }
0x251e   :  { %v6164_v11 = vmul.f32 %v10128_v61, %v12646_v60  ;;  %8536 = vmatmul.mubr.msk.bf16.gmra.mrb[136].mxu0 %vm216_vm3, %v6195_v33  ;;  %9392 = vmatprep.mubr.msk.bf16.mxu1 %vm216_vm3, %v6195_v33  ;;  %v6177_v15 = vmul.f32 %v8517_v5, %v6163_v29 }
0x251f   :  { %6318 = vmatprep.mubr.bf16.mxu0 %v10267_v44 }
0x2520   :  { %v6178_v35 = vmul.f32 %v8517_v5, %v6164_v11  ;;  %v6191_v16 = vadd.f32 %v8518_v17, %v6177_v15 }
0x2522   :  { %v6192_v9 = vadd.f32 %v8518_v17, %v6178_v35 }
0x2524   :  { %v6196_v3 = vpack.c.bf16 %v6192_v9, %v6191_v16 }
0x2526   :  { %8537 = vmatmul.mubr.msk.bf16.gmra.mrb[140].mxu0 %vm216_vm3, %v6196_v3  ;;  %9393 = vmatmul.mubr.msk.bf16.gmra.mrb[172].mxu1 %vm216_vm3, %v6196_v3 }
0x25e1   :  { %v6290_v53 = vpop.f32.mrb[128].mxu0 }
0x25e2   :  { %v6292_v46 = vpop.f32.mrb[129].mxu0 }
0x25e3   :  { %v6294_v26 = vpop.f32.mrb[130].mxu0 }
0x25e4   :  { %v12701_v48 = vpack.c.bf16 %v6294_v26, %v6290_v53  ;;  %v6296_v60 = vpop.f32.mrb[131].mxu0 }
0x25e5   :  { %v12703_v30 = vpack.c.bf16 %v6296_v60, %v6292_v46 }
0x25e6   :  { %9400 = vmatprep.mubr.msk.bf16.mxu0 %vm579_vm5, %v12701_v48 }
0x25e7   :  { %9561 = vmatprep.subr.msk.bf16.mxu0 %vm579_vm5, %v12703_v30  ;;  %v6430_v5 = vsel %vm579_vm5, %v12703_v30, 0 }
0x25e8   :  { %9397 = vmatpush3.bf16.xpose.msra.mxu0 %v6430_v5 }
0x25e9   :  { %v6300_v59 = vpop.f32.mrb[132].mxu0  ;;  %v9390_v38 = vpop.f32.mrb[168].mxu1 }
0x25ea   :  { %v6302_v4 = vpop.f32.mrb[133].mxu0  ;;  %v6363_v42 = vpop.f32.mrb[169].mxu1 }
0x25eb   :  { %v6304_v17 = vpop.f32.mrb[134].mxu0  ;;  %v9391_v8 = vpop.f32.mrb[170].mxu1 }
0x25ec   :  { %v12711_v10 = vpack.c.bf16 %v6304_v17, %v6300_v59  ;;  %v12713_v25 = vpack.c.bf16 %v9391_v8, %v9390_v38  ;;  %v6306_v22 = vpop.f32.mrb[135].mxu0  ;;  %v6366_v62 = vpop.f32.mrb[171].mxu1 }
0x25ed   :  { %v12715_v58 = vpack.c.bf16 %v6306_v22, %v6302_v4  ;;  %v12717_v7 = vpack.c.bf16 %v6366_v62, %v6363_v42 }
0x25ef   :  { %9562 = vmatprep.subr.msk.bf16.mxu0 %vm579_vm5, %v12715_v58  ;;  %v6433_v40 = vsel %vm579_vm5, %v12715_v58, 0 }
0x25f0   :  { %9399 = vmatpush3.bf16.xpose.msra.mxu0 %v6433_v40 }
0x25f1   :  { %v6310_v24 = vpop.f32.mrb[136].mxu0  ;;  %9412 = vmatprep.subr.bf16.mxu0 %v12717_v7 }
0x25f2   :  { %v6312_v49 = vpop.f32.mrb[137].mxu0 }
0x25f3   :  { %v6314_v34 = vpop.f32.mrb[138].mxu0 }
0x25f4   :  { %v12724_v18 = vpack.c.bf16 %v6314_v34, %v6310_v24  ;;  %v6316_v57 = vpop.f32.mrb[139].mxu0 }
0x25f5   :  { %v12726_v32 = vpack.c.bf16 %v6316_v57, %v6312_v49 }
0x25f6   :  { %9408 = vmatprep.mubr.msk.bf16.mxu1 %vm579_vm5, %v12724_v18 }
0x25f7   :  { %9401 = vmatmul.mubr.msk.bf16.vlgmr.msra.gmra.mrb[144].mxu0 %vm579_vm5, %v12711_v10  ;;  %9563 = vmatprep.subr.msk.bf16.mxu1 %vm579_vm5, %v12726_v32  ;;  %v6491_v6 = vsel %vm579_vm5, %v12726_v32, 0 }
0x25f8   :  { %9405 = vmatpush3.bf16.xpose.msra.mxu1 %v6491_v6  ;;  %9413 = vmatpush3.bf16.msra.mxu0 %v12717_v7 }
0x25f9   :  { %v6320_v50 = vpop.f32.mrb[140].mxu0  ;;  %v9394_v31 = vpop.f32.mrb[172].mxu1  ;;  %9414 = vmatprep.subr.bf16.mxu0 %v12713_v25 }
0x25fa   :  { %v6322_v28 = vpop.f32.mrb[141].mxu0  ;;  %v6379_v37 = vpop.f32.mrb[173].mxu1 }
0x25fb   :  { %v6324_v39 = vpop.f32.mrb[142].mxu0  ;;  %v9395_v51 = vpop.f32.mrb[174].mxu1 }
0x25fc   :  { %v12738_v1 = vpack.c.bf16 %v6324_v39, %v6320_v50  ;;  %v12740_v2 = vpack.c.bf16 %v9395_v51, %v9394_v31  ;;  %v6326_v43 = vpop.f32.mrb[143].mxu0  ;;  %v6382_v14 = vpop.f32.mrb[175].mxu1  ;;  %9415 = vmatpush3.bf16.msra.mxu0 %v12713_v25 }
0x25fd   :  { %v12743_v20 = vpack.c.bf16 %v6326_v43, %v6322_v28  ;;  %v12745_v0 = vpack.c.bf16 %v6382_v14, %v6379_v37 }
0x25ff   :  { %9564 = vmatprep.subr.msk.bf16.mxu1 %vm579_vm5, %v12743_v20  ;;  %9420 = vmatprep.subr.bf16.mxu0 %v12745_v0  ;;  %v6494_v45 = vsel %vm579_vm5, %v12743_v20, 0 }
0x2600   :  { %9407 = vmatpush3.bf16.xpose.msra.mxu1 %v6494_v45 }
0x2607   :  { %9409 = vmatmul.mubr.msk.bf16.vlgmr.msra.gmra.mrb[176].mxu1 %vm579_vm5, %v12738_v1 }
0x26ca   :  { %v9402_v54 = vpop.f32.mrb[144].mxu0 }
0x26cb   :  { %v6469_v19 = vpop.f32.mrb[145].mxu0  ;;  %v6547_v56 = vmul.f32 0.125, %v9402_v54 }
0x26cc   :  { %v6545_v29 = vmul.f32 0.125, %v6469_v19  ;;  %v9403_v33 = vpop.f32.mrb[146].mxu0 }
0x26cd   :  { %v6472_v61 = vpop.f32.mrb[147].mxu0  ;;  %v6548_v15 = vmul.f32 0.125, %v9403_v33  ;;  %v6555_v9 = vsel %vm213_vm6, -1e+30, %v6547_v56 }
0x26ce   :  { %v6553_v11 = vsel %vm213_vm6, -1e+30, %v6545_v29  ;;  %v6546_v35 = vmul.f32 0.125, %v6472_v61  ;;  %v6567_v26 = vsel %vm720_vm7, %v6555_v9, -inf }
0x26cf   :  { %v6561_v16 = vsel %vm720_vm7, %v6553_v11, -inf  ;;  %v6556_v46 = vsel %vm213_vm6, -1e+30, %v6548_v15 }
0x26d0   :  { %v6554_v3 = vsel %vm213_vm6, -1e+30, %v6546_v35  ;;  %6562 = vmax.xlane.f32.xlu0 %v6561_v16  ;;  %v6570_v60 = vsel %vm720_vm7, %v6556_v46, -inf }
0x26d1   :  { %v6564_v53 = vsel %vm720_vm7, %v6554_v3, -inf }
0x26d2   :  { %6565 = vmax.xlane.f32.xlu1 %v6564_v53 }
0x26d4   :  { %6568 = vmax.xlane.f32.xlu0 %v6567_v26 }
0x26d6   :  { %6571 = vmax.xlane.f32.xlu1 %v6570_v60 }
0x26da   :  { %v9410_v5 = vpop.f32.mrb[176].mxu1 }
0x26db   :  { %v6530_v59 = vpop.f32.mrb[177].mxu1  ;;  %v6551_v38 = vmul.f32 0.125, %v9410_v5 }
0x26dc   :  { %v6549_v4 = vmul.f32 0.125, %v6530_v59  ;;  %v9411_v42 = vpop.f32.mrb[178].mxu1 }
0x26dd   :  { %v6533_v17 = vpop.f32.mrb[179].mxu1  ;;  %v6552_v22 = vmul.f32 0.125, %v9411_v42  ;;  %v6559_v24 = vsel %vm213_vm6, -1e+30, %v6551_v38 }
0x26de   :  { %v6557_v8 = vsel %vm213_vm6, -1e+30, %v6549_v4  ;;  %v6550_v62 = vmul.f32 0.125, %v6533_v17  ;;  %v6579_v6 = vsel %vm720_vm7, %v6559_v24, -inf }
0x26df   :  { %v6573_v40 = vsel %vm720_vm7, %v6557_v8, -inf  ;;  %v6560_v57 = vsel %vm213_vm6, -1e+30, %v6552_v22 }
0x26e0   :  { %v6558_v49 = vsel %vm213_vm6, -1e+30, %v6550_v62  ;;  %6574 = vmax.xlane.f32.xlu0 %v6573_v40  ;;  %v6582_v50 = vsel %vm720_vm7, %v6560_v57, -inf }
0x26e1   :  { %v6576_v34 = vsel %vm720_vm7, %v6558_v49, -inf }
0x26e2   :  { %6577 = vmax.xlane.f32.xlu1 %v6576_v34 }
0x26e4   :  { %6580 = vmax.xlane.f32.xlu0 %v6579_v6 }
0x26e6   :  { %6583 = vmax.xlane.f32.xlu1 %v6582_v50 }
0x275d   :  { %v6563_v31 = vpop.xlane.xlu0 %6562 }
0x275e   :  { %v6585_v28 = vsub.f32 %v6553_v11, %v6563_v31 }
0x275f   :  { %v6566_v37 = vpop.xlane.xlu1 %6565 }
0x2760   :  { %v6586_v51 = vsub.f32 %v6554_v3, %v6566_v37  ;;  %v6593_v14 = vmul.f32 1.442695, %v6585_v28 }
0x2761   :  { %v6569_v39 = vpop.xlane.xlu0 %6568 }
0x2762   :  { %v6587_v43 = vsub.f32 %v6555_v9, %v6569_v39  ;;  %v6595_v56 = vmul.f32 1.442695, %v6586_v51 }
0x2763   :  { %v6572_v45 = vpop.xlane.xlu1 %6571 }
0x2764   :  { %v6597_v54 = vmul.f32 1.442695, %v6587_v43  ;;  %v6588_v19 = vsub.f32 %v6556_v46, %v6572_v45 }
0x2766   :  { %10129 = vpow2.f32 %v6597_v54  ;;  %v6599_v29 = vmul.f32 1.442695, %v6588_v19 }
0x2767   :  { %10131 = vpow2.f32 %v6593_v14 }
0x2768   :  { %10133 = vpow2.f32 %v6599_v29 }
0x2769   :  { %10135 = vpow2.f32 %v6595_v56 }
0x276d   :  { %v6575_v33 = vpop.xlane.xlu0 %6574 }
0x276e   :  { %v6589_v15 = vsub.f32 %v6557_v8, %v6575_v33 }
0x276f   :  { %v6578_v8 = vpop.xlane.xlu1 %6577 }
0x2770   :  { %v12778_v61 = vpop.eup %10129  ;;  %v6601_v26 = vmul.f32 1.442695, %v6589_v15  ;;  %v6590_v40 = vsub.f32 %v6558_v49, %v6578_v8 }
0x2771   :  { %v10132_v35 = vpop.eup %10131  ;;  %v6581_v11 = vpop.xlane.xlu0 %6580  ;;  %v6615_v16 = vsel %vm720_vm7, %v12778_v61, 0.0 }
0x2772   :  { %v10134_v9 = vpop.eup %10133  ;;  %v6591_v3 = vsub.f32 %v6559_v24, %v6581_v11  ;;  %6616 = vadd.xlane.f32.xlu0 %v6615_v16  ;;  %v6609_v5 = vsel %vm720_vm7, %v10132_v35, 0.0  ;;  %v6603_v34 = vmul.f32 1.442695, %v6590_v40 }
0x2773   :  { %v6618_v53 = vsel %vm720_vm7, %v10134_v9, 0.0  ;;  %v10136_v46 = vpop.eup %10135  ;;  %v6584_v22 = vpop.xlane.xlu1 %6583 }
0x2774   :  { %v6605_v60 = vmul.f32 1.442695, %v6591_v3  ;;  %6619 = vadd.xlane.f32.xlu1 %v6618_v53  ;;  %v6612_v59 = vsel %vm720_vm7, %v10136_v46, 0.0  ;;  %v6592_v62 = vsub.f32 %v6560_v57, %v6584_v22 }
0x2776   :  { %10137 = vpow2.f32 %v6605_v60  ;;  %6610 = vadd.xlane.f32.xlu0 %v6609_v5  ;;  %v6607_v24 = vmul.f32 1.442695, %v6592_v62 }
0x2777   :  { %10139 = vpow2.f32 %v6601_v26 }
0x2778   :  { %6613 = vadd.xlane.f32.xlu1 %v6612_v59  ;;  %10141 = vpow2.f32 %v6607_v24 }
0x2779   :  { %10143 = vpow2.f32 %v6603_v34 }
0x2780   :  { %v12785_v38 = vpop.eup %10137 }
0x2781   :  { %v6627_v4 = vsel %vm720_vm7, %v12785_v38, 0.0  ;;  %v12789_v42 = vpop.eup %10139 }
0x2782   :  { %6628 = vadd.xlane.f32.xlu0 %v6627_v4  ;;  %v6621_v17 = vsel %vm720_vm7, %v12789_v42, 0.0 }
0x2786   :  { %6622 = vadd.xlane.f32.xlu0 %v6621_v17 }
0x2789   :  { %6777 = vrot.lane.b32.xlu1 %v12715_v58, %s10268_s26  ;;  %v10142_v58 = vpop.eup %10141 }
0x278a   :  { %v10144_v6 = vpop.eup %10143 }
0x278b   :  { %v6624_v57 = vsel %vm720_vm7, %v10144_v6, 0.0 }
0x278d   :  { %6848 = vrot.lane.b32.xlu1 %v12726_v32, %s10268_s26  ;;  %v6630_v32 = vsel %vm720_vm7, %v10142_v58, 0.0 }
0x279c   :  { %6775 = vrot.lane.b32.xlu0 %v12703_v30, %s10268_s26 }
0x27a0   :  { %6771 = vrot.lane.b32.xlu0 %v12711_v10, %s10268_s26 }
0x27a4   :  { %6842 = vrot.lane.b32.xlu0 %v12724_v18, %s10268_s26 }
0x27b1   :  { %6631 = vadd.xlane.f32.xlu1 %v6630_v32 }
0x27b5   :  { %6625 = vadd.xlane.f32.xlu1 %v6624_v57 }
0x27c6   :  { %6769 = vrot.lane.b32.xlu1 %v12701_v48, %s10268_s26 }
0x27ca   :  { %6850 = vrot.lane.b32.xlu1 %v12743_v20, %s10268_s26 }
0x27ce   :  { %6844 = vrot.lane.b32.xlu1 %v12738_v1, %s10268_s26 }
0x27ff   :  { %v6617_v30 = vpop.xlane.xlu0 %6616 }
0x2801   :  { %v6620_v10 = vpop.xlane.xlu1 %6619 }
0x2802   :  { %10145 = vrcp.f32 %v6620_v10 }
0x2803   :  { %v6611_v18 = vpop.xlane.xlu0 %6610 }
0x2804   :  { %10147 = vrcp.f32 %v6611_v18 }
0x2805   :  { %10149 = vrcp.f32 %v6617_v30  ;;  %v6614_v49 = vpop.xlane.xlu1 %6613 }
0x2806   :  { %10151 = vrcp.f32 %v6614_v49 }
0x2809   :  { %v6778_v54 = vpop.permute.xlu1 %6777 }
0x280a   :  { %v6789_v33 = vsel %vm579_vm5, %v6778_v54, 0 }
0x280c   :  { %v10146_v50 = vpop.eup %10145 }
0x280d   :  { %v6644_v48 = vmul.f32 %v10146_v50, %v10134_v9  ;;  %v6849_v29 = vpop.permute.xlu1 %6848 }
0x280e   :  { %v10148_v31 = vpop.eup %10147  ;;  %v6859_v17 = vsel %vm579_vm5, %v6849_v29, 0 }
0x280f   :  { %v10150_v28 = vpop.eup %10149  ;;  %v6629_v37 = vpop.xlane.xlu0 %6628  ;;  %v6641_v51 = vmul.f32 %v10148_v31, %v10132_v35 }
0x2810   :  { %v10152_v39 = vpop.eup %10151  ;;  %v6643_v20 = vmul.f32 %v10150_v28, %v12778_v61 }
0x2811   :  { %v6642_v43 = vmul.f32 %v10152_v39, %v10136_v46 }
0x2812   :  { %v6650_v45 = vpack.c.bf16 %v6644_v48, %v6643_v20 }
0x2813   :  { %v6623_v14 = vpop.xlane.xlu0 %6622  ;;  %v6649_v1 = vpack.c.bf16 %v6642_v43, %v6641_v51 }
0x2815   :  { %9416 = vmatprep.mubr.msk.bf16.mxu0 %vm720_vm7, %v6649_v1 }
0x2816   :  { %9417 = vmatmul.mubr.msk.bf16.vlgmr.msra.gmra.mrb[148].mxu0 %vm720_vm7, %v6650_v45 }
0x2817   :  { %9421 = vmatpush3.bf16.msra.mxu0 %v12745_v0  ;;  %v6776_v19 = vpop.permute.xlu0 %6775 }
0x2818   :  { %v6786_v56 = vsel %vm579_vm5, %v6776_v19, 0  ;;  %9422 = vmatprep.subr.bf16.mxu0 %v12740_v2  ;;  %9565 = vmatprep.subr.msk.bf16.mxu1 %vm579_vm5, %v6776_v19 }
0x2819   :  { %9429 = vmatpush3.bf16.xpose.msra.mxu1 %v6786_v56 }
0x281a   :  { %9566 = vmatprep.subr.msk.bf16.mxu1 %vm579_vm5, %v6778_v54 }
0x281b   :  { %9423 = vmatpush3.bf16.msra.mxu0 %v12740_v2  ;;  %v6772_v11 = vpop.permute.xlu0 %6771 }
0x281c   :  { %9567 = vmatprep.subr.msk.bf16.mxu0 %vm579_vm5, %v6849_v29 }
0x281f   :  { %v6843_v8 = vpop.permute.xlu0 %6842 }
0x2821   :  { %9431 = vmatpush3.bf16.xpose.msra.mxu1 %v6789_v33 }
0x283e   :  { %v6632_v61 = vpop.xlane.xlu1 %6631 }
0x283f   :  { %10153 = vrcp.f32 %v6632_v61 }
0x2840   :  { %10155 = vrcp.f32 %v6623_v14 }
0x2841   :  { %10157 = vrcp.f32 %v6629_v37 }
0x2842   :  { %v6626_v15 = vpop.xlane.xlu1 %6625 }
0x2843   :  { %10159 = vrcp.f32 %v6626_v15 }
0x2846   :  { %v6770_v35 = vpop.permute.xlu1 %6769 }
0x2847   :  { %9432 = vmatprep.mubr.msk.bf16.mxu1 %vm579_vm5, %v6770_v35 }
0x2848   :  { %9433 = vmatmul.mubr.msk.bf16.vlgmr.msra.gmra.mrb[180].mxu1 %vm579_vm5, %v6772_v11 }
0x2849   :  { %v10154_v16 = vpop.eup %10153 }
0x284a   :  { %v10156_v9 = vpop.eup %10155  ;;  %v6648_v46 = vmul.f32 %v10154_v16, %v10142_v58  ;;  %v6851_v22 = vpop.permute.xlu1 %6850 }
0x284b   :  { %v10158_v3 = vpop.eup %10157  ;;  %v6645_v26 = vmul.f32 %v10156_v9, %v12789_v42  ;;  %v6862_v42 = vsel %vm579_vm5, %v6851_v22, 0 }
0x284c   :  { %v6647_v5 = vmul.f32 %v10158_v3, %v12785_v38 }
0x284d   :  { %v10160_v53 = vpop.eup %10159 }
0x284e   :  { %v6646_v60 = vmul.f32 %v10160_v53, %v10144_v6  ;;  %v6652_v4 = vpack.c.bf16 %v6648_v46, %v6647_v5  ;;  %v6845_v62 = vpop.permute.xlu1 %6844 }
0x2850   :  { %v6651_v59 = vpack.c.bf16 %v6646_v60, %v6645_v26 }
0x2852   :  { %9424 = vmatprep.mubr.msk.bf16.mxu0 %vm720_vm7, %v6651_v59 }
0x2853   :  { %9425 = vmatmul.mubr.msk.bf16.vlgmr.msra.gmra.mrb[152].mxu0 %vm720_vm7, %v6652_v4 }
0x2854   :  { %9437 = vmatpush3.bf16.xpose.msra.mxu0 %v6859_v17  ;;  %9440 = vmatprep.mubr.msk.bf16.mxu0 %vm579_vm5, %v6843_v8 }
0x2855   :  { %9568 = vmatprep.subr.msk.bf16.mxu0 %vm579_vm5, %v6851_v22 }
0x285c   :  { %9439 = vmatpush3.bf16.xpose.msra.mxu0 %v6862_v42 }
0x2863   :  { %9441 = vmatmul.mubr.msk.bf16.vlgmr.msra.gmra.mrb[156].mxu0 %vm579_vm5, %v6845_v62 }
0x28e9   :  { %v12833_v38 = vpop.f32.mrb[148].mxu0 }
0x28ea   :  { %v12835_v40 = vpop.f32.mrb[149].mxu0 }
0x28eb   :  { %v12837_v24 = vpop.f32.mrb[150].mxu0 }
0x28ec   :  { %v6764_v34 = vpack.c.bf16 %v12837_v24, %v12833_v38  ;;  %v12841_v58 = vpop.f32.mrb[151].mxu0 }
0x28ed   :  { %v6763_v32 = vpack.c.bf16 %v12841_v58, %v12835_v40  ;;  %v8591_v40 = vld [vmem:[%s13285_s9 + $0x3] ss:$0 sm:$0xff] }
0x291b   :  { %v9434_v6 = vpop.f32.mrb[180].mxu1 }
0x291c   :  { %v6825_v57 = vpop.f32.mrb[181].mxu1  ;;  %v6915_v30 = vmul.f32 0.125, %v9434_v6 }
0x291d   :  { %v6913_v10 = vmul.f32 0.125, %v6825_v57  ;;  %v9435_v18 = vpop.f32.mrb[182].mxu1 }
0x291e   :  { %v6828_v49 = vpop.f32.mrb[183].mxu1  ;;  %v6923_v37 = vsel %vm213_vm6, -1e+30, %v6915_v30  ;;  %v6916_v39 = vmul.f32 0.125, %v9435_v18 }
0x291f   :  { %v6921_v50 = vsel %vm213_vm6, -1e+30, %v6913_v10  ;;  %v6914_v31 = vmul.f32 0.125, %v6828_v49  ;;  %v6935_v43 = vsel %vm720_vm7, %v6923_v37, -inf }
0x2920   :  { %v6929_v28 = vsel %vm720_vm7, %v6921_v50, -inf  ;;  %v6924_v20 = vsel %vm213_vm6, -1e+30, %v6916_v39 }
0x2921   :  { %v6922_v48 = vsel %vm213_vm6, -1e+30, %v6914_v31  ;;  %6930 = vmax.xlane.f32.xlu0 %v6929_v28  ;;  %v6938_v54 = vsel %vm720_vm7, %v6924_v20, -inf }
0x2922   :  { %v6932_v51 = vsel %vm720_vm7, %v6922_v48, -inf }
0x2923   :  { %6933 = vmax.xlane.f32.xlu1 %v6932_v51 }
0x2925   :  { %6936 = vmax.xlane.f32.xlu0 %v6935_v43 }
0x2926   :  { %v12856_v14 = vpop.f32.mrb[152].mxu0 }
0x2927   :  { %v12858_v1 = vpop.f32.mrb[153].mxu0 }
0x2928   :  { %v12860_v45 = vpop.f32.mrb[154].mxu0 }
0x2929   :  { %v6766_v19 = vpack.c.bf16 %v12860_v45, %v12856_v14  ;;  %v12865_v56 = vpop.f32.mrb[155].mxu0  ;;  %6939 = vmax.xlane.f32.xlu0 %v6938_v54 }
0x292a   :  { %v6765_v29 = vpack.c.bf16 %v12865_v56, %v12858_v1 }
0x2936   :  { %v9442_v33 = vpop.f32.mrb[156].mxu0 }
0x2937   :  { %v6898_v61 = vpop.f32.mrb[157].mxu0  ;;  %v6919_v15 = vmul.f32 0.125, %v9442_v33 }
0x2938   :  { %v6917_v35 = vmul.f32 0.125, %v6898_v61  ;;  %v9443_v11 = vpop.f32.mrb[158].mxu0 }
0x2939   :  { %v6901_v16 = vpop.f32.mrb[159].mxu0  ;;  %v6920_v3 = vmul.f32 0.125, %v9443_v11  ;;  %v6927_v26 = vsel %vm213_vm6, -1e+30, %v6919_v15 }
0x293a   :  { %v6925_v9 = vsel %vm213_vm6, -1e+30, %v6917_v35  ;;  %v6918_v53 = vmul.f32 0.125, %v6901_v16  ;;  %v6947_v4 = vsel %vm720_vm7, %v6927_v26, -inf }
0x293b   :  { %v6941_v46 = vsel %vm720_vm7, %v6925_v9, -inf  ;;  %v6928_v59 = vsel %vm213_vm6, -1e+30, %v6920_v3 }
0x293c   :  { %v6926_v60 = vsel %vm213_vm6, -1e+30, %v6918_v53  ;;  %6942 = vmax.xlane.f32.xlu0 %v6941_v46  ;;  %v6950_v17 = vsel %vm720_vm7, %v6928_v59, -inf }
0x293d   :  { %v6944_v5 = vsel %vm720_vm7, %v6926_v60, -inf }
0x293e   :  { %6945 = vmax.xlane.f32.xlu1 %v6944_v5 }
0x2940   :  { %6948 = vmax.xlane.f32.xlu0 %v6947_v4 }
0x2942   :  { %6951 = vmax.xlane.f32.xlu1 %v6950_v17 }
0x29ae   :  { %v6931_v8 = vpop.xlane.xlu0 %6930 }
0x29af   :  { %v6953_v22 = vsub.f32 %v6921_v50, %v6931_v8 }
0x29b0   :  { %v6934_v42 = vpop.xlane.xlu1 %6933 }
0x29b1   :  { %v6961_v62 = vmul.f32 1.442695, %v6953_v22  ;;  %v6954_v6 = vsub.f32 %v6922_v48, %v6934_v42 }
0x29b2   :  { %v6937_v57 = vpop.xlane.xlu0 %6936 }
0x29b3   :  { %10161 = vpow2.f32 %v6961_v62  ;;  %v6963_v30 = vmul.f32 1.442695, %v6954_v6  ;;  %v6955_v10 = vsub.f32 %v6923_v37, %v6937_v57 }
0x29b5   :  { %10163 = vpow2.f32 %v6963_v30  ;;  %v6965_v18 = vmul.f32 1.442695, %v6955_v10 }
0x29b6   :  { %v6940_v52 = vpop.xlane.xlu0 %6939 }
0x29b7   :  { %10165 = vpow2.f32 %v6965_v18  ;;  %v6956_v49 = vsub.f32 %v6924_v20, %v6940_v52 }
0x29b9   :  { %v6967_v31 = vmul.f32 1.442695, %v6956_v49 }
0x29bb   :  { %10167 = vpow2.f32 %v6967_v31 }
0x29bd   :  { %v10162_v28 = vpop.eup %10161 }
0x29be   :  { %v6977_v39 = vsel %vm720_vm7, %v10162_v28, 0.0 }
0x29bf   :  { %v10164_v51 = vpop.eup %10163  ;;  %6978 = vadd.xlane.f32.xlu0 %v6977_v39 }
0x29c0   :  { %v6980_v50 = vsel %vm720_vm7, %v10164_v51, 0.0 }
0x29c1   :  { %v12883_v43 = vpop.eup %10165  ;;  %6981 = vadd.xlane.f32.xlu1 %v6980_v50 }
0x29c2   :  { %v6983_v37 = vsel %vm720_vm7, %v12883_v43, 0.0 }
0x29c3   :  { %6984 = vadd.xlane.f32.xlu0 %v6983_v37 }
0x29c5   :  { %v10168_v48 = vpop.eup %10167 }
0x29c6   :  { %v6986_v54 = vsel %vm720_vm7, %v10168_v48, 0.0 }
0x29c7   :  { %6987 = vadd.xlane.f32.xlu1 %v6986_v54 }
0x29c9   :  { %v6943_v20 = vpop.xlane.xlu0 %6942 }
0x29ca   :  { %v6957_v33 = vsub.f32 %v6925_v9, %v6943_v20 }
0x29cb   :  { %v6946_v9 = vpop.xlane.xlu1 %6945 }
0x29cc   :  { %v6969_v35 = vmul.f32 1.442695, %v6957_v33  ;;  %v6958_v4 = vsub.f32 %v6926_v60, %v6946_v9  ;;  %v9698_v33 = vld [vmem:[%s13284_s8 + $0xe8] sm:$0xff]  }
0x29cd   :  { %v6949_v61 = vpop.xlane.xlu0 %6948 }
0x29ce   :  { %v6959_v15 = vsub.f32 %v6927_v26, %v6949_v61  ;;  %v6971_v17 = vmul.f32 1.442695, %v6958_v4 }
0x29cf   :  { %v6952_v26 = vpop.xlane.xlu1 %6951 }
0x29d0   :  { %v6973_v11 = vmul.f32 1.442695, %v6959_v15  ;;  %v6960_v5 = vsub.f32 %v6928_v59, %v6952_v26 }
0x29d2   :  { %10169 = vpow2.f32 %v6973_v11 }
0x29d3   :  { %10171 = vpow2.f32 %v6969_v35 }
0x29d8   :  { %7025 = vrot.lane.b32.xlu1 %v12713_v25, %s10268_s26  ;;  %v6975_v25 = vmul.f32 1.442695, %v6960_v5 }
0x29da   :  { %10173 = vpow2.f32 %v6975_v25 }
0x29db   :  { %10175 = vpow2.f32 %v6971_v17 }
0x29dc   :  { %v12890_v16 = vpop.eup %10169  ;;  %7086 = vrot.lane.b32.xlu1 %v12745_v0, %s10268_s26 }
0x29dd   :  { %v6995_v3 = vsel %vm720_vm7, %v12890_v16, 0.0  ;;  %v12896_v53 = vpop.eup %10171 }
0x29de   :  { %6996 = vadd.xlane.f32.xlu0 %v6995_v3  ;;  %v6989_v46 = vsel %vm720_vm7, %v12896_v53, 0.0 }
0x29e2   :  { %6990 = vadd.xlane.f32.xlu0 %v6989_v46 }
0x29e4   :  { %v10174_v0 = vpop.eup %10173 }
0x29e5   :  { %v6998_v8 = vsel %vm720_vm7, %v10174_v0, 0.0  ;;  %v10176_v22 = vpop.eup %10175 }
0x29e6   :  { %v6992_v42 = vsel %vm720_vm7, %v10176_v22, 0.0 }
0x29f8   :  { %7023 = vrot.lane.b32.xlu0 %v12717_v7, %s10268_s26 }
0x2a00   :  { %6999 = vadd.xlane.f32.xlu1 %v6998_v8  ;;  %v9700_v8 = vld [vmem:[%s13284_s8 + $0xf8] sm:$0xff]  }
0x2a04   :  { %6993 = vadd.xlane.f32.xlu1 %v6992_v42 }
0x2a15   :  { %7088 = vrot.lane.b32.xlu1 %v12740_v2, %s10268_s26 }
0x2a4c   :  { %v6979_v59 = vpop.xlane.xlu0 %6978 }
0x2a4d   :  { %10177 = vrcp.f32 %v6979_v59 }
0x2a4e   :  { %v6982_v60 = vpop.xlane.xlu1 %6981 }
0x2a4f   :  { %10179 = vrcp.f32 %v6982_v60 }
0x2a50   :  { %v6985_v49 = vpop.xlane.xlu0 %6984 }
0x2a54   :  { %v6988_v62 = vpop.xlane.xlu1 %6987 }
0x2a55   :  { %10181 = vrcp.f32 %v6988_v62  ;;  %v9702_v62 = vld [vmem:[%s13284_s8 + $0xc8] sm:$0xff]  }
0x2a56   :  { %10183 = vrcp.f32 %v6985_v49 }
0x2a57   :  { %v10178_v6 = vpop.eup %10177 }
0x2a58   :  { %v7026_v57 = vpop.permute.xlu1 %7025  ;;  %v7009_v7 = vmul.f32 %v10178_v6, %v10162_v28  ;;  %v9697_v28 = vld [vmem:[%s13284_s8 + $0xe0] sm:$0xff]   ;;  %v9703_v6 = vld [vmem:[%s13284_s8 + $0xd0] sm:$0xff]  }
0x2a59   :  { %v10180_v30 = vpop.eup %10179 }
0x2a5a   :  { %v7010_v10 = vmul.f32 %v10180_v30, %v10164_v51 }
0x2a5c   :  { %v7087_v18 = vpop.permute.xlu1 %7086  ;;  %v7017_v52 = vpack.c.bf16 %v7010_v10, %v7009_v7 }
0x2a5d   :  { %9452 = vmatprep.subr.bf16.mxu0 %v7087_v18 }
0x2a5e   :  { %9448 = vmatprep.mubr.msk.bf16.mxu1 %vm720_vm7, %v7017_v52  ;;  %9453 = vmatpush3.bf16.msra.mxu0 %v7087_v18 }
0x2a5f   :  { %v10182_v39 = vpop.eup %10181 }
0x2a60   :  { %v10184_v37 = vpop.eup %10183  ;;  %v7012_v54 = vmul.f32 %v10182_v39, %v10168_v48  ;;  %v9699_v48 = vld [vmem:[%s13284_s8 + $0xf0] sm:$0xff]  }
0x2a61   :  { %v7011_v51 = vmul.f32 %v10184_v37, %v12883_v43 }
0x2a63   :  { %v7018_v20 = vpack.c.bf16 %v7012_v54, %v7011_v51 }
0x2a6b   :  { %v6997_v2 = vpop.xlane.xlu0 %6996 }
0x2a6f   :  { %v6991_v31 = vpop.xlane.xlu0 %6990 }
0x2a73   :  { %v7024_v50 = vpop.permute.xlu0 %7023 }
0x2a74   :  { %9444 = vmatprep.subr.bf16.mxu1 %v7024_v50 }
0x2a75   :  { %9445 = vmatpush3.bf16.msra.mxu1 %v7024_v50 }
0x2a76   :  { %9446 = vmatprep.subr.bf16.mxu1 %v7026_v57 }
0x2a79   :  { %9447 = vmatpush3.bf16.msra.mxu1 %v7026_v57  ;;  %v9704_v57 = vld [vmem:[%s13284_s8 + $0xd8] sm:$0xff]  }
0x2a7a   :  { %9460 = vmatprep.subr.bf16.mxu1 %v9697_v28 }
0x2a7c   :  { %9449 = vmatmul.mubr.msk.bf16.vlgmr.msra.gmra.mrb[184].mxu1 %vm720_vm7, %v7018_v20 }
0x2a7d   :  { %9461 = vmatpush3.bf16.msra.mxu1 %v9697_v28 }
0x2a7e   :  { %9462 = vmatprep.subr.bf16.mxu1 %v9698_v33 }
0x2a81   :  { %9463 = vmatpush3.bf16.msra.mxu1 %v9698_v33 }
0x2a82   :  { %9464 = vmatprep.subr.bf16.mxu1 %v9699_v48 }
0x2a85   :  { %9465 = vmatpush3.bf16.msra.mxu1 %v9699_v48 }
0x2a86   :  { %9466 = vmatprep.subr.bf16.mxu1 %v9700_v8 }
0x2a89   :  { %9467 = vmatpush3.bf16.msra.mxu1 %v9700_v8 }
0x2a8d   :  { %v7000_v61 = vpop.xlane.xlu1 %6999 }
0x2a8e   :  { %10185 = vrcp.f32 %v7000_v61 }
0x2a8f   :  { %10187 = vrcp.f32 %v6991_v31 }
0x2a90   :  { %10189 = vrcp.f32 %v6997_v2 }
0x2a91   :  { %v6994_v43 = vpop.xlane.xlu1 %6993 }
0x2a92   :  { %10191 = vrcp.f32 %v6994_v43 }
0x2a95   :  { %v7089_v15 = vpop.permute.xlu1 %7088 }
0x2a96   :  { %9454 = vmatprep.subr.bf16.mxu0 %v7089_v15 }
0x2a97   :  { %9455 = vmatpush3.bf16.msra.mxu0 %v7089_v15 }
0x2a98   :  { %v10186_v35 = vpop.eup %10185 }
0x2a99   :  { %v10188_v11 = vpop.eup %10187  ;;  %v7016_v46 = vmul.f32 %v10186_v35, %v10174_v0 }
0x2a9a   :  { %v10190_v3 = vpop.eup %10189  ;;  %v7013_v26 = vmul.f32 %v10188_v11, %v12896_v53  ;;  %v9701_v53 = vld [vmem:[%s13284_s8 + $0xc0] sm:$0xff]  }
0x2a9b   :  { %v7015_v4 = vmul.f32 %v10190_v3, %v12890_v16  ;;  %9476 = vmatprep.subr.bf16.mxu1 %v9701_v53 }
0x2a9c   :  { %v10192_v9 = vpop.eup %10191 }
0x2a9d   :  { %v7014_v5 = vmul.f32 %v10192_v9, %v10176_v22  ;;  %v7020_v17 = vpack.c.bf16 %v7016_v46, %v7015_v4 }
0x2a9f   :  { %v7019_v25 = vpack.c.bf16 %v7014_v5, %v7013_v26 }
0x2aa1   :  { %9456 = vmatprep.mubr.msk.bf16.mxu0 %vm720_vm7, %v7019_v25 }
0x2aa2   :  { %9457 = vmatmul.mubr.msk.bf16.vlgmr.msra.gmra.mrb[160].mxu0 %vm720_vm7, %v7020_v17 }
0x2aa3   :  { %7603 = vmatprep.mubr.bf16.mxu0 %v10267_v44 }
0x2b4f   :  { %v9450_v16 = vpop.f32.mrb[184].mxu1 }
0x2b50   :  { %v7069_v0 = vpop.f32.mrb[185].mxu1 }
0x2b51   :  { %v9451_v22 = vpop.f32.mrb[186].mxu1 }
0x2b52   :  { %v7148_v42 = vpack.c.bf16 %v9451_v22, %v9450_v16  ;;  %v7072_v59 = vpop.f32.mrb[187].mxu1 }
0x2b53   :  { %v7147_v60 = vpack.c.bf16 %v7072_v59, %v7069_v0 }
0x2b55   :  { %9468 = vmatprep.mubr.msk.bf16.mxu1 %vm579_vm5, %v7147_v60 }
0x2b56   :  { %9469 = vmatmul.mubr.msk.bf16.vlgmr.msra.gmra.mrb[188].mxu1 %vm579_vm5, %v7148_v42 }
0x2b57   :  { %9477 = vmatpush3.bf16.msra.mxu1 %v9701_v53 }
0x2b58   :  { %9478 = vmatprep.subr.bf16.mxu1 %v9702_v62 }
0x2b5b   :  { %9479 = vmatpush3.bf16.msra.mxu1 %v9702_v62 }
0x2b5c   :  { %9480 = vmatprep.subr.bf16.mxu1 %v9703_v6 }
0x2b5f   :  { %9481 = vmatpush3.bf16.msra.mxu1 %v9703_v6 }
0x2b60   :  { %9482 = vmatprep.subr.bf16.mxu1 %v9704_v57 }
0x2b63   :  { %9483 = vmatpush3.bf16.msra.mxu1 %v9704_v57 }
0x2b75   :  { %v9458_v30 = vpop.f32.mrb[160].mxu0 }
0x2b76   :  { %v7132_v7 = vpop.f32.mrb[161].mxu0 }
0x2b77   :  { %v9459_v10 = vpop.f32.mrb[162].mxu0 }
0x2b78   :  { %v7150_v18 = vpack.c.bf16 %v9459_v10, %v9458_v30  ;;  %v7135_v52 = vpop.f32.mrb[163].mxu0 }
0x2b79   :  { %v7149_v49 = vpack.c.bf16 %v7135_v52, %v7132_v7 }
0x2b7b   :  { %9472 = vmatprep.mubr.msk.bf16.mxu1 %vm579_vm5, %v7149_v49 }
0x2b7c   :  { %9473 = vmatmul.mubr.msk.bf16.gmra.mrb[192].mxu1 %vm579_vm5, %v7150_v18 }
0x2b7d   :  { %9484 = vmatprep.mubr.msk.bf16.mxu1 %vm579_vm5, %v6763_v32 }
0x2b84   :  { %9485 = vmatmul.mubr.msk.bf16.vlgmr.msra.gmra.mrb[188].mxu1 %vm579_vm5, %v6764_v34 }
0x2b85   :  { %9488 = vmatprep.mubr.msk.bf16.mxu1 %vm579_vm5, %v6765_v29 }
0x2b8c   :  { %9489 = vmatmul.mubr.msk.bf16.gmra.mrb[192].mxu1 %vm579_vm5, %v6766_v19 }
0x2c57   :  { %v9486_v58 = vpop.f32.mrb[188].mxu1 }
0x2c58   :  { %v7322_v32 = vpop.f32.mrb[189].mxu1  ;;  %v7363_v2 = vadd.f32 %v9486_v58, %v8591_v40 }
0x2c59   :  { %v7361_v38 = vadd.f32 %v8591_v40, %v7322_v32  ;;  %v9487_v24 = vpop.f32.mrb[190].mxu1 }
0x2c5a   :  { %v7325_v34 = vpop.f32.mrb[191].mxu1  ;;  %v7371_v56 = vadd.f32 %v7363_v2, %v12577_v12  ;;  %v7364_v29 = vadd.f32 %v9487_v24, %v8591_v40  ;;  %v9710_v24 = vld [vmem:[%s13288_s12 + $0x70] ss:$8 sps:$4 sm:$0x7f]  }
0x2c5b   :  { %v12962_v31 = vadd.f32 %v7361_v38, %v12567_v23  ;;  %v7362_v1 = vadd.f32 %v8591_v40, %v7325_v34  ;;  %v9707_v38 = vld [vmem:[%s13288_s12 + $0x64] ss:$8 sps:$4 sm:$0xff]   ;;  %v7566_v34 = vsel %vm403_vm4, %v9710_v24, 0 }
0x2c5c   :  { %v7372_v54 = vadd.f32 %v7364_v29, %v12580_v36  ;;  %v7387_v51 = vsel %vm216_vm3, %v7371_v56, 0.0  ;;  %7571 = vmatprep.subr.bf16.mxu0 %v9707_v38 }
0x2c5d   :  { %v7370_v14 = vadd.f32 %v7362_v1, %v12570_v63  ;;  %v7381_v45 = vsel %vm216_vm3, %v12962_v31, 0.0 }
0x2c5e   :  { %7382 = vadd.xlane.f32.xlu0 %v7381_v45  ;;  %v7390_v61 = vsel %vm216_vm3, %v7372_v54, 0.0 }
0x2c5f   :  { %v9490_v19 = vpop.f32.mrb[192].mxu1  ;;  %v7384_v39 = vsel %vm216_vm3, %v7370_v14, 0.0 }
0x2c60   :  { %v7367_v50 = vadd.f32 %v9490_v19, %v8591_v40  ;;  %7385 = vadd.xlane.f32.xlu1 %v7384_v39  ;;  %v7338_v37 = vpop.f32.mrb[193].mxu1 }
0x2c61   :  { %v7365_v23 = vadd.f32 %v8591_v40, %v7338_v37  ;;  %v9491_v28 = vpop.f32.mrb[194].mxu1 }
0x2c62   :  { %v7368_v12 = vadd.f32 %v9491_v28, %v8591_v40  ;;  %7388 = vadd.xlane.f32.xlu0 %v7387_v51  ;;  %v7341_v20 = vpop.f32.mrb[195].mxu1  ;;  %v7375_v52 = vadd.f32 %v7367_v50, %v12597_v47  ;;  %v9705_v47 = vld [vmem:[%s13288_s12 + $0x60] ss:$8 sps:$4 sm:$0xff]  }
0x2c63   :  { %v7366_v63 = vadd.f32 %v8591_v40, %v7341_v20  ;;  %v12972_v33 = vadd.f32 %v7365_v23, %v12587_v21  ;;  %7572 = vmatpush1.bf16.msra.mxu0 %v9705_v47 }
0x2c64   :  { %v7376_v49 = vadd.f32 %v7368_v12, %v12600_v41  ;;  %v7399_v32 = vsel %vm216_vm3, %v7375_v52, 0.0  ;;  %v9708_v41 = vld [vmem:[%s13288_s12 + $0x74] ss:$8 sps:$4 sm:$0x7f]  }
0x2c65   :  { %v7374_v48 = vadd.f32 %v7366_v63, %v12590_v55  ;;  %v7393_v36 = vsel %vm216_vm3, %v12972_v33, 0.0  ;;  %8605 = vmatprep.subr.msk.bf16.mxu0 %vm403_vm4, %v9708_v41 }
0x2c66   :  { %7391 = vadd.xlane.f32.xlu0 %v7390_v61  ;;  %v7402_v2 = vsel %vm216_vm3, %v7376_v49, 0.0  ;;  %v13032_v61 = vld [vmem:[%s13286_s10 + $0x3] ss:$0 sm:$0xff] }
0x2c67   :  { %v7396_v43 = vsel %vm216_vm3, %v7374_v48, 0.0  ;;  %7574 = vmatpush1.bf16.msra.mxu0 %v7566_v34  ;;  %v9712_v34 = vld [vmem:[%s13290_s14 + $0x180] sm:$0xff]  }
0x2c68   :  { %7397 = vadd.xlane.f32.xlu1 %v7396_v43 }
0x2c6a   :  { %7394 = vadd.xlane.f32.xlu0 %v7393_v36 }
0x2ceb   :  { %v7383_v15 = vpop.xlane.xlu0 %7382 }
0x2cec   :  { %v7405_v35 = vmul.f32 0.033333335, %v7383_v15 }
0x2ced   :  { %v7386_v11 = vpop.xlane.xlu1 %7385 }
0x2cee   :  { %v12980_v3 = vsub.f32 %v12962_v31, %v7405_v35  ;;  %v7406_v21 = vmul.f32 0.033333335, %v7386_v11 }
0x2cef   :  { %v7389_v9 = vpop.xlane.xlu0 %7388 }
0x2cf0   :  { %v12982_v46 = vsub.f32 %v7370_v14, %v7406_v21  ;;  %v7407_v55 = vmul.f32 0.033333335, %v7389_v9  ;;  %v7421_v26 = vmul.f32 %v12980_v3, %v12980_v3 }
0x2cf2   :  { %v12986_v5 = vsub.f32 %v7371_v56, %v7407_v55  ;;  %v7429_v4 = vsel %vm216_vm3, %v7421_v26, 0.0  ;;  %v7422_v25 = vmul.f32 %v12982_v46, %v12982_v46 }
0x2cf3   :  { %v7392_v17 = vpop.xlane.xlu0 %7391  ;;  %7430 = vadd.xlane.f32.xlu0 %v7429_v4 }
0x2cf4   :  { %v7408_v8 = vmul.f32 0.033333335, %v7392_v17  ;;  %v7432_v53 = vsel %vm216_vm3, %v7422_v25, 0.0  ;;  %v7423_v16 = vmul.f32 %v12986_v5, %v12986_v5 }
0x2cf5   :  { %7433 = vadd.xlane.f32.xlu1 %v7432_v53  ;;  %v7398_v0 = vpop.xlane.xlu1 %7397 }
0x2cf6   :  { %v12994_v22 = vsub.f32 %v7372_v54, %v7408_v8  ;;  %v7410_v42 = vmul.f32 0.033333335, %v7398_v0  ;;  %v7435_v59 = vsel %vm216_vm3, %v7423_v16, 0.0 }
0x2cf7   :  { %7436 = vadd.xlane.f32.xlu0 %v7435_v59  ;;  %v7395_v60 = vpop.xlane.xlu0 %7394 }
0x2cf8   :  { %v12997_v62 = vsub.f32 %v7374_v48, %v7410_v42  ;;  %v7409_v6 = vmul.f32 0.033333335, %v7395_v60  ;;  %v7424_v57 = vmul.f32 %v12994_v22, %v12994_v22 }
0x2cfa   :  { %v13002_v30 = vsub.f32 %v12972_v33, %v7409_v6  ;;  %v7438_v7 = vsel %vm216_vm3, %v7424_v57, 0.0  ;;  %v7426_v10 = vmul.f32 %v12997_v62, %v12997_v62 }
0x2cfb   :  { %7439 = vadd.xlane.f32.xlu1 %v7438_v7 }
0x2cfc   :  { %v7425_v18 = vmul.f32 %v13002_v30, %v13002_v30  ;;  %v7444_v58 = vsel %vm216_vm3, %v7426_v10, 0.0 }
0x2cfe   :  { %v7441_v40 = vsel %vm216_vm3, %v7425_v18, 0.0 }
0x2cff   :  { %7442 = vadd.xlane.f32.xlu0 %v7441_v40  ;;  %7445 = vadd.xlane.f32.xlu1 %v7444_v58 }
0x2d03   :  { %7400 = vadd.xlane.f32.xlu0 %v7399_v32  ;;  %7403 = vadd.xlane.f32.xlu1 %v7402_v2 }
0x2d80   :  { %v7431_v1 = vpop.xlane.xlu0 %7430 }
0x2d81   :  { %v7453_v56 = vmul.f32 0.033333335, %v7431_v1  ;;  %v9713_v1 = vld [vmem:[%s13290_s14 + $0x1c8] sm:$0xff]  }
0x2d82   :  { %v7434_v29 = vpop.xlane.xlu1 %7433 }
0x2d83   :  { %v7461_v14 = vadd.f32 1e-05, %v7453_v56  ;;  %v7454_v45 = vmul.f32 0.033333335, %v7434_v29  ;;  %v9714_v56 = vld [vmem:[%s13290_s14 + $0x188] sm:$0xff]   ;;  %v9716_v29 = vld [vmem:[%s13290_s14 + $0x190] sm:$0xff]  }
0x2d84   :  { %v7437_v19 = vpop.xlane.xlu0 %7436 }
0x2d85   :  { %10193 = vrsqrt.f32 %v7461_v14  ;;  %v7462_v39 = vadd.f32 1e-05, %v7454_v45  ;;  %v7455_v50 = vmul.f32 0.033333335, %v7437_v19  ;;  %v9717_v14 = vld [vmem:[%s13290_s14 + $0x1d8] sm:$0xff]   ;;  %v9719_v19 = vld [vmem:[%s13290_s14 + $0x1e0] sm:$0xff]  }
0x2d86   :  { %v9718_v45 = vld [vmem:[%s13290_s14 + $0x198] sm:$0xff]  }
0x2d87   :  { %10195 = vrsqrt.f32 %v7462_v39  ;;  %v7463_v37 = vadd.f32 1e-05, %v7455_v50  ;;  %v9720_v39 = vld [vmem:[%s13290_s14 + $0x1a0] sm:$0xff]   ;;  %v9721_v50 = vld [vmem:[%s13290_s14 + $0x1e8] sm:$0xff]  }
0x2d88   :  { %v7440_v54 = vpop.xlane.xlu1 %7439 }
0x2d89   :  { %10197 = vrsqrt.f32 %v7463_v37  ;;  %v7456_v23 = vmul.f32 0.033333335, %v7440_v54  ;;  %v9722_v37 = vld [vmem:[%s13290_s14 + $0x1a8] sm:$0xff]   ;;  %v9723_v54 = vld [vmem:[%s13290_s14 + $0x1f0] sm:$0xff]  }
0x2d8b   :  { %v7464_v28 = vadd.f32 1e-05, %v7456_v23  ;;  %v9724_v23 = vld [vmem:[%s13290_s14 + $0x1b0] sm:$0xff]  }
0x2d8c   :  { %v7443_v51 = vpop.xlane.xlu0 %7442  ;;  %v7446_v12 = vpop.xlane.xlu1 %7445 }
0x2d8d   :  { %10199 = vrsqrt.f32 %v7464_v28  ;;  %v7457_v20 = vmul.f32 0.033333335, %v7443_v51  ;;  %v7458_v63 = vmul.f32 0.033333335, %v7446_v12  ;;  %v9725_v28 = vld [vmem:[%s13290_s14 + $0x1f8] sm:$0xff]  }
0x2d8e   :  { %v9726_v51 = vld [vmem:[%s13290_s14 + $0x1b8] sm:$0xff]  }
0x2d8f   :  { %v10194_v48 = vpop.eup %10193  ;;  %v7465_v43 = vadd.f32 1e-05, %v7457_v20  ;;  %v7466_v36 = vadd.f32 1e-05, %v7458_v63 }
0x2d90   :  { %v7477_v15 = vmul.f32 %v10194_v48, %v12980_v3  ;;  %v7401_v35 = vpop.xlane.xlu0 %7400  ;;  %v7404_v11 = vpop.xlane.xlu1 %7403  ;;  %v13044_v3 = vld [vmem:[%s13287_s11 + $0x3] ss:$0 sm:$0xff] }
0x2d91   :  { %v10196_v21 = vpop.eup %10195  ;;  %10201 = vrsqrt.f32 %v7465_v43  ;;  %v7411_v9 = vmul.f32 0.033333335, %v7401_v35  ;;  %v7412_v55 = vmul.f32 0.033333335, %v7404_v11 }
0x2d92   :  { %v7491_v26 = vmul.f32 %v13032_v61, %v7477_v15  ;;  %v7478_v4 = vmul.f32 %v10196_v21, %v12982_v46  ;;  %10203 = vrsqrt.f32 %v7466_v36 }
0x2d93   :  { %v10198_v25 = vpop.eup %10197  ;;  %v13037_v17 = vsub.f32 %v7375_v52, %v7411_v9  ;;  %v13039_v8 = vsub.f32 %v7376_v49, %v7412_v55 }
0x2d94   :  { %v7492_v53 = vmul.f32 %v13032_v61, %v7478_v4  ;;  %v7479_v46 = vmul.f32 %v10198_v25, %v12986_v5  ;;  %v7505_v42 = vadd.f32 %v13044_v3, %v7491_v26 }
0x2d95   :  { %v7427_v16 = vmul.f32 %v13037_v17, %v13037_v17  ;;  %v7428_v0 = vmul.f32 %v13039_v8, %v13039_v8 }
0x2d96   :  { %v7506_v59 = vadd.f32 %v13044_v3, %v7492_v53  ;;  %v7493_v18 = vmul.f32 %v13032_v61, %v7479_v46  ;;  %v8600_v53 = vld [vmem:[%s13289_s13 + $0x6] sm:$0x3] }
0x2d97   :  { %v10200_v60 = vpop.eup %10199  ;;  %v7447_v6 = vsel %vm216_vm3, %v7427_v16, 0.0  ;;  %v7450_v57 = vsel %vm216_vm3, %v7428_v0, 0.0  ;;  %v13132_v16 = vrot.slane %v8600_v53, %v11007_v13 }
0x2d98   :  { %v7480_v7 = vmul.f32 %v10200_v60, %v12994_v22  ;;  %7448 = vadd.xlane.f32.xlu0 %v7447_v6  ;;  %7451 = vadd.xlane.f32.xlu1 %v7450_v57  ;;  %v7513_v10 = vpack.c.bf16 %v7506_v59, %v7505_v42  ;;  %v7507_v22 = vadd.f32 %v13044_v3, %v7493_v18 }
0x2d9a   :  { %8606 = vmatmul.mubr.msk.bf16.vlgmr.msra.gmra.mrb[164].mxu0 %vm216_vm3, %v7513_v10  ;;  %v7494_v5 = vmul.f32 %v13032_v61, %v7480_v7 }
0x2d9b   :  { %v10202_v52 = vpop.eup %10201  ;;  %7613 = vmatprep.mubr.bf16.mxu0 %v10267_v44 }
0x2d9c   :  { %v10204_v49 = vpop.eup %10203  ;;  %v7481_v40 = vmul.f32 %v10202_v52, %v13002_v30  ;;  %v7508_v58 = vadd.f32 %v13044_v3, %v7494_v5 }
0x2d9d   :  { %v7482_v32 = vmul.f32 %v10204_v49, %v12997_v62  ;;  %v9711_v62 = vld [vmem:[%s13290_s14 + $0x1c0] sm:$0xff]  }
0x2d9e   :  { %v7514_v2 = vpack.c.bf16 %v7508_v58, %v7507_v22  ;;  %v7495_v38 = vmul.f32 %v13032_v61, %v7481_v40  ;;  %9007 = vmatprep.subr.bf16.mxu0 %v9711_v62 }
0x2d9f   :  { %v7496_v47 = vmul.f32 %v13032_v61, %v7482_v32  ;;  %9008 = vmatpush3.bf16.msra.mxu0 %v9712_v34 }
0x2da0   :  { %v7509_v41 = vadd.f32 %v13044_v3, %v7495_v38  ;;  %9009 = vmatprep.subr.bf16.mxu0 %v9713_v1 }
0x2da1   :  { %v7510_v24 = vadd.f32 %v13044_v3, %v7496_v47 }
0x2da2   :  { %8607 = vmatmul.mubr.msk.bf16.gmra.mrb[168].mxu0 %vm216_vm3, %v7514_v2 }
0x2da3   :  { %7623 = vmatprep.mubr.bf16.mxu0 %v10267_v44  ;;  %v7515_v30 = vpack.c.bf16 %v7510_v24, %v7509_v41  ;;  %9010 = vmatpush3.bf16.msra.mxu0 %v9714_v56 }
0x2daa   :  { %8608 = vmatmul.mubr.msk.bf16.gmra.mrb[172].mxu0 %vm216_vm3, %v7515_v30 }
0x2dab   :  { %7633 = vmatprep.mubr.bf16.mxu0 %v10267_v44  ;;  %v9715_v44 = vld [vmem:[%s13290_s14 + $0x1d0] sm:$0xff]  }
0x2dac   :  { %9011 = vmatprep.subr.bf16.mxu0 %v9715_v44 }
0x2dad   :  { %9012 = vmatpush3.bf16.msra.mxu0 %v9716_v29 }
0x2dae   :  { %9013 = vmatprep.subr.bf16.mxu0 %v9717_v14 }
0x2db1   :  { %9014 = vmatpush3.bf16.msra.mxu0 %v9718_v45 }
0x2db2   :  { %9015 = vmatprep.subr.bf16.mxu0 %v9719_v19 }
0x2db5   :  { %9016 = vmatpush3.bf16.msra.mxu0 %v9720_v39 }
0x2db6   :  { %9017 = vmatprep.subr.bf16.mxu0 %v9721_v50 }
0x2db9   :  { %9018 = vmatpush3.bf16.msra.mxu0 %v9722_v37 }
0x2dba   :  { %9019 = vmatprep.subr.bf16.mxu0 %v9723_v54 }
0x2dbd   :  { %9020 = vmatpush3.bf16.msra.mxu0 %v9724_v23 }
0x2dbe   :  { %9021 = vmatprep.subr.bf16.mxu0 %v9725_v28 }
0x2dc1   :  { %9022 = vmatpush3.bf16.msra.mxu0 %v9726_v51 }
0x2e25   :  { %v7449_v12 = vpop.xlane.xlu0 %7448  ;;  %v7452_v20 = vpop.xlane.xlu1 %7451 }
0x2e26   :  { %v7459_v63 = vmul.f32 0.033333335, %v7449_v12  ;;  %v7460_v48 = vmul.f32 0.033333335, %v7452_v20 }
0x2e28   :  { %v7467_v43 = vadd.f32 1e-05, %v7459_v63  ;;  %v7468_v36 = vadd.f32 1e-05, %v7460_v48 }
0x2e2a   :  { %10205 = vrsqrt.f32 %v7467_v43 }
0x2e2b   :  { %10207 = vrsqrt.f32 %v7468_v36 }
0x2e34   :  { %v10206_v15 = vpop.eup %10205 }
0x2e35   :  { %v10208_v35 = vpop.eup %10207  ;;  %v7483_v11 = vmul.f32 %v10206_v15, %v13037_v17  ;;  %v13135_v17 = vrot.slane %v8600_v53, %v11010_v27 }
0x2e36   :  { %v7484_v21 = vmul.f32 %v10208_v35, %v13039_v8 }
0x2e37   :  { %v7497_v9 = vmul.f32 %v13032_v61, %v7483_v11 }
0x2e38   :  { %v7498_v55 = vmul.f32 %v13032_v61, %v7484_v21 }
0x2e39   :  { %v7511_v26 = vadd.f32 %v13044_v3, %v7497_v9 }
0x2e3a   :  { %v7512_v4 = vadd.f32 %v13044_v3, %v7498_v55 }
0x2e3c   :  { %v7516_v25 = vpack.c.bf16 %v7512_v4, %v7511_v26 }
0x2e3e   :  { %8609 = vmatmul.mubr.msk.bf16.gmra.mrb[176].mxu0 %vm216_vm3, %v7516_v25 }
0x2e6d   :  { %v7605_v8 = vpop.f32.mrb[164].mxu0 }
0x2e6e   :  { %v13138_v61 = vadd.f32 %v7605_v8, %v13132_v16  ;;  %v7607_v0 = vpop.f32.mrb[165].mxu0 }
0x2e6f   :  { %v13141_v3 = vadd.f32 %v7607_v0, %v13135_v17  ;;  %v7609_v46 = vpop.f32.mrb[166].mxu0 }
0x2e70   :  { %v7644_v42 = vmul.f32 %v13138_v61, %v13138_v61  ;;  %v13146_v59 = vadd.f32 %v7609_v46, %v13132_v16  ;;  %v7611_v13 = vpop.f32.mrb[167].mxu0 }
0x2e71   :  { %v7645_v27 = vmul.f32 %v13141_v3, %v13141_v3  ;;  %v13151_v60 = vadd.f32 %v7611_v13, %v13135_v17 }
0x2e72   :  { %v7660_v6 = vmul.f32 %v7644_v42, %v13138_v61  ;;  %v7646_v57 = vmul.f32 %v13146_v59, %v13146_v59 }
0x2e73   :  { %v7661_v7 = vmul.f32 %v7645_v27, %v13141_v3  ;;  %v7647_v10 = vmul.f32 %v13151_v60, %v13151_v60 }
0x2e74   :  { %v7676_v18 = vmul.f32 0.044715, %v7660_v6  ;;  %v7662_v5 = vmul.f32 %v7646_v57, %v13146_v59 }
0x2e75   :  { %v7677_v52 = vmul.f32 0.044715, %v7661_v7  ;;  %v7663_v49 = vmul.f32 %v7647_v10, %v13151_v60  ;;  %v7615_v40 = vpop.f32.mrb[168].mxu0 }
0x2e76   :  { %v7692_v58 = vadd.f32 %v7676_v18, %v13138_v61  ;;  %v7678_v32 = vmul.f32 0.044715, %v7662_v5  ;;  %v13163_v22 = vadd.f32 %v7615_v40, %v13132_v16  ;;  %v7617_v2 = vpop.f32.mrb[169].mxu0 }
0x2e77   :  { %v7693_v38 = vadd.f32 %v7677_v52, %v13141_v3  ;;  %v7679_v47 = vmul.f32 0.044715, %v7663_v49  ;;  %v13167_v41 = vadd.f32 %v7617_v2, %v13135_v17  ;;  %v7619_v24 = vpop.f32.mrb[170].mxu0 }
0x2e78   :  { %v7708_v30 = vmul.f32 0.7978846, %v7692_v58  ;;  %v7694_v62 = vadd.f32 %v7678_v32, %v13146_v59  ;;  %v7648_v34 = vmul.f32 %v13163_v22, %v13163_v22  ;;  %v13173_v1 = vadd.f32 %v7619_v24, %v13132_v16  ;;  %v7621_v56 = vpop.f32.mrb[171].mxu0 }
0x2e79   :  { %v7709_v44 = vmul.f32 0.7978846, %v7693_v38  ;;  %v7695_v29 = vadd.f32 %v7679_v47, %v13151_v60  ;;  %v7649_v14 = vmul.f32 %v13167_v41, %v13167_v41  ;;  %v13179_v45 = vadd.f32 %v7621_v56, %v13135_v17 }
0x2e7a   :  { %10209 = vtanh.f32 %v7708_v30  ;;  %v7710_v19 = vmul.f32 0.7978846, %v7694_v62  ;;  %v7664_v39 = vmul.f32 %v7648_v34, %v13163_v22  ;;  %v7650_v50 = vmul.f32 %v13173_v1, %v13173_v1 }
0x2e7b   :  { %10211 = vtanh.f32 %v7709_v44  ;;  %v7711_v37 = vmul.f32 0.7978846, %v7695_v29  ;;  %v7665_v54 = vmul.f32 %v7649_v14, %v13167_v41  ;;  %v7651_v23 = vmul.f32 %v13179_v45, %v13179_v45 }
0x2e7c   :  { %10213 = vtanh.f32 %v7710_v19  ;;  %v7680_v28 = vmul.f32 0.044715, %v7664_v39  ;;  %v7666_v51 = vmul.f32 %v7650_v50, %v13173_v1 }
0x2e7d   :  { %10215 = vtanh.f32 %v7711_v37  ;;  %v7681_v12 = vmul.f32 0.044715, %v7665_v54  ;;  %v7667_v20 = vmul.f32 %v7651_v23, %v13179_v45  ;;  %v7625_v63 = vpop.f32.mrb[172].mxu0 }
0x2e7e   :  { %v7696_v48 = vadd.f32 %v7680_v28, %v13163_v22  ;;  %v7682_v43 = vmul.f32 0.044715, %v7666_v51  ;;  %v13191_v36 = vadd.f32 %v7625_v63, %v13132_v16  ;;  %v7627_v15 = vpop.f32.mrb[173].mxu0 }
0x2e7f   :  { %v7697_v35 = vadd.f32 %v7681_v12, %v13167_v41  ;;  %v7683_v11 = vmul.f32 0.044715, %v7667_v20  ;;  %v13195_v21 = vadd.f32 %v7627_v15, %v13135_v17  ;;  %v7629_v9 = vpop.f32.mrb[174].mxu0 }
0x2e80   :  { %v7712_v55 = vmul.f32 0.7978846, %v7696_v48  ;;  %v7698_v26 = vadd.f32 %v7682_v43, %v13173_v1  ;;  %v7652_v4 = vmul.f32 %v13191_v36, %v13191_v36  ;;  %v13201_v25 = vadd.f32 %v7629_v9, %v13132_v16  ;;  %v7631_v53 = vpop.f32.mrb[175].mxu0 }
0x2e81   :  { %v7713_v8 = vmul.f32 0.7978846, %v7697_v35  ;;  %v7699_v0 = vadd.f32 %v7683_v11, %v13179_v45  ;;  %v7653_v46 = vmul.f32 %v13195_v21, %v13195_v21  ;;  %v13207_v42 = vadd.f32 %v7631_v53, %v13135_v17 }
0x2e82   :  { %10217 = vtanh.f32 %v7712_v55  ;;  %v7714_v13 = vmul.f32 0.7978846, %v7698_v26  ;;  %v7668_v27 = vmul.f32 %v7652_v4, %v13191_v36  ;;  %v7654_v6 = vmul.f32 %v13201_v25, %v13201_v25 }
0x2e83   :  { %10219 = vtanh.f32 %v7713_v8  ;;  %v7715_v57 = vmul.f32 0.7978846, %v7699_v0  ;;  %v7669_v7 = vmul.f32 %v7653_v46, %v13195_v21  ;;  %v7655_v10 = vmul.f32 %v13207_v42, %v13207_v42 }
0x2e84   :  { %v10210_v18 = vpop.eup %10209  ;;  %10221 = vtanh.f32 %v7714_v13  ;;  %v7684_v5 = vmul.f32 0.044715, %v7668_v27  ;;  %v7670_v52 = vmul.f32 %v7654_v6, %v13201_v25 }
0x2e85   :  { %v10212_v49 = vpop.eup %10211  ;;  %v7740_v40 = vadd.f32 1.0, %v10210_v18  ;;  %10223 = vtanh.f32 %v7715_v57  ;;  %v7685_v58 = vmul.f32 0.044715, %v7669_v7  ;;  %v7671_v32 = vmul.f32 %v7655_v10, %v13207_v42 }
0x2e86   :  { %v10214_v2 = vpop.eup %10213  ;;  %v7700_v38 = vadd.f32 %v7684_v5, %v13191_v36  ;;  %v7686_v47 = vmul.f32 0.044715, %v7670_v52  ;;  %v7741_v24 = vadd.f32 1.0, %v10212_v49 }
0x2e87   :  { %v10216_v30 = vpop.eup %10215  ;;  %v7756_v62 = vmul.f32 0.5, %v7740_v40  ;;  %v7742_v34 = vadd.f32 1.0, %v10214_v2  ;;  %v7701_v56 = vadd.f32 %v7685_v58, %v13195_v21  ;;  %v7687_v44 = vmul.f32 0.044715, %v7671_v32 }
0x2e88   :  { %v7716_v29 = vmul.f32 0.7978846, %v7700_v38  ;;  %v7702_v14 = vadd.f32 %v7686_v47, %v13201_v25  ;;  %v7743_v19 = vadd.f32 1.0, %v10216_v30  ;;  %v7757_v39 = vmul.f32 0.5, %v7741_v24 }
0x2e89   :  { %v7758_v50 = vmul.f32 0.5, %v7742_v34  ;;  %v7717_v37 = vmul.f32 0.7978846, %v7701_v56  ;;  %v7703_v54 = vadd.f32 %v7687_v44, %v13207_v42  ;;  %v7772_v51 = vmul.f32 %v7756_v62, %v13138_v61 }
0x2e8a   :  { %10225 = vtanh.f32 %v7716_v29  ;;  %v7718_v23 = vmul.f32 0.7978846, %v7702_v14  ;;  %v7759_v28 = vmul.f32 0.5, %v7743_v19  ;;  %v7773_v48 = vmul.f32 %v7757_v39, %v13141_v3 }
0x2e8b   :  { %v7774_v12 = vmul.f32 %v7758_v50, %v13146_v59  ;;  %10227 = vtanh.f32 %v7717_v37  ;;  %v7719_v20 = vmul.f32 0.7978846, %v7703_v54 }
0x2e8c   :  { %v10218_v63 = vpop.eup %10217  ;;  %10229 = vtanh.f32 %v7718_v23  ;;  %v7775_v43 = vmul.f32 %v7759_v28, %v13151_v60 }
0x2e8d   :  { %v10220_v15 = vpop.eup %10219  ;;  %v7788_v35 = vpack.c.bf16 %v7774_v12, %v7772_v51  ;;  %10231 = vtanh.f32 %v7719_v20  ;;  %v7744_v11 = vadd.f32 1.0, %v10218_v63 }
0x2e8e   :  { %v10222_v9 = vpop.eup %10221  ;;  %v7789_v55 = vpack.c.bf16 %v7775_v43, %v7773_v48  ;;  %v7745_v26 = vadd.f32 1.0, %v10220_v15 }
0x2e8f   :  { %v10224_v4 = vpop.eup %10223  ;;  %v7746_v53 = vadd.f32 1.0, %v10222_v9  ;;  %v7760_v61 = vmul.f32 0.5, %v7744_v11 }
0x2e90   :  { %7965 = vmatprep.mubr.bf16.mxu0 %v7789_v55  ;;  %v7747_v59 = vadd.f32 1.0, %v10224_v4  ;;  %v7761_v8 = vmul.f32 0.5, %v7745_v26 }
0x2e91   :  { %7966 = vmatmul.mubr.bf16.vlgmr.msra.gmra.mrb[180].mxu0 %v7788_v35  ;;  %v7762_v0 = vmul.f32 0.5, %v7746_v53  ;;  %v7776_v3 = vmul.f32 %v7760_v61, %v13163_v22 }
0x2e92   :  { %v7763_v46 = vmul.f32 0.5, %v7747_v59  ;;  %v7777_v27 = vmul.f32 %v7761_v8, %v13167_v41 }
0x2e93   :  { %v7778_v60 = vmul.f32 %v7762_v0, %v13173_v1 }
0x2e94   :  { %v10226_v13 = vpop.eup %10225  ;;  %v7779_v6 = vmul.f32 %v7763_v46, %v13179_v45 }
0x2e95   :  { %v10228_v57 = vpop.eup %10227  ;;  %v7790_v7 = vpack.c.bf16 %v7778_v60, %v7776_v3  ;;  %v7748_v10 = vadd.f32 1.0, %v10226_v13 }
0x2e96   :  { %v10230_v18 = vpop.eup %10229  ;;  %v7791_v5 = vpack.c.bf16 %v7779_v6, %v7777_v27  ;;  %v7749_v52 = vadd.f32 1.0, %v10228_v57 }
0x2e97   :  { %v10232_v49 = vpop.eup %10231  ;;  %v7750_v40 = vadd.f32 1.0, %v10230_v18  ;;  %v7764_v58 = vmul.f32 0.5, %v7748_v10 }
0x2e98   :  { %7972 = vmatprep.mubr.bf16.mxu0 %v7791_v5  ;;  %v7751_v32 = vadd.f32 1.0, %v10232_v49  ;;  %v7765_v2 = vmul.f32 0.5, %v7749_v52 }
0x2e99   :  { %7973 = vmatmul.mubr.bf16.gmra.mrb[184].mxu0 %v7790_v7  ;;  %v7766_v22 = vmul.f32 0.5, %v7750_v40  ;;  %v7780_v38 = vmul.f32 %v7764_v58, %v13191_v36 }
0x2e9a   :  { %v7767_v1 = vmul.f32 0.5, %v7751_v32  ;;  %v7781_v45 = vmul.f32 %v7765_v2, %v13195_v21 }
0x2e9b   :  { %v7782_v41 = vmul.f32 %v7766_v22, %v13201_v25 }
0x2e9c   :  { %v7783_v47 = vmul.f32 %v7767_v1, %v13207_v42 }
0x2e9d   :  { %v7792_v24 = vpack.c.bf16 %v7782_v41, %v7780_v38  ;;  %v8643_v38 = vld [vmem:[%s13291_s15 + $0x3] ss:$0 sm:$0xff] }
0x2e9e   :  { %v7793_v30 = vpack.c.bf16 %v7783_v47, %v7781_v45 }
0x2ea0   :  { %7978 = vmatprep.mubr.bf16.mxu0 %v7793_v30 }
0x2ea1   :  { %7979 = vmatmul.mubr.bf16.gmra.mrb[188].mxu0 %v7792_v24 }
0x2f11   :  { %v7635_v62 = vpop.f32.mrb[176].mxu0 }
0x2f12   :  { %v7636_v34 = vadd.f32 %v7635_v62, %v13132_v16  ;;  %v7637_v56 = vpop.f32.mrb[177].mxu0 }
0x2f13   :  { %v7638_v44 = vadd.f32 %v7637_v56, %v13135_v17  ;;  %v7639_v29 = vpop.f32.mrb[178].mxu0 }
0x2f14   :  { %v7656_v14 = vmul.f32 %v7636_v34, %v7636_v34  ;;  %v7640_v36 = vadd.f32 %v7639_v29, %v13132_v16  ;;  %v7641_v19 = vpop.f32.mrb[179].mxu0 }
0x2f15   :  { %v7657_v25 = vmul.f32 %v7638_v44, %v7638_v44  ;;  %v7642_v21 = vadd.f32 %v7641_v19, %v13135_v17 }
0x2f16   :  { %v7672_v39 = vmul.f32 %v7656_v14, %v7636_v34  ;;  %v7658_v42 = vmul.f32 %v7640_v36, %v7640_v36 }
0x2f17   :  { %v7673_v50 = vmul.f32 %v7657_v25, %v7638_v44  ;;  %v7659_v37 = vmul.f32 %v7642_v21, %v7642_v21 }
0x2f18   :  { %v7688_v54 = vmul.f32 0.044715, %v7672_v39  ;;  %v7674_v23 = vmul.f32 %v7658_v42, %v7640_v36 }
0x2f19   :  { %v7689_v28 = vmul.f32 0.044715, %v7673_v50  ;;  %v7675_v51 = vmul.f32 %v7659_v37, %v7642_v21 }
0x2f1a   :  { %v7704_v12 = vadd.f32 %v7688_v54, %v7636_v34  ;;  %v7690_v20 = vmul.f32 0.044715, %v7674_v23 }
0x2f1b   :  { %v7705_v63 = vadd.f32 %v7689_v28, %v7638_v44  ;;  %v7691_v48 = vmul.f32 0.044715, %v7675_v51 }
0x2f1c   :  { %v7720_v43 = vmul.f32 0.7978846, %v7704_v12  ;;  %v7706_v15 = vadd.f32 %v7690_v20, %v7640_v36  ;;  %v9727_v12 = vld [vmem:[%s13294_s18] sm:$0xff]   ;;  %v10269_v20 = vmov 0.0  }
0x2f1d   :  { %v7721_v35 = vmul.f32 0.7978846, %v7705_v63  ;;  %v7707_v16 = vadd.f32 %v7691_v48, %v7642_v21  ;;  %9492 = vmatprep.subr.bf16.mxu1 %v10269_v20  ;;  %v9728_v63 = vld [vmem:[%s13294_s18 + $0x8] sm:$0x7f]   ;;  %9496 = vmatprep.mubr.msk.bf16.mxu1 %vm10270_vm10, %v10269_v20 }
0x2f1e   :  { %10233 = vtanh.f32 %v7720_v43  ;;  %v7722_v11 = vmul.f32 0.7978846, %v7706_v15  ;;  %9493 = vmatpush3.bf16.msra.mxu1 %v9727_v12  ;;  %v8083_v48 = vsel %vm403_vm4, %v9728_v63, 0 }
0x2f1f   :  { %10235 = vtanh.f32 %v7721_v35  ;;  %v7723_v17 = vmul.f32 0.7978846, %v7707_v16  ;;  %9494 = vmatprep.subr.bf16.mxu1 %v10269_v20 }
0x2f20   :  { %10237 = vtanh.f32 %v7722_v11  ;;  %v8660_v11 = vld [vmem:[%s13292_s16] ss:$0 sm:$0xff] }
0x2f21   :  { %10239 = vtanh.f32 %v7723_v17 }
0x2f22   :  { %9495 = vmatpush3.bf16.msra.mxu1 %v8083_v48 }
0x2f28   :  { %v10234_v9 = vpop.eup %10233 }
0x2f29   :  { %v10236_v55 = vpop.eup %10235  ;;  %v7752_v26 = vadd.f32 1.0, %v10234_v9 }
0x2f2a   :  { %v10238_v4 = vpop.eup %10237  ;;  %v7753_v53 = vadd.f32 1.0, %v10236_v55  ;;  %v8661_v55 = vld [vmem:[%s13293_s17] ss:$0 sm:$0xff]  ;;  %s10271_s17 = smov [#allocation2]  }
0x2f2b   :  { %v10240_v61 = vpop.eup %10239  ;;  %v7754_v59 = vadd.f32 1.0, %v10238_v4  ;;  %v7768_v8 = vmul.f32 0.5, %v7752_v26  ;;  %s8132_s22 = sshll.u32 %s10271_s17, 4  ;;  %s8133_s22 = int_to_ptr.vmem [resolvable:$true] %s8132_s22 }
0x2f2c   :  { %v7755_v0 = vadd.f32 1.0, %v10240_v61  ;;  %v7769_v46 = vmul.f32 0.5, %v7753_v53  ;;  %s10243_s12 = scalar_lea.vmem %s8133_s22, 32  ;;  %p10248_p1 = scmp.lt.s32.totalorder %s8133_s22, %s8133_s22 }
0x2f2d   :  { %v7770_v3 = vmul.f32 0.5, %v7754_v59  ;;  %v7784_v13 = vmul.f32 %v7768_v8, %v7636_v34  ;;  %p10244_p0 = scmp.ne.s32.totalorder %s8133_s22, %s10243_s12  ;;  %p10249_p2 = scmp.lt.s32.totalorder %s10243_s12, %s10243_s12 }
0x2f2e   :  { %v7771_v60 = vmul.f32 0.5, %v7755_v0  ;;  %v7785_v6 = vmul.f32 %v7769_v46, %v7638_v44 }
0x2f2f   :  { %v7786_v27 = vmul.f32 %v7770_v3, %v7640_v36  ;;  %p10250_p3 = por %p10249_p2, %p10248_p1 }
0x2f30   :  { %v7787_v57 = vmul.f32 %v7771_v60, %v7642_v21 }
0x2f31   :  { %v7794_v7 = vpack.c.bf16 %v7786_v27, %v7784_v13  ;;  %p10251_p4 = pnand %p10250_p3, %p10244_p0 }
0x2f32   :  { %v7795_v10 = vpack.c.bf16 %v7787_v57, %v7785_v6  ;;  %v8662_v6 = vld [vmem:[%s13295_s19] ss:$0 sm:$0xff] }
0x2f34   :  { %7985 = vmatprep.mubr.bf16.mxu0 %v7795_v10 }
0x2f35   :  { %7986 = vmatmul.mubr.bf16.gmra.mrb[192].mxu0 %v7794_v7 }
0x2f64   :  { %v9023_v18 = vpop.f32.mrb[180].mxu0 }
0x2f65   :  { %v9024_v5 = vpop.f32.mrb[181].mxu0 }
0x2f66   :  { %v9025_v52 = vadd.f32 %v9024_v5, %v9023_v18  ;;  %v9026_v49 = vpop.f32.mrb[182].mxu0 }
0x2f67   :  { %v9027_v40 = vpop.f32.mrb[183].mxu0 }
0x2f68   :  { %v7968_v30 = vadd.f32 %v9025_v52, %v8643_v38 }
0x2f6a   :  { %v7992_v56 = vadd.f32 %v7968_v30, %v12962_v31 }
0x2f6c   :  { %v9029_v58 = vpop.f32.mrb[184].mxu0 }
0x2f6d   :  { %v9030_v32 = vpop.f32.mrb[185].mxu0 }
0x2f6e   :  { %v9032_v2 = vpop.f32.mrb[186].mxu0 }
0x2f6f   :  { %v9033_v22 = vpop.f32.mrb[187].mxu0 }
0x2f74   :  { %v9035_v1 = vpop.f32.mrb[188].mxu0 }
0x2f75   :  { %v9036_v41 = vpop.f32.mrb[189].mxu0 }
0x2f76   :  { %v9037_v45 = vadd.f32 %v9036_v41, %v9035_v1  ;;  %v9038_v47 = vpop.f32.mrb[190].mxu0 }
0x2f77   :  { %v9039_v24 = vpop.f32.mrb[191].mxu0 }
0x2f78   :  { %v7981_v62 = vadd.f32 %v9037_v45, %v8643_v38 }
0x2f7a   :  { %v7993_v34 = vadd.f32 %v7981_v62, %v12972_v33 }
0x2f7c   :  { %v7998_v44 = vrot.slane %v7993_v34, 7 }
0x2f7e   :  { %v8000_v29 = vsel %vm7999_vm8, %v7998_v44, %v7992_v56 }
0x2f7f   :  { %v8003_v14 = vsel %vm8002_vm9, %v8000_v29, 0.0 }
0x2f80   :  { %8004 = vadd.xlane.f32.xlu0 %v8003_v14 }
0x3008   :  { %v9041_v36 = vpop.f32.mrb[192].mxu0 }
0x3009   :  { %v9042_v19 = vpop.f32.mrb[193].mxu0 }
0x300a   :  { %v9044_v25 = vpop.f32.mrb[194].mxu0 }
0x300b   :  { %v9045_v21 = vpop.f32.mrb[195].mxu0 }
0x300d   :  { %v8005_v39 = vpop.xlane.xlu0 %8004 }
0x300e   :  { %v8006_v42 = vmul.f32 0.033333335, %v8005_v39 }
0x3010   :  { %v8008_v50 = vrot.slane %v8006_v42, 1  ;;  %v8011_v37 = vsub.f32 %v7992_v56, %v8006_v42 }
0x3012   :  { %v8012_v54 = vsub.f32 %v7993_v34, %v8008_v50  ;;  %v8013_v23 = vmul.f32 %v8011_v37, %v8011_v37 }
0x3014   :  { %v8014_v33 = vmul.f32 %v8012_v54, %v8012_v54 }
0x3016   :  { %v8017_v28 = vrot.slane %v8014_v33, 7 }
0x3018   :  { %v8018_v31 = vsel %vm7999_vm8, %v8017_v28, %v8013_v23 }
0x3019   :  { %v8020_v51 = vsel %vm8002_vm9, %v8018_v31, 0.0 }
0x301a   :  { %8021 = vadd.xlane.f32.xlu1 %v8020_v51 }
0x30a7   :  { %v8022_v43 = vpop.xlane.xlu1 %8021 }
0x30a8   :  { %v8023_v15 = vmul.f32 0.033333335, %v8022_v43 }
0x30aa   :  { %v8024_v35 = vadd.f32 1e-05, %v8023_v15 }
0x30ac   :  { %10241 = vrsqrt.f32 %v8024_v35 }
0x30b6   :  { %v10242_v16 = vpop.eup %10241 }
0x30b7   :  { %v8027_v17 = vrot.slane %v10242_v16, 1  ;;  %v8030_v9 = vmul.f32 %v10242_v16, %v8011_v37 }
0x30b9   :  { %v8031_v26 = vmul.f32 %v8027_v17, %v8012_v54  ;;  %v8038_v4 = vmul.f32 %v8660_v11, %v8030_v9 }
0x30bb   :  { %v8039_v53 = vmul.f32 %v8660_v11, %v8031_v26  ;;  %v8046_v61 = vadd.f32 %v8661_v55, %v8038_v4 }
0x30bd   :  { %v8047_v59 = vadd.f32 %v8661_v55, %v8039_v53  ;;  %v8048_v8 = vpack.c.bf16 %v8046_v61, %v8046_v61 }
0x30bf   :  { %v8049_v0 = vpack.c.bf16 %v8047_v59, %v8047_v59  ;;  %v8063_v3 = vunpack.c.l.b16 %v8048_v8 }
0x30c1   :  { %v8064_v46 = vunpack.c.l.b16 %v8049_v0 }
0x30c3   :  { %v8065_v60 = vrot.slane %v8064_v46, 7 }
0x30c5   :  { %v8066_v13 = vsel %vm7999_vm8, %v8065_v60, %v8063_v3 }
0x30c6   :  { %v8067_v27 = vpack.c.b16 %v8066_v13, %v8066_v13 }
0x30c8   :  { %9497 = vmatmul.mubr.msk.bf16.vlgmr.msra.gmra.mrb[196].mxu1 %vm216_vm3, %v8067_v27 }
0x319b   :  { %v8119_v57 = vpop.f32.mrb[196].mxu1 }
0x319c   :  { %v8120_v7 = vadd.f32 %v8662_v6, %v8119_v57  ;;  %v9498_v10 = vpop.f32.mrb[197].mxu1 }
0x319d   :  { %v8122_v18 = vpop.f32.mrb[198].mxu1 }
0x319e   :  { %8125 = vst [vmem:[#allocation2] sm:$0x3] %v8120_v7  ;;  %v9499_v5 = vpop.f32.mrb[199].mxu1 }
0x319f   :  { %10254 = shalt.err (!%p10251_p4)
}
0x31a0   :  { %s10255_s19 = scalar_lea.hbm %s13296_s20, 32 }
0x31a1   :  { %p10256_p5 = scmp.ne.s32.totalorder %s13296_s20, %s10255_s19  ;;  %p10259_p6 = scmp.lt.u32.totalorder %s10255_s19, %s13296_s20 }
0x31a3   :  { %p10261_p7 = pnand %p10259_p6, %p10256_p5 }
0x31a5   :  { %10264 = shalt.err (!%p10261_p7)
}
0x31a6   :  { %8135 = dma.vmem_to_hbm [thread:$0]  %s8133_s22, 32, %s13296_s20, [#allocation3]  }
0x31a7   :  { %10265 = dma.done.wait [#allocation3], 32  }
0x31a8   :  { %10266 = vsyncadd [#allocation3], 4294967264 }
0x31a9   :  { %8139 = vsyncpa [#allocation3], 1 }

</bundles_post_ra>
